<compile_context>
chip_gen: v5e
topology: v5e:2x2
jax: 0.10.0
libtpu: 0.0.40
codegen_flags: <defaults>
</compile_context>

<pallas_src>
import jax
import jax.numpy as jnp
from jax.experimental import pallas as pl
from jax.experimental.pallas import tpu as pltpu


def _fstar_kernel(x_ref,
                  w1_ref, b1_ref, w2_ref, b2_ref, w3_ref, b3_ref,
                  w4_ref, b4_ref, w5_ref, b5_ref,
                  o_ref):
    # x_ref: (TB, F).  Weights in (out, in) layout; biases (out, 1) f32;
    # w5_ref is the (F/4, 1) column of the final (1, F/4) layer, f32.
    x = x_ref[...].astype(w1_ref.dtype)

    # Layer 1: contract the feature dims of W1 (2F, F) and x (TB, F) -> (2F, TB).
    # Batch becomes the MXU lane/N dimension for the whole chain.
    h = jax.lax.dot_general(
        w1_ref[...], x, (((1,), (1,)), ((), ())),
        preferred_element_type=jnp.float32)
    h = jnp.maximum(h + b1_ref[...], 0.0)

    # Layers 2-4: (out, in) @ (in, TB) -> (out, TB), f32 accumulation,
    # f32 bias + relu on the VPU.
    for w_ref, b_ref in ((w2_ref, b2_ref), (w3_ref, b3_ref), (w4_ref, b4_ref)):
        h = jnp.dot(w_ref[...], h.astype(w_ref.dtype),
                    preferred_element_type=jnp.float32)
        h = jnp.maximum(h + b_ref[...], 0.0)

    # Layer 5 (F/4 -> 1): VPU multiply + sublane reduce instead of an N=1 MXU
    # matmul; result is already the lane-dense (1, TB) output row.
    z = jnp.sum(h * w5_ref[...], axis=0, keepdims=True) + b5_ref[...]

    # Exact, overflow-safe sigmoid (exp on the EUP), then 2**sigmoid.
    e = jnp.exp(-jnp.abs(z))
    sig = jnp.where(z >= 0.0, 1.0 / (1.0 + e), e / (1.0 + e))
    o_ref[...] = jnp.exp2(sig)


def _choose_batch_tile(batch: int, num_features: int) -> int:
    """Largest multiple of 128 (<= 2048) fitting a ~8 MiB batch-column budget."""
    per_col = 4 * (5 * num_features + 8)          # f32 bytes of batch-sized buffers / column
    cap = min(2048, (8 << 20) // max(per_col, 1))
    cap = max(128, (cap // 128) * 128)
    need = max(128, pl.cdiv(batch, 128) * 128)    # don't overshoot tiny batches
    return min(cap, need)


def _vmem_limit_bytes(num_features: int, tb: int, w_bytes: int) -> int:
    f = num_features
    weights = 2 * w_bytes * (2 * f * f + 2 * f * f + (f // 2) * f + (f // 4) * (f // 2))
    biases = 2 * 4 * (2 * f + f + f // 2 + 2 * (f // 4) + 1)
    x_blk = 2 * tb * f * 4
    acts = 4 * tb * (2 * f) * 4
    out_blk = 2 * tb * 4
    est = weights + biases + x_blk + acts + out_blk + (8 << 20)   # + compiler headroom
    return int(min(112 << 20, max(32 << 20, est)))


def fstar_forward(x, params, *, matmul_dtype=None):
    """x: (B, F) float32.  params: [(W (out,in), b (out,)), ...] (torch Linear layout)."""
    B, F = x.shape
    TB = _choose_batch_tile(B, F)
    grid = (pl.cdiv(B, TB),)

    if matmul_dtype is None:
        # bf16 matmul inputs only pay off for larger F (and v5e has no bf16
        # VPU/EUP); keep exact f32 at small sizes.
        matmul_dtype = jnp.bfloat16 if F >= 256 else jnp.float32
    w_bytes = jnp.dtype(matmul_dtype).itemsize

    (w1, b1), (w2, b2), (w3, b3), (w4, b4), (w5, b5) = params
    x_in = x if jnp.dtype(matmul_dtype) == jnp.dtype(jnp.float32) else x.astype(matmul_dtype)

    # W1..W4 feed the MXU (optionally bf16); biases, the final weight column
    # and all elementwise math stay f32.
    pinned = [
        w1.astype(matmul_dtype), b1.reshape(-1, 1).astype(jnp.float32),
        w2.astype(matmul_dtype), b2.reshape(-1, 1).astype(jnp.float32),
        w3.astype(matmul_dtype), b3.reshape(-1, 1).astype(jnp.float32),
        w4.astype(matmul_dtype), b4.reshape(-1, 1).astype(jnp.float32),
        w5.reshape(-1, 1).astype(jnp.float32), b5.reshape(1, 1).astype(jnp.float32),
    ]

    x_spec = pl.BlockSpec((TB, F), lambda i: (i, 0))
    out_spec = pl.BlockSpec((1, TB), lambda i: (0, i))
    compiler_params = pltpu.CompilerParams(
        dimension_semantics=("parallel",),
        vmem_limit_bytes=_vmem_limit_bytes(F, TB, w_bytes))

    def run(pinned_kwargs):
        pinned_specs = [pl.BlockSpec(a.shape, lambda i: (0, 0), **pinned_kwargs)
                        for a in pinned]
        return pl.pallas_call(
            _fstar_kernel,
            out_shape=jax.ShapeDtypeStruct((1, B), jnp.float32),
            grid=grid,
            in_specs=[x_spec] + pinned_specs,
            out_specs=out_spec,
            compiler_params=compiler_params,
        )(x_in, *pinned)

    try:
        # Constant index_map + single buffer: one VMEM copy of each weight.
        out = run(dict(pipeline_mode=pl.Buffered(1)))
    except Exception:
        # Fallback if this JAX build rejects pipeline_mode on a top-level
        # pallas_call: default double-buffering (still correct, more VMEM).
        out = run({})

    return out.reshape(B, 1)   # free reshape of the lane-dense (1, B) row


def init_mlp_params(num_features: int, key):
    """Deterministic PyTorch-Linear-style init: W (out, in), b (out,)."""
    dims = [num_features, 2 * num_features, num_features,
            num_features // 2, num_features // 4, 1]
    params = []
    for d_in, d_out in zip(dims[:-1], dims[1:]):
        key, kw, kb = jax.random.split(key, 3)
        bound = 1.0 / (d_in ** 0.5)
        w = jax.random.uniform(kw, (d_out, d_in), jnp.float32, -bound, bound)
        b = jax.random.uniform(kb, (d_out,), jnp.float32, -bound, bound)
        params.append((w, b))
    return params


def reference_forward(x, params):
    h = x
    for i, (w, b) in enumerate(params):
        h = h @ w.T + b
        if i < len(params) - 1:
            h = jnp.maximum(h, 0.0)
    return 2.0 ** jax.nn.sigmoid(h)


if __name__ == "__main__":
    num_features = 32

    key = jax.random.PRNGKey(0)
    key, kx1, kx2 = jax.random.split(key, 3)
    params = init_mlp_params(num_features, key)

    # Batch divisible by the tile (two grid steps of 2048).
    x = jax.random.normal(kx1, (4096, num_features), jnp.float32)
    out = jax.block_until_ready(fstar_forward(x, params))
    ref = reference_forward(x, params)
    assert out.shape == (4096, 1), out.shape
    assert jnp.allclose(out, ref, atol=1e-3, rtol=1e-3), (
        "mismatch vs reference", float(jnp.max(jnp.abs(out - ref))))

    # Ragged batch: edge tile handled by Pallas block masking (no pad / slice).
    x2 = jax.random.normal(kx2, (3000, num_features), jnp.float32)
    out2 = jax.block_until_ready(fstar_forward(x2, params))
    ref2 = reference_forward(x2, params)
    assert out2.shape == (3000, 1), out2.shape
    assert jnp.allclose(out2, ref2, atol=1e-3, rtol=1e-3), (
        "mismatch vs reference (ragged)", float(jnp.max(jnp.abs(out2 - ref2))))

    print("KERNEL_OK")
</pallas_src>

<mosaic_0001>
module attributes {stable_mosaic.version = 11 : i64} {
  func.func @_fstar_kernel(%arg0: i32, %arg1: memref<2048x32xf32, #tpu.memory_space<vmem>>, %arg2: memref<64x32xf32, #tpu.memory_space<vmem>>, %arg3: memref<64x1xf32, #tpu.memory_space<vmem>>, %arg4: memref<32x64xf32, #tpu.memory_space<vmem>>, %arg5: memref<32x1xf32, #tpu.memory_space<vmem>>, %arg6: memref<16x32xf32, #tpu.memory_space<vmem>>, %arg7: memref<16x1xf32, #tpu.memory_space<vmem>>, %arg8: memref<8x16xf32, #tpu.memory_space<vmem>>, %arg9: memref<8x1xf32, #tpu.memory_space<vmem>>, %arg10: memref<8x1xf32, #tpu.memory_space<vmem>>, %arg11: memref<1x1xf32, #tpu.memory_space<vmem>>, %arg12: memref<1x2048xf32, #tpu.memory_space<vmem>>) attributes {dimension_semantics = [#tpu.dimension_semantics<parallel>], iteration_bounds = array<i64: 2>, scalar_prefetch = 0 : i64, scratch_operands = 0 : i64, tpu.core_type = #tpu.core_type<tc>, window_params = [{transform_indices = @transform_0, window_bounds = array<i64: 2048, 32>}, {pipeline_mode = #tpu.pipeline_mode<synchronous>, transform_indices = @transform_1, window_bounds = array<i64: 64, 32>}, {pipeline_mode = #tpu.pipeline_mode<synchronous>, transform_indices = @transform_2, window_bounds = array<i64: 64, 1>}, {pipeline_mode = #tpu.pipeline_mode<synchronous>, transform_indices = @transform_3, window_bounds = array<i64: 32, 64>}, {pipeline_mode = #tpu.pipeline_mode<synchronous>, transform_indices = @transform_4, window_bounds = array<i64: 32, 1>}, {pipeline_mode = #tpu.pipeline_mode<synchronous>, transform_indices = @transform_5, window_bounds = array<i64: 16, 32>}, {pipeline_mode = #tpu.pipeline_mode<synchronous>, transform_indices = @transform_6, window_bounds = array<i64: 16, 1>}, {pipeline_mode = #tpu.pipeline_mode<synchronous>, transform_indices = @transform_7, window_bounds = array<i64: 8, 16>}, {pipeline_mode = #tpu.pipeline_mode<synchronous>, transform_indices = @transform_8, window_bounds = array<i64: 8, 1>}, {pipeline_mode = #tpu.pipeline_mode<synchronous>, transform_indices = @transform_9, window_bounds = array<i64: 8, 1>}, {pipeline_mode = #tpu.pipeline_mode<synchronous>, transform_indices = @transform_10, window_bounds = array<i64: 1, 1>}, {transform_indices = @transform_11, window_bounds = array<i64: 1, 2048>}]} {
    %c0 = arith.constant 0 : index
    %c0_0 = arith.constant 0 : index
    %0 = vector.load %arg1[%c0, %c0_0] : memref<2048x32xf32, #tpu.memory_space<vmem>>, vector<2048x32xf32>
    %c0_1 = arith.constant 0 : index
    %c0_2 = arith.constant 0 : index
    %1 = vector.load %arg2[%c0_1, %c0_2] : memref<64x32xf32, #tpu.memory_space<vmem>>, vector<64x32xf32>
    %cst = arith.constant dense<0.000000e+00> : vector<64x2048xf32>
    %2 = tpu.matmul %1, %0, %cst {dimension_numbers = #tpu.dot_dimension_numbers<[1], [1], [0], [0], [0, 0, 1, 0], [], []>} : vector<64x32xf32>, vector<2048x32xf32>, vector<64x2048xf32> -> vector<64x2048xf32>
    %c0_3 = arith.constant 0 : index
    %c0_4 = arith.constant 0 : index
    %3 = vector.load %arg3[%c0_3, %c0_4] : memref<64x1xf32, #tpu.memory_space<vmem>>, vector<64x1xf32>
    %4 = vector.broadcast %3 : vector<64x1xf32> to vector<64x2048xf32>
    %5 = arith.addf %2, %4 : vector<64x2048xf32>
    %cst_5 = arith.constant 0.000000e+00 : f32
    %6 = vector.broadcast %cst_5 : f32 to vector<64x2048xf32>
    %7 = arith.maximumf %5, %6 : vector<64x2048xf32>
    %c0_6 = arith.constant 0 : index
    %c0_7 = arith.constant 0 : index
    %8 = vector.load %arg4[%c0_6, %c0_7] : memref<32x64xf32, #tpu.memory_space<vmem>>, vector<32x64xf32>
    %cst_8 = arith.constant dense<0.000000e+00> : vector<32x2048xf32>
    %9 = tpu.matmul %8, %7, %cst_8 {dimension_numbers = #tpu.dot_dimension_numbers<[1], [0], [0], [1], [0, 0, 1, 1], [], []>} : vector<32x64xf32>, vector<64x2048xf32>, vector<32x2048xf32> -> vector<32x2048xf32>
    %c0_9 = arith.constant 0 : index
    %c0_10 = arith.constant 0 : index
    %10 = vector.load %arg5[%c0_9, %c0_10] : memref<32x1xf32, #tpu.memory_space<vmem>>, vector<32x1xf32>
    %11 = vector.broadcast %10 : vector<32x1xf32> to vector<32x2048xf32>
    %12 = arith.addf %9, %11 : vector<32x2048xf32>
    %cst_11 = arith.constant 0.000000e+00 : f32
    %13 = vector.broadcast %cst_11 : f32 to vector<32x2048xf32>
    %14 = arith.maximumf %12, %13 : vector<32x2048xf32>
    %c0_12 = arith.constant 0 : index
    %c0_13 = arith.constant 0 : index
    %15 = vector.load %arg6[%c0_12, %c0_13] : memref<16x32xf32, #tpu.memory_space<vmem>>, vector<16x32xf32>
    %cst_14 = arith.constant dense<0.000000e+00> : vector<16x2048xf32>
    %16 = tpu.matmul %15, %14, %cst_14 {dimension_numbers = #tpu.dot_dimension_numbers<[1], [0], [0], [1], [0, 0, 1, 1], [], []>} : vector<16x32xf32>, vector<32x2048xf32>, vector<16x2048xf32> -> vector<16x2048xf32>
    %c0_15 = arith.constant 0 : index
    %c0_16 = arith.constant 0 : index
    %17 = vector.load %arg7[%c0_15, %c0_16] : memref<16x1xf32, #tpu.memory_space<vmem>>, vector<16x1xf32>
    %18 = vector.broadcast %17 : vector<16x1xf32> to vector<16x2048xf32>
    %19 = arith.addf %16, %18 : vector<16x2048xf32>
    %cst_17 = arith.constant 0.000000e+00 : f32
    %20 = vector.broadcast %cst_17 : f32 to vector<16x2048xf32>
    %21 = arith.maximumf %19, %20 : vector<16x2048xf32>
    %c0_18 = arith.constant 0 : index
    %c0_19 = arith.constant 0 : index
    %22 = vector.load %arg8[%c0_18, %c0_19] : memref<8x16xf32, #tpu.memory_space<vmem>>, vector<8x16xf32>
    %cst_20 = arith.constant dense<0.000000e+00> : vector<8x2048xf32>
    %23 = tpu.matmul %22, %21, %cst_20 {dimension_numbers = #tpu.dot_dimension_numbers<[1], [0], [0], [1], [0, 0, 1, 1], [], []>} : vector<8x16xf32>, vector<16x2048xf32>, vector<8x2048xf32> -> vector<8x2048xf32>
    %c0_21 = arith.constant 0 : index
    %c0_22 = arith.constant 0 : index
    %24 = vector.load %arg9[%c0_21, %c0_22] : memref<8x1xf32, #tpu.memory_space<vmem>>, vector<8x1xf32>
    %25 = vector.broadcast %24 : vector<8x1xf32> to vector<8x2048xf32>
    %26 = arith.addf %23, %25 : vector<8x2048xf32>
    %cst_23 = arith.constant 0.000000e+00 : f32
    %27 = vector.broadcast %cst_23 : f32 to vector<8x2048xf32>
    %28 = arith.maximumf %26, %27 : vector<8x2048xf32>
    %c0_24 = arith.constant 0 : index
    %c0_25 = arith.constant 0 : index
    %29 = vector.load %arg10[%c0_24, %c0_25] : memref<8x1xf32, #tpu.memory_space<vmem>>, vector<8x1xf32>
    %30 = vector.broadcast %29 : vector<8x1xf32> to vector<8x2048xf32>
    %31 = arith.mulf %28, %30 : vector<8x2048xf32>
    %cst_26 = arith.constant dense<0.000000e+00> : vector<2048xf32>
    %32 = vector.multi_reduction <add>, %31, %cst_26 [0] : vector<8x2048xf32> to vector<2048xf32>
    %33 = vector.shape_cast %32 : vector<2048xf32> to vector<1x2048xf32>
    %c0_27 = arith.constant 0 : index
    %c0_28 = arith.constant 0 : index
    %34 = vector.load %arg11[%c0_27, %c0_28] : memref<1x1xf32, #tpu.memory_space<vmem>>, vector<1x1xf32>
    %35 = vector.broadcast %34 : vector<1x1xf32> to vector<1x2048xf32>
    %36 = arith.addf %33, %35 : vector<1x2048xf32>
    %37 = math.absf %36 : vector<1x2048xf32>
    %cst_29 = arith.constant 0.000000e+00 : f32
    %38 = vector.broadcast %cst_29 : f32 to vector<1x2048xf32>
    %39 = arith.subf %38, %37 : vector<1x2048xf32>
    %40 = math.exp %39 : vector<1x2048xf32>
    %cst_30 = arith.constant 0.000000e+00 : f32
    %41 = vector.broadcast %cst_30 : f32 to vector<1x2048xf32>
    %42 = arith.cmpf oge, %36, %41 : vector<1x2048xf32>
    %cst_31 = arith.constant 1.000000e+00 : f32
    %43 = vector.broadcast %cst_31 : f32 to vector<1x2048xf32>
    %44 = arith.addf %43, %40 : vector<1x2048xf32>
    %cst_32 = arith.constant 1.000000e+00 : f32
    %45 = vector.broadcast %cst_32 : f32 to vector<1x2048xf32>
    %46 = arith.divf %45, %44 : vector<1x2048xf32>
    %cst_33 = arith.constant 1.000000e+00 : f32
    %47 = vector.broadcast %cst_33 : f32 to vector<1x2048xf32>
    %48 = arith.addf %47, %40 : vector<1x2048xf32>
    %49 = arith.divf %40, %48 : vector<1x2048xf32>
    %50 = arith.select %42, %46, %49 : vector<1x2048xi1>, vector<1x2048xf32>
    %51 = math.exp2 %50 : vector<1x2048xf32>
    %c0_34 = arith.constant 0 : index
    %c0_35 = arith.constant 0 : index
    %52 = vector.load %arg12[%c0_34, %c0_35] : memref<1x2048xf32, #tpu.memory_space<vmem>>, vector<1x2048xf32>
    tpu.vector_store %arg12[%c0_34, %c0_35], %51 {strides = array<i32>} : memref<1x2048xf32, #tpu.memory_space<vmem>>, vector<1x2048xf32>,
    return
  }
  func.func @transform_0(%arg0: i32) -> (i32, i32) {
    %c0_i32 = arith.constant 0 : i32
    %c0_i32_0 = arith.constant 0 : i32
    return %arg0, %c0_i32 : i32, i32
  }
  func.func @transform_1(%arg0: i32) -> (i32, i32) {
    %c0_i32 = arith.constant 0 : i32
    %c0_i32_0 = arith.constant 0 : i32
    %c0_i32_1 = arith.constant 0 : i32
    return %c0_i32, %c0_i32_0 : i32, i32
  }
  func.func @transform_2(%arg0: i32) -> (i32, i32) {
    %c0_i32 = arith.constant 0 : i32
    %c0_i32_0 = arith.constant 0 : i32
    %c0_i32_1 = arith.constant 0 : i32
    return %c0_i32, %c0_i32_0 : i32, i32
  }
  func.func @transform_3(%arg0: i32) -> (i32, i32) {
    %c0_i32 = arith.constant 0 : i32
    %c0_i32_0 = arith.constant 0 : i32
    %c0_i32_1 = arith.constant 0 : i32
    return %c0_i32, %c0_i32_0 : i32, i32
  }
  func.func @transform_4(%arg0: i32) -> (i32, i32) {
    %c0_i32 = arith.constant 0 : i32
    %c0_i32_0 = arith.constant 0 : i32
    %c0_i32_1 = arith.constant 0 : i32
    return %c0_i32, %c0_i32_0 : i32, i32
  }
  func.func @transform_5(%arg0: i32) -> (i32, i32) {
    %c0_i32 = arith.constant 0 : i32
    %c0_i32_0 = arith.constant 0 : i32
    %c0_i32_1 = arith.constant 0 : i32
    return %c0_i32, %c0_i32_0 : i32, i32
  }
  func.func @transform_6(%arg0: i32) -> (i32, i32) {
    %c0_i32 = arith.constant 0 : i32
    %c0_i32_0 = arith.constant 0 : i32
    %c0_i32_1 = arith.constant 0 : i32
    return %c0_i32, %c0_i32_0 : i32, i32
  }
  func.func @transform_7(%arg0: i32) -> (i32, i32) {
    %c0_i32 = arith.constant 0 : i32
    %c0_i32_0 = arith.constant 0 : i32
    %c0_i32_1 = arith.constant 0 : i32
    return %c0_i32, %c0_i32_0 : i32, i32
  }
  func.func @transform_8(%arg0: i32) -> (i32, i32) {
    %c0_i32 = arith.constant 0 : i32
    %c0_i32_0 = arith.constant 0 : i32
    %c0_i32_1 = arith.constant 0 : i32
    return %c0_i32, %c0_i32_0 : i32, i32
  }
  func.func @transform_9(%arg0: i32) -> (i32, i32) {
    %c0_i32 = arith.constant 0 : i32
    %c0_i32_0 = arith.constant 0 : i32
    %c0_i32_1 = arith.constant 0 : i32
    return %c0_i32, %c0_i32_0 : i32, i32
  }
  func.func @transform_10(%arg0: i32) -> (i32, i32) {
    %c0_i32 = arith.constant 0 : i32
    %c0_i32_0 = arith.constant 0 : i32
    %c0_i32_1 = arith.constant 0 : i32
    return %c0_i32, %c0_i32_0 : i32, i32
  }
  func.func @transform_11(%arg0: i32) -> (i32, i32) {
    %c0_i32 = arith.constant 0 : i32
    %c0_i32_0 = arith.constant 0 : i32
    return %c0_i32, %arg0 : i32, i32
  }
}

module attributes {stable_mosaic.version = 11 : i64} {
  func.func @_fstar_kernel(%arg0: i32, %arg1: memref<2048x32xf32, #tpu.memory_space<vmem>>, %arg2: memref<64x32xf32, #tpu.memory_space<vmem>>, %arg3: memref<64x1xf32, #tpu.memory_space<vmem>>, %arg4: memref<32x64xf32, #tpu.memory_space<vmem>>, %arg5: memref<32x1xf32, #tpu.memory_space<vmem>>, %arg6: memref<16x32xf32, #tpu.memory_space<vmem>>, %arg7: memref<16x1xf32, #tpu.memory_space<vmem>>, %arg8: memref<8x16xf32, #tpu.memory_space<vmem>>, %arg9: memref<8x1xf32, #tpu.memory_space<vmem>>, %arg10: memref<8x1xf32, #tpu.memory_space<vmem>>, %arg11: memref<1x1xf32, #tpu.memory_space<vmem>>, %arg12: memref<1x2048xf32, #tpu.memory_space<vmem>>) attributes {dimension_semantics = [#tpu.dimension_semantics<parallel>], iteration_bounds = array<i64: 2>, scalar_prefetch = 0 : i64, scratch_operands = 0 : i64, tpu.core_type = #tpu.core_type<tc>, window_params = [{transform_indices = @transform_0, window_bounds = array<i64: 2048, 32>}, {pipeline_mode = #tpu.pipeline_mode<synchronous>, transform_indices = @transform_1, window_bounds = array<i64: 64, 32>}, {pipeline_mode = #tpu.pipeline_mode<synchronous>, transform_indices = @transform_2, window_bounds = array<i64: 64, 1>}, {pipeline_mode = #tpu.pipeline_mode<synchronous>, transform_indices = @transform_3, window_bounds = array<i64: 32, 64>}, {pipeline_mode = #tpu.pipeline_mode<synchronous>, transform_indices = @transform_4, window_bounds = array<i64: 32, 1>}, {pipeline_mode = #tpu.pipeline_mode<synchronous>, transform_indices = @transform_5, window_bounds = array<i64: 16, 32>}, {pipeline_mode = #tpu.pipeline_mode<synchronous>, transform_indices = @transform_6, window_bounds = array<i64: 16, 1>}, {pipeline_mode = #tpu.pipeline_mode<synchronous>, transform_indices = @transform_7, window_bounds = array<i64: 8, 16>}, {pipeline_mode = #tpu.pipeline_mode<synchronous>, transform_indices = @transform_8, window_bounds = array<i64: 8, 1>}, {pipeline_mode = #tpu.pipeline_mode<synchronous>, transform_indices = @transform_9, window_bounds = array<i64: 8, 1>}, {pipeline_mode = #tpu.pipeline_mode<synchronous>, transform_indices = @transform_10, window_bounds = array<i64: 1, 1>}, {transform_indices = @transform_11, window_bounds = array<i64: 1, 2048>}]} {
    %c0 = arith.constant 0 : index
    %c0_0 = arith.constant 0 : index
    %0 = vector.load %arg1[%c0, %c0_0] : memref<2048x32xf32, #tpu.memory_space<vmem>>, vector<2048x32xf32>
    %c0_1 = arith.constant 0 : index
    %c0_2 = arith.constant 0 : index
    %1 = vector.load %arg2[%c0_1, %c0_2] : memref<64x32xf32, #tpu.memory_space<vmem>>, vector<64x32xf32>
    %cst = arith.constant dense<0.000000e+00> : vector<64x2048xf32>
    %2 = tpu.matmul %1, %0, %cst {dimension_numbers = #tpu.dot_dimension_numbers<[1], [1], [0], [0], [0, 0, 1, 0], [], []>} : vector<64x32xf32>, vector<2048x32xf32>, vector<64x2048xf32> -> vector<64x2048xf32>
    %c0_3 = arith.constant 0 : index
    %c0_4 = arith.constant 0 : index
    %3 = vector.load %arg3[%c0_3, %c0_4] : memref<64x1xf32, #tpu.memory_space<vmem>>, vector<64x1xf32>
    %4 = vector.broadcast %3 : vector<64x1xf32> to vector<64x2048xf32>
    %5 = arith.addf %2, %4 : vector<64x2048xf32>
    %cst_5 = arith.constant 0.000000e+00 : f32
    %6 = vector.broadcast %cst_5 : f32 to vector<64x2048xf32>
    %7 = arith.maximumf %5, %6 : vector<64x2048xf32>
    %c0_6 = arith.constant 0 : index
    %c0_7 = arith.constant 0 : index
    %8 = vector.load %arg4[%c0_6, %c0_7] : memref<32x64xf32, #tpu.memory_space<vmem>>, vector<32x64xf32>
    %cst_8 = arith.constant dense<0.000000e+00> : vector<32x2048xf32>
    %9 = tpu.matmul %8, %7, %cst_8 {dimension_numbers = #tpu.dot_dimension_numbers<[1], [0], [0], [1], [0, 0, 1, 1], [], []>} : vector<32x64xf32>, vector<64x2048xf32>, vector<32x2048xf32> -> vector<32x2048xf32>
    %c0_9 = arith.constant 0 : index
    %c0_10 = arith.constant 0 : index
    %10 = vector.load %arg5[%c0_9, %c0_10] : memref<32x1xf32, #tpu.memory_space<vmem>>, vector<32x1xf32>
    %11 = vector.broadcast %10 : vector<32x1xf32> to vector<32x2048xf32>
    %12 = arith.addf %9, %11 : vector<32x2048xf32>
    %cst_11 = arith.constant 0.000000e+00 : f32
    %13 = vector.broadcast %cst_11 : f32 to vector<32x2048xf32>
    %14 = arith.maximumf %12, %13 : vector<32x2048xf32>
    %c0_12 = arith.constant 0 : index
    %c0_13 = arith.constant 0 : index
    %15 = vector.load %arg6[%c0_12, %c0_13] : memref<16x32xf32, #tpu.memory_space<vmem>>, vector<16x32xf32>
    %cst_14 = arith.constant dense<0.000000e+00> : vector<16x2048xf32>
    %16 = tpu.matmul %15, %14, %cst_14 {dimension_numbers = #tpu.dot_dimension_numbers<[1], [0], [0], [1], [0, 0, 1, 1], [], []>} : vector<16x32xf32>, vector<32x2048xf32>, vector<16x2048xf32> -> vector<16x2048xf32>
    %c0_15 = arith.constant 0 : index
    %c0_16 = arith.constant 0 : index
    %17 = vector.load %arg7[%c0_15, %c0_16] : memref<16x1xf32, #tpu.memory_space<vmem>>, vector<16x1xf32>
    %18 = vector.broadcast %17 : vector<16x1xf32> to vector<16x2048xf32>
    %19 = arith.addf %16, %18 : vector<16x2048xf32>
    %cst_17 = arith.constant 0.000000e+00 : f32
    %20 = vector.broadcast %cst_17 : f32 to vector<16x2048xf32>
    %21 = arith.maximumf %19, %20 : vector<16x2048xf32>
    %c0_18 = arith.constant 0 : index
    %c0_19 = arith.constant 0 : index
    %22 = vector.load %arg8[%c0_18, %c0_19] : memref<8x16xf32, #tpu.memory_space<vmem>>, vector<8x16xf32>
    %cst_20 = arith.constant dense<0.000000e+00> : vector<8x2048xf32>
    %23 = tpu.matmul %22, %21, %cst_20 {dimension_numbers = #tpu.dot_dimension_numbers<[1], [0], [0], [1], [0, 0, 1, 1], [], []>} : vector<8x16xf32>, vector<16x2048xf32>, vector<8x2048xf32> -> vector<8x2048xf32>
    %c0_21 = arith.constant 0 : index
    %c0_22 = arith.constant 0 : index
    %24 = vector.load %arg9[%c0_21, %c0_22] : memref<8x1xf32, #tpu.memory_space<vmem>>, vector<8x1xf32>
    %25 = vector.broadcast %24 : vector<8x1xf32> to vector<8x2048xf32>
    %26 = arith.addf %23, %25 : vector<8x2048xf32>
    %cst_23 = arith.constant 0.000000e+00 : f32
    %27 = vector.broadcast %cst_23 : f32 to vector<8x2048xf32>
    %28 = arith.maximumf %26, %27 : vector<8x2048xf32>
    %c0_24 = arith.constant 0 : index
    %c0_25 = arith.constant 0 : index
    %29 = vector.load %arg10[%c0_24, %c0_25] : memref<8x1xf32, #tpu.memory_space<vmem>>, vector<8x1xf32>
    %30 = vector.broadcast %29 : vector<8x1xf32> to vector<8x2048xf32>
    %31 = arith.mulf %28, %30 : vector<8x2048xf32>
    %cst_26 = arith.constant dense<0.000000e+00> : vector<2048xf32>
    %32 = vector.multi_reduction <add>, %31, %cst_26 [0] : vector<8x2048xf32> to vector<2048xf32>
    %33 = vector.shape_cast %32 : vector<2048xf32> to vector<1x2048xf32>
    %c0_27 = arith.constant 0 : index
    %c0_28 = arith.constant 0 : index
    %34 = vector.load %arg11[%c0_27, %c0_28] : memref<1x1xf32, #tpu.memory_space<vmem>>, vector<1x1xf32>
    %35 = vector.broadcast %34 : vector<1x1xf32> to vector<1x2048xf32>
    %36 = arith.addf %33, %35 : vector<1x2048xf32>
    %37 = math.absf %36 : vector<1x2048xf32>
    %cst_29 = arith.constant 0.000000e+00 : f32
    %38 = vector.broadcast %cst_29 : f32 to vector<1x2048xf32>
    %39 = arith.subf %38, %37 : vector<1x2048xf32>
    %40 = math.exp %39 : vector<1x2048xf32>
    %cst_30 = arith.constant 0.000000e+00 : f32
    %41 = vector.broadcast %cst_30 : f32 to vector<1x2048xf32>
    %42 = arith.cmpf oge, %36, %41 : vector<1x2048xf32>
    %cst_31 = arith.constant 1.000000e+00 : f32
    %43 = vector.broadcast %cst_31 : f32 to vector<1x2048xf32>
    %44 = arith.addf %43, %40 : vector<1x2048xf32>
    %cst_32 = arith.constant 1.000000e+00 : f32
    %45 = vector.broadcast %cst_32 : f32 to vector<1x2048xf32>
    %46 = arith.divf %45, %44 : vector<1x2048xf32>
    %cst_33 = arith.constant 1.000000e+00 : f32
    %47 = vector.broadcast %cst_33 : f32 to vector<1x2048xf32>
    %48 = arith.addf %47, %40 : vector<1x2048xf32>
    %49 = arith.divf %40, %48 : vector<1x2048xf32>
    %50 = arith.select %42, %46, %49 : vector<1x2048xi1>, vector<1x2048xf32>
    %51 = math.exp2 %50 : vector<1x2048xf32>
    %c0_34 = arith.constant 0 : index
    %c0_35 = arith.constant 0 : index
    %52 = vector.load %arg12[%c0_34, %c0_35] : memref<1x2048xf32, #tpu.memory_space<vmem>>, vector<1x2048xf32>
    tpu.vector_store %arg12[%c0_34, %c0_35], %51 {strides = array<i32>} : memref<1x2048xf32, #tpu.memory_space<vmem>>, vector<1x2048xf32>,
    return
  }
  func.func @transform_0(%arg0: i32) -> (i32, i32) {
    %c0_i32 = arith.constant 0 : i32
    %c0_i32_0 = arith.constant 0 : i32
    return %arg0, %c0_i32 : i32, i32
  }
  func.func @transform_1(%arg0: i32) -> (i32, i32) {
    %c0_i32 = arith.constant 0 : i32
    %c0_i32_0 = arith.constant 0 : i32
    %c0_i32_1 = arith.constant 0 : i32
    return %c0_i32, %c0_i32_0 : i32, i32
  }
  func.func @transform_2(%arg0: i32) -> (i32, i32) {
    %c0_i32 = arith.constant 0 : i32
    %c0_i32_0 = arith.constant 0 : i32
    %c0_i32_1 = arith.constant 0 : i32
    return %c0_i32, %c0_i32_0 : i32, i32
  }
  func.func @transform_3(%arg0: i32) -> (i32, i32) {
    %c0_i32 = arith.constant 0 : i32
    %c0_i32_0 = arith.constant 0 : i32
    %c0_i32_1 = arith.constant 0 : i32
    return %c0_i32, %c0_i32_0 : i32, i32
  }
  func.func @transform_4(%arg0: i32) -> (i32, i32) {
    %c0_i32 = arith.constant 0 : i32
    %c0_i32_0 = arith.constant 0 : i32
    %c0_i32_1 = arith.constant 0 : i32
    return %c0_i32, %c0_i32_0 : i32, i32
  }
  func.func @transform_5(%arg0: i32) -> (i32, i32) {
    %c0_i32 = arith.constant 0 : i32
    %c0_i32_0 = arith.constant 0 : i32
    %c0_i32_1 = arith.constant 0 : i32
    return %c0_i32, %c0_i32_0 : i32, i32
  }
  func.func @transform_6(%arg0: i32) -> (i32, i32) {
    %c0_i32 = arith.constant 0 : i32
    %c0_i32_0 = arith.constant 0 : i32
    %c0_i32_1 = arith.constant 0 : i32
    return %c0_i32, %c0_i32_0 : i32, i32
  }
  func.func @transform_7(%arg0: i32) -> (i32, i32) {
    %c0_i32 = arith.constant 0 : i32
    %c0_i32_0 = arith.constant 0 : i32
    %c0_i32_1 = arith.constant 0 : i32
    return %c0_i32, %c0_i32_0 : i32, i32
  }
  func.func @transform_8(%arg0: i32) -> (i32, i32) {
    %c0_i32 = arith.constant 0 : i32
    %c0_i32_0 = arith.constant 0 : i32
    %c0_i32_1 = arith.constant 0 : i32
    return %c0_i32, %c0_i32_0 : i32, i32
  }
  func.func @transform_9(%arg0: i32) -> (i32, i32) {
    %c0_i32 = arith.constant 0 : i32
    %c0_i32_0 = arith.constant 0 : i32
    %c0_i32_1 = arith.constant 0 : i32
    return %c0_i32, %c0_i32_0 : i32, i32
  }
  func.func @transform_10(%arg0: i32) -> (i32, i32) {
    %c0_i32 = arith.constant 0 : i32
    %c0_i32_0 = arith.constant 0 : i32
    %c0_i32_1 = arith.constant 0 : i32
    return %c0_i32, %c0_i32_0 : i32, i32
  }
  func.func @transform_11(%arg0: i32) -> (i32, i32) {
    %c0_i32 = arith.constant 0 : i32
    %c0_i32_0 = arith.constant 0 : i32
    return %c0_i32, %arg0 : i32, i32
  }
}

</mosaic_0001>

<bundles_post_ra>
// kernel: tpu_custom_call.1
= control target key start
LH: loop header
LB: loop body
LE: loop exit
PB: predicated region body
PF: predicated region fallthrough
CT: control target
= control target key end

     0   :  { %s7253_s0 = inlined_call_operand.vmem [shape: f32[4096,32], index: 0, kind: input, shape index: {}]   ;;  %s7254_s1 = inlined_call_operand.vmem [shape: f32[64,32], index: 1, kind: input, shape index: {}]   ;;  %s7255_s2 = inlined_call_operand.vmem [shape: f32[64,1], index: 2, kind: input, shape index: {}]   ;;  %s7256_s3 = inlined_call_operand.vmem [shape: f32[32,64], index: 3, kind: input, shape index: {}]   ;;  %s7257_s4 = inlined_call_operand.vmem [shape: f32[32,1], index: 4, kind: input, shape index: {}]   ;;  %s7258_s5 = inlined_call_operand.vmem [shape: f32[16,32], index: 5, kind: input, shape index: {}]   ;;  %s7259_s6 = inlined_call_operand.vmem [shape: f32[16,1], index: 6, kind: input, shape index: {}]   ;;  %s7260_s7 = inlined_call_operand.vmem [shape: f32[8,16], index: 7, kind: input, shape index: {}]   ;;  %s7261_s8 = inlined_call_operand.vmem [shape: f32[8,1], index: 8, kind: input, shape index: {}]   ;;  %s7262_s9 = inlined_call_operand.vmem [shape: f32[8,1], index: 9, kind: input, shape index: {}]   ;;  %s7263_s10 = inlined_call_operand.<no memory space> [shape: f32[1,1], index: 10, kind: input, shape index: {}]   ;;  %s7264_s11 = inlined_call_operand.hbm [shape: f32[1,4096], index: 11, kind: output, shape index: {}]  }
   0x1   :  { %v16_v0 = vstv %s7263_s10 }
   0x2   :  { %17 = vst [vmem:[#allocation2] sm:$0x1] %v16_v0 }
   0x3   :  { %18 = vsyncpa [#allocation4], 0 }
   0x4   :  { %20 = vsyncpa [#allocation4 + $0x1], 0  ;;  %s5052_s19 = smov 0   ;;  %s5054_s20 = smov 0  }
   0x5   :  { %s5056_s21 = smov 0   ;;  %s5058_s22 = smov 0  }
   0x6 LB: > { %s5073_s10 = sadd.s32 4294967295, %s4986_s22   ;;  %s4270_s23 = sadd.s32 4294967294, %s4986_s22   ;;  %s4986_s22 = sphi %s5058_s22, %s7300_s22   ;;  %s4982_s21 = sphi %s5056_s21, %s7299_s21   ;;  %s4978_s20 = sphi %s5054_s20, %s7298_s20   ;;  %s4974_s19 = sphi %s5052_s19, %s7297_s19  }
   0x7   : > { %s5077_s24 = sadd.s32 1, %s4986_s22   ;;  %s269_s25 = sadd.s32 1, %s4982_s21 }
   0x8   : > { %s266_s26 = ssub.s32 %s4986_s22, %s5077_s24  ;;  %p279_p0 = scmp.ne.s32.totalorder %s4982_s21, %s4978_s20 }
   0x9   : > { %p267_p1 = scmp.eq.s32.totalorder %s266_s26, 0  ;;  %p280_p2 = scmp.eq.s32.totalorder %s5073_s10, 1 }
   0xa   : > { %p285_p3 = scmp.ne.s32.totalorder %s4978_s20, %s4974_s19  ;;  %p286_p4 = scmp.eq.s32.totalorder %s4270_s23, 1 }
   0xb   : > { %s5088_s27 = scalar_select %p267_p1, %s4982_s21, %s269_s25  }
   0xc   : > { %p5090_p5 = por %p280_p2, %p279_p0  ;;  %p5094_p6 = por %p286_p4, %p285_p3 }
   0xd   : > { %p4273_p7 = scmp.ge.s32.totalorder %s4986_s22, 1  ;;  %p343_p8 = scmp.lt.s32.totalorder %s4986_s22, 3 }
   0xf   : > { %p344_p9 = pnand %p4273_p7, %p343_p8 }
  0x10   : > { %s4275_s30 = sshll.u32 (!%p344_p9), %s5073_s10, 8  ;;  %s380_s26 = sand.u32 (!%p344_p9), 1, %s4978_s20  }
  0x11   : > { %347 = sbr.rel (%p344_p9) target bundleno = 1014 (0x3f6), region = 64  ;;  %p384_p10 = scmp.lt.s32.totalorder (!%p344_p9), %s4275_s30, 511 }
  0x12   : > { %s4196_s18 = scalar_lea.sflag (!%p344_p9), [#allocation4], %s380_s26  ;;  %s4944_s13 = scalar_lea.hbm (!%p344_p9), %s7264_s11, 32 }
  0x16   : > { %s7302_s30 = smov (!%p384_p10, %s4275_s30), 511  ;;  %vm702_vm0 = vcmask 261120   ;;  %v4988_v37 = vmov 0   ;;  %v659_v38 = vld [vmem:[%s7255_s2 + $0x28] sm:$0xff]  ;;  %v661_v47 = vld [vmem:[%s7255_s2 + $0x38] sm:$0xff]  ;;  %v658_v48 = vld [vmem:[%s7255_s2 + $0x20] sm:$0xff] }
  0x17   : > { %s4276_s12 = sshll.u32 %s7302_s30, 3  ;;  %4818 = vset.pattern.permute.xlu1 %v4988_v37  ;;  %4817 = vset.pattern.permute.xlu0 %v4988_v37  ;;  %v660_v57 = vld [vmem:[%s7255_s2 + $0x30] sm:$0xff]  ;;  %v654_v58 = vld [vmem:[%s7255_s2] sm:$0xff]  ;;  %vm2307_vm1 = vcmask 523264   ;;  %vm3275_vm2 = vcmask 130048   ;;  %s4274_s30 = sshll.u32 %s380_s26, 4 }
  0x18   : > { %s5104_s15 = scalar_lea.vmem %s7253_s0, %s4276_s12  ;;  %4819 = vset.pattern.permute.xlu2 %v4988_v37  ;;  %689 = vperm.xlu1 %4818, %v659_v38   ;;  %v5345_v38 = vld [vmem:[%s7254_s1 + $0x18] sm:$0xff]  ;;  %s6988_s12 = scalar_lea.vmem [#allocation3], %s4274_s30 }
  0x19   : > { %v405_v1 = vld [vmem:[%s5104_s15 + $0x78] sm:$0xff]  ;;  %v404_v5 = vld [vmem:[%s5104_s15 + $0x70] sm:$0xff]  ;;  %v403_v9 = vld [vmem:[%s5104_s15 + $0x68] sm:$0xff]  ;;  %699 = vperm.xlu0 %4817, %v661_v47  }
  0x1a   : > { %v421_v2 = vld [vmem:[%s5104_s15 + $0xf8] sm:$0xff]  ;;  %4277 = vmatpush.xpose.msk.msra.mxu0 %vm702_vm0, %v405_v1  ;;  %v420_v6 = vld [vmem:[%s5104_s15 + $0xf0] sm:$0xff]  ;;  %v419_v10 = vld [vmem:[%s5104_s15 + $0xe8] sm:$0xff] }
  0x1b   : > { %v437_v3 = vld [vmem:[%s5104_s15 + $0x178] sm:$0xff]  ;;  %4301 = vmatpush.xpose.msk.msra.mxu1 %vm702_vm0, %v421_v2  ;;  %v436_v7 = vld [vmem:[%s5104_s15 + $0x170] sm:$0xff]  ;;  %v435_v11 = vld [vmem:[%s5104_s15 + $0x168] sm:$0xff] }
  0x1c   : > { %v453_v4 = vld [vmem:[%s5104_s15 + $0x1f8] sm:$0xff]  ;;  %4325 = vmatpush.xpose.msk.msra.mxu2 %vm702_vm0, %v437_v3  ;;  %v452_v8 = vld [vmem:[%s5104_s15 + $0x1f0] sm:$0xff]  ;;  %v451_v12 = vld [vmem:[%s5104_s15 + $0x1e8] sm:$0xff] }
  0x1d   : > { %4349 = vmatpush.xpose.msk.msra.mxu3 %vm702_vm0, %v453_v4  ;;  %v402_v13 = vld [vmem:[%s5104_s15 + $0x60] sm:$0xff]  ;;  %v401_v17 = vld [vmem:[%s5104_s15 + $0x58] sm:$0xff]  ;;  %v400_v21 = vld [vmem:[%s5104_s15 + $0x50] sm:$0xff] }
  0x1e   : > { %4278 = vmatpush.xpose.msk.msra.mxu0 %vm702_vm0, %v404_v5  ;;  %v418_v14 = vld [vmem:[%s5104_s15 + $0xe0] sm:$0xff]  ;;  %v417_v18 = vld [vmem:[%s5104_s15 + $0xd8] sm:$0xff]  ;;  %v416_v22 = vld [vmem:[%s5104_s15 + $0xd0] sm:$0xff] }
  0x1f   : > { %4302 = vmatpush.xpose.msk.msra.mxu1 %vm702_vm0, %v420_v6  ;;  %v434_v15 = vld [vmem:[%s5104_s15 + $0x160] sm:$0xff]  ;;  %v433_v19 = vld [vmem:[%s5104_s15 + $0x158] sm:$0xff]  ;;  %v432_v23 = vld [vmem:[%s5104_s15 + $0x150] sm:$0xff] }
  0x20   : > { %4326 = vmatpush.xpose.msk.msra.mxu2 %vm702_vm0, %v436_v7  ;;  %v450_v16 = vld [vmem:[%s5104_s15 + $0x1e0] sm:$0xff]  ;;  %v449_v20 = vld [vmem:[%s5104_s15 + $0x1d8] sm:$0xff]  ;;  %v448_v24 = vld [vmem:[%s5104_s15 + $0x1d0] sm:$0xff]  ;;  %684 = vperm.xlu1 %4818, %v658_v48  }
  0x21   : > { %4350 = vmatpush.xpose.msk.msra.mxu3 %vm702_vm0, %v452_v8  ;;  %v399_v25 = vld [vmem:[%s5104_s15 + $0x48] sm:$0xff]  ;;  %v398_v29 = vld [vmem:[%s5104_s15 + $0x40] sm:$0xff]  ;;  %v397_v33 = vld [vmem:[%s5104_s15 + $0x38] sm:$0xff]  ;;  %694 = vperm.xlu0 %4817, %v660_v57  }
  0x22   : > { %4279 = vmatpush.xpose.msk.msra.mxu0 %vm702_vm0, %v403_v9  ;;  %v415_v26 = vld [vmem:[%s5104_s15 + $0xc8] sm:$0xff]  ;;  %v414_v30 = vld [vmem:[%s5104_s15 + $0xc0] sm:$0xff]  ;;  %v413_v34 = vld [vmem:[%s5104_s15 + $0xb8] sm:$0xff] }
  0x23   : > { %4303 = vmatpush.xpose.msk.msra.mxu1 %vm702_vm0, %v419_v10  ;;  %v431_v27 = vld [vmem:[%s5104_s15 + $0x148] sm:$0xff]  ;;  %v430_v31 = vld [vmem:[%s5104_s15 + $0x140] sm:$0xff]  ;;  %v429_v35 = vld [vmem:[%s5104_s15 + $0x138] sm:$0xff] }
  0x24   : > { %4327 = vmatpush.xpose.msk.msra.mxu2 %vm702_vm0, %v435_v11  ;;  %v447_v28 = vld [vmem:[%s5104_s15 + $0x1c8] sm:$0xff]  ;;  %v446_v32 = vld [vmem:[%s5104_s15 + $0x1c0] sm:$0xff]  ;;  %v445_v36 = vld [vmem:[%s5104_s15 + $0x1b8] sm:$0xff] }
  0x25   : > { %4351 = vmatpush.xpose.msk.msra.mxu3 %vm702_vm0, %v451_v12  ;;  %v396_v39 = vld [vmem:[%s5104_s15 + $0x30] sm:$0xff]  ;;  %v395_v43 = vld [vmem:[%s5104_s15 + $0x28] sm:$0xff]  ;;  %v394_v49 = vld [vmem:[%s5104_s15 + $0x20] sm:$0xff] }
  0x26   : > { %4280 = vmatpush.xpose.msk.msra.mxu0 %vm702_vm0, %v402_v13  ;;  %v412_v40 = vld [vmem:[%s5104_s15 + $0xb0] sm:$0xff]  ;;  %v411_v44 = vld [vmem:[%s5104_s15 + $0xa8] sm:$0xff]  ;;  %v410_v50 = vld [vmem:[%s5104_s15 + $0xa0] sm:$0xff] }
  0x27   : > { %4304 = vmatpush.xpose.msk.msra.mxu1 %vm702_vm0, %v418_v14  ;;  %v428_v41 = vld [vmem:[%s5104_s15 + $0x130] sm:$0xff]  ;;  %v427_v45 = vld [vmem:[%s5104_s15 + $0x128] sm:$0xff]  ;;  %v426_v51 = vld [vmem:[%s5104_s15 + $0x120] sm:$0xff] }
  0x28   : > { %4328 = vmatpush.xpose.msk.msra.mxu2 %vm702_vm0, %v434_v15  ;;  %v444_v42 = vld [vmem:[%s5104_s15 + $0x1b0] sm:$0xff]  ;;  %v443_v46 = vld [vmem:[%s5104_s15 + $0x1a8] sm:$0xff]  ;;  %v442_v52 = vld [vmem:[%s5104_s15 + $0x1a0] sm:$0xff]  ;;  %664 = vperm.xlu1 %4818, %v654_v58  }
  0x29   : > { %4352 = vmatpush.xpose.msk.msra.mxu3 %vm702_vm0, %v450_v16  ;;  %v393_v53 = vld [vmem:[%s5104_s15 + $0x18] sm:$0xff]  ;;  %v392_v59 = vld [vmem:[%s5104_s15 + $0x10] sm:$0xff]  ;;  %v391_v63 = vld [vmem:[%s5104_s15 + $0x8] sm:$0xff] }
  0x2a   : > { %4281 = vmatpush.xpose.msk.msra.mxu0 %vm702_vm0, %v401_v17  ;;  %v409_v54 = vld [vmem:[%s5104_s15 + $0x98] sm:$0xff]  ;;  %v408_v60 = vld [vmem:[%s5104_s15 + $0x90] sm:$0xff]  ;;  %v407_v0 = vld [vmem:[%s5104_s15 + $0x88] sm:$0xff] }
  0x2b   : > { %4305 = vmatpush.xpose.msk.msra.mxu1 %vm702_vm0, %v417_v18  ;;  %v425_v55 = vld [vmem:[%s5104_s15 + $0x118] sm:$0xff]  ;;  %v424_v61 = vld [vmem:[%s5104_s15 + $0x110] sm:$0xff]  ;;  %v423_v1 = vld [vmem:[%s5104_s15 + $0x108] sm:$0xff] }
  0x2c   : > { %4329 = vmatpush.xpose.msk.msra.mxu2 %vm702_vm0, %v433_v19  ;;  %v441_v56 = vld [vmem:[%s5104_s15 + $0x198] sm:$0xff]  ;;  %v440_v62 = vld [vmem:[%s5104_s15 + $0x190] sm:$0xff]  ;;  %v439_v2 = vld [vmem:[%s5104_s15 + $0x188] sm:$0xff] }
  0x2d   : > { %4353 = vmatpush.xpose.msk.msra.mxu3 %vm702_vm0, %v449_v20  ;;  %v655_v3 = vld [vmem:[%s7255_s2 + $0x8] sm:$0xff]  ;;  %v390_v4 = vld [vmem:[%s5104_s15] sm:$0xff]  ;;  %v469_v8 = vld [vmem:[%s5104_s15 + $0x278] sm:$0xff] }
  0x2e   : > { %4282 = vmatpush.xpose.msk.msra.mxu0 %vm702_vm0, %v400_v21  ;;  %v406_v5 = vld [vmem:[%s5104_s15 + $0x80] sm:$0xff]  ;;  %669 = vperm.xlu0 %4817, %v655_v3   ;;  %v485_v9 = vld [vmem:[%s5104_s15 + $0x2f8] sm:$0xff]  ;;  %v468_v13 = vld [vmem:[%s5104_s15 + $0x270] sm:$0xff] }
  0x2f   : > { %4306 = vmatpush.xpose.msk.msra.mxu1 %vm702_vm0, %v416_v22  ;;  %v422_v6 = vld [vmem:[%s5104_s15 + $0x100] sm:$0xff]  ;;  %v501_v11 = vld [vmem:[%s5104_s15 + $0x378] sm:$0xff]  ;;  %v484_v14 = vld [vmem:[%s5104_s15 + $0x2f0] sm:$0xff] }
  0x30   : > { %4330 = vmatpush.xpose.msk.msra.mxu2 %vm702_vm0, %v432_v23  ;;  %v438_v7 = vld [vmem:[%s5104_s15 + $0x180] sm:$0xff]  ;;  %v517_v12 = vld [vmem:[%s5104_s15 + $0x3f8] sm:$0xff]  ;;  %v500_v15 = vld [vmem:[%s5104_s15 + $0x370] sm:$0xff] }
  0x31   : > { %4354 = vmatpush.xpose.msk.msra.mxu3 %vm702_vm0, %v448_v24  ;;  %v5255_v10 = vld [vmem:[%s7254_s1] sm:$0xff]  ;;  %v516_v16 = vld [vmem:[%s5104_s15 + $0x3f0] sm:$0xff]  ;;  %v467_v17 = vld [vmem:[%s5104_s15 + $0x268] sm:$0xff] }
  0x32   : > { %4283 = vmatpush.xpose.msk.msra.mxu0 %vm702_vm0, %v399_v25  ;;  %v483_v18 = vld [vmem:[%s5104_s15 + $0x2e8] sm:$0xff]  ;;  %v466_v22 = vld [vmem:[%s5104_s15 + $0x260] sm:$0xff]  ;;  %v477_v47 = vld [vmem:[%s5104_s15 + $0x2b8] sm:$0xff] }
  0x33   : > { %4307 = vmatpush.xpose.msk.msra.mxu1 %vm702_vm0, %v415_v26  ;;  %v5284_v19 = vld [vmem:[%s7254_s1 + $0x8] sm:$0xff]  ;;  %v482_v23 = vld [vmem:[%s5104_s15 + $0x2e0] sm:$0xff]  ;;  %v465_v26 = vld [vmem:[%s5104_s15 + $0x258] sm:$0xff] }
  0x34   : > { %4331 = vmatpush.xpose.msk.msra.mxu2 %vm702_vm0, %v431_v27  ;;  %v499_v20 = vld [vmem:[%s5104_s15 + $0x368] sm:$0xff]  ;;  %v498_v24 = vld [vmem:[%s5104_s15 + $0x360] sm:$0xff]  ;;  %v481_v27 = vld [vmem:[%s5104_s15 + $0x2d8] sm:$0xff] }
  0x35   : > { %4355 = vmatpush.xpose.msk.msra.mxu3 %vm702_vm0, %v447_v28  ;;  %v515_v21 = vld [vmem:[%s5104_s15 + $0x3e8] sm:$0xff]  ;;  %v514_v25 = vld [vmem:[%s5104_s15 + $0x3e0] sm:$0xff]  ;;  %v5313_v28 = vld [vmem:[%s7254_s1 + $0x10] sm:$0xff] }
  0x36   : > { %4284 = vmatpush.xpose.msk.msra.mxu0 %vm702_vm0, %v398_v29  ;;  %v497_v29 = vld [vmem:[%s5104_s15 + $0x358] sm:$0xff]  ;;  %v479_v37 = vld [vmem:[%s5104_s15 + $0x2c8] sm:$0xff]  ;;  %v5377_v48 = vld [vmem:[%s7254_s1 + $0x20] sm:$0xff] }
  0x37   : > { %4308 = vmatpush.xpose.msk.msra.mxu1 %vm702_vm0, %v414_v30  ;;  %v513_v30 = vld [vmem:[%s5104_s15 + $0x3d8] sm:$0xff]  ;;  %v5406_v57 = vld [vmem:[%s7254_s1 + $0x28] sm:$0xff] }
  0x38   : > { %4332 = vmatpush.xpose.msk.msra.mxu2 %vm702_vm0, %v430_v31  ;;  %v464_v31 = vld [vmem:[%s5104_s15 + $0x250] sm:$0xff]  ;;  %v491_v58 = vld [vmem:[%s5104_s15 + $0x328] sm:$0xff]  ;;  %v489_v3 = vld [vmem:[%s5104_s15 + $0x318] sm:$0xff] }
  0x39   : > { %4356 = vmatpush.xpose.msk.msra.mxu3 %vm702_vm0, %v446_v32  ;;  %v480_v32 = vld [vmem:[%s5104_s15 + $0x2d0] sm:$0xff] }
  0x3a   : > { %4285 = vmatpush.xpose.msk.msra.mxu0 %vm702_vm0, %v397_v33  ;;  %v657_v33 = vld [vmem:[%s7255_s2 + $0x18] sm:$0xff] }
  0x3b   : > { %4309 = vmatpush.xpose.msk.msra.mxu1 %vm702_vm0, %v413_v34  ;;  %v496_v34 = vld [vmem:[%s5104_s15 + $0x350] sm:$0xff]  ;;  %679 = vperm.xlu2 %4819, %v657_v33   ;;  %v530_v33 = vld [vmem:[%s5104_s15 + $0x460] sm:$0xff] }
  0x3c   : > { %4333 = vmatpush.xpose.msk.msra.mxu2 %vm702_vm0, %v429_v35  ;;  %v512_v35 = vld [vmem:[%s5104_s15 + $0x3d0] sm:$0xff] }
  0x3d   : > { %4357 = vmatpush.xpose.msk.msra.mxu3 %vm702_vm0, %v445_v36  ;;  %v463_v36 = vld [vmem:[%s5104_s15 + $0x248] sm:$0xff] }
  0x3e   : > { %4286 = vmatpush.xpose.msk.msra.mxu0 %vm702_vm0, %v396_v39  ;;  %v495_v39 = vld [vmem:[%s5104_s15 + $0x348] sm:$0xff] }
  0x3f   : > { %4310 = vmatpush.xpose.msk.msra.mxu1 %vm702_vm0, %v412_v40  ;;  %v511_v40 = vld [vmem:[%s5104_s15 + $0x3c8] sm:$0xff] }
  0x40   : > { %4334 = vmatpush.xpose.msk.msra.mxu2 %vm702_vm0, %v428_v41  ;;  %v462_v41 = vld [vmem:[%s5104_s15 + $0x240] sm:$0xff] }
  0x41   : > { %4358 = vmatpush.xpose.msk.msra.mxu3 %vm702_vm0, %v444_v42  ;;  %v478_v42 = vld [vmem:[%s5104_s15 + $0x2c0] sm:$0xff] }
  0x42   : > { %4287 = vmatpush.xpose.msk.msra.mxu0 %vm702_vm0, %v395_v43  ;;  %v656_v43 = vld [vmem:[%s7255_s2 + $0x10] sm:$0xff] }
  0x43   : > { %4311 = vmatpush.xpose.msk.msra.mxu1 %vm702_vm0, %v411_v44  ;;  %v494_v44 = vld [vmem:[%s5104_s15 + $0x340] sm:$0xff]  ;;  %674 = vperm.xlu2 %4819, %v656_v43   ;;  %v544_v43 = vld [vmem:[%s5104_s15 + $0x4d0] sm:$0xff] }
  0x44   : > { %4335 = vmatpush.xpose.msk.msra.mxu2 %vm702_vm0, %v427_v45  ;;  %v510_v45 = vld [vmem:[%s5104_s15 + $0x3c0] sm:$0xff] }
  0x45   : > { %4359 = vmatpush.xpose.msk.msra.mxu3 %vm702_vm0, %v443_v46  ;;  %v461_v46 = vld [vmem:[%s5104_s15 + $0x238] sm:$0xff] }
  0x46   : > { %4288 = vmatpush.xpose.msk.msra.mxu0 %vm702_vm0, %v394_v49  ;;  %v493_v49 = vld [vmem:[%s5104_s15 + $0x338] sm:$0xff] }
  0x47   : > { %4312 = vmatpush.xpose.msk.msra.mxu1 %vm702_vm0, %v410_v50  ;;  %v509_v50 = vld [vmem:[%s5104_s15 + $0x3b8] sm:$0xff] }
  0x48   : > { %4336 = vmatpush.xpose.msk.msra.mxu2 %vm702_vm0, %v426_v51  ;;  %v460_v51 = vld [vmem:[%s5104_s15 + $0x230] sm:$0xff] }
  0x49   : > { %4360 = vmatpush.xpose.msk.msra.mxu3 %vm702_vm0, %v442_v52  ;;  %v476_v52 = vld [vmem:[%s5104_s15 + $0x2b0] sm:$0xff] }
  0x4a   : > { %4289 = vmatpush.xpose.msk.msra.mxu0 %vm702_vm0, %v393_v53  ;;  %v492_v53 = vld [vmem:[%s5104_s15 + $0x330] sm:$0xff] }
  0x4b   : > { %4313 = vmatpush.xpose.msk.msra.mxu1 %vm702_vm0, %v409_v54  ;;  %v508_v54 = vld [vmem:[%s5104_s15 + $0x3b0] sm:$0xff] }
  0x4c   : > { %4337 = vmatpush.xpose.msk.msra.mxu2 %vm702_vm0, %v425_v55  ;;  %v459_v55 = vld [vmem:[%s5104_s15 + $0x228] sm:$0xff] }
  0x4d   : > { %4361 = vmatpush.xpose.msk.msra.mxu3 %vm702_vm0, %v441_v56  ;;  %v475_v56 = vld [vmem:[%s5104_s15 + $0x2a8] sm:$0xff] }
  0x4e   : > { %4290 = vmatpush.xpose.msk.msra.mxu0 %vm702_vm0, %v392_v59  ;;  %v507_v59 = vld [vmem:[%s5104_s15 + $0x3a8] sm:$0xff] }
  0x4f   : > { %4314 = vmatpush.xpose.msk.msra.mxu1 %vm702_vm0, %v408_v60  ;;  %v458_v60 = vld [vmem:[%s5104_s15 + $0x220] sm:$0xff] }
  0x50   : > { %4338 = vmatpush.xpose.msk.msra.mxu2 %vm702_vm0, %v424_v61  ;;  %v474_v61 = vld [vmem:[%s5104_s15 + $0x2a0] sm:$0xff] }
  0x51   : > { %4362 = vmatpush.xpose.msk.msra.mxu3 %vm702_vm0, %v440_v62  ;;  %v490_v62 = vld [vmem:[%s5104_s15 + $0x320] sm:$0xff] }
  0x52   : > { %4291 = vmatpush.xpose.msk.msra.mxu0 %vm702_vm0, %v391_v63  ;;  %v506_v63 = vld [vmem:[%s5104_s15 + $0x3a0] sm:$0xff] }
  0x53   : > { %4315 = vmatpush.xpose.msk.msra.mxu1 %vm702_vm0, %v407_v0  ;;  %v457_v0 = vld [vmem:[%s5104_s15 + $0x218] sm:$0xff] }
  0x54   : > { %4339 = vmatpush.xpose.msk.msra.mxu2 %vm702_vm0, %v423_v1  ;;  %v473_v1 = vld [vmem:[%s5104_s15 + $0x298] sm:$0xff] }
  0x55   : > { %4363 = vmatpush.xpose.msk.msra.mxu3 %vm702_vm0, %v439_v2  ;;  %v5435_v2 = vld [vmem:[%s7254_s1 + $0x30] sm:$0xff] }
  0x56   : > { %4292 = vmatpush.xpose.msk.msra.mxu0 %vm702_vm0, %v390_v4  ;;  %v505_v4 = vld [vmem:[%s5104_s15 + $0x398] sm:$0xff] }
  0x57   : > { %4316 = vmatpush.xpose.msk.msra.mxu1 %vm702_vm0, %v406_v5  ;;  %v456_v5 = vld [vmem:[%s5104_s15 + $0x210] sm:$0xff] }
  0x58   : > { %4340 = vmatpush.xpose.msk.msra.mxu2 %vm702_vm0, %v422_v6  ;;  %v472_v6 = vld [vmem:[%s5104_s15 + $0x290] sm:$0xff] }
  0x59   : > { %4364 = vmatpush.xpose.msk.msra.mxu3 %vm702_vm0, %v438_v7  ;;  %4293 = vmatmul.msk.f32.vlgmr.msra.gmra.mxu0 %vm702_vm0, %v5255_v10  ;;  %v488_v7 = vld [vmem:[%s5104_s15 + $0x310] sm:$0xff] }
  0x5a   : > { %4373 = vmatpush.xpose.msk.msrb.mxu0 %vm702_vm0, %v469_v8  ;;  %4317 = vmatmul.msk.f32.vlgmr.msra.gmra.mxu1 %vm702_vm0, %v5255_v10  ;;  %v504_v8 = vld [vmem:[%s5104_s15 + $0x390] sm:$0xff] }
  0x5b   : > { %4397 = vmatpush.xpose.msk.msrb.mxu1 %vm702_vm0, %v485_v9  ;;  %4341 = vmatmul.msk.f32.vlgmr.msra.gmra.mxu2 %vm702_vm0, %v5255_v10  ;;  %v455_v9 = vld [vmem:[%s5104_s15 + $0x208] sm:$0xff] }
  0x5c   : > { %4365 = vmatmul.msk.f32.vlgmr.msra.gmra.mxu3 %vm702_vm0, %v5255_v10  ;;  %4421 = vmatpush.xpose.msk.msrb.mxu2 %vm702_vm0, %v501_v11  ;;  %v471_v11 = vld [vmem:[%s5104_s15 + $0x288] sm:$0xff] }
  0x5d   : > { %4445 = vmatpush.xpose.msk.msrb.mxu3 %vm702_vm0, %v517_v12  ;;  %v5464_v12 = vld [vmem:[%s7254_s1 + $0x38] sm:$0xff] }
  0x5e   : > { %4374 = vmatpush.xpose.msk.msrb.mxu0 %vm702_vm0, %v468_v13  ;;  %v487_v13 = vld [vmem:[%s5104_s15 + $0x308] sm:$0xff] }
  0x5f   : > { %4398 = vmatpush.xpose.msk.msrb.mxu1 %vm702_vm0, %v484_v14  ;;  %v503_v14 = vld [vmem:[%s5104_s15 + $0x388] sm:$0xff] }
  0x60   : > { %4422 = vmatpush.xpose.msk.msrb.mxu2 %vm702_vm0, %v500_v15  ;;  %v454_v15 = vld [vmem:[%s5104_s15 + $0x200] sm:$0xff] }
  0x61   : > { %4446 = vmatpush.xpose.msk.msrb.mxu3 %vm702_vm0, %v516_v16  ;;  %4294 = vmatmul.msk.f32.gmra.mxu0 %vm702_vm0, %v5284_v19  ;;  %v470_v16 = vld [vmem:[%s5104_s15 + $0x280] sm:$0xff] }
  0x62   : > { %4375 = vmatpush.xpose.msk.msrb.mxu0 %vm702_vm0, %v467_v17  ;;  %4318 = vmatmul.msk.f32.gmra.mxu1 %vm702_vm0, %v5284_v19  ;;  %v533_v17 = vld [vmem:[%s5104_s15 + $0x478] sm:$0xff] }
  0x63   : > { %4399 = vmatpush.xpose.msk.msrb.mxu1 %vm702_vm0, %v483_v18  ;;  %4342 = vmatmul.msk.f32.gmra.mxu2 %vm702_vm0, %v5284_v19  ;;  %v549_v18 = vld [vmem:[%s5104_s15 + $0x4f8] sm:$0xff] }
  0x64   : > { %4366 = vmatmul.msk.f32.gmra.mxu3 %vm702_vm0, %v5284_v19  ;;  %4423 = vmatpush.xpose.msk.msrb.mxu2 %vm702_vm0, %v499_v20  ;;  %v486_v20 = vld [vmem:[%s5104_s15 + $0x300] sm:$0xff] }
  0x65   : > { %4447 = vmatpush.xpose.msk.msrb.mxu3 %vm702_vm0, %v515_v21  ;;  %v502_v21 = vld [vmem:[%s5104_s15 + $0x380] sm:$0xff] }
  0x66   : > { %4376 = vmatpush.xpose.msk.msrb.mxu0 %vm702_vm0, %v466_v22  ;;  %v565_v22 = vld [vmem:[%s5104_s15 + $0x578] sm:$0xff] }
  0x67   : > { %4400 = vmatpush.xpose.msk.msrb.mxu1 %vm702_vm0, %v482_v23  ;;  %v581_v23 = vld [vmem:[%s5104_s15 + $0x5f8] sm:$0xff] }
  0x68   : > { %4424 = vmatpush.xpose.msk.msrb.mxu2 %vm702_vm0, %v498_v24  ;;  %v532_v24 = vld [vmem:[%s5104_s15 + $0x470] sm:$0xff] }
  0x69   : > { %4448 = vmatpush.xpose.msk.msrb.mxu3 %vm702_vm0, %v514_v25  ;;  %4295 = vmatmul.msk.f32.gmra.mxu0 %vm702_vm0, %v5313_v28  ;;  %v548_v25 = vld [vmem:[%s5104_s15 + $0x4f0] sm:$0xff] }
  0x6a   : > { %4377 = vmatpush.xpose.msk.msrb.mxu0 %vm702_vm0, %v465_v26  ;;  %4319 = vmatmul.msk.f32.gmra.mxu1 %vm702_vm0, %v5313_v28  ;;  %v564_v26 = vld [vmem:[%s5104_s15 + $0x570] sm:$0xff] }
  0x6b   : > { %4401 = vmatpush.xpose.msk.msrb.mxu1 %vm702_vm0, %v481_v27  ;;  %4343 = vmatmul.msk.f32.gmra.mxu2 %vm702_vm0, %v5313_v28  ;;  %v580_v27 = vld [vmem:[%s5104_s15 + $0x5f0] sm:$0xff] }
  0x6c   : > { %4367 = vmatmul.msk.f32.gmra.mxu3 %vm702_vm0, %v5313_v28  ;;  %4425 = vmatpush.xpose.msk.msrb.mxu2 %vm702_vm0, %v497_v29  ;;  %v531_v29 = vld [vmem:[%s5104_s15 + $0x468] sm:$0xff] }
  0x6d   : > { %4449 = vmatpush.xpose.msk.msrb.mxu3 %vm702_vm0, %v513_v30  ;;  %v547_v30 = vld [vmem:[%s5104_s15 + $0x4e8] sm:$0xff] }
  0x6e   : > { %4378 = vmatpush.xpose.msk.msrb.mxu0 %vm702_vm0, %v464_v31  ;;  %v563_v31 = vld [vmem:[%s5104_s15 + $0x568] sm:$0xff] }
  0x6f   : > { %4402 = vmatpush.xpose.msk.msrb.mxu1 %vm702_vm0, %v480_v32  ;;  %v579_v32 = vld [vmem:[%s5104_s15 + $0x5e8] sm:$0xff] }
  0x70   : > { %4426 = vmatpush.xpose.msk.msrb.mxu2 %vm702_vm0, %v496_v34  ;;  %v546_v34 = vld [vmem:[%s5104_s15 + $0x4e0] sm:$0xff] }
  0x71   : > { %4450 = vmatpush.xpose.msk.msrb.mxu3 %vm702_vm0, %v512_v35  ;;  %4296 = vmatmul.msk.f32.gmra.mxu0 %vm702_vm0, %v5345_v38  ;;  %v562_v35 = vld [vmem:[%s5104_s15 + $0x560] sm:$0xff] }
  0x72   : > { %4379 = vmatpush.xpose.msk.msrb.mxu0 %vm702_vm0, %v463_v36  ;;  %4320 = vmatmul.msk.f32.gmra.mxu1 %vm702_vm0, %v5345_v38  ;;  %v578_v36 = vld [vmem:[%s5104_s15 + $0x5e0] sm:$0xff] }
  0x73   : > { %4403 = vmatpush.xpose.msk.msrb.mxu1 %vm702_vm0, %v479_v37  ;;  %4344 = vmatmul.msk.f32.gmra.mxu2 %vm702_vm0, %v5345_v38  ;;  %v529_v37 = vld [vmem:[%s5104_s15 + $0x458] sm:$0xff] }
  0x74   : > { %4368 = vmatmul.msk.f32.gmra.mxu3 %vm702_vm0, %v5345_v38  ;;  %4427 = vmatpush.xpose.msk.msrb.mxu2 %vm702_vm0, %v495_v39  ;;  %v545_v39 = vld [vmem:[%s5104_s15 + $0x4d8] sm:$0xff] }
  0x75   : > { %4451 = vmatpush.xpose.msk.msrb.mxu3 %vm702_vm0, %v511_v40  ;;  %v561_v40 = vld [vmem:[%s5104_s15 + $0x558] sm:$0xff] }
  0x76   : > { %4380 = vmatpush.xpose.msk.msrb.mxu0 %vm702_vm0, %v462_v41  ;;  %v577_v41 = vld [vmem:[%s5104_s15 + $0x5d8] sm:$0xff] }
  0x77   : > { %4404 = vmatpush.xpose.msk.msrb.mxu1 %vm702_vm0, %v478_v42  ;;  %v528_v42 = vld [vmem:[%s5104_s15 + $0x450] sm:$0xff] }
  0x78   : > { %4428 = vmatpush.xpose.msk.msrb.mxu2 %vm702_vm0, %v494_v44  ;;  %v560_v44 = vld [vmem:[%s5104_s15 + $0x550] sm:$0xff] }
  0x79   : > { %4452 = vmatpush.xpose.msk.msrb.mxu3 %vm702_vm0, %v510_v45  ;;  %4297 = vmatmul.msk.f32.gmra.mxu0 %vm702_vm0, %v5377_v48  ;;  %v576_v45 = vld [vmem:[%s5104_s15 + $0x5d0] sm:$0xff] }
  0x7a   : > { %4381 = vmatpush.xpose.msk.msrb.mxu0 %vm702_vm0, %v461_v46  ;;  %4321 = vmatmul.msk.f32.gmra.mxu1 %vm702_vm0, %v5377_v48  ;;  %v527_v46 = vld [vmem:[%s5104_s15 + $0x448] sm:$0xff] }
  0x7b   : > { %4405 = vmatpush.xpose.msk.msrb.mxu1 %vm702_vm0, %v477_v47  ;;  %4345 = vmatmul.msk.f32.gmra.mxu2 %vm702_vm0, %v5377_v48  ;;  %v543_v47 = vld [vmem:[%s5104_s15 + $0x4c8] sm:$0xff] }
  0x7c   : > { %4369 = vmatmul.msk.f32.gmra.mxu3 %vm702_vm0, %v5377_v48  ;;  %4429 = vmatpush.xpose.msk.msrb.mxu2 %vm702_vm0, %v493_v49  ;;  %v559_v49 = vld [vmem:[%s5104_s15 + $0x548] sm:$0xff] }
  0x7d   : > { %4453 = vmatpush.xpose.msk.msrb.mxu3 %vm702_vm0, %v509_v50  ;;  %v575_v50 = vld [vmem:[%s5104_s15 + $0x5c8] sm:$0xff] }
  0x7e   : > { %4382 = vmatpush.xpose.msk.msrb.mxu0 %vm702_vm0, %v460_v51  ;;  %v526_v51 = vld [vmem:[%s5104_s15 + $0x440] sm:$0xff] }
  0x7f   : > { %4406 = vmatpush.xpose.msk.msrb.mxu1 %vm702_vm0, %v476_v52  ;;  %v542_v52 = vld [vmem:[%s5104_s15 + $0x4c0] sm:$0xff] }
  0x80   : > { %4430 = vmatpush.xpose.msk.msrb.mxu2 %vm702_vm0, %v492_v53  ;;  %v558_v53 = vld [vmem:[%s5104_s15 + $0x540] sm:$0xff] }
  0x81   : > { %4454 = vmatpush.xpose.msk.msrb.mxu3 %vm702_vm0, %v508_v54  ;;  %4298 = vmatmul.msk.f32.gmra.mxu0 %vm702_vm0, %v5406_v57  ;;  %v574_v54 = vld [vmem:[%s5104_s15 + $0x5c0] sm:$0xff] }
  0x82   : > { %4383 = vmatpush.xpose.msk.msrb.mxu0 %vm702_vm0, %v459_v55  ;;  %4322 = vmatmul.msk.f32.gmra.mxu1 %vm702_vm0, %v5406_v57  ;;  %v2285_v55 = vld [vmem:[%s7257_s4 + $0x10] sm:$0xff] }
  0x83   : > { %4407 = vmatpush.xpose.msk.msrb.mxu1 %vm702_vm0, %v475_v56  ;;  %4346 = vmatmul.msk.f32.gmra.mxu2 %vm702_vm0, %v5406_v57  ;;  %v525_v56 = vld [vmem:[%s5104_s15 + $0x438] sm:$0xff] }
  0x84   : > { %4370 = vmatmul.msk.f32.gmra.mxu3 %vm702_vm0, %v5406_v57  ;;  %4431 = vmatpush.xpose.msk.msrb.mxu2 %vm702_vm0, %v491_v58  ;;  %v541_v58 = vld [vmem:[%s5104_s15 + $0x4b8] sm:$0xff] }
  0x85   : > { %4455 = vmatpush.xpose.msk.msrb.mxu3 %vm702_vm0, %v507_v59  ;;  %v557_v59 = vld [vmem:[%s5104_s15 + $0x538] sm:$0xff]  ;;  %2299 = vperm.xlu0 %4817, %v2285_v55   ;;  %v610_v55 = vld [vmem:[%s5104_s15 + $0x6e0] sm:$0xff] }
  0x86   : > { %4384 = vmatpush.xpose.msk.msrb.mxu0 %vm702_vm0, %v458_v60  ;;  %v573_v60 = vld [vmem:[%s5104_s15 + $0x5b8] sm:$0xff] }
  0x87   : > { %4408 = vmatpush.xpose.msk.msrb.mxu1 %vm702_vm0, %v474_v61  ;;  %v524_v61 = vld [vmem:[%s5104_s15 + $0x430] sm:$0xff] }
  0x88   : > { %4432 = vmatpush.xpose.msk.msrb.mxu2 %vm702_vm0, %v490_v62  ;;  %v540_v62 = vld [vmem:[%s5104_s15 + $0x4b0] sm:$0xff] }
  0x89   : > { %4456 = vmatpush.xpose.msk.msrb.mxu3 %vm702_vm0, %v506_v63  ;;  %4299 = vmatmul.msk.f32.gmra.mxu0 %vm702_vm0, %v5435_v2  ;;  %v556_v63 = vld [vmem:[%s5104_s15 + $0x530] sm:$0xff] }
  0x8a   : > { %4385 = vmatpush.xpose.msk.msrb.mxu0 %vm702_vm0, %v457_v0  ;;  %4323 = vmatmul.msk.f32.gmra.mxu1 %vm702_vm0, %v5435_v2  ;;  %v572_v0 = vld [vmem:[%s5104_s15 + $0x5b0] sm:$0xff] }
  0x8b   : > { %4409 = vmatpush.xpose.msk.msrb.mxu1 %vm702_vm0, %v473_v1  ;;  %4347 = vmatmul.msk.f32.gmra.mxu2 %vm702_vm0, %v5435_v2  ;;  %v2851_v1 = vld [vmem:[%s7259_s6 + $0x8] sm:$0xff] }
  0x8c   : > { %4371 = vmatmul.msk.f32.gmra.mxu3 %vm702_vm0, %v5435_v2  ;;  %4433 = vmatpush.xpose.msk.msrb.mxu2 %vm702_vm0, %v489_v3  ;;  %v523_v3 = vld [vmem:[%s5104_s15 + $0x428] sm:$0xff] }
  0x8d   : > { %4457 = vmatpush.xpose.msk.msrb.mxu3 %vm702_vm0, %v505_v4  ;;  %v539_v4 = vld [vmem:[%s5104_s15 + $0x4a8] sm:$0xff]  ;;  %2859 = vperm.xlu0 %4817, %v2851_v1  }
  0x8e   : > { %4386 = vmatpush.xpose.msk.msrb.mxu0 %vm702_vm0, %v456_v5  ;;  %v555_v5 = vld [vmem:[%s5104_s15 + $0x528] sm:$0xff] }
  0x8f   : > { %4410 = vmatpush.xpose.msk.msrb.mxu1 %vm702_vm0, %v472_v6  ;;  %v571_v6 = vld [vmem:[%s5104_s15 + $0x5a8] sm:$0xff] }
  0x90   : > { %4434 = vmatpush.xpose.msk.msrb.mxu2 %vm702_vm0, %v488_v7  ;;  %v522_v7 = vld [vmem:[%s5104_s15 + $0x420] sm:$0xff] }
  0x91   : > { %4458 = vmatpush.xpose.msk.msrb.mxu3 %vm702_vm0, %v504_v8  ;;  %4300 = vmatmul.msk.f32.gmra.mxu0 %vm702_vm0, %v5464_v12  ;;  %v538_v8 = vld [vmem:[%s5104_s15 + $0x4a0] sm:$0xff] }
  0x92   : > { %4387 = vmatpush.xpose.msk.msrb.mxu0 %vm702_vm0, %v455_v9  ;;  %4324 = vmatmul.msk.f32.gmra.mxu1 %vm702_vm0, %v5464_v12  ;;  %v554_v9 = vld [vmem:[%s5104_s15 + $0x520] sm:$0xff] }
  0x93   : > { %4411 = vmatpush.xpose.msk.msrb.mxu1 %vm702_vm0, %v471_v11  ;;  %4348 = vmatmul.msk.f32.gmra.mxu2 %vm702_vm0, %v5464_v12  ;;  %v570_v11 = vld [vmem:[%s5104_s15 + $0x5a0] sm:$0xff] }
  0x94   : > { %4372 = vmatmul.msk.f32.gmra.mxu3 %vm702_vm0, %v5464_v12  ;;  %4435 = vmatpush.xpose.msk.msrb.mxu2 %vm702_vm0, %v487_v13  ;;  %v3615_v13 = vld [vmem:[%s7262_s9] sm:$0xff] }
  0x95   : > { %4459 = vmatpush.xpose.msk.msrb.mxu3 %vm702_vm0, %v503_v14  ;;  %v2284_v14 = vld [vmem:[%s7257_s4 + $0x8] sm:$0xff]  ;;  %3618 = vperm.xlu0 %4817, %v3615_v13  }
  0x96   : > { %4388 = vmatpush.xpose.msk.msrb.mxu0 %vm702_vm0, %v454_v15  ;;  %v521_v15 = vld [vmem:[%s5104_s15 + $0x418] sm:$0xff]  ;;  %2294 = vperm.xlu1 %4818, %v2284_v14   ;;  %v623_v13 = vld [vmem:[%s5104_s15 + $0x748] sm:$0xff] }
  0x97   : > { %4412 = vmatpush.xpose.msk.msrb.mxu1 %vm702_vm0, %v470_v16  ;;  %v537_v16 = vld [vmem:[%s5104_s15 + $0x498] sm:$0xff]  ;;  %v639_v14 = vld [vmem:[%s5104_s15 + $0x7c8] sm:$0xff] }
  0x98   : > { %4436 = vmatpush.xpose.msk.msrb.mxu2 %vm702_vm0, %v486_v20  ;;  %v520_v20 = vld [vmem:[%s5104_s15 + $0x410] sm:$0xff] }
  0x99   : > { %4460 = vmatpush.xpose.msk.msrb.mxu3 %vm702_vm0, %v502_v21  ;;  %4389 = vmatmul.msk.f32.vlgmr.msrb.gmra.mxu0 %vm702_vm0, %v5255_v10  ;;  %v536_v21 = vld [vmem:[%s5104_s15 + $0x490] sm:$0xff] }
  0x9a   : > { %4469 = vmatpush.xpose.msk.msra.mxu0 %vm702_vm0, %v533_v17  ;;  %4413 = vmatmul.msk.f32.vlgmr.msrb.gmra.mxu1 %vm702_vm0, %v5255_v10  ;;  %v553_v17 = vld [vmem:[%s5104_s15 + $0x518] sm:$0xff] }
  0x9b   : > { %4493 = vmatpush.xpose.msk.msra.mxu1 %vm702_vm0, %v549_v18  ;;  %4437 = vmatmul.msk.f32.vlgmr.msrb.gmra.mxu2 %vm702_vm0, %v5255_v10  ;;  %v569_v18 = vld [vmem:[%s5104_s15 + $0x598] sm:$0xff] }
  0x9c   : > { %4517 = vmatpush.xpose.msk.msra.mxu2 %vm702_vm0, %v565_v22  ;;  %4461 = vmatmul.msk.f32.vlgmr.msrb.gmra.mxu3 %vm702_vm0, %v5255_v10  ;;  %v552_v22 = vld [vmem:[%s5104_s15 + $0x510] sm:$0xff] }
  0x9d   : > { %4541 = vmatpush.xpose.msk.msra.mxu3 %vm702_vm0, %v581_v23  ;;  %v568_v23 = vld [vmem:[%s5104_s15 + $0x590] sm:$0xff] }
  0x9e   : > { %4470 = vmatpush.xpose.msk.msra.mxu0 %vm702_vm0, %v532_v24  ;;  %v2850_v24 = vld [vmem:[%s7259_s6] sm:$0xff] }
  0x9f   : > { %4494 = vmatpush.xpose.msk.msra.mxu1 %vm702_vm0, %v548_v25  ;;  %v519_v25 = vld [vmem:[%s5104_s15 + $0x408] sm:$0xff]  ;;  %2854 = vperm.xlu1 %4818, %v2850_v24   ;;  %v605_v24 = vld [vmem:[%s5104_s15 + $0x6b8] sm:$0xff] }
  0xa0   : > { %4518 = vmatpush.xpose.msk.msra.mxu2 %vm702_vm0, %v564_v26  ;;  %v535_v26 = vld [vmem:[%s5104_s15 + $0x488] sm:$0xff] }
  0xa1   : > { %4542 = vmatpush.xpose.msk.msra.mxu3 %vm702_vm0, %v580_v27  ;;  %4390 = vmatmul.msk.f32.gmra.mxu0 %vm702_vm0, %v5284_v19  ;;  %v551_v27 = vld [vmem:[%s5104_s15 + $0x508] sm:$0xff] }
  0xa2   : > { %4471 = vmatpush.xpose.msk.msra.mxu0 %vm702_vm0, %v531_v29  ;;  %4414 = vmatmul.msk.f32.gmra.mxu1 %vm702_vm0, %v5284_v19  ;;  %v567_v29 = vld [vmem:[%s5104_s15 + $0x588] sm:$0xff] }
  0xa3   : > { %4495 = vmatpush.xpose.msk.msra.mxu1 %vm702_vm0, %v547_v30  ;;  %4438 = vmatmul.msk.f32.gmra.mxu2 %vm702_vm0, %v5284_v19  ;;  %v518_v30 = vld [vmem:[%s5104_s15 + $0x400] sm:$0xff] }
  0xa4   : > { %4519 = vmatpush.xpose.msk.msra.mxu2 %vm702_vm0, %v563_v31  ;;  %4462 = vmatmul.msk.f32.gmra.mxu3 %vm702_vm0, %v5284_v19  ;;  %v534_v31 = vld [vmem:[%s5104_s15 + $0x480] sm:$0xff] }
  0xa5   : > { %4543 = vmatpush.xpose.msk.msra.mxu3 %vm702_vm0, %v579_v32  ;;  %v550_v32 = vld [vmem:[%s5104_s15 + $0x500] sm:$0xff] }
  0xa6   : > { %4472 = vmatpush.xpose.msk.msra.mxu0 %vm702_vm0, %v530_v33  ;;  %v566_v33 = vld [vmem:[%s5104_s15 + $0x580] sm:$0xff] }
  0xa7   : > { %4496 = vmatpush.xpose.msk.msra.mxu1 %vm702_vm0, %v546_v34  ;;  %v597_v34 = vld [vmem:[%s5104_s15 + $0x678] sm:$0xff] }
  0xa8   : > { %4520 = vmatpush.xpose.msk.msra.mxu2 %vm702_vm0, %v562_v35  ;;  %v613_v35 = vld [vmem:[%s5104_s15 + $0x6f8] sm:$0xff] }
  0xa9   : > { %4544 = vmatpush.xpose.msk.msra.mxu3 %vm702_vm0, %v578_v36  ;;  %4391 = vmatmul.msk.f32.gmra.mxu0 %vm702_vm0, %v5313_v28  ;;  %v629_v36 = vld [vmem:[%s5104_s15 + $0x778] sm:$0xff] }
  0xaa   : > { %4473 = vmatpush.xpose.msk.msra.mxu0 %vm702_vm0, %v529_v37  ;;  %4415 = vmatmul.msk.f32.gmra.mxu1 %vm702_vm0, %v5313_v28  ;;  %v645_v37 = vld [vmem:[%s5104_s15 + $0x7f8] sm:$0xff] }
  0xab   : > { %4497 = vmatpush.xpose.msk.msra.mxu1 %vm702_vm0, %v545_v39  ;;  %4439 = vmatmul.msk.f32.gmra.mxu2 %vm702_vm0, %v5313_v28  ;;  %v3733_v39 = vld [vmem:[#allocation2] sm:$0x1] }
  0xac   : > { %4521 = vmatpush.xpose.msk.msra.mxu2 %vm702_vm0, %v561_v40  ;;  %4463 = vmatmul.msk.f32.gmra.mxu3 %vm702_vm0, %v5313_v28 }
  0xad   : > { %4545 = vmatpush.xpose.msk.msra.mxu3 %vm702_vm0, %v577_v41  ;;  %3736 = vperm.xlu1 %4818, %v3733_v39  }
  0xae   : > { %4474 = vmatpush.xpose.msk.msra.mxu0 %vm702_vm0, %v528_v42  ;;  %v596_v42 = vld [vmem:[%s5104_s15 + $0x670] sm:$0xff] }
  0xaf   : > { %4498 = vmatpush.xpose.msk.msra.mxu1 %vm702_vm0, %v544_v43  ;;  %v612_v43 = vld [vmem:[%s5104_s15 + $0x6f0] sm:$0xff] }
  0xb0   : > { %4522 = vmatpush.xpose.msk.msra.mxu2 %vm702_vm0, %v560_v44  ;;  %v628_v44 = vld [vmem:[%s5104_s15 + $0x770] sm:$0xff] }
  0xb1   : > { %4546 = vmatpush.xpose.msk.msra.mxu3 %vm702_vm0, %v576_v45  ;;  %4392 = vmatmul.msk.f32.gmra.mxu0 %vm702_vm0, %v5345_v38  ;;  %v644_v45 = vld [vmem:[%s5104_s15 + $0x7f0] sm:$0xff] }
  0xb2   : > { %4475 = vmatpush.xpose.msk.msra.mxu0 %vm702_vm0, %v527_v46  ;;  %4416 = vmatmul.msk.f32.gmra.mxu1 %vm702_vm0, %v5345_v38  ;;  %v595_v46 = vld [vmem:[%s5104_s15 + $0x668] sm:$0xff] }
  0xb3   : > { %4499 = vmatpush.xpose.msk.msra.mxu1 %vm702_vm0, %v543_v47  ;;  %4440 = vmatmul.msk.f32.gmra.mxu2 %vm702_vm0, %v5345_v38  ;;  %v611_v47 = vld [vmem:[%s5104_s15 + $0x6e8] sm:$0xff] }
  0xb4   : > { %4523 = vmatpush.xpose.msk.msra.mxu2 %vm702_vm0, %v559_v49  ;;  %4464 = vmatmul.msk.f32.gmra.mxu3 %vm702_vm0, %v5345_v38 }
  0xb5   : > { %4547 = vmatpush.xpose.msk.msra.mxu3 %vm702_vm0, %v575_v50 }
  0xb6   : > { %4476 = vmatpush.xpose.msk.msra.mxu0 %vm702_vm0, %v526_v51  ;;  %v627_v51 = vld [vmem:[%s5104_s15 + $0x768] sm:$0xff] }
  0xb7   : > { %4500 = vmatpush.xpose.msk.msra.mxu1 %vm702_vm0, %v542_v52  ;;  %v643_v52 = vld [vmem:[%s5104_s15 + $0x7e8] sm:$0xff] }
  0xb8   : > { %4524 = vmatpush.xpose.msk.msra.mxu2 %vm702_vm0, %v558_v53 }
  0xb9   : > { %4548 = vmatpush.xpose.msk.msra.mxu3 %vm702_vm0, %v574_v54  ;;  %4393 = vmatmul.msk.f32.gmra.mxu0 %vm702_vm0, %v5377_v48  ;;  %v594_v54 = vld [vmem:[%s5104_s15 + $0x660] sm:$0xff] }
  0xba   : > { %4477 = vmatpush.xpose.msk.msra.mxu0 %vm702_vm0, %v525_v56  ;;  %4417 = vmatmul.msk.f32.gmra.mxu1 %vm702_vm0, %v5377_v48  ;;  %v626_v56 = vld [vmem:[%s5104_s15 + $0x760] sm:$0xff] }
  0xbb   : > { %4501 = vmatpush.xpose.msk.msra.mxu1 %vm702_vm0, %v541_v58  ;;  %4441 = vmatmul.msk.f32.gmra.mxu2 %vm702_vm0, %v5377_v48  ;;  %v642_v58 = vld [vmem:[%s5104_s15 + $0x7e0] sm:$0xff] }
  0xbc   : > { %4525 = vmatpush.xpose.msk.msra.mxu2 %vm702_vm0, %v557_v59  ;;  %4465 = vmatmul.msk.f32.gmra.mxu3 %vm702_vm0, %v5377_v48  ;;  %v593_v59 = vld [vmem:[%s5104_s15 + $0x658] sm:$0xff] }
  0xbd   : > { %4549 = vmatpush.xpose.msk.msra.mxu3 %vm702_vm0, %v573_v60  ;;  %v609_v60 = vld [vmem:[%s5104_s15 + $0x6d8] sm:$0xff] }
  0xbe   : > { %4478 = vmatpush.xpose.msk.msra.mxu0 %vm702_vm0, %v524_v61 }
  0xbf   : > { %4502 = vmatpush.xpose.msk.msra.mxu1 %vm702_vm0, %v540_v62 }
  0xc0   : > { %4526 = vmatpush.xpose.msk.msra.mxu2 %vm702_vm0, %v556_v63  ;;  %v625_v63 = vld [vmem:[%s5104_s15 + $0x758] sm:$0xff] }
  0xc1   : > { %4550 = vmatpush.xpose.msk.msra.mxu3 %vm702_vm0, %v572_v0  ;;  %4394 = vmatmul.msk.f32.gmra.mxu0 %vm702_vm0, %v5406_v57  ;;  %v641_v0 = vld [vmem:[%s5104_s15 + $0x7d8] sm:$0xff] }
  0xc2   : > { %4479 = vmatpush.xpose.msk.msra.mxu0 %vm702_vm0, %v523_v3  ;;  %4418 = vmatmul.msk.f32.gmra.mxu1 %vm702_vm0, %v5406_v57  ;;  %v592_v3 = vld [vmem:[%s5104_s15 + $0x650] sm:$0xff] }
  0xc3   : > { %4503 = vmatpush.xpose.msk.msra.mxu1 %vm702_vm0, %v539_v4  ;;  %4442 = vmatmul.msk.f32.gmra.mxu2 %vm702_vm0, %v5406_v57  ;;  %v608_v4 = vld [vmem:[%s5104_s15 + $0x6d0] sm:$0xff] }
  0xc4   : > { %4527 = vmatpush.xpose.msk.msra.mxu2 %vm702_vm0, %v555_v5  ;;  %4466 = vmatmul.msk.f32.gmra.mxu3 %vm702_vm0, %v5406_v57  ;;  %v624_v5 = vld [vmem:[%s5104_s15 + $0x750] sm:$0xff] }
  0xc5   : > { %4551 = vmatpush.xpose.msk.msra.mxu3 %vm702_vm0, %v571_v6  ;;  %v640_v6 = vld [vmem:[%s5104_s15 + $0x7d0] sm:$0xff] }
  0xc6   : > { %4480 = vmatpush.xpose.msk.msra.mxu0 %vm702_vm0, %v522_v7  ;;  %v2286_v7 = vld [vmem:[%s7257_s4 + $0x18] sm:$0xff] }
  0xc7   : > { %4504 = vmatpush.xpose.msk.msra.mxu1 %vm702_vm0, %v538_v8  ;;  %v591_v8 = vld [vmem:[%s5104_s15 + $0x648] sm:$0xff]  ;;  %2304 = vperm.xlu2 %4819, %v2286_v7   ;;  %v632_v7 = vld [vmem:[%s5104_s15 + $0x790] sm:$0xff] }
  0xc8   : > { %4528 = vmatpush.xpose.msk.msra.mxu2 %vm702_vm0, %v554_v9  ;;  %v607_v9 = vld [vmem:[%s5104_s15 + $0x6c8] sm:$0xff] }
  0xc9   : > { %4552 = vmatpush.xpose.msk.msra.mxu3 %vm702_vm0, %v570_v11  ;;  %4395 = vmatmul.msk.f32.gmra.mxu0 %vm702_vm0, %v5435_v2 }
  0xca   : > { %4481 = vmatpush.xpose.msk.msra.mxu0 %vm702_vm0, %v521_v15  ;;  %4419 = vmatmul.msk.f32.gmra.mxu1 %vm702_vm0, %v5435_v2 }
  0xcb   : > { %4505 = vmatpush.xpose.msk.msra.mxu1 %vm702_vm0, %v537_v16  ;;  %4443 = vmatmul.msk.f32.gmra.mxu2 %vm702_vm0, %v5435_v2 }
  0xcc   : > { %4529 = vmatpush.xpose.msk.msra.mxu2 %vm702_vm0, %v553_v17  ;;  %4467 = vmatmul.msk.f32.gmra.mxu3 %vm702_vm0, %v5435_v2  ;;  %v590_v17 = vld [vmem:[%s5104_s15 + $0x640] sm:$0xff] }
  0xcd   : > { %4553 = vmatpush.xpose.msk.msra.mxu3 %vm702_vm0, %v569_v18  ;;  %v606_v18 = vld [vmem:[%s5104_s15 + $0x6c0] sm:$0xff] }
  0xce   : > { %4482 = vmatpush.xpose.msk.msra.mxu0 %vm702_vm0, %v520_v20  ;;  %v622_v20 = vld [vmem:[%s5104_s15 + $0x740] sm:$0xff] }
  0xcf   : > { %4506 = vmatpush.xpose.msk.msra.mxu1 %vm702_vm0, %v536_v21  ;;  %v638_v21 = vld [vmem:[%s5104_s15 + $0x7c0] sm:$0xff] }
  0xd0   : > { %4530 = vmatpush.xpose.msk.msra.mxu2 %vm702_vm0, %v552_v22  ;;  %v2283_v22 = vld [vmem:[%s7257_s4] sm:$0xff] }
  0xd1   : > { %4554 = vmatpush.xpose.msk.msra.mxu3 %vm702_vm0, %v568_v23  ;;  %4396 = vmatmul.msk.f32.gmra.mxu0 %vm702_vm0, %v5464_v12  ;;  %v589_v23 = vld [vmem:[%s5104_s15 + $0x638] sm:$0xff] }
  0xd2   : > { %4483 = vmatpush.xpose.msk.msra.mxu0 %vm702_vm0, %v519_v25  ;;  %4420 = vmatmul.msk.f32.gmra.mxu1 %vm702_vm0, %v5464_v12 }
  0xd3   : > { %4507 = vmatpush.xpose.msk.msra.mxu1 %vm702_vm0, %v535_v26  ;;  %4444 = vmatmul.msk.f32.gmra.mxu2 %vm702_vm0, %v5464_v12  ;;  %v621_v26 = vld [vmem:[%s5104_s15 + $0x738] sm:$0xff] }
  0xd4   : > { %4531 = vmatpush.xpose.msk.msra.mxu2 %vm702_vm0, %v551_v27  ;;  %4468 = vmatmul.msk.f32.gmra.mxu3 %vm702_vm0, %v5464_v12  ;;  %v637_v27 = vld [vmem:[%s5104_s15 + $0x7b8] sm:$0xff] }
  0xd5   : > { %4555 = vmatpush.xpose.msk.msra.mxu3 %vm702_vm0, %v567_v29  ;;  %2289 = vperm.xlu2 %4819, %v2283_v22  }
  0xd6   : > { %4484 = vmatpush.xpose.msk.msra.mxu0 %vm702_vm0, %v518_v30  ;;  %v5703_v40 = vpop.f32.mrf.mxu0 }
  0xd7   : > { %4508 = vmatpush.xpose.msk.msra.mxu1 %vm702_vm0, %v534_v31  ;;  %v5705_v41 = vpop.f32.mrf.mxu1  ;;  %v588_v31 = vld [vmem:[%s5104_s15 + $0x630] sm:$0xff] }
  0xd8   : > { %4532 = vmatpush.xpose.msk.msra.mxu2 %vm702_vm0, %v550_v32  ;;  %v604_v32 = vld [vmem:[%s5104_s15 + $0x6b0] sm:$0xff] }
  0xd9   : > { %4556 = vmatpush.xpose.msk.msra.mxu3 %vm702_vm0, %v566_v33  ;;  %4485 = vmatmul.msk.f32.vlgmr.msra.gmra.mxu0 %vm702_vm0, %v5255_v10  ;;  %v620_v33 = vld [vmem:[%s5104_s15 + $0x730] sm:$0xff] }
  0xda   : > { %4565 = vmatpush.xpose.msk.msrb.mxu0 %vm702_vm0, %v597_v34  ;;  %4509 = vmatmul.msk.f32.vlgmr.msra.gmra.mxu1 %vm702_vm0, %v5255_v10  ;;  %v636_v34 = vld [vmem:[%s5104_s15 + $0x7b0] sm:$0xff] }
  0xdb   : > { %4589 = vmatpush.xpose.msk.msrb.mxu1 %vm702_vm0, %v613_v35  ;;  %4533 = vmatmul.msk.f32.vlgmr.msra.gmra.mxu2 %vm702_vm0, %v5255_v10  ;;  %v587_v35 = vld [vmem:[%s5104_s15 + $0x628] sm:$0xff] }
  0xdc   : > { %4613 = vmatpush.xpose.msk.msrb.mxu2 %vm702_vm0, %v629_v36  ;;  %4557 = vmatmul.msk.f32.vlgmr.msra.gmra.mxu3 %vm702_vm0, %v5255_v10  ;;  %v603_v36 = vld [vmem:[%s5104_s15 + $0x6a8] sm:$0xff] }
  0xdd   : > { %4637 = vmatpush.xpose.msk.msrb.mxu3 %vm702_vm0, %v645_v37  ;;  %v3269_v37 = vld [vmem:[%s7261_s8] sm:$0xff] }
  0xde   : > { %4566 = vmatpush.xpose.msk.msrb.mxu0 %vm702_vm0, %v596_v42  ;;  %v5727_v49 = vpop.f32.mrf.mxu2  ;;  %v5733_v10 = vpop.f32.mrf.mxu0  ;;  %v619_v42 = vld [vmem:[%s5104_s15 + $0x728] sm:$0xff]  ;;  %3272 = vperm.xlu2 %4819, %v3269_v37  }
  0xdf   : > { %4590 = vmatpush.xpose.msk.msrb.mxu1 %vm702_vm0, %v612_v43  ;;  %v5729_v50 = vpop.f32.mrf.mxu3  ;;  %v5735_v53 = vpop.f32.mrf.mxu1  ;;  %v635_v43 = vld [vmem:[%s5104_s15 + $0x7a8] sm:$0xff] }
  0xe0   : > { %4614 = vmatpush.xpose.msk.msrb.mxu2 %vm702_vm0, %v628_v44 }
  0xe1   : > { %4638 = vmatpush.xpose.msk.msrb.mxu3 %vm702_vm0, %v644_v45  ;;  %4486 = vmatmul.msk.f32.gmra.mxu0 %vm702_vm0, %v5284_v19 }
  0xe2   : > { %4567 = vmatpush.xpose.msk.msrb.mxu0 %vm702_vm0, %v595_v46  ;;  %4510 = vmatmul.msk.f32.gmra.mxu1 %vm702_vm0, %v5284_v19  ;;  %v586_v46 = vld [vmem:[%s5104_s15 + $0x620] sm:$0xff] }
  0xe3   : > { %4591 = vmatpush.xpose.msk.msrb.mxu1 %vm702_vm0, %v611_v47  ;;  %4534 = vmatmul.msk.f32.gmra.mxu2 %vm702_vm0, %v5284_v19  ;;  %v602_v47 = vld [vmem:[%s5104_s15 + $0x6a0] sm:$0xff] }
  0xe4   : > { %4615 = vmatpush.xpose.msk.msrb.mxu2 %vm702_vm0, %v627_v51  ;;  %4558 = vmatmul.msk.f32.gmra.mxu3 %vm702_vm0, %v5284_v19  ;;  %v618_v51 = vld [vmem:[%s5104_s15 + $0x720] sm:$0xff] }
  0xe5   : > { %4639 = vmatpush.xpose.msk.msrb.mxu3 %vm702_vm0, %v643_v52  ;;  %v634_v52 = vld [vmem:[%s5104_s15 + $0x7a0] sm:$0xff] }
  0xe6   : > { %4568 = vmatpush.xpose.msk.msrb.mxu0 %vm702_vm0, %v594_v54  ;;  %v5759_v61 = vpop.f32.mrf.mxu2  ;;  %v5765_v19 = vpop.f32.mrf.mxu0 }
  0xe7   : > { %4592 = vmatpush.xpose.msk.msrb.mxu1 %vm702_vm0, %v610_v55  ;;  %v5761_v62 = vpop.f32.mrf.mxu3  ;;  %v5767_v1 = vpop.f32.mrf.mxu1  ;;  %v585_v55 = vld [vmem:[%s5104_s15 + $0x618] sm:$0xff] }
  0xe8   : > { %4616 = vmatpush.xpose.msk.msrb.mxu2 %vm702_vm0, %v626_v56  ;;  %v5882_v54 = vpop.permute.xlu0 %699  ;;  %v601_v56 = vld [vmem:[%s5104_s15 + $0x698] sm:$0xff] }
  0xe9   : > { %4640 = vmatpush.xpose.msk.msrb.mxu3 %vm702_vm0, %v642_v58  ;;  %4487 = vmatmul.msk.f32.gmra.mxu0 %vm702_vm0, %v5313_v28 }
  0xea   : > { %4569 = vmatpush.xpose.msk.msrb.mxu0 %vm702_vm0, %v593_v59  ;;  %4511 = vmatmul.msk.f32.gmra.mxu1 %vm702_vm0, %v5313_v28 }
  0xeb   : > { %4593 = vmatpush.xpose.msk.msrb.mxu1 %vm702_vm0, %v609_v60  ;;  %4535 = vmatmul.msk.f32.gmra.mxu2 %vm702_vm0, %v5313_v28  ;;  %v617_v60 = vld [vmem:[%s5104_s15 + $0x718] sm:$0xff] }
  0xec   : > { %4617 = vmatpush.xpose.msk.msrb.mxu2 %vm702_vm0, %v625_v63  ;;  %4559 = vmatmul.msk.f32.gmra.mxu3 %vm702_vm0, %v5313_v28 }
  0xed   : > { %4641 = vmatpush.xpose.msk.msrb.mxu3 %vm702_vm0, %v641_v0 }
  0xee   : > { %4570 = vmatpush.xpose.msk.msrb.mxu0 %vm702_vm0, %v592_v3  ;;  %v5794_v11 = vpop.f32.mrf.mxu2  ;;  %v5800_v15 = vpop.f32.mrf.mxu0 }
  0xef   : > { %4594 = vmatpush.xpose.msk.msrb.mxu1 %vm702_vm0, %v608_v4  ;;  %v5796_v28 = vpop.f32.mrf.mxu3  ;;  %v5802_v16 = vpop.f32.mrf.mxu1  ;;  %v584_v4 = vld [vmem:[%s5104_s15 + $0x610] sm:$0xff] }
  0xf0   : > { %4618 = vmatpush.xpose.msk.msrb.mxu2 %vm702_vm0, %v624_v5  ;;  %v5902_v3 = vpop.permute.xlu1 %689  ;;  %v600_v5 = vld [vmem:[%s5104_s15 + $0x690] sm:$0xff] }
  0xf1   : > { %4642 = vmatpush.xpose.msk.msrb.mxu3 %vm702_vm0, %v640_v6  ;;  %4488 = vmatmul.msk.f32.gmra.mxu0 %vm702_vm0, %v5345_v38  ;;  %v616_v6 = vld [vmem:[%s5104_s15 + $0x710] sm:$0xff] }
  0xf2   : > { %4571 = vmatpush.xpose.msk.msrb.mxu0 %vm702_vm0, %v591_v8  ;;  %4512 = vmatmul.msk.f32.gmra.mxu1 %vm702_vm0, %v5345_v38  ;;  %v5920_v8 = vpop.permute.xlu0 %694 }
  0xf3   : > { %4595 = vmatpush.xpose.msk.msrb.mxu1 %vm702_vm0, %v607_v9  ;;  %4536 = vmatmul.msk.f32.gmra.mxu2 %vm702_vm0, %v5345_v38  ;;  %v5922_v9 = vpop.permute.xlu2 %679 }
  0xf4   : > { %4619 = vmatpush.xpose.msk.msrb.mxu2 %vm702_vm0, %v623_v13  ;;  %4560 = vmatmul.msk.f32.gmra.mxu3 %vm702_vm0, %v5345_v38  ;;  %v583_v13 = vld [vmem:[%s5104_s15 + $0x608] sm:$0xff] }
  0xf5   : > { %4643 = vmatpush.xpose.msk.msrb.mxu3 %vm702_vm0, %v639_v14  ;;  %v599_v14 = vld [vmem:[%s5104_s15 + $0x688] sm:$0xff] }
  0xf6   : > { %4572 = vmatpush.xpose.msk.msrb.mxu0 %vm702_vm0, %v590_v17  ;;  %v5829_v25 = vpop.f32.mrf.mxu2  ;;  %v5835_v29 = vpop.f32.mrf.mxu0 }
  0xf7   : > { %4596 = vmatpush.xpose.msk.msrb.mxu1 %vm702_vm0, %v606_v18  ;;  %v5831_v38 = vpop.f32.mrf.mxu3  ;;  %v5837_v30 = vpop.f32.mrf.mxu1 }
  0xf8   : > { %4620 = vmatpush.xpose.msk.msrb.mxu2 %vm702_vm0, %v622_v20  ;;  %v615_v20 = vld [vmem:[%s5104_s15 + $0x708] sm:$0xff]  ;;  %v5946_v37 = vpop.permute.xlu1 %684 }
  0xf9   : > { %4644 = vmatpush.xpose.msk.msrb.mxu3 %vm702_vm0, %v638_v21  ;;  %4489 = vmatmul.msk.f32.gmra.mxu0 %vm702_vm0, %v5377_v48 }
  0xfa   : > { %4573 = vmatpush.xpose.msk.msrb.mxu0 %vm702_vm0, %v589_v23  ;;  %4513 = vmatmul.msk.f32.gmra.mxu1 %vm702_vm0, %v5377_v48 }
  0xfb   : > { %4597 = vmatpush.xpose.msk.msrb.mxu1 %vm702_vm0, %v605_v24  ;;  %4537 = vmatmul.msk.f32.gmra.mxu2 %vm702_vm0, %v5377_v48 }
  0xfc   : > { %4621 = vmatpush.xpose.msk.msrb.mxu2 %vm702_vm0, %v621_v26  ;;  %4561 = vmatmul.msk.f32.gmra.mxu3 %vm702_vm0, %v5377_v48 }
  0xfd   : > { %4645 = vmatpush.xpose.msk.msrb.mxu3 %vm702_vm0, %v637_v27 }
  0xfe   : > { %4574 = vmatpush.xpose.msk.msrb.mxu0 %vm702_vm0, %v588_v31  ;;  %v5864_v39 = vpop.f32.mrf.mxu2  ;;  %v1527_v44 = vpop.f32.mrf.mxu0 }
  0xff   : > { %4598 = vmatpush.xpose.msk.msrb.mxu1 %vm702_vm0, %v604_v32  ;;  %v5866_v48 = vpop.f32.mrf.mxu3  ;;  %v1568_v45 = vpop.f32.mrf.mxu1  ;;  %v1528_v31 = vadd.f32 %v1527_v44, %v5902_v3  ;;  %v614_v44 = vld [vmem:[%s5104_s15 + $0x700] sm:$0xff] }
 0x100   : > { %4622 = vmatpush.xpose.msk.msrb.mxu2 %vm702_vm0, %v620_v33  ;;  %v1569_v32 = vadd.f32 %v1568_v45, %v5902_v3  ;;  %v582_v33 = vld [vmem:[%s5104_s15 + $0x600] sm:$0xff] }
 0x101   : > { %4646 = vmatpush.xpose.msk.msrb.mxu3 %vm702_vm0, %v636_v34  ;;  %4490 = vmatmul.msk.f32.gmra.mxu0 %vm702_vm0, %v5406_v57  ;;  %v598_v34 = vld [vmem:[%s5104_s15 + $0x680] sm:$0xff] }
 0x102   : > { %4575 = vmatpush.xpose.msk.msrb.mxu0 %vm702_vm0, %v587_v35  ;;  %4514 = vmatmul.msk.f32.gmra.mxu1 %vm702_vm0, %v5406_v57  ;;  %v630_v45 = vld [vmem:[%s5104_s15 + $0x780] sm:$0xff] }
 0x103   : > { %4599 = vmatpush.xpose.msk.msrb.mxu1 %vm702_vm0, %v603_v36  ;;  %4538 = vmatmul.msk.f32.gmra.mxu2 %vm702_vm0, %v5406_v57 }
 0x104   : > { %4623 = vmatpush.xpose.msk.msrb.mxu2 %vm702_vm0, %v619_v42  ;;  %4562 = vmatmul.msk.f32.gmra.mxu3 %vm702_vm0, %v5406_v57  ;;  %v633_v57 = vld [vmem:[%s5104_s15 + $0x798] sm:$0xff] }
 0x105   : > { %4647 = vmatpush.xpose.msk.msrb.mxu3 %vm702_vm0, %v635_v43 }
 0x106   : > { %4576 = vmatpush.xpose.msk.msrb.mxu0 %vm702_vm0, %v586_v46  ;;  %v5894_v58 = vpop.f32.mrf.mxu2  ;;  %v1530_v63 = vpop.f32.mrf.mxu0  ;;  %v2231_v46 = vmax.f32 %v1528_v31, 0.0 }
 0x107   : > { %4600 = vmatpush.xpose.msk.msrb.mxu1 %vm702_vm0, %v602_v47  ;;  %v5896_v59 = vpop.f32.mrf.mxu3  ;;  %v1571_v0 = vpop.f32.mrf.mxu1  ;;  %v1531_v21 = vadd.f32 %v1530_v63, %v5920_v8  ;;  %v2232_v47 = vmax.f32 %v1569_v32, 0.0 }
 0x108   : > { %4624 = vmatpush.xpose.msk.msrb.mxu2 %vm702_vm0, %v618_v51  ;;  %v1572_v22 = vadd.f32 %v1571_v0, %v5920_v8  ;;  %v1525_v51 = vadd.f32 %v5835_v29, %v5946_v37  ;;  %v1522_v29 = vadd.f32 %v5800_v15, %v5922_v9  ;;  %v5972_v0 = vpop.permute.xlu2 %674 }
 0x109   : > { %4648 = vmatpush.xpose.msk.msrb.mxu3 %vm702_vm0, %v634_v52  ;;  %4491 = vmatmul.msk.f32.gmra.mxu0 %vm702_vm0, %v5435_v2  ;;  %v2247_v42 = vmax.f32 %v1531_v21, 0.0  ;;  %v1566_v52 = vadd.f32 %v5837_v30, %v5946_v37  ;;  %v1563_v30 = vadd.f32 %v5802_v16, %v5922_v9  ;;  %v1519_v15 = vadd.f32 %v5765_v19, %v5972_v0 }
 0x10a   : > { %4577 = vmatpush.xpose.msk.msrb.mxu0 %vm702_vm0, %v585_v55  ;;  %4515 = vmatmul.msk.f32.gmra.mxu1 %vm702_vm0, %v5435_v2  ;;  %v2248_v43 = vmax.f32 %v1572_v22, 0.0  ;;  %v1560_v16 = vadd.f32 %v5767_v1, %v5972_v0  ;;  %v2199_v21 = vmax.f32 %v1522_v29, 0.0 }
 0x10b   : > { %4601 = vmatpush.xpose.msk.msrb.mxu1 %vm702_vm0, %v601_v56  ;;  %4539 = vmatmul.msk.f32.gmra.mxu2 %vm702_vm0, %v5435_v2  ;;  %v2200_v22 = vmax.f32 %v1563_v30, 0.0  ;;  %v2183_v31 = vmax.f32 %v1519_v15, 0.0  ;;  %v4919_v15 = vld [vmem:[%s7254_s1 + $0x18] sm:$0xff] }
 0x10c   : > { %4625 = vmatpush.xpose.msk.msrb.mxu2 %vm702_vm0, %v617_v60  ;;  %4563 = vmatmul.msk.f32.gmra.mxu3 %vm702_vm0, %v5435_v2  ;;  %v631_v2 = vld [vmem:[%s5104_s15 + $0x788] sm:$0xff]  ;;  %s4774_s15 = sshll.u32 %s5073_s10, 4  ;;  %s4208_s10 = sshll.u32 %s6988_s12, 4  ;;  %s4209_s10 = int_to_ptr.vmem [resolvable:$true] %s4208_s10 }
 0x10d   : > { %4649 = vmatpush.xpose.msk.msrb.mxu3 %vm702_vm0, %v633_v57  ;;  %s4206_s16 = scalar_lea.hbm %s7264_s11, %s4774_s15 }
 0x10e   : > { %4578 = vmatpush.xpose.msk.msrb.mxu0 %vm702_vm0, %v584_v4  ;;  %v1612_v17 = vpop.f32.mrf.mxu2  ;;  %v1533_v23 = vpop.f32.mrf.mxu0  ;;  %s4210_s17 = sshll.u32 %s4206_s16, 4  ;;  %s4211_s17 = int_to_ptr.hbm [resolvable:$true] %s4210_s17 }
 0x10f   : > { %4602 = vmatpush.xpose.msk.msrb.mxu1 %vm702_vm0, %v600_v5  ;;  %v1653_v18 = vpop.f32.mrf.mxu3  ;;  %v1574_v24 = vpop.f32.mrf.mxu1  ;;  %v1534_v26 = vadd.f32 %v1533_v23, %v5882_v54  ;;  %v1613_v4 = vadd.f32 %v1612_v17, %v5920_v8  ;;  %s4938_s23 = sshra.s32 %s4211_s17, 4  ;;  %s4939_s23 = int_to_ptr.hbm [resolvable:$true] %s4938_s23 }
 0x110   : > { %4626 = vmatpush.xpose.msk.msrb.mxu2 %vm702_vm0, %v616_v6  ;;  %v1575_v27 = vadd.f32 %v1574_v24, %v5882_v54  ;;  %v1654_v5 = vadd.f32 %v1653_v18, %v5920_v8  ;;  %v5985_v17 = vpop.permute.xlu0 %669  ;;  %v1610_v18 = vadd.f32 %v5894_v58, %v5902_v3  ;;  %v5997_v23 = vpop.permute.xlu1 %664  ;;  %v1607_v58 = vadd.f32 %v5864_v39, %v5946_v37  ;;  %s4940_s25 = scalar_lea.hbm %s4939_s23, 16  ;;  %p4945_p0 = scmp.lt.s32.totalorder %s4939_s23, %s7264_s11 }
 0x111   : > { %4650 = vmatpush.xpose.msk.msrb.mxu3 %vm702_vm0, %v632_v7  ;;  %v2263_v35 = vmax.f32 %v1534_v26, 0.0  ;;  %4492 = vmatmul.msk.f32.gmra.mxu0 %vm702_vm0, %v5464_v12  ;;  %v1516_v19 = vadd.f32 %v5733_v10, %v5985_v17  ;;  %v1557_v1 = vadd.f32 %v5735_v53, %v5985_v17  ;;  %v2249_v24 = vmax.f32 %v1613_v4, 0.0  ;;  %p4941_p11 = scmp.ne.s32.totalorder %s4939_s23, %s4940_s25  ;;  %p4946_p1 = scmp.lt.s32.totalorder %s4944_s13, %s4940_s25 }
 0x112   : > { %4579 = vmatpush.xpose.msk.msrb.mxu0 %vm702_vm0, %v583_v13  ;;  %v2264_v36 = vmax.f32 %v1575_v27, 0.0  ;;  %4516 = vmatmul.msk.f32.gmra.mxu1 %vm702_vm0, %v5464_v12  ;;  %v2215_v13 = vmax.f32 %v1525_v51, 0.0  ;;  %v2250_v26 = vmax.f32 %v1654_v5, 0.0  ;;  %v2184_v53 = vmax.f32 %v1560_v16, 0.0 }
 0x113   : > { %4603 = vmatpush.xpose.msk.msrb.mxu1 %vm702_vm0, %v599_v14  ;;  %4540 = vmatmul.msk.f32.gmra.mxu2 %vm702_vm0, %v5464_v12  ;;  %v2216_v14 = vmax.f32 %v1566_v52, 0.0  ;;  %v2233_v32 = vmax.f32 %v1610_v18, 0.0  ;;  %v1598_v51 = vadd.f32 %v5759_v61, %v5985_v17  ;;  %v1636_v61 = vadd.f32 %v5729_v50, %v5997_v23  ;;  %p4942_p12 = pnand %p4941_p11, %p5090_p5  ;;  %p4947_p2 = por %p4946_p1, %p4945_p0 }
 0x114   : > { %4627 = vmatpush.xpose.msk.msrb.mxu2 %vm702_vm0, %v615_v20  ;;  %4564 = vmatmul.msk.f32.gmra.mxu3 %vm702_vm0, %v5464_v12  ;;  %v4916_v20 = vld [vmem:[%s7254_s1] sm:$0xff] }
 0x115   : > { %4651 = vmatpush.xpose.msk.msrb.mxu3 %vm702_vm0, %v631_v2  ;;  %v1651_v2 = vadd.f32 %v5896_v59, %v5902_v3  ;;  %v1648_v59 = vadd.f32 %v5866_v48, %v5946_v37  ;;  %v2167_v48 = vmax.f32 %v1516_v19, 0.0  ;;  %v2169_v4 = vmax.f32 %v1598_v51, 0.0  ;;  %p4943_p13 = pneg %p4942_p12 }
 0x116   : > { %4580 = vmatpush.xpose.msk.msrb.mxu0 %vm702_vm0, %v582_v33  ;;  %v1615_v55 = vpop.f32.mrf.mxu2  ;;  %v5964_v57 = vpop.f32.mrf.mxu0 }
 0x117   : > { %4604 = vmatpush.xpose.msk.msrb.mxu1 %vm702_vm0, %v598_v34  ;;  %v1656_v56 = vpop.f32.mrf.mxu3  ;;  %v1616_v12 = vadd.f32 %v1615_v55, %v5882_v54  ;;  %v5966_v63 = vpop.f32.mrf.mxu1  ;;  %v2234_v33 = vmax.f32 %v1651_v2, 0.0  ;;  %p4948_p3 = pnand %p4947_p2, %p4943_p13 }
 0x118   : > { %4628 = vmatpush.xpose.msk.msrb.mxu2 %vm702_vm0, %v614_v44  ;;  %v1657_v60 = vadd.f32 %v1656_v56, %v5882_v54  ;;  %v1645_v44 = vadd.f32 %v5831_v38, %v5922_v9 }
 0x119   : > { %4652 = vmatpush.xpose.msk.msrb.mxu3 %vm702_vm0, %v630_v45  ;;  %v2265_v6 = vmax.f32 %v1616_v12, 0.0  ;;  %4581 = vmatmul.msk.f32.vlgmr.msrb.gmra.mxu0 %vm702_vm0, %v4916_v20  ;;  %v2217_v45 = vmax.f32 %v1607_v58, 0.0  ;;  %v1595_v12 = vadd.f32 %v5727_v49, %v5997_v23  ;;  %v4918_v49 = vld [vmem:[%s7254_s1 + $0x10] sm:$0xff] }
 0x11a   : > { %2328 = vmatpush.msra.mxu0 %v2263_v35  ;;  %v2266_v7 = vmax.f32 %v1657_v60, 0.0  ;;  %4605 = vmatmul.msk.f32.vlgmr.msrb.gmra.mxu1 %vm702_vm0, %v4916_v20  ;;  %v2168_v35 = vmax.f32 %v1557_v1, 0.0 }
 0x11b   : > { %2357 = vmatpush.msra.mxu1 %v2264_v36  ;;  %4629 = vmatmul.msk.f32.vlgmr.msrb.gmra.mxu2 %vm702_vm0, %v4916_v20  ;;  %v1513_v36 = vadd.f32 %v5703_v40, %v5997_v23  ;;  %v1642_v40 = vadd.f32 %v5796_v28, %v5972_v0  ;;  %v2202_v28 = vmax.f32 %v1645_v44, 0.0 }
 0x11c   : > { %2329 = vmatpush.msra.mxu0 %v2247_v42  ;;  %4653 = vmatmul.msk.f32.vlgmr.msrb.gmra.mxu3 %vm702_vm0, %v4916_v20  ;;  %v1554_v42 = vadd.f32 %v5705_v41, %v5997_v23  ;;  %v4917_v41 = vld [vmem:[%s7254_s1 + $0x8] sm:$0xff] }
 0x11d   : > { %2358 = vmatpush.msra.mxu1 %v2248_v43  ;;  %2386 = vmatpush.msra.mxu2 %v2265_v6  ;;  %v1604_v43 = vadd.f32 %v5829_v25, %v5922_v9  ;;  %v2151_v25 = vmax.f32 %v1513_v36, 0.0  ;;  %v2153_v6 = vmax.f32 %v1595_v12, 0.0 }
 0x11e   : > { %2330 = vmatpush.msra.mxu0 %v2231_v46  ;;  %2415 = vmatpush.msra.mxu3 %v2266_v7  ;;  %v6003_v27 = vpop.f32.mrf.mxu2  ;;  %v6007_v39 = vpop.f32.mrf.mxu0  ;;  %v2218_v46 = vmax.f32 %v1648_v59, 0.0  ;;  %v2152_v38 = vmax.f32 %v1554_v42, 0.0  ;;  %v2154_v7 = vmax.f32 %v1636_v61, 0.0 }
 0x11f   : > { %2359 = vmatpush.msra.mxu1 %v2232_v47  ;;  %v6005_v10 = vpop.f32.mrf.mxu3  ;;  %2387 = vmatpush.msra.mxu2 %v2249_v24  ;;  %v6009_v34 = vpop.f32.mrf.mxu1  ;;  %v1601_v47 = vadd.f32 %v5794_v11, %v5972_v0  ;;  %v1639_v11 = vadd.f32 %v5761_v62, %v5985_v17  ;;  %v2201_v52 = vmax.f32 %v1604_v43, 0.0  ;;  %v2186_v62 = vmax.f32 %v1642_v40, 0.0  ;;  %v4921_v24 = vld [vmem:[%s7254_s1 + $0x28] sm:$0xff] }
 0x120   : > { %2331 = vmatpush.msra.mxu0 %v2215_v13  ;;  %2416 = vmatpush.msra.mxu3 %v2250_v26 }
 0x121   : > { %2360 = vmatpush.msra.mxu1 %v2216_v14  ;;  %2388 = vmatpush.msra.mxu2 %v2233_v32  ;;  %v2185_v60 = vmax.f32 %v1601_v47, 0.0  ;;  %v2170_v5 = vmax.f32 %v1639_v11, 0.0 }
 0x122   : > { %2332 = vmatpush.msra.mxu0 %v2199_v21  ;;  %2417 = vmatpush.msra.mxu3 %v2234_v33  ;;  %v4922_v33 = vld [vmem:[%s7254_s1 + $0x30] sm:$0xff] }
 0x123   : > { %2361 = vmatpush.msra.mxu1 %v2200_v22  ;;  %2389 = vmatpush.msra.mxu2 %v2217_v45  ;;  %v4920_v22 = vld [vmem:[%s7254_s1 + $0x20] sm:$0xff] }
 0x124   : > { %2333 = vmatpush.msra.mxu0 %v2183_v31  ;;  %2418 = vmatpush.msra.mxu3 %v2218_v46 }
 0x125   : > { %2362 = vmatpush.msra.mxu1 %v2184_v53  ;;  %4582 = vmatmul.msk.f32.gmra.mxu0 %vm702_vm0, %v4917_v41 }
 0x126   : > { %2334 = vmatpush.msra.mxu0 %v2167_v48  ;;  %4606 = vmatmul.msk.f32.gmra.mxu1 %vm702_vm0, %v4917_v41  ;;  %v6034_v55 = vpop.f32.mrf.mxu2  ;;  %v6042_v29 = vpop.f32.mrf.mxu0 }
 0x127   : > { %2363 = vmatpush.msra.mxu1 %v2168_v35  ;;  %4630 = vmatmul.msk.f32.gmra.mxu2 %vm702_vm0, %v4917_v41  ;;  %v6036_v56 = vpop.f32.mrf.mxu3  ;;  %v6044_v30 = vpop.f32.mrf.mxu1 }
 0x128   : > { %4654 = vmatmul.msk.f32.gmra.mxu3 %vm702_vm0, %v4917_v41  ;;  %2335 = vmatpush.msra.mxu0 %v2151_v25 }
 0x129   : > { %2364 = vmatpush.msra.mxu1 %v2152_v38  ;;  %2390 = vmatpush.msra.mxu2 %v2201_v52  ;;  %v4923_v52 = vld [vmem:[%s7254_s1 + $0x38] sm:$0xff] }
 0x12a   : > { %2419 = vmatpush.msra.mxu3 %v2202_v28 }
 0x12b   : > { %2391 = vmatpush.msra.mxu2 %v2185_v60 }
 0x12c   : > { %2420 = vmatpush.msra.mxu3 %v2186_v62 }
 0x12d   : > { %2392 = vmatpush.msra.mxu2 %v2169_v4  ;;  %4583 = vmatmul.msk.f32.gmra.mxu0 %vm702_vm0, %v4918_v49 }
 0x12e   : > { %2421 = vmatpush.msra.mxu3 %v2170_v5  ;;  %4607 = vmatmul.msk.f32.gmra.mxu1 %vm702_vm0, %v4918_v49  ;;  %v6053_v50 = vpop.f32.mrf.mxu2  ;;  %v6057_v14 = vpop.f32.mrf.mxu0 }
 0x12f   : > { %2393 = vmatpush.msra.mxu2 %v2153_v6  ;;  %v6055_v13 = vpop.f32.mrf.mxu3  ;;  %v6059_v20 = vpop.f32.mrf.mxu1 }
 0x130   : > { %2422 = vmatpush.msra.mxu3 %v2154_v7  ;;  %4631 = vmatmul.msk.f32.gmra.mxu2 %vm702_vm0, %v4918_v49 }
 0x131   : > { %4655 = vmatmul.msk.f32.gmra.mxu3 %vm702_vm0, %v4918_v49  ;;  %v1686_v49 = vadd.f32 %v6057_v14, %v5922_v9  ;;  %v1683_v14 = vadd.f32 %v6042_v29, %v5972_v0  ;;  %v1721_v29 = vadd.f32 %v6009_v34, %v5985_v17 }
 0x135   : > { %4584 = vmatmul.msk.f32.gmra.mxu0 %vm702_vm0, %v4919_v15 }
 0x136   : > { %4608 = vmatmul.msk.f32.gmra.mxu1 %vm702_vm0, %v4919_v15  ;;  %v6068_v16 = vpop.f32.mrf.mxu2  ;;  %v1688_v2 = vpop.f32.mrf.mxu0 }
 0x137   : > { %v6070_v18 = vpop.f32.mrf.mxu3  ;;  %v1729_v21 = vpop.f32.mrf.mxu1  ;;  %v1689_v11 = vadd.f32 %v1688_v2, %v5946_v37 }
 0x138   : > { %4632 = vmatmul.msk.f32.gmra.mxu2 %vm702_vm0, %v4919_v15  ;;  %v1730_v28 = vadd.f32 %v1729_v21, %v5946_v37 }
 0x139   : > { %4656 = vmatmul.msk.f32.gmra.mxu3 %vm702_vm0, %v4919_v15  ;;  %v1727_v15 = vadd.f32 %v6059_v20, %v5922_v9  ;;  %v2219_v2 = vmax.f32 %v1689_v11, 0.0  ;;  %v1724_v20 = vadd.f32 %v6044_v30, %v5972_v0 }
 0x13a   : > { %v2220_v21 = vmax.f32 %v1730_v28, 0.0 }
 0x13b   : > { %v2204_v30 = vmax.f32 %v1727_v15, 0.0 }
 0x13d   : > { %4585 = vmatmul.msk.f32.gmra.mxu0 %vm702_vm0, %v4920_v22 }
 0x13e   : > { %4609 = vmatmul.msk.f32.gmra.mxu1 %vm702_vm0, %v4920_v22  ;;  %v6079_v19 = vpop.f32.mrf.mxu2  ;;  %v1691_v58 = vpop.f32.mrf.mxu0 }
 0x13f   : > { %v6081_v1 = vpop.f32.mrf.mxu3  ;;  %v1732_v59 = vpop.f32.mrf.mxu1  ;;  %v1692_v47 = vadd.f32 %v1691_v58, %v5902_v3 }
 0x140   : > { %4633 = vmatmul.msk.f32.gmra.mxu2 %vm702_vm0, %v4920_v22  ;;  %v1733_v40 = vadd.f32 %v1732_v59, %v5902_v3  ;;  %v6125_v59 = vld [vmem:[%s7256_s3] sm:$0xff] }
 0x141   : > { %4657 = vmatmul.msk.f32.gmra.mxu3 %vm702_vm0, %v4920_v22  ;;  %v2235_v12 = vmax.f32 %v1692_v47, 0.0  ;;  %v1677_v47 = vadd.f32 %v5964_v57, %v5997_v23  ;;  %v6170_v57 = vld [vmem:[%s7256_s3 + $0x8] sm:$0xff] }
 0x142   : > { %v2236_v61 = vmax.f32 %v1733_v40, 0.0  ;;  %v1718_v40 = vadd.f32 %v5966_v63, %v5997_v23  ;;  %v1765_v63 = vadd.f32 %v6053_v50, %v5972_v0 }
 0x144   : > { %v2156_v28 = vmax.f32 %v1718_v40, 0.0 }
 0x145   : > { %4586 = vmatmul.msk.f32.gmra.mxu0 %vm702_vm0, %v4921_v24 }
 0x146   : > { %4610 = vmatmul.msk.f32.gmra.mxu1 %vm702_vm0, %v4921_v24  ;;  %v1773_v26 = vpop.f32.mrf.mxu2  ;;  %v1694_v53 = vpop.f32.mrf.mxu0 }
 0x147   : > { %v1814_v31 = vpop.f32.mrf.mxu3  ;;  %v1735_v32 = vpop.f32.mrf.mxu1  ;;  %v1695_v36 = vadd.f32 %v1694_v53, %v5920_v8 }
 0x148   : > { %4634 = vmatmul.msk.f32.gmra.mxu2 %vm702_vm0, %v4921_v24  ;;  %v1736_v42 = vadd.f32 %v1735_v32, %v5920_v8  ;;  %v1774_v32 = vadd.f32 %v1773_v26, %v5902_v3  ;;  %v1771_v26 = vadd.f32 %v6079_v19, %v5946_v37 }
 0x149   : > { %4658 = vmatmul.msk.f32.gmra.mxu3 %vm702_vm0, %v4921_v24  ;;  %v2251_v38 = vmax.f32 %v1695_v36, 0.0 }
 0x14a   : > { %v2252_v51 = vmax.f32 %v1736_v42, 0.0  ;;  %v2221_v11 = vmax.f32 %v1771_v26, 0.0 }
 0x14d   : > { %4587 = vmatmul.msk.f32.gmra.mxu0 %vm702_vm0, %v4922_v33 }
 0x14e   : > { %4611 = vmatmul.msk.f32.gmra.mxu1 %vm702_vm0, %v4922_v33  ;;  %v1776_v48 = vpop.f32.mrf.mxu2  ;;  %v1697_v43 = vpop.f32.mrf.mxu0 }
 0x14f   : > { %v1817_v35 = vpop.f32.mrf.mxu3  ;;  %v1738_v44 = vpop.f32.mrf.mxu1  ;;  %v1698_v45 = vadd.f32 %v1697_v43, %v5882_v54  ;;  %v1777_v24 = vadd.f32 %v1776_v48, %v5920_v8  ;;  %v1680_v48 = vadd.f32 %v6007_v39, %v5985_v17  ;;  %v2187_v43 = vmax.f32 %v1683_v14, 0.0 }
 0x150   : > { %4635 = vmatmul.msk.f32.gmra.mxu2 %vm702_vm0, %v4922_v33  ;;  %v1739_v46 = vadd.f32 %v1738_v44, %v5882_v54  ;;  %v1818_v53 = vadd.f32 %v1817_v35, %v5920_v8  ;;  %v2203_v35 = vmax.f32 %v1686_v49, 0.0  ;;  %v2188_v44 = vmax.f32 %v1724_v20, 0.0  ;;  %v6220_v20 = vld [vmem:[%s7256_s3 + $0x18] sm:$0xff] }
 0x151   : > { %4659 = vmatmul.msk.f32.gmra.mxu3 %vm702_vm0, %v4922_v33  ;;  %v2267_v41 = vmax.f32 %v1698_v45, 0.0  ;;  %v1815_v33 = vadd.f32 %v1814_v31, %v5902_v3  ;;  %v1812_v31 = vadd.f32 %v6081_v1, %v5946_v37  ;;  %v2253_v36 = vmax.f32 %v1777_v24, 0.0 }
 0x152   : > { %v2268_v25 = vmax.f32 %v1739_v46, 0.0  ;;  %v2254_v42 = vmax.f32 %v1818_v53, 0.0  ;;  %v2237_v1 = vmax.f32 %v1774_v32, 0.0  ;;  %v2189_v49 = vmax.f32 %v1765_v63, 0.0 }
 0x153   : > { %2444 = vmatpush.msrb.mxu0 %v2267_v41  ;;  %v2238_v46 = vmax.f32 %v1815_v33, 0.0  ;;  %v2171_v41 = vmax.f32 %v1680_v48, 0.0 }
 0x154   : > { %2473 = vmatpush.msrb.mxu1 %v2268_v25  ;;  %v2172_v25 = vmax.f32 %v1721_v29, 0.0 }
 0x155   : > { %4588 = vmatmul.msk.f32.gmra.mxu0 %vm702_vm0, %v4923_v52 }
 0x156   : > { %4612 = vmatmul.msk.f32.gmra.mxu1 %vm702_vm0, %v4923_v52  ;;  %v1779_v60 = vpop.f32.mrf.mxu2  ;;  %2445 = vmatpush.msrb.mxu0 %v2251_v38  ;;  %v6114_v6 = vpop.f32.mrf.mxu0  ;;  %v1768_v38 = vadd.f32 %v6068_v16, %v5922_v9  ;;  %v1806_v16 = vadd.f32 %v6055_v13, %v5972_v0 }
 0x157   : > { %v1820_v62 = vpop.f32.mrf.mxu3  ;;  %v1780_v4 = vadd.f32 %v1779_v60, %v5882_v54  ;;  %2474 = vmatpush.msrb.mxu1 %v2252_v51  ;;  %v6116_v7 = vpop.f32.mrf.mxu1  ;;  %v1809_v51 = vadd.f32 %v6070_v18, %v5922_v9  ;;  %v2155_v18 = vmax.f32 %v1677_v47, 0.0 }
 0x158   : > { %4636 = vmatmul.msk.f32.gmra.mxu2 %vm702_vm0, %v4923_v52  ;;  %v1821_v5 = vadd.f32 %v1820_v62, %v5882_v54  ;;  %2446 = vmatpush.msrb.mxu0 %v2235_v12  ;;  %v1762_v12 = vadd.f32 %v6034_v55, %v5985_v17  ;;  %v2205_v50 = vmax.f32 %v1768_v38, 0.0  ;;  %v2190_v15 = vmax.f32 %v1806_v16, 0.0 }
 0x159   : > { %4660 = vmatmul.msk.f32.gmra.mxu3 %vm702_vm0, %v4923_v52  ;;  %v2269_v22 = vmax.f32 %v1780_v4, 0.0  ;;  %2475 = vmatpush.msrb.mxu1 %v2236_v61  ;;  %v2222_v52 = vmax.f32 %v1812_v31, 0.0  ;;  %v1803_v61 = vadd.f32 %v6036_v56, %v5985_v17  ;;  %v2206_v60 = vmax.f32 %v1809_v51, 0.0 }
 0x15a   : > { %v2270_v58 = vmax.f32 %v1821_v5, 0.0  ;;  %2447 = vmatpush.msrb.mxu0 %v2219_v2  ;;  %v1759_v56 = vadd.f32 %v6003_v27, %v5997_v23  ;;  %v1800_v5 = vadd.f32 %v6005_v10, %v5997_v23  ;;  %v2173_v2 = vmax.f32 %v1762_v12, 0.0 }
 0x15b   : > { %2476 = vmatpush.msrb.mxu1 %v2220_v21  ;;  %2502 = vmatpush.msrb.mxu2 %v2269_v22  ;;  %v2174_v21 = vmax.f32 %v1803_v61, 0.0  ;;  %v6203_v22 = vld [vmem:[%s7256_s3 + $0x10] sm:$0xff] }
 0x15c   : > { %2531 = vmatpush.msrb.mxu3 %v2270_v58  ;;  %2448 = vmatpush.msrb.mxu0 %v2203_v35  ;;  %v2157_v58 = vmax.f32 %v1759_v56, 0.0  ;;  %v2158_v24 = vmax.f32 %v1800_v5, 0.0 }
 0x15d   : > { %4661 = vmatmul.msk.f32.vlgmr.msra.gmra.mxu0 %vm2307_vm1, %v6125_v59  ;;  %2477 = vmatpush.msrb.mxu1 %v2204_v30 }
 0x15e   : > { %4665 = vmatmul.msk.f32.vlgmr.msra.gmra.mxu1 %vm2307_vm1, %v6125_v59  ;;  %v6151_v39 = vpop.f32.mrf.mxu2  ;;  %v6155_v19 = vpop.f32.mrf.mxu0  ;;  %2503 = vmatpush.msrb.mxu2 %v2253_v36 }
 0x15f   : > { %v6153_v34 = vpop.f32.mrf.mxu3  ;;  %v6157_v45 = vpop.f32.mrf.mxu1  ;;  %2532 = vmatpush.msrb.mxu3 %v2254_v42  ;;  %2449 = vmatpush.msrb.mxu0 %v2187_v43 }
 0x160   : > { %4669 = vmatmul.msk.f32.vlgmr.msra.gmra.mxu2 %vm2307_vm1, %v6125_v59  ;;  %2478 = vmatpush.msrb.mxu1 %v2188_v44 }
 0x161   : > { %4673 = vmatmul.msk.f32.vlgmr.msra.gmra.mxu3 %vm2307_vm1, %v6125_v59  ;;  %2504 = vmatpush.msrb.mxu2 %v2237_v1 }
 0x162   : > { %2533 = vmatpush.msrb.mxu3 %v2238_v46  ;;  %2450 = vmatpush.msrb.mxu0 %v2171_v41 }
 0x163   : > { %2479 = vmatpush.msrb.mxu1 %v2172_v25  ;;  %2505 = vmatpush.msrb.mxu2 %v2221_v11 }
 0x164   : > { %2534 = vmatpush.msrb.mxu3 %v2222_v52  ;;  %2451 = vmatpush.msrb.mxu0 %v2155_v18 }
 0x165   : > { %4662 = vmatmul.msk.f32.gmra.mxu0 %vm2307_vm1, %v6170_v57  ;;  %2480 = vmatpush.msrb.mxu1 %v2156_v28 }
 0x166   : > { %4666 = vmatmul.msk.f32.gmra.mxu1 %vm2307_vm1, %v6170_v57  ;;  %v6188_v13 = vpop.f32.mrf.mxu2  ;;  %v6192_v4 = vpop.f32.mrf.mxu0  ;;  %2506 = vmatpush.msrb.mxu2 %v2205_v50 }
 0x167   : > { %v6190_v62 = vpop.f32.mrf.mxu3  ;;  %v6194_v55 = vpop.f32.mrf.mxu1  ;;  %2535 = vmatpush.msrb.mxu3 %v2206_v60 }
 0x168   : > { %4670 = vmatmul.msk.f32.gmra.mxu2 %vm2307_vm1, %v6170_v57 }
 0x169   : > { %4674 = vmatmul.msk.f32.gmra.mxu3 %vm2307_vm1, %v6170_v57  ;;  %2507 = vmatpush.msrb.mxu2 %v2189_v49 }
 0x16a   : > { %2536 = vmatpush.msrb.mxu3 %v2190_v15 }
 0x16b   : > { %2508 = vmatpush.msrb.mxu2 %v2173_v2 }
 0x16c   : > { %2537 = vmatpush.msrb.mxu3 %v2174_v21 }
 0x16d   : > { %4663 = vmatmul.msk.f32.gmra.mxu0 %vm2307_vm1, %v6203_v22  ;;  %2509 = vmatpush.msrb.mxu2 %v2157_v58 }
 0x16e   : > { %4667 = vmatmul.msk.f32.gmra.mxu1 %vm2307_vm1, %v6203_v22  ;;  %2538 = vmatpush.msrb.mxu3 %v2158_v24  ;;  %v6209_v27 = vpop.f32.mrf.mxu2  ;;  %v1849_v53 = vpop.f32.mrf.mxu0 }
 0x16f   : > { %v6211_v10 = vpop.f32.mrf.mxu3  ;;  %v1890_v14 = vpop.f32.mrf.mxu1  ;;  %v1850_v50 = vadd.f32 %v1849_v53, %v5922_v9 }
 0x170   : > { %4671 = vmatmul.msk.f32.gmra.mxu2 %vm2307_vm1, %v6203_v22  ;;  %v1891_v60 = vadd.f32 %v1890_v14, %v5922_v9 }
 0x171   : > { %4675 = vmatmul.msk.f32.gmra.mxu3 %vm2307_vm1, %v6203_v22 }
 0x175   : > { %4664 = vmatmul.msk.f32.gmra.mxu0 %vm2307_vm1, %v6220_v20 }
 0x176   : > { %4668 = vmatmul.msk.f32.gmra.mxu1 %vm2307_vm1, %v6220_v20  ;;  %v6226_v32 = vpop.f32.mrf.mxu2  ;;  %v1852_v48 = vpop.f32.mrf.mxu0 }
 0x177   : > { %v6228_v33 = vpop.f32.mrf.mxu3  ;;  %v1893_v29 = vpop.f32.mrf.mxu1  ;;  %v1853_v18 = vadd.f32 %v1852_v48, %v5946_v37  ;;  %v1847_v48 = vadd.f32 %v6192_v4, %v5972_v0  ;;  %v2207_v4 = vmax.f32 %v1850_v50, 0.0  ;;  %v1926_v50 = vadd.f32 %v6188_v13, %v5985_v17 }
 0x178   : > { %4672 = vmatmul.msk.f32.gmra.mxu2 %vm2307_vm1, %v6220_v20  ;;  %v1894_v28 = vadd.f32 %v1893_v29, %v5946_v37  ;;  %v1888_v29 = vadd.f32 %v6194_v55, %v5972_v0 }
 0x179   : > { %4676 = vmatmul.msk.f32.gmra.mxu3 %vm2307_vm1, %v6220_v20 }
 0x17d   : > { %4677 = vmatmul.msk.f32.vlgmr.msrb.gmra.mxu0 %vm2307_vm1, %v6125_v59 }
 0x17e   : > { %4681 = vmatmul.msk.f32.vlgmr.msrb.gmra.mxu1 %vm2307_vm1, %v6125_v59  ;;  %v6238_v35 = vpop.f32.mrf.mxu2  ;;  %v1855_v26 = vpop.f32.mrf.mxu0 }
 0x17f   : > { %v6240_v30 = vpop.f32.mrf.mxu3  ;;  %v1896_v31 = vpop.f32.mrf.mxu1  ;;  %v1856_v11 = vadd.f32 %v1855_v26, %v5902_v3  ;;  %v2223_v26 = vmax.f32 %v1853_v18, 0.0  ;;  %v1935_v55 = vadd.f32 %v6238_v35, %v5946_v37  ;;  %v1932_v35 = vadd.f32 %v6226_v32, %v5922_v9 }
 0x180   : > { %4685 = vmatmul.msk.f32.vlgmr.msrb.gmra.mxu2 %vm2307_vm1, %v6125_v59  ;;  %v1897_v52 = vadd.f32 %v1896_v31, %v5902_v3  ;;  %v2224_v31 = vmax.f32 %v1894_v28, 0.0  ;;  %v1970_v32 = vadd.f32 %v6211_v10, %v5972_v0  ;;  %v1923_v10 = vadd.f32 %v6151_v39, %v5997_v23 }
 0x181   : > { %4689 = vmatmul.msk.f32.vlgmr.msrb.gmra.mxu3 %vm2307_vm1, %v6125_v59  ;;  %v2239_v56 = vmax.f32 %v1856_v11, 0.0  ;;  %v2225_v28 = vmax.f32 %v1935_v55, 0.0 }
 0x182   : > { %v2240_v5 = vmax.f32 %v1897_v52, 0.0 }
 0x185   : > { %4678 = vmatmul.msk.f32.gmra.mxu0 %vm2307_vm1, %v6170_v57 }
 0x186   : > { %4682 = vmatmul.msk.f32.gmra.mxu1 %vm2307_vm1, %v6170_v57  ;;  %v1937_v36 = vpop.f32.mrf.mxu2  ;;  %v1858_v43 = vpop.f32.mrf.mxu0 }
 0x187   : > { %v1978_v42 = vpop.f32.mrf.mxu3  ;;  %v1899_v44 = vpop.f32.mrf.mxu1  ;;  %v1859_v41 = vadd.f32 %v1858_v43, %v5920_v8  ;;  %v1938_v43 = vadd.f32 %v1937_v36, %v5902_v3  ;;  %v1976_v36 = vadd.f32 %v6240_v30, %v5946_v37  ;;  %v1973_v30 = vadd.f32 %v6228_v33, %v5922_v9 }
 0x188   : > { %4686 = vmatmul.msk.f32.gmra.mxu2 %vm2307_vm1, %v6170_v57  ;;  %v1900_v25 = vadd.f32 %v1899_v44, %v5920_v8  ;;  %v1979_v44 = vadd.f32 %v1978_v42, %v5902_v3 }
 0x189   : > { %4690 = vmatmul.msk.f32.gmra.mxu3 %vm2307_vm1, %v6170_v57  ;;  %v2255_v12 = vmax.f32 %v1859_v41, 0.0  ;;  %v2208_v41 = vmax.f32 %v1891_v60, 0.0  ;;  %v2241_v11 = vmax.f32 %v1938_v43, 0.0  ;;  %v2226_v33 = vmax.f32 %v1976_v36, 0.0 }
 0x18a   : > { %v2256_v61 = vmax.f32 %v1900_v25, 0.0  ;;  %v2242_v52 = vmax.f32 %v1979_v44, 0.0  ;;  %v1967_v60 = vadd.f32 %v6190_v62, %v5985_v17  ;;  %v2177_v62 = vmax.f32 %v1926_v50, 0.0 }
 0x18d   : > { %4679 = vmatmul.msk.f32.gmra.mxu0 %vm2307_vm1, %v6203_v22 }
 0x18e   : > { %4683 = vmatmul.msk.f32.gmra.mxu1 %vm2307_vm1, %v6203_v22  ;;  %v1940_v1 = vpop.f32.mrf.mxu2  ;;  %v1861_v47 = vpop.f32.mrf.mxu0 }
 0x18f   : > { %v1981_v46 = vpop.f32.mrf.mxu3  ;;  %v1902_v40 = vpop.f32.mrf.mxu1  ;;  %v1862_v38 = vadd.f32 %v1861_v47, %v5882_v54  ;;  %v1941_v49 = vadd.f32 %v1940_v1, %v5920_v8  ;;  %v1844_v47 = vadd.f32 %v6155_v19, %v5985_v17  ;;  %v1841_v19 = vadd.f32 %v6114_v6, %v5997_v23 }
 0x190   : > { %4687 = vmatmul.msk.f32.gmra.mxu2 %vm2307_vm1, %v6203_v22  ;;  %v1903_v51 = vadd.f32 %v1902_v40, %v5882_v54  ;;  %v1982_v21 = vadd.f32 %v1981_v46, %v5920_v8  ;;  %v1885_v40 = vadd.f32 %v6157_v45, %v5985_v17  ;;  %v1882_v45 = vadd.f32 %v6116_v7, %v5997_v23 }
 0x191   : > { %4691 = vmatmul.msk.f32.gmra.mxu3 %vm2307_vm1, %v6203_v22  ;;  %v2271_v63 = vmax.f32 %v1862_v38, 0.0  ;;  %v2257_v25 = vmax.f32 %v1941_v49, 0.0  ;;  %v2191_v38 = vmax.f32 %v1847_v48, 0.0  ;;  %v1929_v7 = vadd.f32 %v6209_v27, %v5972_v0 }
 0x192   : > { %v2272_v16 = vmax.f32 %v1903_v51, 0.0  ;;  %v2258_v42 = vmax.f32 %v1982_v21, 0.0  ;;  %v2192_v51 = vmax.f32 %v1888_v29, 0.0  ;;  %v2178_v21 = vmax.f32 %v1967_v60, 0.0 }
 0x193   : > { %2560 = vmatpush.msra.mxu0 %v2271_v63  ;;  %v2175_v63 = vmax.f32 %v1844_v47, 0.0  ;;  %v2193_v13 = vmax.f32 %v1929_v7, 0.0 }
 0x194   : > { %2589 = vmatpush.msra.mxu1 %v2272_v16  ;;  %v2176_v16 = vmax.f32 %v1885_v40, 0.0 }
 0x195   : > { %4680 = vmatmul.msk.f32.gmra.mxu0 %vm2307_vm1, %v6220_v20 }
 0x196   : > { %4684 = vmatmul.msk.f32.gmra.mxu1 %vm2307_vm1, %v6220_v20  ;;  %v1943_v15 = vpop.f32.mrf.mxu2  ;;  %2561 = vmatpush.msra.mxu0 %v2255_v12  ;;  %v6284_v53 = vpop.f32.mrf.mxu0  ;;  %v2159_v12 = vmax.f32 %v1841_v19, 0.0 }
 0x197   : > { %v1984_v2 = vpop.f32.mrf.mxu3  ;;  %2590 = vmatpush.msra.mxu1 %v2256_v61  ;;  %v1944_v58 = vadd.f32 %v1943_v15, %v5882_v54  ;;  %v6286_v14 = vpop.f32.mrf.mxu1  ;;  %v2160_v61 = vmax.f32 %v1882_v45, 0.0  ;;  %v1964_v15 = vadd.f32 %v6153_v34, %v5997_v23 }
 0x198   : > { %4688 = vmatmul.msk.f32.gmra.mxu2 %vm2307_vm1, %v6220_v20  ;;  %v1985_v24 = vadd.f32 %v1984_v2, %v5882_v54  ;;  %2562 = vmatpush.msra.mxu0 %v2239_v56  ;;  %v2209_v56 = vmax.f32 %v1932_v35, 0.0  ;;  %v2194_v2 = vmax.f32 %v1970_v32, 0.0 }
 0x199   : > { %4692 = vmatmul.msk.f32.gmra.mxu3 %vm2307_vm1, %v6220_v20  ;;  %2591 = vmatpush.msra.mxu1 %v2240_v5  ;;  %v2273_v1 = vmax.f32 %v1944_v58, 0.0  ;;  %v2210_v5 = vmax.f32 %v1973_v30, 0.0  ;;  %v2161_v58 = vmax.f32 %v1923_v10, 0.0 }
 0x19a   : > { %v2274_v46 = vmax.f32 %v1985_v24, 0.0  ;;  %2563 = vmatpush.msra.mxu0 %v2223_v26  ;;  %v2162_v24 = vmax.f32 %v1964_v15, 0.0 }
 0x19b   : > { %2592 = vmatpush.msra.mxu1 %v2224_v31  ;;  %2618 = vmatpush.msra.mxu2 %v2273_v1 }
 0x19c   : > { %2647 = vmatpush.msra.mxu3 %v2274_v46  ;;  %2564 = vmatpush.msra.mxu0 %v2207_v4 }
 0x19d   : > { %2593 = vmatpush.msra.mxu1 %v2208_v41  ;;  %2619 = vmatpush.msra.mxu2 %v2257_v25 }
 0x19e   : > { %2648 = vmatpush.msra.mxu3 %v2258_v42  ;;  %v6310_v6 = vpop.f32.mrf.mxu2  ;;  %2565 = vmatpush.msra.mxu0 %v2191_v38 }
 0x19f   : > { %v6312_v18 = vpop.f32.mrf.mxu3  ;;  %2594 = vmatpush.msra.mxu1 %v2192_v51  ;;  %2620 = vmatpush.msra.mxu2 %v2241_v11 }
 0x1a0   : > { %2649 = vmatpush.msra.mxu3 %v2242_v52  ;;  %2566 = vmatpush.msra.mxu0 %v2175_v63 }
 0x1a1   : > { %2595 = vmatpush.msra.mxu1 %v2176_v16  ;;  %2621 = vmatpush.msra.mxu2 %v2225_v28 }
 0x1a2   : > { %v6322_v27 = vpop.f32.mrf.mxu0  ;;  %2650 = vmatpush.msra.mxu3 %v2226_v33  ;;  %2567 = vmatpush.msra.mxu0 %v2159_v12 }
 0x1a3   : > { %v6324_v49 = vpop.f32.mrf.mxu1  ;;  %2596 = vmatpush.msra.mxu1 %v2160_v61  ;;  %2622 = vmatpush.msra.mxu2 %v2209_v56 }
 0x1a4   : > { %2651 = vmatpush.msra.mxu3 %v2210_v5  ;;  %4693 = vmatmul.msk.f32.vlgmr.msra.gmra.mxu0 %vm2307_vm1, %v6125_v59 }
 0x1a5   : > { %4697 = vmatmul.msk.f32.vlgmr.msra.gmra.mxu1 %vm2307_vm1, %v6125_v59  ;;  %2623 = vmatpush.msra.mxu2 %v2193_v13 }
 0x1a6   : > { %2652 = vmatpush.msra.mxu3 %v2194_v2 }
 0x1a7   : > { %2624 = vmatpush.msra.mxu2 %v2177_v62 }
 0x1a8   : > { %2653 = vmatpush.msra.mxu3 %v2178_v21 }
 0x1a9   : > { %2625 = vmatpush.msra.mxu2 %v2161_v58 }
 0x1aa   : > { %v6334_v39 = vpop.f32.mrf.mxu2  ;;  %v6338_v48 = vpop.f32.mrf.mxu0  ;;  %2654 = vmatpush.msra.mxu3 %v2162_v24  ;;  %4701 = vmatmul.msk.f32.vlgmr.msra.gmra.mxu2 %vm2307_vm1, %v6125_v59 }
 0x1ab   : > { %v6336_v34 = vpop.f32.mrf.mxu3  ;;  %v6340_v29 = vpop.f32.mrf.mxu1  ;;  %4705 = vmatmul.msk.f32.vlgmr.msra.gmra.mxu3 %vm2307_vm1, %v6125_v59 }
 0x1ac   : > { %4694 = vmatmul.msk.f32.gmra.mxu0 %vm2307_vm1, %v6170_v57 }
 0x1ad   : > { %4698 = vmatmul.msk.f32.gmra.mxu1 %vm2307_vm1, %v6170_v57 }
 0x1b2   : > { %v2013_v43 = vpop.f32.mrf.mxu0  ;;  %4702 = vmatmul.msk.f32.gmra.mxu2 %vm2307_vm1, %v6170_v57 }
 0x1b3   : > { %v6350_v26 = vpop.f32.mrf.mxu2  ;;  %v2054_v44 = vpop.f32.mrf.mxu1  ;;  %4706 = vmatmul.msk.f32.gmra.mxu3 %vm2307_vm1, %v6170_v57  ;;  %v2014_v56 = vadd.f32 %v2013_v43, %v5922_v9  ;;  %v2011_v43 = vadd.f32 %v6338_v48, %v5972_v0 }
 0x1b4   : > { %v6352_v31 = vpop.f32.mrf.mxu3  ;;  %4695 = vmatmul.msk.f32.gmra.mxu0 %vm2307_vm1, %v6203_v22  ;;  %v2055_v5 = vadd.f32 %v2054_v44, %v5922_v9  ;;  %v2052_v44 = vadd.f32 %v6340_v29, %v5972_v0 }
 0x1b5   : > { %4699 = vmatmul.msk.f32.gmra.mxu1 %vm2307_vm1, %v6203_v22  ;;  %v2211_v48 = vmax.f32 %v2014_v56, 0.0 }
 0x1ba   : > { %v2016_v47 = vpop.f32.mrf.mxu0  ;;  %4703 = vmatmul.msk.f32.gmra.mxu2 %vm2307_vm1, %v6203_v22 }
 0x1bb   : > { %v6362_v1 = vpop.f32.mrf.mxu2  ;;  %v2057_v40 = vpop.f32.mrf.mxu1  ;;  %4707 = vmatmul.msk.f32.gmra.mxu3 %vm2307_vm1, %v6203_v22  ;;  %v2017_v12 = vadd.f32 %v2016_v47, %v5946_v37 }
 0x1bc   : > { %v6364_v46 = vpop.f32.mrf.mxu3  ;;  %4696 = vmatmul.msk.f32.gmra.mxu0 %vm2307_vm1, %v6220_v20  ;;  %v2058_v61 = vadd.f32 %v2057_v40, %v5946_v37 }
 0x1bd   : > { %4700 = vmatmul.msk.f32.gmra.mxu1 %vm2307_vm1, %v6220_v20 }
 0x1c2   : > { %v2019_v55 = vpop.f32.mrf.mxu0  ;;  %4704 = vmatmul.msk.f32.gmra.mxu2 %vm2307_vm1, %v6220_v20 }
 0x1c3   : > { %v2098_v4 = vpop.f32.mrf.mxu2  ;;  %v2060_v36 = vpop.f32.mrf.mxu1  ;;  %4708 = vmatmul.msk.f32.gmra.mxu3 %vm2307_vm1, %v6220_v20  ;;  %v2020_v7 = vadd.f32 %v2019_v55, %v5902_v3  ;;  %v2227_v55 = vmax.f32 %v2017_v12, 0.0 }
 0x1c4   : > { %v2139_v41 = vpop.f32.mrf.mxu3  ;;  %v2061_v32 = vadd.f32 %v2060_v36, %v5902_v3  ;;  %v2228_v36 = vmax.f32 %v2058_v61, 0.0  ;;  %v2099_v29 = vadd.f32 %v2098_v4, %v5946_v37  ;;  %v2090_v61 = vadd.f32 %v6334_v39, %v5985_v17 }
 0x1c5   : > { %v2243_v10 = vmax.f32 %v2020_v7, 0.0 }
 0x1c6   : > { %v2244_v15 = vmax.f32 %v2061_v32, 0.0  ;;  %v2229_v32 = vmax.f32 %v2099_v29, 0.0 }
 0x1ca   : > { %v2022_v19 = vpop.f32.mrf.mxu0 }
 0x1cb   : > { %v2101_v25 = vpop.f32.mrf.mxu2  ;;  %v2063_v45 = vpop.f32.mrf.mxu1  ;;  %v2023_v11 = vadd.f32 %v2022_v19, %v5920_v8 }
 0x1cc   : > { %v2142_v42 = vpop.f32.mrf.mxu3  ;;  %v2064_v52 = vadd.f32 %v2063_v45, %v5920_v8 }
 0x1cd   : > { %v2259_v50 = vmax.f32 %v2023_v11, 0.0  ;;  %v2143_v19 = vadd.f32 %v2142_v42, %v5902_v3  ;;  %v2195_v42 = vmax.f32 %v2011_v43, 0.0 }
 0x1ce   : > { %v2260_v60 = vmax.f32 %v2064_v52, 0.0  ;;  %v2096_v52 = vadd.f32 %v6362_v1, %v5922_v9  ;;  %v2134_v1 = vadd.f32 %v6352_v31, %v5972_v0  ;;  %v2128_v31 = vadd.f32 %v6312_v18, %v5997_v23 }
 0x1d2   : > { %v2025_v35 = vpop.f32.mrf.mxu0 }
 0x1d3   : > { %v2104_v38 = vpop.f32.mrf.mxu2  ;;  %v2066_v30 = vpop.f32.mrf.mxu1  ;;  %v2026_v63 = vadd.f32 %v2025_v35, %v5882_v54  ;;  %v2212_v35 = vmax.f32 %v2055_v5, 0.0  ;;  %v2198_v5 = vmax.f32 %v2134_v1, 0.0 }
 0x1d4   : > { %v2145_v51 = vpop.f32.mrf.mxu3  ;;  %v2067_v16 = vadd.f32 %v2066_v30, %v5882_v54  ;;  %v2105_v62 = vadd.f32 %v2104_v38, %v5920_v8  ;;  %v2008_v38 = vadd.f32 %v6322_v27, %v5985_v17  ;;  %v2140_v30 = vadd.f32 %v2139_v41, %v5946_v37 }
 0x1d5   : > { %v2275_v28 = vmax.f32 %v2026_v63, 0.0  ;;  %v2146_v21 = vadd.f32 %v2145_v51, %v5920_v8  ;;  %v2102_v8 = vadd.f32 %v2101_v25, %v5902_v3  ;;  %v2049_v51 = vadd.f32 %v6324_v49, %v5985_v17 }
 0x1d6   : > { %v2276_v33 = vmax.f32 %v2067_v16, 0.0  ;;  %v2261_v11 = vmax.f32 %v2105_v62, 0.0  ;;  %v2005_v3 = vadd.f32 %v6284_v53, %v5997_v23  ;;  %v2046_v27 = vadd.f32 %v6286_v14, %v5997_v23 }
 0x1d7   : > { %2676 = vmatpush.msrb.mxu0 %v2275_v28  ;;  %v2262_v25 = vmax.f32 %v2146_v21, 0.0  ;;  %v2196_v49 = vmax.f32 %v2052_v44, 0.0  ;;  %v2137_v37 = vadd.f32 %v6364_v46, %v5922_v9  ;;  %v2245_v4 = vmax.f32 %v2102_v8, 0.0 }
 0x1d8   : > { %2705 = vmatpush.msrb.mxu1 %v2276_v33  ;;  %v2246_v41 = vmax.f32 %v2143_v19, 0.0  ;;  %v2179_v63 = vmax.f32 %v2008_v38, 0.0  ;;  %v2180_v16 = vmax.f32 %v2049_v51, 0.0  ;;  %v2093_v14 = vadd.f32 %v6350_v26, %v5972_v0 }
 0x1d9   : > { %2677 = vmatpush.msrb.mxu0 %v2259_v50  ;;  %v2230_v9 = vmax.f32 %v2140_v30, 0.0  ;;  %v2163_v33 = vmax.f32 %v2005_v3, 0.0  ;;  %v2164_v12 = vmax.f32 %v2046_v27, 0.0  ;;  %v2131_v50 = vadd.f32 %v6336_v34, %v5985_v17 }
 0x1da   : > { %2706 = vmatpush.msrb.mxu1 %v2260_v60  ;;  %v6392_v47 = vpop.f32.mrf.mxu0  ;;  %v2213_v26 = vmax.f32 %v2096_v52, 0.0  ;;  %v2214_v60 = vmax.f32 %v2137_v37, 0.0  ;;  %v2087_v0 = vadd.f32 %v6310_v6, %v5997_v23  ;;  %v2197_v56 = vmax.f32 %v2093_v14, 0.0 }
 0x1db   : > { %v2107_v13 = vpop.f32.mrf.mxu2  ;;  %v6394_v40 = vpop.f32.mrf.mxu1  ;;  %2678 = vmatpush.msrb.mxu0 %v2243_v10  ;;  %v2181_v17 = vmax.f32 %v2090_v61, 0.0  ;;  %v2182_v39 = vmax.f32 %v2131_v50, 0.0  ;;  %v6499_v50 = vld [vmem:[%s7258_s5] sm:$0xff] }
 0x1dc   : > { %v2148_v2 = vpop.f32.mrf.mxu3  ;;  %v2108_v58 = vadd.f32 %v2107_v13, %v5882_v54  ;;  %2707 = vmatpush.msrb.mxu1 %v2244_v15  ;;  %v2165_v6 = vmax.f32 %v2087_v0, 0.0  ;;  %v2166_v15 = vmax.f32 %v2128_v31, 0.0  ;;  %v6436_v13 = vpop.permute.xlu2 %2304 }
 0x1dd   : > { %v2149_v24 = vadd.f32 %v2148_v2, %v5882_v54  ;;  %2679 = vmatpush.msrb.mxu0 %v2227_v55  ;;  %v6446_v2 = vpop.permute.xlu0 %2299 }
 0x1de   : > { %v2277_v45 = vmax.f32 %v2108_v58, 0.0  ;;  %2708 = vmatpush.msrb.mxu1 %v2228_v36  ;;  %v6452_v36 = vpop.permute.xlu1 %2294 }
 0x1df   : > { %v2278_v54 = vmax.f32 %v2149_v24, 0.0  ;;  %2680 = vmatpush.msrb.mxu0 %v2211_v48 }
 0x1e0   : > { %2734 = vmatpush.msrb.mxu2 %v2277_v45  ;;  %2709 = vmatpush.msrb.mxu1 %v2212_v35 }
 0x1e1   : > { %2763 = vmatpush.msrb.mxu3 %v2278_v54  ;;  %2681 = vmatpush.msrb.mxu0 %v2195_v42 }
 0x1e2   : > { %2735 = vmatpush.msrb.mxu2 %v2261_v11  ;;  %2710 = vmatpush.msrb.mxu1 %v2196_v49  ;;  %v2340_v46 = vpop.f32.mrf.mxu0 }
 0x1e3   : > { %2764 = vmatpush.msrb.mxu3 %v2262_v25  ;;  %v6416_v53 = vpop.f32.mrf.mxu2  ;;  %v2369_v28 = vpop.f32.mrf.mxu1  ;;  %2682 = vmatpush.msrb.mxu0 %v2179_v63  ;;  %v2341_v8 = vadd.f32 %v2340_v46, %v6452_v36 }
 0x1e4   : > { %v6418_v7 = vpop.f32.mrf.mxu3  ;;  %2736 = vmatpush.msrb.mxu2 %v2245_v4  ;;  %2711 = vmatpush.msrb.mxu1 %v2180_v16  ;;  %v2370_v19 = vadd.f32 %v2369_v28, %v6452_v36  ;;  %v6460_v38 = vpop.permute.xlu2 %2289 }
 0x1e5   : > { %2765 = vmatpush.msrb.mxu3 %v2246_v41  ;;  %2683 = vmatpush.msrb.mxu0 %v2163_v33  ;;  %v2338_v51 = vadd.f32 %v6392_v47, %v6460_v38  ;;  %v2800_v29 = vmax.f32 %v2341_v8, 0.0  ;;  %v2396_v14 = vadd.f32 %v6416_v53, %v6460_v38  ;;  %v2425_v1 = vadd.f32 %v6418_v7, %v6460_v38 }
 0x1e6   : > { %2737 = vmatpush.msrb.mxu2 %v2229_v32  ;;  %2712 = vmatpush.msrb.mxu1 %v2164_v12  ;;  %v2801_v30 = vmax.f32 %v2370_v19, 0.0 }
 0x1e7   : > { %2766 = vmatpush.msrb.mxu3 %v2230_v9  ;;  %4709 = vmatmul.msk.f32.vlgmr.msrb.gmra.mxu0 %vm2307_vm1, %v6125_v59  ;;  %v2784_v52 = vmax.f32 %v2338_v51, 0.0  ;;  %v2786_v33 = vmax.f32 %v2396_v14, 0.0  ;;  %v2787_v7 = vmax.f32 %v2425_v1, 0.0 }
 0x1e8   : > { %2738 = vmatpush.msrb.mxu2 %v2213_v26  ;;  %4713 = vmatmul.msk.f32.vlgmr.msrb.gmra.mxu1 %vm2307_vm1, %v6125_v59 }
 0x1e9   : > { %2767 = vmatpush.msrb.mxu3 %v2214_v60 }
 0x1ea   : > { %2739 = vmatpush.msrb.mxu2 %v2197_v56  ;;  %v2343_v23 = vpop.f32.mrf.mxu0  ;;  %v6512_v56 = vld [vmem:[%s7258_s5 + $0x8] sm:$0xff] }
 0x1eb   : > { %2768 = vmatpush.msrb.mxu3 %v2198_v5  ;;  %v2398_v34 = vpop.f32.mrf.mxu2  ;;  %v2372_v18 = vpop.f32.mrf.mxu1  ;;  %v2344_v43 = vadd.f32 %v2343_v23, %v6446_v2 }
 0x1ec   : > { %v2427_v10 = vpop.f32.mrf.mxu3  ;;  %2740 = vmatpush.msrb.mxu2 %v2181_v17  ;;  %v2373_v44 = vadd.f32 %v2372_v18, %v6446_v2  ;;  %v2399_v4 = vadd.f32 %v2398_v34, %v6452_v36 }
 0x1ed   : > { %2769 = vmatpush.msrb.mxu3 %v2182_v39  ;;  %v2816_v48 = vmax.f32 %v2344_v43, 0.0  ;;  %v2428_v41 = vadd.f32 %v2427_v10, %v6452_v36 }
 0x1ee   : > { %2741 = vmatpush.msrb.mxu2 %v2165_v6  ;;  %v2817_v35 = vmax.f32 %v2373_v44, 0.0  ;;  %v2802_v46 = vmax.f32 %v2399_v4, 0.0 }
 0x1ef   : > { %2770 = vmatpush.msrb.mxu3 %v2166_v15  ;;  %4717 = vmatmul.msk.f32.vlgmr.msrb.gmra.mxu2 %vm2307_vm1, %v6125_v59 }
 0x1f0   : > { %4721 = vmatmul.msk.f32.vlgmr.msrb.gmra.mxu3 %vm2307_vm1, %v6125_v59  ;;  %4710 = vmatmul.msk.f32.gmra.mxu0 %vm2307_vm1, %v6170_v57 }
 0x1f1   : > { %4714 = vmatmul.msk.f32.gmra.mxu1 %vm2307_vm1, %v6170_v57 }
 0x1f2   : > { %v2346_v58 = vpop.f32.mrf.mxu0 }
 0x1f3   : > { %v2401_v62 = vpop.f32.mrf.mxu2  ;;  %v2375_v24 = vpop.f32.mrf.mxu1  ;;  %v2347_v55 = vadd.f32 %v2346_v58, %v6436_v13 }
 0x1f4   : > { %v2430_v21 = vpop.f32.mrf.mxu3  ;;  %v2376_v59 = vadd.f32 %v2375_v24, %v6436_v13  ;;  %v2402_v3 = vadd.f32 %v2401_v62, %v6446_v2 }
 0x1f5   : > { %v2832_v45 = vmax.f32 %v2347_v55, 0.0  ;;  %v2431_v27 = vadd.f32 %v2430_v21, %v6446_v2 }
 0x1f6   : > { %v2833_v54 = vmax.f32 %v2376_v59, 0.0  ;;  %v2818_v32 = vmax.f32 %v2402_v3, 0.0 }
 0x1f7   : > { %4718 = vmatmul.msk.f32.gmra.mxu2 %vm2307_vm1, %v6170_v57  ;;  %2880 = vmatpush.msra.mxu0 %v2832_v45  ;;  %v2819_v9 = vmax.f32 %v2431_v27, 0.0 }
 0x1f8   : > { %4722 = vmatmul.msk.f32.gmra.mxu3 %vm2307_vm1, %v6170_v57  ;;  %4711 = vmatmul.msk.f32.gmra.mxu0 %vm2307_vm1, %v6203_v22  ;;  %v2367_v57 = vadd.f32 %v6394_v40, %v6460_v38 }
 0x1f9   : > { %4715 = vmatmul.msk.f32.gmra.mxu1 %vm2307_vm1, %v6203_v22  ;;  %2881 = vmatpush.msra.mxu0 %v2816_v48 }
 0x1fa   : > { %2903 = vmatpush.msra.mxu1 %v2833_v54  ;;  %v6474_v49 = vpop.f32.mrf.mxu0  ;;  %v2785_v37 = vmax.f32 %v2367_v57, 0.0 }
 0x1fb   : > { %v2404_v11 = vpop.f32.mrf.mxu2  ;;  %v6476_v40 = vpop.f32.mrf.mxu1  ;;  %2882 = vmatpush.msra.mxu0 %v2800_v29  ;;  %v2454_v58 = vadd.f32 %v6474_v49, %v6460_v38 }
 0x1fc   : > { %v2433_v25 = vpop.f32.mrf.mxu3  ;;  %2904 = vmatpush.msra.mxu1 %v2817_v35  ;;  %v2405_v42 = vadd.f32 %v2404_v11, %v6436_v13  ;;  %v2483_v24 = vadd.f32 %v6476_v40, %v6460_v38 }
 0x1fd   : > { %v2434_v47 = vadd.f32 %v2433_v25, %v6436_v13  ;;  %2883 = vmatpush.msra.mxu0 %v2784_v52  ;;  %v2788_v48 = vmax.f32 %v2454_v58, 0.0 }
 0x1fe   : > { %2905 = vmatpush.msra.mxu1 %v2801_v30  ;;  %v2834_v63 = vmax.f32 %v2405_v42, 0.0  ;;  %v2789_v35 = vmax.f32 %v2483_v24, 0.0 }
 0x1ff   : > { %v2835_v16 = vmax.f32 %v2434_v47, 0.0  ;;  %4719 = vmatmul.msk.f32.gmra.mxu2 %vm2307_vm1, %v6203_v22 }
 0x200   : > { %4723 = vmatmul.msk.f32.gmra.mxu3 %vm2307_vm1, %v6203_v22  ;;  %2906 = vmatpush.msra.mxu1 %v2785_v37  ;;  %v2803_v22 = vmax.f32 %v2428_v41, 0.0 }
 0x201   : > { %2926 = vmatpush.msra.mxu2 %v2834_v63  ;;  %2949 = vmatpush.msra.mxu3 %v2835_v16 }
 0x202   : > { %4712 = vmatmul.msk.f32.gmra.mxu0 %vm2307_vm1, %v6220_v20  ;;  %4716 = vmatmul.msk.f32.gmra.mxu1 %vm2307_vm1, %v6220_v20  ;;  %v2456_v12 = vpop.f32.mrf.mxu0 }
 0x203   : > { %2927 = vmatpush.msra.mxu2 %v2818_v32  ;;  %2950 = vmatpush.msra.mxu3 %v2819_v9  ;;  %v6492_v28 = vpop.f32.mrf.mxu2  ;;  %v2485_v61 = vpop.f32.mrf.mxu1  ;;  %v2457_v23 = vadd.f32 %v2456_v12, %v6452_v36 }
 0x204   : > { %v6494_v53 = vpop.f32.mrf.mxu3  ;;  %v2486_v18 = vadd.f32 %v2485_v61, %v6452_v36  ;;  %v2512_v3 = vadd.f32 %v6492_v28, %v6460_v38 }
 0x205   : > { %2928 = vmatpush.msra.mxu2 %v2802_v46  ;;  %2951 = vmatpush.msra.mxu3 %v2803_v22  ;;  %v2804_v55 = vmax.f32 %v2457_v23, 0.0  ;;  %v2541_v27 = vadd.f32 %v6494_v53, %v6460_v38 }
 0x206   : > { %v2805_v59 = vmax.f32 %v2486_v18, 0.0  ;;  %v2790_v4 = vmax.f32 %v2512_v3, 0.0 }
 0x207   : > { %2929 = vmatpush.msra.mxu2 %v2786_v33  ;;  %2952 = vmatpush.msra.mxu3 %v2787_v7  ;;  %v2791_v41 = vmax.f32 %v2541_v27, 0.0 }
 0x208   : > { %4720 = vmatmul.msk.f32.gmra.mxu2 %vm2307_vm1, %v6220_v20  ;;  %4724 = vmatmul.msk.f32.gmra.mxu3 %vm2307_vm1, %v6220_v20 }
 0x20a   : > { %4725 = vmatmul.msk.f32.vlgmr.msra.gmra.mxu0 %vm702_vm0, %v6499_v50  ;;  %4727 = vmatmul.msk.f32.vlgmr.msra.gmra.mxu1 %vm702_vm0, %v6499_v50  ;;  %v2459_v0 = vpop.f32.mrf.mxu0 }
 0x20b   : > { %v2514_v26 = vpop.f32.mrf.mxu2  ;;  %v2488_v31 = vpop.f32.mrf.mxu1  ;;  %v2460_v34 = vadd.f32 %v2459_v0, %v6446_v2 }
 0x20c   : > { %v2543_v60 = vpop.f32.mrf.mxu3  ;;  %v2489_v10 = vadd.f32 %v2488_v31, %v6446_v2  ;;  %v2515_v29 = vadd.f32 %v2514_v26, %v6452_v36 }
 0x20d   : > { %v2820_v43 = vmax.f32 %v2460_v34, 0.0  ;;  %v2544_v30 = vadd.f32 %v2543_v60, %v6452_v36 }
 0x20e   : > { %v2821_v44 = vmax.f32 %v2489_v10, 0.0  ;;  %v2806_v49 = vmax.f32 %v2515_v29, 0.0 }
 0x20f   : > { %v2807_v40 = vmax.f32 %v2544_v30, 0.0 }
 0x210   : > { %4729 = vmatmul.msk.f32.vlgmr.msra.gmra.mxu2 %vm702_vm0, %v6499_v50  ;;  %4731 = vmatmul.msk.f32.vlgmr.msra.gmra.mxu3 %vm702_vm0, %v6499_v50 }
 0x212   : > { %4726 = vmatmul.msk.f32.gmra.mxu0 %vm702_vm0, %v6512_v56  ;;  %4728 = vmatmul.msk.f32.gmra.mxu1 %vm702_vm0, %v6512_v56  ;;  %v2462_v17 = vpop.f32.mrf.mxu0 }
 0x213   : > { %v2517_v20 = vpop.f32.mrf.mxu2  ;;  %v2491_v39 = vpop.f32.mrf.mxu1  ;;  %v2463_v6 = vadd.f32 %v2462_v17, %v6436_v13 }
 0x214   : > { %v2546_v5 = vpop.f32.mrf.mxu3  ;;  %v2492_v15 = vadd.f32 %v2491_v39, %v6436_v13  ;;  %v2518_v45 = vadd.f32 %v2517_v20, %v6446_v2 }
 0x215   : > { %v2836_v62 = vmax.f32 %v2463_v6, 0.0  ;;  %v2547_v54 = vadd.f32 %v2546_v5, %v6446_v2 }
 0x216   : > { %v2837_v21 = vmax.f32 %v2492_v15, 0.0  ;;  %v2822_v42 = vmax.f32 %v2518_v45, 0.0 }
 0x217   : > { %2972 = vmatpush.msrb.mxu0 %v2836_v62  ;;  %v2823_v47 = vmax.f32 %v2547_v54, 0.0 }
 0x218   : > { %4730 = vmatmul.msk.f32.gmra.mxu2 %vm702_vm0, %v6512_v56  ;;  %4732 = vmatmul.msk.f32.gmra.mxu3 %vm702_vm0, %v6512_v56 }
 0x219   : > { %2995 = vmatpush.msrb.mxu1 %v2837_v21  ;;  %2973 = vmatpush.msrb.mxu0 %v2820_v43 }
 0x21b   : > { %v2520_v8 = vpop.f32.mrf.mxu2  ;;  %2996 = vmatpush.msrb.mxu1 %v2821_v44  ;;  %2974 = vmatpush.msrb.mxu0 %v2804_v55 }
 0x21c   : > { %v2549_v19 = vpop.f32.mrf.mxu3  ;;  %v2521_v51 = vadd.f32 %v2520_v8, %v6436_v13 }
 0x21d   : > { %v2550_v57 = vadd.f32 %v2549_v19, %v6436_v13  ;;  %2997 = vmatpush.msrb.mxu1 %v2805_v59  ;;  %2975 = vmatpush.msrb.mxu0 %v2788_v48 }
 0x21e   : > { %v2838_v11 = vmax.f32 %v2521_v51, 0.0  ;;  %4733 = vmatmul.msk.f32.vlgmr.msrb.gmra.mxu0 %vm702_vm0, %v6499_v50 }
 0x21f   : > { %v2839_v25 = vmax.f32 %v2550_v57, 0.0  ;;  %2998 = vmatpush.msrb.mxu1 %v2789_v35 }
 0x220   : > { %3018 = vmatpush.msrb.mxu2 %v2838_v11  ;;  %4735 = vmatmul.msk.f32.vlgmr.msrb.gmra.mxu1 %vm702_vm0, %v6499_v50 }
 0x221   : > { %3041 = vmatpush.msrb.mxu3 %v2839_v25  ;;  %v2569_v52 = vpop.f32.mrf.mxu0 }
 0x222   : > { %3019 = vmatpush.msrb.mxu2 %v2822_v42  ;;  %v2598_v37 = vpop.f32.mrf.mxu1  ;;  %v2570_v17 = vadd.f32 %v2569_v52, %v6460_v38 }
 0x223   : > { %3042 = vmatpush.msrb.mxu3 %v2823_v47  ;;  %v2599_v39 = vadd.f32 %v2598_v37, %v6460_v38 }
 0x224   : > { %3020 = vmatpush.msrb.mxu2 %v2806_v49  ;;  %v2792_v23 = vmax.f32 %v2570_v17, 0.0 }
 0x225   : > { %3043 = vmatpush.msrb.mxu3 %v2807_v40  ;;  %v2793_v18 = vmax.f32 %v2599_v39, 0.0 }
 0x226   : > { %3021 = vmatpush.msrb.mxu2 %v2790_v4  ;;  %4734 = vmatmul.msk.f32.gmra.mxu0 %vm702_vm0, %v6512_v56 }
 0x227   : > { %3044 = vmatpush.msrb.mxu3 %v2791_v41  ;;  %4737 = vmatmul.msk.f32.vlgmr.msrb.gmra.mxu2 %vm702_vm0, %v6499_v50 }
 0x228   : > { %4739 = vmatmul.msk.f32.vlgmr.msrb.gmra.mxu3 %vm702_vm0, %v6499_v50  ;;  %4736 = vmatmul.msk.f32.gmra.mxu1 %vm702_vm0, %v6512_v56 }
 0x229   : > { %v2572_v63 = vpop.f32.mrf.mxu0 }
 0x22a   : > { %v2601_v16 = vpop.f32.mrf.mxu1  ;;  %v2573_v26 = vadd.f32 %v2572_v63, %v6452_v36 }
 0x22b   : > { %v2602_v60 = vadd.f32 %v2601_v16, %v6452_v36 }
 0x22c   : > { %v2808_v6 = vmax.f32 %v2573_v26, 0.0 }
 0x22d   : > { %v2627_v14 = vpop.f32.mrf.mxu2  ;;  %v2809_v15 = vmax.f32 %v2602_v60, 0.0 }
 0x22e   : > { %v2656_v1 = vpop.f32.mrf.mxu3  ;;  %v2628_v45 = vadd.f32 %v2627_v14, %v6460_v38 }
 0x22f   : > { %4738 = vmatmul.msk.f32.gmra.mxu2 %vm702_vm0, %v6512_v56  ;;  %v2657_v54 = vadd.f32 %v2656_v1, %v6460_v38 }
 0x230   : > { %4740 = vmatmul.msk.f32.gmra.mxu3 %vm702_vm0, %v6512_v56  ;;  %v2794_v29 = vmax.f32 %v2628_v45, 0.0 }
 0x231   : > { %v2575_v32 = vpop.f32.mrf.mxu0  ;;  %v2795_v30 = vmax.f32 %v2657_v54, 0.0 }
 0x232   : > { %v2604_v9 = vpop.f32.mrf.mxu1  ;;  %v2576_v33 = vadd.f32 %v2575_v32, %v6446_v2 }
 0x233   : > { %v2605_v7 = vadd.f32 %v2604_v9, %v6446_v2 }
 0x234   : > { %v2824_v34 = vmax.f32 %v2576_v33, 0.0 }
 0x235   : > { %v2630_v46 = vpop.f32.mrf.mxu2  ;;  %v2825_v10 = vmax.f32 %v2605_v7, 0.0 }
 0x236   : > { %v2659_v22 = vpop.f32.mrf.mxu3  ;;  %v2631_v55 = vadd.f32 %v2630_v46, %v6452_v36 }
 0x237   : > { %v2660_v59 = vadd.f32 %v2659_v22, %v6452_v36 }
 0x238   : > { %v2810_v48 = vmax.f32 %v2631_v55, 0.0 }
 0x239   : > { %v2578_v28 = vpop.f32.mrf.mxu0  ;;  %v2811_v35 = vmax.f32 %v2660_v59, 0.0  ;;  %v6616_v59 = vpop.permute.xlu1 %2854 }
 0x23a   : > { %v2607_v53 = vpop.f32.mrf.mxu1  ;;  %v2579_v12 = vadd.f32 %v2578_v28, %v6436_v13 }
 0x23b   : > { %v2608_v61 = vadd.f32 %v2607_v53, %v6436_v13 }
 0x23c   : > { %v2840_v0 = vmax.f32 %v2579_v12, 0.0 }
 0x23d   : > { %v2841_v31 = vmax.f32 %v2608_v61, 0.0  ;;  %v2633_v20 = vpop.f32.mrf.mxu2 }
 0x23e   : > { %v2662_v5 = vpop.f32.mrf.mxu3  ;;  %3064 = vmatpush.msra.mxu0 %v2840_v0  ;;  %v2634_v58 = vadd.f32 %v2633_v20, %v6446_v2 }
 0x23f   : > { %3087 = vmatpush.msra.mxu1 %v2841_v31  ;;  %v2663_v24 = vadd.f32 %v2662_v5, %v6446_v2 }
 0x240   : > { %3065 = vmatpush.msra.mxu0 %v2824_v34  ;;  %v2826_v51 = vmax.f32 %v2634_v58, 0.0 }
 0x241   : > { %3088 = vmatpush.msra.mxu1 %v2825_v10  ;;  %v2827_v57 = vmax.f32 %v2663_v24, 0.0 }
 0x242   : > { %3066 = vmatpush.msra.mxu0 %v2808_v6 }
 0x243   : > { %3089 = vmatpush.msra.mxu1 %v2809_v15 }
 0x244   : > { %3067 = vmatpush.msra.mxu0 %v2792_v23  ;;  %v6610_v23 = vpop.permute.xlu0 %2859 }
 0x245   : > { %3090 = vmatpush.msra.mxu1 %v2793_v18  ;;  %v2636_v62 = vpop.f32.mrf.mxu2  ;;  %4741 = vmatmul.msk.f32.vlgmr.msra.gmra.mxu0 %vm702_vm0, %v6499_v50 }
 0x246   : > { %v2665_v21 = vpop.f32.mrf.mxu3  ;;  %4743 = vmatmul.msk.f32.vlgmr.msra.gmra.mxu1 %vm702_vm0, %v6499_v50  ;;  %v2637_v43 = vadd.f32 %v2636_v62, %v6436_v13 }
 0x247   : > { %v2666_v44 = vadd.f32 %v2665_v21, %v6436_v13 }
 0x248   : > { %v2842_v8 = vmax.f32 %v2637_v43, 0.0 }
 0x249   : > { %v2843_v19 = vmax.f32 %v2666_v44, 0.0 }
 0x24a   : > { %3110 = vmatpush.msra.mxu2 %v2842_v8 }
 0x24b   : > { %3133 = vmatpush.msra.mxu3 %v2843_v19 }
 0x24c   : > { %3111 = vmatpush.msra.mxu2 %v2826_v51 }
 0x24d   : > { %3134 = vmatpush.msra.mxu3 %v2827_v57  ;;  %4742 = vmatmul.msk.f32.gmra.mxu0 %vm702_vm0, %v6512_v56 }
 0x24e   : > { %4744 = vmatmul.msk.f32.gmra.mxu1 %vm702_vm0, %v6512_v56  ;;  %3112 = vmatpush.msra.mxu2 %v2810_v48 }
 0x24f   : > { %3135 = vmatpush.msra.mxu3 %v2811_v35 }
 0x250   : > { %3113 = vmatpush.msra.mxu2 %v2794_v29 }
 0x251   : > { %3136 = vmatpush.msra.mxu3 %v2795_v30  ;;  %4745 = vmatmul.msk.f32.vlgmr.msra.gmra.mxu2 %vm702_vm0, %v6499_v50 }
 0x252   : > { %4747 = vmatmul.msk.f32.vlgmr.msra.gmra.mxu3 %vm702_vm0, %v6499_v50 }
 0x259   : > { %4746 = vmatmul.msk.f32.gmra.mxu2 %vm702_vm0, %v6512_v56 }
 0x25a   : > { %4748 = vmatmul.msk.f32.gmra.mxu3 %vm702_vm0, %v6512_v56 }
 0x264   : > { %v2685_v11 = vpop.f32.mrf.mxu0 }
 0x265   : > { %v2714_v25 = vpop.f32.mrf.mxu1  ;;  %v2686_v33 = vadd.f32 %v2685_v11, %v6460_v38 }
 0x266   : > { %v2715_v7 = vadd.f32 %v2714_v25, %v6460_v38 }
 0x267   : > { %v2796_v20 = vmax.f32 %v2686_v33, 0.0 }
 0x268   : > { %v2797_v5 = vmax.f32 %v2715_v7, 0.0 }
 0x26d   : > { %v2688_v3 = vpop.f32.mrf.mxu0 }
 0x26e   : > { %v2717_v27 = vpop.f32.mrf.mxu1  ;;  %v2689_v32 = vadd.f32 %v2688_v3, %v6452_v36  ;;  %v6633_v3 = vld [vmem:[%s7260_s7] sm:$0xff] }
 0x26f   : > { %v2718_v9 = vadd.f32 %v2717_v27, %v6452_v36 }
 0x270   : > { %v2812_v26 = vmax.f32 %v2689_v32, 0.0 }
 0x271   : > { %v2813_v60 = vmax.f32 %v2718_v9, 0.0 }
 0x272   : > { %v2743_v42 = vpop.f32.mrf.mxu2 }
 0x273   : > { %v2772_v47 = vpop.f32.mrf.mxu3  ;;  %v2744_v24 = vadd.f32 %v2743_v42, %v6460_v38 }
 0x274   : > { %v2773_v43 = vadd.f32 %v2772_v47, %v6460_v38 }
 0x275   : > { %v2691_v49 = vpop.f32.mrf.mxu0  ;;  %v2798_v29 = vmax.f32 %v2744_v24, 0.0 }
 0x276   : > { %v2720_v40 = vpop.f32.mrf.mxu1  ;;  %v2692_v63 = vadd.f32 %v2691_v49, %v6446_v2  ;;  %v2799_v30 = vmax.f32 %v2773_v43, 0.0 }
 0x277   : > { %v2721_v16 = vadd.f32 %v2720_v40, %v6446_v2 }
 0x278   : > { %v2828_v12 = vmax.f32 %v2692_v63, 0.0 }
 0x279   : > { %v2829_v61 = vmax.f32 %v2721_v16, 0.0 }
 0x27a   : > { %v2746_v52 = vpop.f32.mrf.mxu2 }
 0x27b   : > { %v2775_v37 = vpop.f32.mrf.mxu3  ;;  %v2747_v18 = vadd.f32 %v2746_v52, %v6452_v36 }
 0x27c   : > { %v2776_v62 = vadd.f32 %v2775_v37, %v6452_v36 }
 0x27d   : > { %v2814_v54 = vmax.f32 %v2747_v18, 0.0 }
 0x27e   : > { %v2815_v51 = vmax.f32 %v2776_v62, 0.0 }
 0x27f   : > { %v2694_v4 = vpop.f32.mrf.mxu0  ;;  %v2723_v41 = vpop.f32.mrf.mxu1 }
 0x280   : > { %v2695_v14 = vadd.f32 %v2694_v4, %v6436_v13  ;;  %v2724_v1 = vadd.f32 %v2723_v41, %v6436_v13 }
 0x282   : > { %v2844_v46 = vmax.f32 %v2695_v14, 0.0  ;;  %v2845_v22 = vmax.f32 %v2724_v1, 0.0  ;;  %v2749_v28 = vpop.f32.mrf.mxu2 }
 0x283   : > { %v2778_v53 = vpop.f32.mrf.mxu3  ;;  %v2750_v34 = vadd.f32 %v2749_v28, %v6446_v2 }
 0x284   : > { %3156 = vmatpush.msrb.mxu0 %v2844_v46  ;;  %3179 = vmatpush.msrb.mxu1 %v2845_v22  ;;  %v2779_v10 = vadd.f32 %v2778_v53, %v6446_v2 }
 0x285   : > { %v2830_v2 = vmax.f32 %v2750_v34, 0.0 }
 0x286   : > { %3157 = vmatpush.msrb.mxu0 %v2828_v12  ;;  %3180 = vmatpush.msrb.mxu1 %v2829_v61  ;;  %v2831_v8 = vmax.f32 %v2779_v10, 0.0 }
 0x287   : > { %v2885_v0 = vpop.f32.mrf.mxu0  ;;  %v2908_v31 = vpop.f32.mrf.mxu1 }
 0x288   : > { %3158 = vmatpush.msrb.mxu0 %v2812_v26  ;;  %3181 = vmatpush.msrb.mxu1 %v2813_v60  ;;  %v2886_v36 = vadd.f32 %v2885_v0, %v6616_v59  ;;  %v2909_v45 = vadd.f32 %v2908_v31, %v6616_v59 }
 0x28a   : > { %3159 = vmatpush.msrb.mxu0 %v2796_v20  ;;  %3182 = vmatpush.msrb.mxu1 %v2797_v5  ;;  %v3236_v11 = vmax.f32 %v2886_v36, 0.0  ;;  %v3237_v25 = vmax.f32 %v2909_v45, 0.0 }
 0x28b   : > { %v2752_v17 = vpop.f32.mrf.mxu2  ;;  %v2781_v39 = vpop.f32.mrf.mxu3  ;;  %4749 = vmatmul.msk.f32.vlgmr.msrb.gmra.mxu0 %vm702_vm0, %v6499_v50  ;;  %4751 = vmatmul.msk.f32.vlgmr.msrb.gmra.mxu1 %vm702_vm0, %v6499_v50 }
 0x28c   : > { %v2753_v6 = vadd.f32 %v2752_v17, %v6436_v13  ;;  %v2782_v15 = vadd.f32 %v2781_v39, %v6436_v13 }
 0x28e   : > { %v2846_v21 = vmax.f32 %v2753_v6, 0.0  ;;  %v2847_v58 = vmax.f32 %v2782_v15, 0.0 }
 0x28f   : > { %v2888_v44 = vpop.f32.mrf.mxu0  ;;  %v2911_v55 = vpop.f32.mrf.mxu1 }
 0x290   : > { %v2889_v13 = vadd.f32 %v2888_v44, %v6610_v23  ;;  %v2912_v19 = vadd.f32 %v2911_v55, %v6610_v23  ;;  %3202 = vmatpush.msrb.mxu2 %v2846_v21  ;;  %3225 = vmatpush.msrb.mxu3 %v2847_v58 }
 0x292   : > { %v3252_v57 = vmax.f32 %v2889_v13, 0.0  ;;  %v3253_v38 = vmax.f32 %v2912_v19, 0.0  ;;  %3203 = vmatpush.msrb.mxu2 %v2830_v2  ;;  %3226 = vmatpush.msrb.mxu3 %v2831_v8 }
 0x293   : > { %v2931_v48 = vpop.f32.mrf.mxu2  ;;  %v2954_v35 = vpop.f32.mrf.mxu3  ;;  %4750 = vmatmul.msk.f32.gmra.mxu0 %vm702_vm0, %v6512_v56  ;;  %4752 = vmatmul.msk.f32.gmra.mxu1 %vm702_vm0, %v6512_v56 }
 0x294   : > { %3204 = vmatpush.msrb.mxu2 %v2814_v54  ;;  %3227 = vmatpush.msrb.mxu3 %v2815_v51  ;;  %v2955_v40 = vadd.f32 %v2954_v35, %v6616_v59 }
 0x295   : > { %3293 = vmatpush.msra.mxu0 %v3252_v57  ;;  %3313 = vmatpush.msra.mxu1 %v3253_v38 }
 0x296   : > { %3205 = vmatpush.msrb.mxu2 %v2798_v29  ;;  %3228 = vmatpush.msrb.mxu3 %v2799_v30  ;;  %v3239_v16 = vmax.f32 %v2955_v40, 0.0 }
 0x297   : > { %3294 = vmatpush.msra.mxu0 %v3236_v11  ;;  %3314 = vmatpush.msra.mxu1 %v3237_v25 }
 0x298   : > { %4753 = vmatmul.msk.f32.vlgmr.msrb.gmra.mxu2 %vm702_vm0, %v6499_v50  ;;  %4755 = vmatmul.msk.f32.vlgmr.msrb.gmra.mxu3 %vm702_vm0, %v6499_v50  ;;  %v2932_v50 = vadd.f32 %v2931_v48, %v6616_v59 }
 0x29a   : > { %v3238_v63 = vmax.f32 %v2932_v50, 0.0 }
 0x29b   : > { %v2934_v27 = vpop.f32.mrf.mxu2  ;;  %v2957_v42 = vpop.f32.mrf.mxu3  ;;  %4757 = vmatmul.msk.f32.vlgmr.msra.gmra.mxu0 %vm3275_vm2, %v6633_v3  ;;  %4758 = vmatmul.msk.f32.vlgmr.msra.gmra.mxu1 %vm3275_vm2, %v6633_v3 }
 0x29c   : > { %v2935_v47 = vadd.f32 %v2934_v27, %v6610_v23  ;;  %v2958_v49 = vadd.f32 %v2957_v42, %v6610_v23  ;;  %v2977_v4 = vpop.f32.mrf.mxu0 }
 0x29d   : > { %v3000_v41 = vpop.f32.mrf.mxu1  ;;  %v2978_v14 = vadd.f32 %v2977_v4, %v6616_v59 }
 0x29e   : > { %v3254_v52 = vmax.f32 %v2935_v47, 0.0  ;;  %v3255_v37 = vmax.f32 %v2958_v49, 0.0  ;;  %v3001_v9 = vadd.f32 %v3000_v41, %v6616_v59  ;;  %v6687_v41 = vpop.permute.xlu2 %3272 }
 0x29f   : > { %v3240_v7 = vmax.f32 %v2978_v14, 0.0 }
 0x2a0   : > { %4754 = vmatmul.msk.f32.gmra.mxu2 %vm702_vm0, %v6512_v56  ;;  %4756 = vmatmul.msk.f32.gmra.mxu3 %vm702_vm0, %v6512_v56  ;;  %v3241_v12 = vmax.f32 %v3001_v9, 0.0 }
 0x2a1   : > { %3333 = vmatpush.msra.mxu2 %v3254_v52  ;;  %3353 = vmatpush.msra.mxu3 %v3255_v37 }
 0x2a3   : > { %3334 = vmatpush.msra.mxu2 %v3238_v63  ;;  %3354 = vmatpush.msra.mxu3 %v3239_v16 }
 0x2a4   : > { %v2980_v1 = vpop.f32.mrf.mxu0 }
 0x2a5   : > { %v3003_v32 = vpop.f32.mrf.mxu1  ;;  %v2981_v46 = vadd.f32 %v2980_v1, %v6610_v23 }
 0x2a6   : > { %v3004_v22 = vadd.f32 %v3003_v32, %v6610_v23 }
 0x2a7   : > { %v3256_v56 = vmax.f32 %v2981_v46, 0.0 }
 0x2a8   : > { %4759 = vmatmul.msk.f32.vlgmr.msra.gmra.mxu2 %vm3275_vm2, %v6633_v3  ;;  %4760 = vmatmul.msk.f32.vlgmr.msra.gmra.mxu3 %vm3275_vm2, %v6633_v3  ;;  %v3257_v28 = vmax.f32 %v3004_v22, 0.0 }
 0x2a9   : > { %3373 = vmatpush.msrb.mxu0 %v3256_v56  ;;  %v6695_v56 = vpop.permute.xlu0 %3618 }
 0x2aa   : > { %v3023_v53 = vpop.f32.mrf.mxu2  ;;  %3393 = vmatpush.msrb.mxu1 %v3257_v28 }
 0x2ab   : > { %v3046_v33 = vpop.f32.mrf.mxu3  ;;  %3374 = vmatpush.msrb.mxu0 %v3240_v7  ;;  %v3024_v60 = vadd.f32 %v3023_v53, %v6616_v59 }
 0x2ac   : > { %3394 = vmatpush.msrb.mxu1 %v3241_v12  ;;  %4761 = vmatmul.msk.f32.vlgmr.msrb.gmra.mxu0 %vm3275_vm2, %v6633_v3  ;;  %v3047_v0 = vadd.f32 %v3046_v33, %v6616_v59 }
 0x2ad   : > { %4762 = vmatmul.msk.f32.vlgmr.msrb.gmra.mxu1 %vm3275_vm2, %v6633_v3  ;;  %v3242_v39 = vmax.f32 %v3024_v60, 0.0 }
 0x2ae   : > { %v3243_v34 = vmax.f32 %v3047_v0, 0.0 }
 0x2b2   : > { %v3026_v61 = vpop.f32.mrf.mxu2 }
 0x2b3   : > { %v3049_v26 = vpop.f32.mrf.mxu3  ;;  %v3027_v31 = vadd.f32 %v3026_v61, %v6610_v23 }
 0x2b4   : > { %v3050_v20 = vadd.f32 %v3049_v26, %v6610_v23 }
 0x2b5   : > { %v3258_v5 = vmax.f32 %v3027_v31, 0.0 }
 0x2b6   : > { %v3259_v17 = vmax.f32 %v3050_v20, 0.0 }
 0x2b7   : > { %3413 = vmatpush.msrb.mxu2 %v3258_v5 }
 0x2b8   : > { %3433 = vmatpush.msrb.mxu3 %v3259_v17 }
 0x2b9   : > { %3414 = vmatpush.msrb.mxu2 %v3242_v39 }
 0x2ba   : > { %3434 = vmatpush.msrb.mxu3 %v3243_v34  ;;  %4763 = vmatmul.msk.f32.vlgmr.msrb.gmra.mxu2 %vm3275_vm2, %v6633_v3 }
 0x2bb   : > { %4764 = vmatmul.msk.f32.vlgmr.msrb.gmra.mxu3 %vm3275_vm2, %v6633_v3 }
 0x2c2   : > { %v3069_v10 = vpop.f32.mrf.mxu0 }
 0x2c3   : > { %v3092_v6 = vpop.f32.mrf.mxu1  ;;  %v3070_v62 = vadd.f32 %v3069_v10, %v6616_v59 }
 0x2c4   : > { %v3093_v21 = vadd.f32 %v3092_v6, %v6616_v59 }
 0x2c5   : > { %v3244_v55 = vmax.f32 %v3070_v62, 0.0  ;;  %v3737_v62 = vpop.permute.xlu1 %3736 }
 0x2c6   : > { %v3245_v2 = vmax.f32 %v3093_v21, 0.0 }
 0x2ca   : > { %v3072_v15 = vpop.f32.mrf.mxu0 }
 0x2cb   : > { %v3095_v18 = vpop.f32.mrf.mxu1  ;;  %v3073_v58 = vadd.f32 %v3072_v15, %v6610_v23 }
 0x2cc   : > { %v3096_v24 = vadd.f32 %v3095_v18, %v6610_v23 }
 0x2cd   : > { %v3260_v43 = vmax.f32 %v3073_v58, 0.0 }
 0x2ce   : > { %v3261_v44 = vmax.f32 %v3096_v24, 0.0 }
 0x2cf   : > { %3453 = vmatpush.msra.mxu0 %v3260_v43 }
 0x2d0   : > { %3473 = vmatpush.msra.mxu1 %v3261_v44  ;;  %v6703_v44 = vperm.slane %v3737_v62, 0 }
 0x2d1   : > { %3454 = vmatpush.msra.mxu0 %v3244_v55 }
 0x2d2   : > { %3474 = vmatpush.msra.mxu1 %v3245_v2  ;;  %4765 = vmatmul.msk.f32.vlgmr.msra.gmra.mxu0 %vm3275_vm2, %v6633_v3 }
 0x2d3   : > { %4766 = vmatmul.msk.f32.vlgmr.msra.gmra.mxu1 %vm3275_vm2, %v6633_v3 }
 0x2d4   : > { %v3115_v8 = vpop.f32.mrf.mxu2 }
 0x2d5   : > { %v3138_v13 = vpop.f32.mrf.mxu3  ;;  %v3116_v45 = vadd.f32 %v3115_v8, %v6616_v59 }
 0x2d6   : > { %v3139_v54 = vadd.f32 %v3138_v13, %v6616_v59 }
 0x2d7   : > { %v3246_v35 = vmax.f32 %v3116_v45, 0.0 }
 0x2d8   : > { %v3247_v29 = vmax.f32 %v3139_v54, 0.0 }
 0x2dc   : > { %v3118_v19 = vpop.f32.mrf.mxu2 }
 0x2dd   : > { %v3141_v36 = vpop.f32.mrf.mxu3  ;;  %v3119_v51 = vadd.f32 %v3118_v19, %v6610_v23 }
 0x2de   : > { %v3142_v57 = vadd.f32 %v3141_v36, %v6610_v23 }
 0x2df   : > { %v3262_v38 = vmax.f32 %v3119_v51, 0.0 }
 0x2e0   : > { %v3263_v48 = vmax.f32 %v3142_v57, 0.0 }
 0x2e1   : > { %3493 = vmatpush.msra.mxu2 %v3262_v38 }
 0x2e2   : > { %3513 = vmatpush.msra.mxu3 %v3263_v48 }
 0x2e3   : > { %3494 = vmatpush.msra.mxu2 %v3246_v35 }
 0x2e4   : > { %3514 = vmatpush.msra.mxu3 %v3247_v29  ;;  %4767 = vmatmul.msk.f32.vlgmr.msra.gmra.mxu2 %vm3275_vm2, %v6633_v3 }
 0x2e5   : > { %4768 = vmatmul.msk.f32.vlgmr.msra.gmra.mxu3 %vm3275_vm2, %v6633_v3 }
 0x308   : > { %v3161_v30 = vpop.f32.mrf.mxu0  ;;  %v3184_v11 = vpop.f32.mrf.mxu1 }
 0x309   : > { %v3162_v42 = vadd.f32 %v3161_v30, %v6616_v59  ;;  %v3185_v47 = vadd.f32 %v3184_v11, %v6616_v59 }
 0x30b   : > { %v3248_v37 = vmax.f32 %v3162_v42, 0.0  ;;  %v3249_v4 = vmax.f32 %v3185_v47, 0.0 }
 0x310   : > { %v3164_v25 = vpop.f32.mrf.mxu0  ;;  %v3187_v27 = vpop.f32.mrf.mxu1 }
 0x311   : > { %v3165_v49 = vadd.f32 %v3164_v25, %v6610_v23  ;;  %v3188_v50 = vadd.f32 %v3187_v27, %v6610_v23 }
 0x313   : > { %v3264_v40 = vmax.f32 %v3165_v49, 0.0  ;;  %v3265_v52 = vmax.f32 %v3188_v50, 0.0 }
 0x315   : > { %3533 = vmatpush.msrb.mxu0 %v3264_v40  ;;  %3553 = vmatpush.msrb.mxu1 %v3265_v52 }
 0x317   : > { %3534 = vmatpush.msrb.mxu0 %v3248_v37  ;;  %3554 = vmatpush.msrb.mxu1 %v3249_v4 }
 0x318   : > { %v3296_v63 = vpop.f32.mrf.mxu0  ;;  %v3316_v16 = vpop.f32.mrf.mxu1  ;;  %4769 = vmatmul.msk.f32.vlgmr.msrb.gmra.mxu0 %vm3275_vm2, %v6633_v3  ;;  %4770 = vmatmul.msk.f32.vlgmr.msrb.gmra.mxu1 %vm3275_vm2, %v6633_v3 }
 0x319   : > { %v3297_v14 = vadd.f32 %v3296_v63, %v6687_v41  ;;  %v3317_v1 = vadd.f32 %v3316_v16, %v6687_v41 }
 0x31b   : > { %v3599_v32 = vmax.f32 %v3297_v14, 0.0  ;;  %v3600_v9 = vmax.f32 %v3317_v1, 0.0  ;;  %v3207_v46 = vpop.f32.mrf.mxu2  ;;  %v3230_v22 = vpop.f32.mrf.mxu3 }
 0x31c   : > { %v3208_v20 = vadd.f32 %v3207_v46, %v6616_v59  ;;  %v3231_v5 = vadd.f32 %v3230_v22, %v6616_v59 }
 0x31d   : > { %v3621_v28 = vmul.f32 %v6695_v56, %v3599_v32  ;;  %v3622_v53 = vmul.f32 %v6695_v56, %v3600_v9 }
 0x31e   : > { %v3250_v21 = vmax.f32 %v3208_v20, 0.0  ;;  %v3251_v58 = vmax.f32 %v3231_v5, 0.0 }
 0x31f   : > { %v3637_v33 = vrot.slane %v3621_v28, 4  ;;  %v3643_v7 = vrot.slane %v3622_v53, 4 }
 0x321   : > { %v3638_v12 = vadd.f32 %v3637_v33, %v3621_v28  ;;  %v3644_v61 = vadd.f32 %v3643_v7, %v3622_v53 }
 0x323   : > { %v3639_v26 = vrot.slane %v3638_v12, 2  ;;  %v3645_v60 = vrot.slane %v3644_v61, 2  ;;  %v3210_v0 = vpop.f32.mrf.mxu2  ;;  %v3233_v31 = vpop.f32.mrf.mxu3 }
 0x324   : > { %v3211_v17 = vadd.f32 %v3210_v0, %v6610_v23  ;;  %v3234_v39 = vadd.f32 %v3233_v31, %v6610_v23 }
 0x325   : > { %v3640_v34 = vadd.f32 %v3639_v26, %v3638_v12  ;;  %v3646_v10 = vadd.f32 %v3645_v60, %v3644_v61 }
 0x326   : > { %v3266_v6 = vmax.f32 %v3211_v17, 0.0  ;;  %v3267_v15 = vmax.f32 %v3234_v39, 0.0 }
 0x327   : > { %v3647_v18 = vrot.slane %v3646_v10, 1  ;;  %v3641_v24 = vrot.slane %v3640_v34, 1 }
 0x328   : > { %3573 = vmatpush.msrb.mxu2 %v3266_v6  ;;  %3593 = vmatpush.msrb.mxu3 %v3267_v15 }
 0x329   : > { %v3648_v43 = vadd.f32 %v3647_v18, %v3646_v10  ;;  %v3376_v8 = vpop.f32.mrf.mxu0  ;;  %v3642_v19 = vadd.f32 %v3641_v24, %v3640_v34 }
 0x32a   : > { %3574 = vmatpush.msrb.mxu2 %v3250_v21  ;;  %3594 = vmatpush.msrb.mxu3 %v3251_v58  ;;  %v3396_v13 = vpop.f32.mrf.mxu1  ;;  %v3377_v51 = vadd.f32 %v3376_v8, %v6687_v41 }
 0x32b   : > { %v3336_v59 = vpop.f32.mrf.mxu2  ;;  %v3356_v55 = vpop.f32.mrf.mxu3  ;;  %4771 = vmatmul.msk.f32.vlgmr.msrb.gmra.mxu2 %vm3275_vm2, %v6633_v3  ;;  %4772 = vmatmul.msk.f32.vlgmr.msrb.gmra.mxu3 %vm3275_vm2, %v6633_v3  ;;  %v6712_v36 = vadd.f32 %v6703_v44, %v3648_v43  ;;  %v3397_v57 = vadd.f32 %v3396_v13, %v6687_v41  ;;  %v6719_v29 = vadd.f32 %v6703_v44, %v3642_v19 }
 0x32c   : > { %v3337_v23 = vadd.f32 %v3336_v59, %v6687_v41  ;;  %v3357_v2 = vadd.f32 %v3356_v55, %v6687_v41  ;;  %v3603_v48 = vmax.f32 %v3377_v51, 0.0 }
 0x32d   : > { %v3604_v35 = vmax.f32 %v3397_v57, 0.0  ;;  %v3757_v30 = vand.u32 2147483647, %v6712_v36  ;;  %v3756_v37 = vand.u32 2147483647, %v6719_v29  ;;  %vm3821_vm10 = vcmp.ge.f32.partialorder %v6712_v36, 0.0 }
 0x32e   : > { %v3601_v45 = vmax.f32 %v3337_v23, 0.0  ;;  %v3602_v54 = vmax.f32 %v3357_v2, 0.0  ;;  %v3625_v27 = vmul.f32 %v6695_v56, %v3603_v48 }
 0x32f   : > { %v3626_v42 = vmul.f32 %v6695_v56, %v3604_v35  ;;  %v3773_v40 = vsub.f32 0.0, %v3757_v30  ;;  %v3772_v28 = vsub.f32 0.0, %v3756_v37 }
 0x330   : > { %v3623_v38 = vmul.f32 %v6695_v56, %v3601_v45  ;;  %v3624_v3 = vmul.f32 %v6695_v56, %v3602_v54  ;;  %v3661_v50 = vrot.slane %v3625_v27, 4 }
 0x331   : > { %v3667_v52 = vrot.slane %v3626_v42, 4  ;;  %v3790_v46 = vmul.f32 1.442695, %v3773_v40  ;;  %v3788_v61 = vmul.f32 1.442695, %v3772_v28 }
 0x332   : > { %v3649_v11 = vrot.slane %v3623_v38, 4  ;;  %v3655_v25 = vrot.slane %v3624_v3, 4  ;;  %v3662_v16 = vadd.f32 %v3661_v50, %v3625_v27 }
 0x333   : > { %v3668_v14 = vadd.f32 %v3667_v52, %v3626_v42  ;;  %4820 = vpow2.f32 %v3790_v46 }
 0x334   : > { %v3650_v47 = vadd.f32 %v3649_v11, %v3623_v38  ;;  %v3656_v49 = vadd.f32 %v3655_v25, %v3624_v3  ;;  %v3663_v9 = vrot.slane %v3662_v16, 2  ;;  %4822 = vpow2.f32 %v3788_v61 }
 0x335   : > { %v3669_v22 = vrot.slane %v3668_v14, 2 }
 0x336   : > { %v3651_v4 = vrot.slane %v3650_v47, 2  ;;  %v3657_v63 = vrot.slane %v3656_v49, 2  ;;  %v3664_v7 = vadd.f32 %v3663_v9, %v3662_v16 }
 0x337   : > { %v3670_v12 = vadd.f32 %v3669_v22, %v3668_v14 }
 0x338   : > { %v3652_v1 = vadd.f32 %v3651_v4, %v3650_v47  ;;  %v3658_v32 = vadd.f32 %v3657_v63, %v3656_v49  ;;  %v3665_v0 = vrot.slane %v3664_v7, 1 }
 0x339   : > { %v3671_v31 = vrot.slane %v3670_v12, 1  ;;  %v6733_v18 = vpop.eup %4820 }
 0x33a   : > { %v3653_v53 = vrot.slane %v3652_v1, 1  ;;  %v3659_v33 = vrot.slane %v3658_v32, 1  ;;  %v3666_v39 = vadd.f32 %v3665_v0, %v3664_v7  ;;  %v6746_v2 = vadd.f32 1.0, %v6733_v18  ;;  %v6748_v13 = vpop.eup %4822 }
 0x33b   : > { %v3672_v34 = vadd.f32 %v3671_v31, %v3670_v12  ;;  %v6753_v3 = vadd.f32 1.0, %v6748_v13 }
 0x33c   : > { %v3654_v26 = vadd.f32 %v3653_v53, %v3652_v1  ;;  %v3660_v60 = vadd.f32 %v3659_v33, %v3658_v32  ;;  %v6736_v62 = vadd.f32 %v6703_v44, %v3666_v39  ;;  %4824 = vrcp.f32 %v6746_v2 }
 0x33d   : > { %v3416_v17 = vpop.f32.mrf.mxu2  ;;  %v6739_v21 = vadd.f32 %v6703_v44, %v3672_v34  ;;  %vm3872_vm4 = vweird.f32 %v6746_v2  ;;  %vm3857_vm8 = vweird.f32 %v6753_v3 }
 0x33e   : > { %v6726_v20 = vadd.f32 %v6703_v44, %v3654_v26  ;;  %v6729_v5 = vadd.f32 %v6703_v44, %v3660_v60  ;;  %v3436_v10 = vpop.f32.mrf.mxu3  ;;  %v3417_v58 = vadd.f32 %v3416_v17, %v6687_v41  ;;  %v3760_v55 = vand.u32 2147483647, %v6736_v62 }
 0x33f   : > { %v3437_v43 = vadd.f32 %v3436_v10, %v6687_v41  ;;  %v3761_v23 = vand.u32 2147483647, %v6739_v21 }
 0x340   : > { %v3758_v6 = vand.u32 2147483647, %v6726_v20  ;;  %v3759_v15 = vand.u32 2147483647, %v6729_v5  ;;  %v3605_v8 = vmax.f32 %v3417_v58, 0.0  ;;  %v3776_v45 = vsub.f32 0.0, %v3760_v55 }
 0x341   : > { %v3606_v54 = vmax.f32 %v3437_v43, 0.0  ;;  %v3777_v57 = vsub.f32 0.0, %v3761_v23 }
 0x342   : > { %v3774_v24 = vsub.f32 0.0, %v3758_v6  ;;  %v3775_v59 = vsub.f32 0.0, %v3759_v15  ;;  %v3627_v38 = vmul.f32 %v6695_v56, %v3605_v8  ;;  %v3796_v35 = vmul.f32 1.442695, %v3776_v45  ;;  %v4825_v42 = vpop.eup %4824 }
 0x343   : > { %v3628_v48 = vmul.f32 %v6695_v56, %v3606_v54  ;;  %v3798_v11 = vmul.f32 1.442695, %v3777_v57  ;;  %v3868_v40 = vmul.f32 %v4825_v42, %v6746_v2  ;;  %vm3873_vm3 = vweird.f32 %v4825_v42 }
 0x344   : > { %v3792_v19 = vmul.f32 1.442695, %v3774_v24  ;;  %v3794_v51 = vmul.f32 1.442695, %v3775_v59  ;;  %v3673_v30 = vrot.slane %v3627_v38, 4  ;;  %v3878_v6 = vand.u32 2147483648, %v6746_v2  ;;  %vm6801_vm5 = vmor %vm3872_vm4, %vm3873_vm3 }
 0x345   : > { %v3679_v27 = vrot.slane %v3628_v48, 4  ;;  %v3869_v32 = vsub.f32 1.0, %v3868_v40  ;;  %v3876_v24 = vand.u32 2147483647, %v6746_v2  ;;  %v3861_v54 = vand.u32 2147483647, %v6753_v3 }
 0x346   : > { %4826 = vpow2.f32 %v3792_v19  ;;  %v3674_v25 = vadd.f32 %v3673_v30, %v3627_v38 }
 0x347   : > { %4828 = vpow2.f32 %v3794_v51  ;;  %v3680_v52 = vadd.f32 %v3679_v27, %v3628_v48  ;;  %v3870_v12 = vmul.f32 %v4825_v42, %v3869_v32  ;;  %v3879_v51 = vor.u32 1.1754944e-38, %v3878_v6 }
 0x348   : > { %4830 = vrcp.f32 %v6753_v3  ;;  %v3675_v47 = vrot.slane %v3674_v25, 2  ;;  %v3863_v48 = vand.u32 2147483648, %v6753_v3  ;;  %vm3877_vm7 = vcmp.eq.f32.partialorder %v3876_v24, 8.507059e+37 }
 0x349   : > { %4832 = vpow2.f32 %v3796_v35  ;;  %v3681_v46 = vrot.slane %v3680_v52, 2  ;;  %v3871_v39 = vadd.f32 %v4825_v42, %v3870_v12  ;;  %vm3862_vm11 = vcmp.eq.f32.partialorder %v3861_v54, 8.507059e+37 }
 0x34a   : > { %4834 = vpow2.f32 %v3798_v11  ;;  %v3676_v37 = vadd.f32 %v3675_v47, %v3674_v25 }
 0x34b   : > { %v3682_v33 = vadd.f32 %v3681_v46, %v3680_v52  ;;  %v3875_v19 = vsel %vm6801_vm5, %v4825_v42, %v3871_v39 }
 0x34c   : > { %v6757_v49 = vpop.eup %4826  ;;  %v3677_v9 = vrot.slane %v3676_v37, 1  ;;  %v3880_v35 = vsel %vm3877_vm7, %v3879_v51, %v3875_v19 }
 0x34d   : > { %v6759_v50 = vpop.eup %4828  ;;  %v6765_v63 = vadd.f32 1.0, %v6757_v49  ;;  %v3683_v26 = vrot.slane %v3682_v33, 1 }
 0x34e   : > { %v6762_v4 = vpop.eup %4830  ;;  %v6770_v14 = vadd.f32 1.0, %v6759_v50  ;;  %v3678_v53 = vadd.f32 %v3677_v9, %v3676_v37  ;;  %v3864_v37 = vor.u32 1.1754944e-38, %v3863_v48 }
 0x34f   : > { %v6767_v16 = vpop.eup %4832  ;;  %v3853_v22 = vmul.f32 %v6762_v4, %v6753_v3  ;;  %4836 = vrcp.f32 %v6765_v63  ;;  %v3684_v31 = vadd.f32 %v3683_v26, %v3682_v33  ;;  %vm3858_vm6 = vweird.f32 %v6762_v4 }
 0x350   : > { %v6772_v1 = vpop.eup %4834  ;;  %v6778_v28 = vadd.f32 1.0, %v6767_v16  ;;  %4838 = vrcp.f32 %v6770_v14  ;;  %v6785_v61 = vadd.f32 %v6703_v44, %v3678_v53  ;;  %vm6825_vm9 = vmor %vm3857_vm8, %vm3858_vm6  ;;  %v4093_v3 = vmul.f32 %v6733_v18, %v3880_v35  ;;  %v3476_v53 = vpop.f32.mrf.mxu1 }
 0x351   : > { %v6782_v7 = vadd.f32 1.0, %v6772_v1  ;;  %v3854_v60 = vsub.f32 1.0, %v3853_v22  ;;  %v6796_v15 = vadd.f32 %v6703_v44, %v3684_v31  ;;  %v3891_v9 = vand.u32 2147483647, %v6765_v63 }
 0x352   : > { %4840 = vrcp.f32 %v6778_v28  ;;  %v3762_v0 = vand.u32 2147483647, %v6785_v61  ;;  %v3893_v33 = vand.u32 2147483648, %v6765_v63  ;;  %v3908_v18 = vand.u32 2147483648, %v6770_v14 }
 0x353   : > { %4842 = vrcp.f32 %v6782_v7  ;;  %v3855_v58 = vmul.f32 %v6762_v4, %v3854_v60  ;;  %v3763_v23 = vand.u32 2147483647, %v6796_v15  ;;  %v3906_v60 = vand.u32 2147483647, %v6770_v14 }
 0x354   : > { %v3778_v34 = vsub.f32 0.0, %v3762_v0  ;;  %v6850_v0 = vsel %vm3821_vm10, %v3880_v35, %v4093_v3  ;;  %vm3887_vm12 = vweird.f32 %v6765_v63  ;;  %vm3902_vm13 = vweird.f32 %v6770_v14 }
 0x355   : > { %v6790_v17 = vpop.eup %4836  ;;  %v3779_v57 = vsub.f32 0.0, %v3763_v23  ;;  %v3856_v38 = vadd.f32 %v6762_v4, %v3855_v58  ;;  %v3477_v31 = vadd.f32 %v3476_v53, %v6687_v41  ;;  %vm6857_vm15 = vcmp.eq.f32.partialorder %v3891_v9, 8.507059e+37 }
 0x356   : > { %v6792_v10 = vpop.eup %4838  ;;  %v3800_v43 = vmul.f32 1.442695, %v3778_v34  ;;  %v3883_v55 = vmul.f32 %v6790_v17, %v6765_v63  ;;  %vm3888_vm14 = vweird.f32 %v6790_v17  ;;  %v3894_v58 = vor.u32 1.1754944e-38, %v3893_v33 }
 0x357   : > { %v3898_v45 = vmul.f32 %v6792_v10, %v6770_v14  ;;  %v3802_v42 = vmul.f32 1.442695, %v3779_v57  ;;  %v3860_v52 = vsel %vm6825_vm9, %v6762_v4, %v3856_v38  ;;  %vm3903_vm0 = vweird.f32 %v6792_v10  ;;  %vm6875_vm3 = vmor %vm3887_vm12, %vm3888_vm14 }
 0x358   : > { %v6808_v8 = vpop.eup %4840  ;;  %4844 = vpow2.f32 %v3800_v43  ;;  %v3884_v30 = vsub.f32 1.0, %v3883_v55  ;;  %v6843_v4 = vsel %vm3862_vm11, %v3864_v37, %v3860_v52  ;;  %vm6865_vm1 = vcmp.eq.f32.partialorder %v3906_v60, 8.507059e+37  ;;  %vm6889_vm5 = vmor %vm3902_vm13, %vm3903_vm0 }
 0x359   : > { %v6814_v2 = vpop.eup %4842  ;;  %v3913_v11 = vmul.f32 %v6808_v8, %v6778_v28  ;;  %v3899_v25 = vsub.f32 1.0, %v3898_v45  ;;  %4846 = vpow2.f32 %v3802_v42  ;;  %v3909_v59 = vor.u32 1.1754944e-38, %v3908_v18 }
 0x35a   : > { %v3928_v27 = vmul.f32 %v6814_v2, %v6782_v7  ;;  %v3885_v32 = vmul.f32 %v6790_v17, %v3884_v30  ;;  %vm3917_vm2 = vweird.f32 %v6778_v28  ;;  %v3921_v55 = vand.u32 2147483647, %v6778_v28 }
 0x35b   : > { %v3914_v46 = vsub.f32 1.0, %v3913_v11  ;;  %v3900_v12 = vmul.f32 %v6792_v10, %v3899_v25  ;;  %v3923_v45 = vand.u32 2147483648, %v6778_v28  ;;  %vm3932_vm4 = vweird.f32 %v6782_v7  ;;  %v3456_v11 = vpop.f32.mrf.mxu0 }
 0x35c   : > { %v3929_v26 = vsub.f32 1.0, %v3928_v27  ;;  %v3886_v39 = vadd.f32 %v6790_v17, %v3885_v32  ;;  %v3936_v54 = vand.u32 2147483647, %v6782_v7  ;;  %v3608_v51 = vmax.f32 %v3477_v31, 0.0 }
 0x35d   : > { %v3915_v6 = vmul.f32 %v6808_v8, %v3914_v46  ;;  %v3901_v36 = vadd.f32 %v6792_v10, %v3900_v12  ;;  %vm3918_vm6 = vweird.f32 %v6808_v8  ;;  %vm3933_vm7 = vweird.f32 %v6814_v2 }
 0x35e   : > { %v6830_v40 = vpop.eup %4844  ;;  %v3930_v24 = vmul.f32 %v6814_v2, %v3929_v26  ;;  %v3890_v48 = vsel %vm6875_vm3, %v6790_v17, %v3886_v39  ;;  %vm3822_vm8 = vcmp.ge.f32.partialorder %v6726_v20, 0.0  ;;  %vm6905_vm9 = vcmp.eq.f32.partialorder %v3921_v55, 8.507059e+37  ;;  %vm6917_vm11 = vmor %vm3917_vm2, %vm3918_vm6 }
 0x35f   : > { %v6839_v22 = vadd.f32 1.0, %v6830_v40  ;;  %v6871_v23 = vpop.eup %4846  ;;  %v3916_v35 = vadd.f32 %v6808_v8, %v3915_v6  ;;  %v3905_v17 = vsel %vm6889_vm5, %v6792_v10, %v3901_v36  ;;  %v3938_v42 = vand.u32 2147483648, %v6782_v7  ;;  %vm6931_vm12 = vmor %vm3932_vm4, %vm3933_vm7 }
 0x360   : > { %v6896_v30 = vadd.f32 1.0, %v6871_v23  ;;  %v3931_v25 = vadd.f32 %v6814_v2, %v3930_v24  ;;  %v3895_v10 = vsel %vm6857_vm15, %v3894_v58, %v3890_v48  ;;  %vm3823_vm10 = vcmp.ge.f32.partialorder %v6729_v5, 0.0 }
 0x361   : > { %4848 = vrcp.f32 %v6839_v22  ;;  %v3924_v37 = vor.u32 1.1754944e-38, %v3923_v45  ;;  %v3457_v32 = vadd.f32 %v3456_v11, %v6687_v41  ;;  %v3910_v9 = vsel %vm6865_vm1, %v3909_v59, %v3905_v17 }
 0x362   : > { %4850 = vrcp.f32 %v6896_v30  ;;  %v3920_v46 = vsel %vm6917_vm11, %v6808_v8, %v3916_v35  ;;  %v3953_v53 = vand.u32 2147483648, %v6839_v22  ;;  %v3630_v33 = vmul.f32 %v6695_v56, %v3608_v51 }
 0x363   : > { %vm3824_vm13 = vcmp.ge.f32.partialorder %v6736_v62, 0.0  ;;  %v3935_v26 = vsel %vm6931_vm12, %v6814_v2, %v3931_v25  ;;  %v3951_v60 = vand.u32 2147483647, %v6839_v22  ;;  %v4094_v7 = vmul.f32 %v6757_v49, %v3895_v10 }
 0x364   : > { %vm3937_vm15 = vcmp.eq.f32.partialorder %v3936_v54, 8.507059e+37  ;;  %v3939_v18 = vor.u32 1.1754944e-38, %v3938_v42  ;;  %v3925_v39 = vsel %vm6905_vm9, %v3924_v37, %v3920_v46  ;;  %vm3825_vm0 = vcmp.ge.f32.partialorder %v6739_v21, 0.0 }
 0x365   : > { %vm3947_vm1 = vweird.f32 %v6839_v22  ;;  %v4095_v58 = vmul.f32 %v6759_v50, %v3910_v9  ;;  %v3954_v24 = vor.u32 1.1754944e-38, %v3953_v53  ;;  %v3607_v49 = vmax.f32 %v3457_v32, 0.0 }
 0x366   : > { %v3940_v36 = vsel %vm3937_vm15, %v3939_v18, %v3935_v26  ;;  %vm3952_vm3 = vcmp.eq.f32.partialorder %v3951_v60, 8.507059e+37  ;;  %v3691_v55 = vrot.slane %v3630_v33, 4  ;;  %4852 = vpow2.f32 %v6850_v0 }
 0x367   : > { %v3496_v57 = vpop.f32.mrf.mxu2  ;;  %v4849_v38 = vpop.eup %4848  ;;  %v4096_v19 = vmul.f32 %v6767_v16, %v3925_v39  ;;  %v4110_v54 = vsel %vm3822_vm8, %v3895_v10, %v4094_v7  ;;  %v4097_v48 = vmul.f32 %v6772_v1, %v3940_v36  ;;  %v3968_v63 = vand.u32 2147483648, %v6896_v30 }
 0x368   : > { %v3943_v14 = vmul.f32 %v4849_v38, %v6839_v22  ;;  %v3497_v47 = vadd.f32 %v3496_v57, %v6687_v41  ;;  %v3516_v12 = vpop.f32.mrf.mxu3  ;;  %vm3948_vm14 = vweird.f32 %v4849_v38  ;;  %v4851_v2 = vpop.eup %4850  ;;  %v3629_v0 = vmul.f32 %v6695_v56, %v3607_v49 }
 0x369   : > { %v3517_v6 = vadd.f32 %v3516_v12, %v6687_v41  ;;  %vm3949_vm2 = vmor %vm3947_vm1, %vm3948_vm14  ;;  %v3958_v59 = vmul.f32 %v4851_v2, %v6896_v30  ;;  %vm3963_vm4 = vweird.f32 %v4851_v2  ;;  %v3966_v35 = vand.u32 2147483647, %v6896_v30 }
 0x36a   : > { %v3944_v3 = vsub.f32 1.0, %v3943_v14  ;;  %v3609_v31 = vmax.f32 %v3497_v47, 0.0  ;;  %v3692_v11 = vadd.f32 %v3691_v55, %v3630_v33  ;;  %4854 = vpow2.f32 %v4110_v54 }
 0x36b   : > { %v3959_v51 = vsub.f32 1.0, %v3958_v59  ;;  %v3610_v57 = vmax.f32 %v3517_v6, 0.0  ;;  %v4112_v20 = vsel %vm3824_vm13, %v3925_v39, %v4096_v19  ;;  %vm3826_vm5 = vcmp.ge.f32.partialorder %v6785_v61, 0.0 }
 0x36c   : > { %v3945_v8 = vmul.f32 %v4849_v38, %v3944_v3  ;;  %v3631_v22 = vmul.f32 %v6695_v56, %v3609_v31  ;;  %vm3962_vm6 = vweird.f32 %v6896_v30  ;;  %v4853_v25 = vpop.eup %4852  ;;  %v4113_v14 = vsel %vm3825_vm0, %v3940_v36, %v4097_v48 }
 0x36d   : > { %v3960_v16 = vmul.f32 %v4851_v2, %v3959_v51  ;;  %v3632_v1 = vmul.f32 %v6695_v56, %v3610_v57  ;;  %vm3964_vm7 = vmor %vm3962_vm6, %vm3963_vm4  ;;  %v3969_v27 = vor.u32 1.1754944e-38, %v3968_v63  ;;  %v3685_v42 = vrot.slane %v3629_v0, 4 }
 0x36e   : > { %v3946_v34 = vadd.f32 %v4849_v38, %v3945_v8  ;;  %vm3967_vm8 = vcmp.eq.f32.partialorder %v3966_v35, 8.507059e+37  ;;  %v3693_v47 = vrot.slane %v3692_v11, 2  ;;  %v4092_v61 = vmul.f32 %v6748_v13, %v6843_v4 }
 0x36f   : > { %v3961_v17 = vadd.f32 %v4851_v2, %v3960_v16  ;;  %v3703_v37 = vrot.slane %v3632_v1, 4  ;;  %vm3827_vm9 = vcmp.ge.f32.partialorder %v6796_v15, 0.0  ;;  %v3686_v32 = vadd.f32 %v3685_v42, %v3629_v0 }
 0x370   : > { %v3950_v43 = vsel %vm3949_vm2, %v4849_v38, %v3946_v34  ;;  %v4111_v38 = vsel %vm3823_vm10, %v3910_v9, %v4095_v58  ;;  %v4855_v3 = vpop.eup %4854  ;;  %vm3820_vm10 = vcmp.ge.f32.partialorder %v6719_v29, 0.0  ;;  %v3694_v9 = vadd.f32 %v3693_v47, %v3692_v11 }
 0x371   : > { %v3955_v45 = vsel %vm3952_vm3, %v3954_v24, %v3950_v43  ;;  %4856 = vpow2.f32 %v4111_v38  ;;  %v3965_v62 = vsel %vm3964_vm7, %v4851_v2, %v3961_v17  ;;  %v4108_v28 = vsel %vm3820_vm10, %v6843_v4, %v4092_v61 }
 0x372   : > { %v4098_v50 = vmul.f32 %v6830_v40, %v3955_v45  ;;  %v3697_v40 = vrot.slane %v3631_v22, 4  ;;  %4858 = vpow2.f32 %v4112_v20  ;;  %v3970_v10 = vsel %vm3967_vm8, %v3969_v27, %v3965_v62 }
 0x373   : > { %v4099_v52 = vmul.f32 %v6871_v23, %v3970_v10  ;;  %v3704_v33 = vadd.f32 %v3703_v37, %v3632_v1  ;;  %v3687_v23 = vrot.slane %v3686_v32, 2  ;;  %v3695_v8 = vrot.slane %v3694_v9, 1 }
 0x374   : > { %v4114_v5 = vsel %vm3826_vm5, %v3955_v45, %v4098_v50  ;;  %v3698_v30 = vadd.f32 %v3697_v40, %v3631_v22  ;;  %v4157_v29 = vrot.slane %v4855_v3, 6  ;;  %vm4170_vm11 = vcmask 1040384  }
 0x375   : > { %4860 = vpow2.f32 %v4114_v5  ;;  %v4115_v21 = vsel %vm3827_vm9, %v3970_v10, %v4099_v52  ;;  %v3705_v7 = vrot.slane %v3704_v33, 2  ;;  %vm4172_vm12 = vcmask 1042434  }
 0x376   : > { %4862 = vpow2.f32 %v4113_v14  ;;  %v3699_v13 = vrot.slane %v3698_v30, 2  ;;  %v4156_v4 = vrot.slane %v4853_v25, 7  ;;  %vm4178_vm13 = vcmask 1046534  }
 0x377   : > { %v4857_v46 = vpop.eup %4856  ;;  %4864 = vpow2.f32 %v4115_v21  ;;  %v3688_v6 = vadd.f32 %v3687_v23, %v3686_v32  ;;  %v3696_v2 = vadd.f32 %v3695_v8, %v3694_v9  ;;  %vm4176_vm14 = vcmask 1044484  }
 0x378   : > { %v4859_v53 = vpop.eup %4858  ;;  %4866 = vpow2.f32 %v4108_v28  ;;  %v3700_v15 = vadd.f32 %v3699_v13, %v3698_v30  ;;  %v4158_v60 = vrot.slane %v4857_v46, 5  ;;  %vm4174_vm15 = vcmask 1041408  }
 0x379   : > { %v4159_v39 = vrot.slane %v4859_v53, 4  ;;  %vm4180_vm0 = vcmask 1045508   ;;  %v3706_v43 = vadd.f32 %v3705_v7, %v3704_v33  ;;  %vm4182_vm1 = vcmask 1043456  }
 0x37a   : > { %v3701_v36 = vrot.slane %v3700_v15, 1  ;;  %v4173_v24 = vsel %vm4172_vm12, %v4157_v29, %v4158_v60  ;;  %v3689_v45 = vrot.slane %v3688_v6, 1  ;;  %v6983_v22 = vadd.f32 %v6703_v44, %v3696_v2 }
 0x37b   : > { %v4861_v12 = vpop.eup %4860  ;;  %v3707_v38 = vrot.slane %v3706_v43, 1 }
 0x37c   : > { %v4863_v26 = vpop.eup %4862  ;;  %v4161_v18 = vrot.slane %v4861_v12, 2  ;;  %v3702_v51 = vadd.f32 %v3701_v36, %v3700_v15  ;;  %v3690_v35 = vadd.f32 %v3689_v45, %v3688_v6  ;;  %v3765_v11 = vand.u32 2147483647, %v6983_v22 }
 0x37d   : > { %v4865_v31 = vpop.eup %4864  ;;  %v4160_v34 = vrot.slane %v4863_v26, 3  ;;  %v3708_v17 = vadd.f32 %v3707_v38, %v3706_v43 }
 0x37e   : > { %v4162_v58 = vrot.slane %v4865_v31, 1  ;;  %v4867_v49 = vpop.eup %4866  ;;  %v6995_v20 = vadd.f32 %v6703_v44, %v3702_v51  ;;  %v6999_v25 = vadd.f32 %v6703_v44, %v3690_v35  ;;  %v3781_v14 = vsub.f32 0.0, %v3765_v11 }
 0x37f   : > { %v4171_v55 = vsel %vm4170_vm11, %v4867_v49, %v4156_v4  ;;  %v4177_v19 = vsel %vm4176_vm14, %v4159_v39, %v4160_v34  ;;  %v7004_v47 = vadd.f32 %v6703_v44, %v3708_v17 }
 0x380   : > { %v4179_v59 = vsel %vm4178_vm13, %v4161_v18, %v4162_v58  ;;  %v4175_v54 = vsel %vm4174_vm15, %v4171_v55, %v4173_v24  ;;  %v3766_v42 = vand.u32 2147483647, %v6995_v20  ;;  %v3764_v30 = vand.u32 2147483647, %v6999_v25 }
 0x381   : > { %v4181_v50 = vsel %vm4180_vm0, %v4177_v19, %v4179_v59  ;;  %v3806_v52 = vmul.f32 1.442695, %v3781_v14  ;;  %v3767_v32 = vand.u32 2147483647, %v7004_v47 }
 0x382   : > { %v4183_v57 = vsel %vm4182_vm1, %v4175_v54, %v4181_v50  ;;  %v3782_v3 = vsub.f32 0.0, %v3766_v42  ;;  %v3780_v28 = vsub.f32 0.0, %v3764_v30 }
 0x383   : > { %4193 = vst [vmem:[%s6988_s12] sm:$0xff] %v4183_v57  ;;  %4868 = vpow2.f32 %v3806_v52  ;;  %v3783_v12 = vsub.f32 0.0, %v3767_v32 }
 0x384   : > { %v3808_v53 = vmul.f32 1.442695, %v3782_v3  ;;  %v3804_v8 = vmul.f32 1.442695, %v3780_v28 }
 0x385   : > { %v3810_v7 = vmul.f32 1.442695, %v3783_v12 }
 0x386   : > { %4870 = vpow2.f32 %v3808_v53 }
 0x387   : > { %4872 = vpow2.f32 %v3804_v8 }
 0x388   : > { %4874 = vpow2.f32 %v3810_v7 }
 0x389   : > { %v7011_v60 = vpop.eup %4868 }
 0x38a   : > { %v7019_v39 = vadd.f32 1.0, %v7011_v60 }
 0x38c   : > { %v7021_v2 = vpop.eup %4870  ;;  %4876 = vrcp.f32 %v7019_v39  ;;  %vm3992_vm3 = vweird.f32 %v7019_v39 }
 0x38d   : > { %v7026_v55 = vpop.eup %4872  ;;  %v7029_v19 = vadd.f32 1.0, %v7021_v2 }
 0x38e   : > { %v7031_v50 = vpop.eup %4874  ;;  %v7036_v38 = vadd.f32 1.0, %v7026_v55 }
 0x38f   : > { %vm4007_vm8 = vweird.f32 %v7029_v19 }
 0x390   : > { %vm3977_vm9 = vweird.f32 %v7036_v38 }
 0x395   : > { %v3536_v48 = vpop.f32.mrf.mxu0  ;;  %v3556_v63 = vpop.f32.mrf.mxu1 }
 0x396   : > { %v3537_v0 = vadd.f32 %v3536_v48, %v6687_v41  ;;  %v3557_v16 = vadd.f32 %v3556_v63, %v6687_v41  ;;  %v7039_v63 = vpop.eup %4876 }
 0x397   : > { %vm3993_vm2 = vweird.f32 %v7039_v63 }
 0x398   : > { %v3611_v40 = vmax.f32 %v3537_v0, 0.0  ;;  %v3612_v5 = vmax.f32 %v3557_v16, 0.0  ;;  %v7042_v0 = vadd.f32 1.0, %v7031_v50  ;;  %vm7095_vm4 = vmor %vm3992_vm3, %vm3993_vm2 }
 0x39a   : > { %v3633_v1 = vmul.f32 %v6695_v56, %v3611_v40  ;;  %v3634_v27 = vmul.f32 %v6695_v56, %v3612_v5 }
 0x39c   : > { %v3709_v62 = vrot.slane %v3633_v1, 4  ;;  %v3715_v61 = vrot.slane %v3634_v27, 4 }
 0x39e   : > { %v3710_v10 = vadd.f32 %v3709_v62, %v3633_v1  ;;  %v3716_v37 = vadd.f32 %v3715_v61, %v3634_v27 }
 0x3a0   : > { %v3711_v21 = vrot.slane %v3710_v10, 2  ;;  %v3717_v9 = vrot.slane %v3716_v37, 2 }
 0x3a2   : > { %v3712_v46 = vadd.f32 %v3711_v21, %v3710_v10  ;;  %v3718_v13 = vadd.f32 %v3717_v9, %v3716_v37 }
 0x3a4   : > { %v3713_v33 = vrot.slane %v3712_v46, 1  ;;  %v3719_v26 = vrot.slane %v3718_v13, 1 }
 0x3a6   : > { %v3714_v23 = vadd.f32 %v3713_v33, %v3712_v46  ;;  %v3720_v15 = vadd.f32 %v3719_v26, %v3718_v13 }
 0x3a8   : > { %v7009_v29 = vadd.f32 %v6703_v44, %v3714_v23  ;;  %v7014_v18 = vadd.f32 %v6703_v44, %v3720_v15 }
 0x3aa   : > { %v3768_v31 = vand.u32 2147483647, %v7009_v29  ;;  %v3769_v4 = vand.u32 2147483647, %v7014_v18 }
 0x3ac   : > { %v3784_v34 = vsub.f32 0.0, %v3768_v31  ;;  %v3785_v6 = vsub.f32 0.0, %v3769_v4 }
 0x3ae   : > { %v3812_v58 = vmul.f32 1.442695, %v3784_v34  ;;  %v3576_v36 = vpop.f32.mrf.mxu2  ;;  %v3596_v24 = vpop.f32.mrf.mxu3  ;;  %v3814_v49 = vmul.f32 1.442695, %v3785_v6 }
 0x3af   : > { %v3577_v43 = vadd.f32 %v3576_v36, %v6687_v41  ;;  %v3597_v59 = vadd.f32 %v3596_v24, %v6687_v41 }
 0x3b0   : > { %4878 = vpow2.f32 %v3812_v58  ;;  %v3998_v58 = vand.u32 2147483648, %v7019_v39 }
 0x3b1   : > { %v3613_v45 = vmax.f32 %v3577_v43, 0.0  ;;  %v3614_v54 = vmax.f32 %v3597_v59, 0.0  ;;  %4880 = vpow2.f32 %v3814_v49  ;;  %v3996_v43 = vand.u32 2147483647, %v7019_v39 }
 0x3b2   : > { %4882 = vrcp.f32 %v7029_v19 }
 0x3b3   : > { %v3635_v51 = vmul.f32 %v6695_v56, %v3613_v45  ;;  %v3636_v57 = vmul.f32 %v6695_v56, %v3614_v54  ;;  %4884 = vrcp.f32 %v7036_v38  ;;  %v3988_v56 = vmul.f32 %v7039_v63, %v7019_v39 }
 0x3b4   : > { %4886 = vrcp.f32 %v7042_v0  ;;  %vm3997_vm7 = vcmp.eq.f32.partialorder %v3996_v43, 8.507059e+37 }
 0x3b5   : > { %v3721_v41 = vrot.slane %v3635_v51, 4  ;;  %v3727_v48 = vrot.slane %v3636_v57, 4  ;;  %v3989_v10 = vsub.f32 1.0, %v3988_v56 }
 0x3b6   : > { %v7044_v16 = vpop.eup %4878 }
 0x3b7   : > { %v3722_v35 = vadd.f32 %v3721_v41, %v3635_v51  ;;  %v3728_v11 = vadd.f32 %v3727_v48, %v3636_v57  ;;  %v7046_v40 = vpop.eup %4880  ;;  %v7053_v5 = vadd.f32 1.0, %v7044_v16  ;;  %v3990_v46 = vmul.f32 %v7039_v63, %v3989_v10 }
 0x3b8   : > { %v7055_v17 = vpop.eup %4882  ;;  %v7058_v1 = vadd.f32 1.0, %v7046_v40  ;;  %v3999_v48 = vor.u32 1.1754944e-38, %v3998_v58 }
 0x3b9   : > { %v3723_v14 = vrot.slane %v3722_v35, 2  ;;  %v3729_v27 = vrot.slane %v3728_v11, 2  ;;  %v7060_v61 = vpop.eup %4884  ;;  %v4003_v30 = vmul.f32 %v7055_v17, %v7029_v19  ;;  %4888 = vrcp.f32 %v7053_v5 }
 0x3ba   : > { %4890 = vrcp.f32 %v7058_v1  ;;  %v7066_v3 = vpop.eup %4886  ;;  %v3973_v21 = vmul.f32 %v7060_v61, %v7036_v38  ;;  %v3991_v7 = vadd.f32 %v7039_v63, %v3990_v46  ;;  %vm3978_vm5 = vweird.f32 %v7060_v61 }
 0x3bb   : > { %v3724_v42 = vadd.f32 %v3723_v14, %v3722_v35  ;;  %v3730_v62 = vadd.f32 %v3729_v27, %v3728_v11  ;;  %v4004_v28 = vsub.f32 1.0, %v4003_v30  ;;  %v4018_v13 = vmul.f32 %v7066_v3, %v7042_v0  ;;  %vm7127_vm3 = vmor %vm3977_vm9, %vm3978_vm5 }
 0x3bc   : > { %v3974_v23 = vsub.f32 1.0, %v3973_v21  ;;  %v3995_v54 = vsel %vm7095_vm4, %v7039_v63, %v3991_v7  ;;  %vm4008_vm6 = vweird.f32 %v7055_v17  ;;  %v4013_v35 = vand.u32 2147483648, %v7029_v19 }
 0x3bd   : > { %v3725_v52 = vrot.slane %v3724_v42, 1  ;;  %v3731_v37 = vrot.slane %v3730_v62, 1  ;;  %v4005_v31 = vmul.f32 %v7055_v17, %v4004_v28  ;;  %v4019_v4 = vsub.f32 1.0, %v4018_v13  ;;  %vm7114_vm10 = vmor %vm4007_vm8, %vm4008_vm6 }
 0x3be   : > { %v3975_v24 = vmul.f32 %v7060_v61, %v3974_v23  ;;  %v4011_v63 = vand.u32 2147483647, %v7029_v19  ;;  %v4000_v56 = vsel %vm3997_vm7, %v3999_v48, %v3995_v54  ;;  %v4028_v27 = vand.u32 2147483648, %v7042_v0 }
 0x3bf   : > { %v3726_v32 = vadd.f32 %v3725_v52, %v3724_v42  ;;  %v3732_v9 = vadd.f32 %v3731_v37, %v3730_v62  ;;  %v7079_v12 = vpop.eup %4888  ;;  %v4006_v51 = vadd.f32 %v7055_v17, %v4005_v31  ;;  %v4020_v57 = vmul.f32 %v7066_v3, %v4019_v4 }
 0x3c0   : > { %v7081_v26 = vpop.eup %4890  ;;  %v3976_v11 = vadd.f32 %v7060_v61, %v3975_v24  ;;  %vm4023_vm2 = vweird.f32 %v7066_v3  ;;  %v3981_v30 = vand.u32 2147483647, %v7036_v38  ;;  %v3983_v52 = vand.u32 2147483648, %v7036_v38 }
 0x3c1   : > { %v7074_v53 = vadd.f32 %v6703_v44, %v3726_v32  ;;  %v7077_v33 = vadd.f32 %v6703_v44, %v3732_v9  ;;  %v4033_v44 = vmul.f32 %v7079_v12, %v7053_v5  ;;  %v4048_v36 = vmul.f32 %v7081_v26, %v7058_v1 }
 0x3c2   : > { %v4010_v42 = vsel %vm7114_vm10, %v7055_v17, %v4006_v51  ;;  %v4021_v62 = vadd.f32 %v7066_v3, %v4020_v57  ;;  %v4014_v37 = vor.u32 1.1754944e-38, %v4013_v35  ;;  %v3980_v32 = vsel %vm7127_vm3, %v7060_v61, %v3976_v11 }
 0x3c3   : > { %v3770_v8 = vand.u32 2147483647, %v7074_v53  ;;  %v3771_v15 = vand.u32 2147483647, %v7077_v33  ;;  %v4034_v41 = vsub.f32 1.0, %v4033_v44  ;;  %v4049_v39 = vsub.f32 1.0, %v4048_v36 }
 0x3c4   : > { %vm4012_vm4 = vcmp.eq.f32.partialorder %v4011_v63, 8.507059e+37  ;;  %vm4022_vm6 = vweird.f32 %v7042_v0  ;;  %v4026_v9 = vand.u32 2147483647, %v7042_v0  ;;  %v4101_v28 = vmul.f32 %v7011_v60, %v4000_v56 }
 0x3c5   : > { %v3786_v34 = vsub.f32 0.0, %v3770_v8  ;;  %v3787_v6 = vsub.f32 0.0, %v3771_v15  ;;  %v4035_v19 = vmul.f32 %v7079_v12, %v4034_v41  ;;  %v4050_v21 = vmul.f32 %v7081_v26, %v4049_v39  ;;  %vm7146_vm5 = vmor %vm4022_vm6, %vm4023_vm2 }
 0x3c6   : > { %v4015_v13 = vsel %vm4012_vm4, %v4014_v37, %v4010_v42  ;;  %v4029_v23 = vor.u32 1.1754944e-38, %v4028_v27  ;;  %v4025_v61 = vsel %vm7146_vm5, %v7066_v3, %v4021_v62  ;;  %vm4038_vm7 = vweird.f32 %v7079_v12 }
 0x3c7   : > { %v3816_v59 = vmul.f32 1.442695, %v3786_v34  ;;  %v3818_v45 = vmul.f32 1.442695, %v3787_v6  ;;  %v4036_v0 = vadd.f32 %v7079_v12, %v4035_v19  ;;  %v4043_v15 = vand.u32 2147483648, %v7053_v5 }
 0x3c8   : > { %v4051_v7 = vadd.f32 %v7081_v26, %v4050_v21  ;;  %vm4053_vm8 = vweird.f32 %v7081_v26  ;;  %vm4037_vm9 = vweird.f32 %v7053_v5  ;;  %v4041_v31 = vand.u32 2147483647, %v7053_v5 }
 0x3c9   : > { %4892 = vpow2.f32 %v3816_v59  ;;  %v4058_v3 = vand.u32 2147483648, %v7058_v1  ;;  %v4102_v4 = vmul.f32 %v7021_v2, %v4015_v13  ;;  %vm4027_vm10 = vcmp.eq.f32.partialorder %v4026_v9, 8.507059e+37  ;;  %vm7170_vm2 = vmor %vm4037_vm9, %vm4038_vm7 }
 0x3ca   : > { %4894 = vpow2.f32 %v3818_v45  ;;  %vm4052_vm3 = vweird.f32 %v7058_v1  ;;  %v4056_v34 = vand.u32 2147483647, %v7058_v1  ;;  %v3984_v6 = vor.u32 1.1754944e-38, %v3983_v52 }
 0x3cb   : > { %vm3829_vm4 = vcmp.ge.f32.partialorder %v6983_v22, 0.0  ;;  %v4030_v58 = vsel %vm4027_vm10, %v4029_v23, %v4025_v61  ;;  %v4040_v5 = vsel %vm7170_vm2, %v7079_v12, %v4036_v0  ;;  %vm7182_vm6 = vmor %vm4052_vm3, %vm4053_vm8  ;;  %vm3982_vm5 = vcmp.eq.f32.partialorder %v3981_v30, 8.507059e+37 }
 0x3cc   : > { %vm3830_vm7 = vcmp.ge.f32.partialorder %v6995_v20, 0.0  ;;  %v4044_v36 = vor.u32 1.1754944e-38, %v4043_v15  ;;  %v4055_v1 = vsel %vm7182_vm6, %v7081_v26, %v4051_v7  ;;  %v3985_v22 = vsel %vm3982_vm5, %v3984_v6, %v3980_v32 }
 0x3cd   : > { %v4117_v24 = vsel %vm3829_vm4, %v4000_v56, %v4101_v28  ;;  %vm4042_vm9 = vcmp.eq.f32.partialorder %v4041_v31, 8.507059e+37  ;;  %v4059_v49 = vor.u32 1.1754944e-38, %v4058_v3  ;;  %v4118_v12 = vsel %vm3830_vm7, %v4015_v13, %v4102_v4 }
 0x3ce   : > { %v4103_v59 = vmul.f32 %v7031_v50, %v4030_v58  ;;  %v4045_v45 = vsel %vm4042_vm9, %v4044_v36, %v4040_v5  ;;  %vm4057_vm8 = vcmp.eq.f32.partialorder %v4056_v34, 8.507059e+37  ;;  %vm3831_vm10 = vcmp.ge.f32.partialorder %v7004_v47, 0.0 }
 0x3cf   : > { %v7134_v17 = vpop.eup %4892  ;;  %v4060_v51 = vsel %vm4057_vm8, %v4059_v49, %v4055_v1  ;;  %v4100_v26 = vmul.f32 %v7026_v55, %v3985_v22  ;;  %v4104_v41 = vmul.f32 %v7044_v16, %v4045_v45  ;;  %vm3832_vm3 = vcmp.ge.f32.partialorder %v7009_v29, 0.0 }
 0x3d0   : > { %v7141_v46 = vpop.eup %4894  ;;  %v7151_v8 = vadd.f32 1.0, %v7134_v17  ;;  %v4119_v35 = vsel %vm3831_vm10, %v4030_v58, %v4103_v59  ;;  %v4105_v50 = vmul.f32 %v7046_v40, %v4060_v51  ;;  %vm3833_vm6 = vcmp.ge.f32.partialorder %v7014_v18, 0.0 }
 0x3d1   : > { %v7159_v60 = vadd.f32 1.0, %v7141_v46  ;;  %v4120_v16 = vsel %vm3832_vm3, %v4045_v45, %v4104_v41 }
 0x3d2   : > { %4896 = vrcp.f32 %v7151_v8  ;;  %v4073_v39 = vand.u32 2147483648, %v7151_v8  ;;  %v4071_v56 = vand.u32 2147483647, %v7151_v8  ;;  %vm4067_vm5 = vweird.f32 %v7151_v8 }
 0x3d3   : > { %4898 = vrcp.f32 %v7159_v60  ;;  %v4088_v47 = vand.u32 2147483648, %v7159_v60  ;;  %v4086_v55 = vand.u32 2147483647, %v7159_v60  ;;  %v4121_v42 = vsel %vm3833_vm6, %v4060_v51, %v4105_v50 }
 0x3d4   : > { %4900 = vpow2.f32 %v4117_v24  ;;  %v4074_v62 = vor.u32 1.1754944e-38, %v4073_v39  ;;  %vm4082_vm9 = vweird.f32 %v7159_v60  ;;  %vm4072_vm8 = vcmp.eq.f32.partialorder %v4071_v56, 8.507059e+37 }
 0x3d5   : > { %4902 = vpow2.f32 %v4118_v12  ;;  %v4089_v30 = vor.u32 1.1754944e-38, %v4088_v47  ;;  %vm4087_vm3 = vcmp.eq.f32.partialorder %v4086_v55, 8.507059e+37  ;;  %vm3828_vm6 = vcmp.ge.f32.partialorder %v6999_v25, 0.0 }
 0x3d6   : > { %4904 = vpow2.f32 %v4119_v35  ;;  %v4116_v28 = vsel %vm3828_vm6, %v3985_v22, %v4100_v26 }
 0x3d7   : > { %4906 = vpow2.f32 %v4120_v16 }
 0x3d8   : > { %v4897_v43 = vpop.eup %4896  ;;  %4908 = vpow2.f32 %v4121_v42 }
 0x3d9   : > { %v4899_v54 = vpop.eup %4898  ;;  %v4063_v57 = vmul.f32 %v4897_v43, %v7151_v8  ;;  %vm4068_vm2 = vweird.f32 %v4897_v43 }
 0x3da   : > { %v4078_v20 = vmul.f32 %v4899_v54, %v7159_v60  ;;  %vm4083_vm4 = vweird.f32 %v4899_v54  ;;  %v4901_v40 = vpop.eup %4900  ;;  %vm4069_vm7 = vmor %vm4067_vm5, %vm4068_vm2  ;;  %vm3834_vm2 = vcmp.ge.f32.partialorder %v7074_v53, 0.0  ;;  %vm3835_vm5 = vcmp.ge.f32.partialorder %v7077_v33, 0.0 }
 0x3db   : > { %v4064_v48 = vsub.f32 1.0, %v4063_v57  ;;  %v4903_v10 = vpop.eup %4902  ;;  %vm4084_vm10 = vmor %vm4082_vm9, %vm4083_vm4  ;;  %v4163_v53 = vrot.slane %v4901_v40, 7 }
 0x3dc   : > { %v4079_v11 = vsub.f32 1.0, %v4078_v20  ;;  %v4905_v38 = vpop.eup %4904 }
 0x3dd   : > { %v4065_v63 = vmul.f32 %v4897_v43, %v4064_v48  ;;  %v4907_v23 = vpop.eup %4906  ;;  %v4165_v61 = vrot.slane %v4905_v38, 5 }
 0x3de   : > { %v4080_v14 = vmul.f32 %v4899_v54, %v4079_v11  ;;  %v4909_v8 = vpop.eup %4908 }
 0x3df   : > { %v4066_v27 = vadd.f32 %v4897_v43, %v4065_v63  ;;  %v4167_v33 = vrot.slane %v4909_v8, 3 }
 0x3e0   : > { %v4081_v19 = vadd.f32 %v4899_v54, %v4080_v14 }
 0x3e1   : > { %v4070_v29 = vsel %vm4069_vm7, %v4897_v43, %v4066_v27 }
 0x3e2   : > { %v4075_v52 = vsel %vm4072_vm8, %v4074_v62, %v4070_v29  ;;  %v4085_v18 = vsel %vm4084_vm10, %v4899_v54, %v4081_v19 }
 0x3e3   : > { %v4106_v37 = vmul.f32 %v7134_v17, %v4075_v52  ;;  %v4090_v21 = vsel %vm4087_vm3, %v4089_v30, %v4085_v18  ;;  %v4164_v17 = vrot.slane %v4903_v10, 6 }
 0x3e4   : > { %v4107_v32 = vmul.f32 %v7141_v46, %v4090_v21  ;;  %v4166_v46 = vrot.slane %v4907_v23, 4 }
 0x3e5   : > { %v4122_v9 = vsel %vm3834_vm2, %v4075_v52, %v4106_v37  ;;  %v4185_v7 = vsel %vm4172_vm12, %v4164_v17, %v4165_v61 }
 0x3e6   : > { %4910 = vpow2.f32 %v4122_v9  ;;  %v4123_v13 = vsel %vm3835_vm5, %v4090_v21, %v4107_v32  ;;  %v4187_v4 = vsel %vm4176_vm14, %v4166_v46, %v4167_v33 }
 0x3e7   : > { %4912 = vpow2.f32 %v4123_v13 }
 0x3e8   : > { %4914 = vpow2.f32 %v4116_v28 }
 0x3ec   : > { %v4911_v25 = vpop.eup %4910 }
 0x3ed   : > { %v4913_v0 = vpop.eup %4912  ;;  %v4168_v60 = vrot.slane %v4911_v25, 2 }
 0x3ee   : > { %v4169_v15 = vrot.slane %v4913_v0, 1  ;;  %v4915_v31 = vpop.eup %4914 }
 0x3ef   : > { %v4184_v3 = vsel %vm4170_vm11, %v4915_v31, %v4163_v53 }
 0x3f0   : > { %v4188_v44 = vsel %vm4178_vm13, %v4168_v60, %v4169_v15  ;;  %v4186_v34 = vsel %vm4174_vm15, %v4184_v3, %v4185_v7 }
 0x3f1   : > { %v4189_v6 = vsel %vm4180_vm0, %v4187_v4, %v4188_v44 }
 0x3f2   : > { %v4190_v58 = vsel %vm4182_vm1, %v4186_v34, %v4189_v6 }
 0x3f3   : > { %4194 = vst [vmem:[%s6988_s12 + $0x8] sm:$0xff] %v4190_v58 }
 0x3f4   : > { %4951 = shalt.err (!%p4948_p3)
}
 0x3f5   : > { %4777 = dma.vmem_to_hbm [thread:$0]  (%p5090_p5), %s4209_s10, 256, %s4211_s17, %s4196_s18  }
 0x3f6 PF: > { %p4783_p4 = scmp.ge.s32.totalorder %s4986_s22, 2  ;;  %s4222_s26 = sand.u32 1, %s4974_s19  }
 0x3f7   : > { %s4223_s12 = scalar_lea.sflag [#allocation4], %s4222_s26 }
 0x3f8   : > { %p4780_p7 = pnand %p4783_p4, %p5094_p6 }
 0x3fa   : > { %p4781_p8 = pneg %p4780_p7 }
 0x3fc   : > { %4969 = dma.done.wait (%p4781_p8), %s4223_s12, 256  }
 0x3fd   : > { %4971 = vsyncadd (%p4781_p8), %s4223_s12, 4294967040  ;;  %p23_p9 = scmp.ge.s32.totalorder %s5077_s24, 4   ;;  %s7297_s19 = smov %s4978_s20 }
 0x3fe   : > { %s7298_s20 = smov %s4982_s21  ;;  %s7299_s21 = smov %s5088_s27 }
 0x3ff   : > { %s7300_s22 = smov %s5077_s24  ;;  %25 = sbr.rel (!%p23_p9) target bundleno = 6 (0x6), region = 99 }
 0x404   :  { %4229 = vsyncpa [#allocation4], 1 }
 0x405   :  { %4231 = vsyncpa [#allocation4 + $0x1], 1 }

// kernel: tpu_custom_call.1
= control target key start
LH: loop header
LB: loop body
LE: loop exit
PB: predicated region body
PF: predicated region fallthrough
CT: control target
= control target key end

     0   :  { %s7253_s0 = inlined_call_operand.vmem [shape: f32[4096,32], index: 0, kind: input, shape index: {}]   ;;  %s7254_s1 = inlined_call_operand.vmem [shape: f32[64,32], index: 1, kind: input, shape index: {}]   ;;  %s7255_s2 = inlined_call_operand.vmem [shape: f32[64,1], index: 2, kind: input, shape index: {}]   ;;  %s7256_s3 = inlined_call_operand.vmem [shape: f32[32,64], index: 3, kind: input, shape index: {}]   ;;  %s7257_s4 = inlined_call_operand.vmem [shape: f32[32,1], index: 4, kind: input, shape index: {}]   ;;  %s7258_s5 = inlined_call_operand.vmem [shape: f32[16,32], index: 5, kind: input, shape index: {}]   ;;  %s7259_s6 = inlined_call_operand.vmem [shape: f32[16,1], index: 6, kind: input, shape index: {}]   ;;  %s7260_s7 = inlined_call_operand.vmem [shape: f32[8,16], index: 7, kind: input, shape index: {}]   ;;  %s7261_s8 = inlined_call_operand.vmem [shape: f32[8,1], index: 8, kind: input, shape index: {}]   ;;  %s7262_s9 = inlined_call_operand.vmem [shape: f32[8,1], index: 9, kind: input, shape index: {}]   ;;  %s7263_s10 = inlined_call_operand.<no memory space> [shape: f32[1,1], index: 10, kind: input, shape index: {}]   ;;  %s7264_s11 = inlined_call_operand.hbm [shape: f32[1,4096], index: 11, kind: output, shape index: {}]  }
   0x1   :  { %v16_v0 = vstv %s7263_s10 }
   0x2   :  { %17 = vst [vmem:[#allocation2] sm:$0x1] %v16_v0 }
   0x3   :  { %18 = vsyncpa [#allocation4], 0 }
   0x4   :  { %20 = vsyncpa [#allocation4 + $0x1], 0  ;;  %s5052_s19 = smov 0   ;;  %s5054_s20 = smov 0  }
   0x5   :  { %s5056_s21 = smov 0   ;;  %s5058_s22 = smov 0  }
   0x6 LB: > { %s5073_s10 = sadd.s32 4294967295, %s4986_s22   ;;  %s4270_s23 = sadd.s32 4294967294, %s4986_s22   ;;  %s4986_s22 = sphi %s5058_s22, %s7300_s22   ;;  %s4982_s21 = sphi %s5056_s21, %s7299_s21   ;;  %s4978_s20 = sphi %s5054_s20, %s7298_s20   ;;  %s4974_s19 = sphi %s5052_s19, %s7297_s19  }
   0x7   : > { %s5077_s24 = sadd.s32 1, %s4986_s22   ;;  %s269_s25 = sadd.s32 1, %s4982_s21 }
   0x8   : > { %s266_s26 = ssub.s32 %s4986_s22, %s5077_s24  ;;  %p279_p0 = scmp.ne.s32.totalorder %s4982_s21, %s4978_s20 }
   0x9   : > { %p267_p1 = scmp.eq.s32.totalorder %s266_s26, 0  ;;  %p280_p2 = scmp.eq.s32.totalorder %s5073_s10, 1 }
   0xa   : > { %p285_p3 = scmp.ne.s32.totalorder %s4978_s20, %s4974_s19  ;;  %p286_p4 = scmp.eq.s32.totalorder %s4270_s23, 1 }
   0xb   : > { %s5088_s27 = scalar_select %p267_p1, %s4982_s21, %s269_s25  }
   0xc   : > { %p5090_p5 = por %p280_p2, %p279_p0  ;;  %p5094_p6 = por %p286_p4, %p285_p3 }
   0xd   : > { %p4273_p7 = scmp.ge.s32.totalorder %s4986_s22, 1  ;;  %p343_p8 = scmp.lt.s32.totalorder %s4986_s22, 3 }
   0xf   : > { %p344_p9 = pnand %p4273_p7, %p343_p8 }
  0x10   : > { %s4275_s30 = sshll.u32 (!%p344_p9), %s5073_s10, 8  ;;  %s380_s26 = sand.u32 (!%p344_p9), 1, %s4978_s20  }
  0x11   : > { %347 = sbr.rel (%p344_p9) target bundleno = 1014 (0x3f6), region = 64  ;;  %p384_p10 = scmp.lt.s32.totalorder (!%p344_p9), %s4275_s30, 511 }
  0x12   : > { %s4196_s18 = scalar_lea.sflag (!%p344_p9), [#allocation4], %s380_s26  ;;  %s4944_s13 = scalar_lea.hbm (!%p344_p9), %s7264_s11, 32 }
  0x16   : > { %s7302_s30 = smov (!%p384_p10, %s4275_s30), 511  ;;  %vm702_vm0 = vcmask 261120   ;;  %v4988_v37 = vmov 0   ;;  %v659_v38 = vld [vmem:[%s7255_s2 + $0x28] sm:$0xff]  ;;  %v661_v47 = vld [vmem:[%s7255_s2 + $0x38] sm:$0xff]  ;;  %v658_v48 = vld [vmem:[%s7255_s2 + $0x20] sm:$0xff] }
  0x17   : > { %s4276_s12 = sshll.u32 %s7302_s30, 3  ;;  %4818 = vset.pattern.permute.xlu1 %v4988_v37  ;;  %4817 = vset.pattern.permute.xlu0 %v4988_v37  ;;  %v660_v57 = vld [vmem:[%s7255_s2 + $0x30] sm:$0xff]  ;;  %v654_v58 = vld [vmem:[%s7255_s2] sm:$0xff]  ;;  %vm2307_vm1 = vcmask 523264   ;;  %vm3275_vm2 = vcmask 130048   ;;  %s4274_s30 = sshll.u32 %s380_s26, 4 }
  0x18   : > { %s5104_s15 = scalar_lea.vmem %s7253_s0, %s4276_s12  ;;  %4819 = vset.pattern.permute.xlu2 %v4988_v37  ;;  %689 = vperm.xlu1 %4818, %v659_v38   ;;  %v5345_v38 = vld [vmem:[%s7254_s1 + $0x18] sm:$0xff]  ;;  %s6988_s12 = scalar_lea.vmem [#allocation3], %s4274_s30 }
  0x19   : > { %v405_v1 = vld [vmem:[%s5104_s15 + $0x78] sm:$0xff]  ;;  %v404_v5 = vld [vmem:[%s5104_s15 + $0x70] sm:$0xff]  ;;  %v403_v9 = vld [vmem:[%s5104_s15 + $0x68] sm:$0xff]  ;;  %699 = vperm.xlu0 %4817, %v661_v47  }
  0x1a   : > { %v421_v2 = vld [vmem:[%s5104_s15 + $0xf8] sm:$0xff]  ;;  %4277 = vmatpush.xpose.msk.msra.mxu0 %vm702_vm0, %v405_v1  ;;  %v420_v6 = vld [vmem:[%s5104_s15 + $0xf0] sm:$0xff]  ;;  %v419_v10 = vld [vmem:[%s5104_s15 + $0xe8] sm:$0xff] }
  0x1b   : > { %v437_v3 = vld [vmem:[%s5104_s15 + $0x178] sm:$0xff]  ;;  %4301 = vmatpush.xpose.msk.msra.mxu1 %vm702_vm0, %v421_v2  ;;  %v436_v7 = vld [vmem:[%s5104_s15 + $0x170] sm:$0xff]  ;;  %v435_v11 = vld [vmem:[%s5104_s15 + $0x168] sm:$0xff] }
  0x1c   : > { %v453_v4 = vld [vmem:[%s5104_s15 + $0x1f8] sm:$0xff]  ;;  %4325 = vmatpush.xpose.msk.msra.mxu2 %vm702_vm0, %v437_v3  ;;  %v452_v8 = vld [vmem:[%s5104_s15 + $0x1f0] sm:$0xff]  ;;  %v451_v12 = vld [vmem:[%s5104_s15 + $0x1e8] sm:$0xff] }
  0x1d   : > { %4349 = vmatpush.xpose.msk.msra.mxu3 %vm702_vm0, %v453_v4  ;;  %v402_v13 = vld [vmem:[%s5104_s15 + $0x60] sm:$0xff]  ;;  %v401_v17 = vld [vmem:[%s5104_s15 + $0x58] sm:$0xff]  ;;  %v400_v21 = vld [vmem:[%s5104_s15 + $0x50] sm:$0xff] }
  0x1e   : > { %4278 = vmatpush.xpose.msk.msra.mxu0 %vm702_vm0, %v404_v5  ;;  %v418_v14 = vld [vmem:[%s5104_s15 + $0xe0] sm:$0xff]  ;;  %v417_v18 = vld [vmem:[%s5104_s15 + $0xd8] sm:$0xff]  ;;  %v416_v22 = vld [vmem:[%s5104_s15 + $0xd0] sm:$0xff] }
  0x1f   : > { %4302 = vmatpush.xpose.msk.msra.mxu1 %vm702_vm0, %v420_v6  ;;  %v434_v15 = vld [vmem:[%s5104_s15 + $0x160] sm:$0xff]  ;;  %v433_v19 = vld [vmem:[%s5104_s15 + $0x158] sm:$0xff]  ;;  %v432_v23 = vld [vmem:[%s5104_s15 + $0x150] sm:$0xff] }
  0x20   : > { %4326 = vmatpush.xpose.msk.msra.mxu2 %vm702_vm0, %v436_v7  ;;  %v450_v16 = vld [vmem:[%s5104_s15 + $0x1e0] sm:$0xff]  ;;  %v449_v20 = vld [vmem:[%s5104_s15 + $0x1d8] sm:$0xff]  ;;  %v448_v24 = vld [vmem:[%s5104_s15 + $0x1d0] sm:$0xff]  ;;  %684 = vperm.xlu1 %4818, %v658_v48  }
  0x21   : > { %4350 = vmatpush.xpose.msk.msra.mxu3 %vm702_vm0, %v452_v8  ;;  %v399_v25 = vld [vmem:[%s5104_s15 + $0x48] sm:$0xff]  ;;  %v398_v29 = vld [vmem:[%s5104_s15 + $0x40] sm:$0xff]  ;;  %v397_v33 = vld [vmem:[%s5104_s15 + $0x38] sm:$0xff]  ;;  %694 = vperm.xlu0 %4817, %v660_v57  }
  0x22   : > { %4279 = vmatpush.xpose.msk.msra.mxu0 %vm702_vm0, %v403_v9  ;;  %v415_v26 = vld [vmem:[%s5104_s15 + $0xc8] sm:$0xff]  ;;  %v414_v30 = vld [vmem:[%s5104_s15 + $0xc0] sm:$0xff]  ;;  %v413_v34 = vld [vmem:[%s5104_s15 + $0xb8] sm:$0xff] }
  0x23   : > { %4303 = vmatpush.xpose.msk.msra.mxu1 %vm702_vm0, %v419_v10  ;;  %v431_v27 = vld [vmem:[%s5104_s15 + $0x148] sm:$0xff]  ;;  %v430_v31 = vld [vmem:[%s5104_s15 + $0x140] sm:$0xff]  ;;  %v429_v35 = vld [vmem:[%s5104_s15 + $0x138] sm:$0xff] }
  0x24   : > { %4327 = vmatpush.xpose.msk.msra.mxu2 %vm702_vm0, %v435_v11  ;;  %v447_v28 = vld [vmem:[%s5104_s15 + $0x1c8] sm:$0xff]  ;;  %v446_v32 = vld [vmem:[%s5104_s15 + $0x1c0] sm:$0xff]  ;;  %v445_v36 = vld [vmem:[%s5104_s15 + $0x1b8] sm:$0xff] }
  0x25   : > { %4351 = vmatpush.xpose.msk.msra.mxu3 %vm702_vm0, %v451_v12  ;;  %v396_v39 = vld [vmem:[%s5104_s15 + $0x30] sm:$0xff]  ;;  %v395_v43 = vld [vmem:[%s5104_s15 + $0x28] sm:$0xff]  ;;  %v394_v49 = vld [vmem:[%s5104_s15 + $0x20] sm:$0xff] }
  0x26   : > { %4280 = vmatpush.xpose.msk.msra.mxu0 %vm702_vm0, %v402_v13  ;;  %v412_v40 = vld [vmem:[%s5104_s15 + $0xb0] sm:$0xff]  ;;  %v411_v44 = vld [vmem:[%s5104_s15 + $0xa8] sm:$0xff]  ;;  %v410_v50 = vld [vmem:[%s5104_s15 + $0xa0] sm:$0xff] }
  0x27   : > { %4304 = vmatpush.xpose.msk.msra.mxu1 %vm702_vm0, %v418_v14  ;;  %v428_v41 = vld [vmem:[%s5104_s15 + $0x130] sm:$0xff]  ;;  %v427_v45 = vld [vmem:[%s5104_s15 + $0x128] sm:$0xff]  ;;  %v426_v51 = vld [vmem:[%s5104_s15 + $0x120] sm:$0xff] }
  0x28   : > { %4328 = vmatpush.xpose.msk.msra.mxu2 %vm702_vm0, %v434_v15  ;;  %v444_v42 = vld [vmem:[%s5104_s15 + $0x1b0] sm:$0xff]  ;;  %v443_v46 = vld [vmem:[%s5104_s15 + $0x1a8] sm:$0xff]  ;;  %v442_v52 = vld [vmem:[%s5104_s15 + $0x1a0] sm:$0xff]  ;;  %664 = vperm.xlu1 %4818, %v654_v58  }
  0x29   : > { %4352 = vmatpush.xpose.msk.msra.mxu3 %vm702_vm0, %v450_v16  ;;  %v393_v53 = vld [vmem:[%s5104_s15 + $0x18] sm:$0xff]  ;;  %v392_v59 = vld [vmem:[%s5104_s15 + $0x10] sm:$0xff]  ;;  %v391_v63 = vld [vmem:[%s5104_s15 + $0x8] sm:$0xff] }
  0x2a   : > { %4281 = vmatpush.xpose.msk.msra.mxu0 %vm702_vm0, %v401_v17  ;;  %v409_v54 = vld [vmem:[%s5104_s15 + $0x98] sm:$0xff]  ;;  %v408_v60 = vld [vmem:[%s5104_s15 + $0x90] sm:$0xff]  ;;  %v407_v0 = vld [vmem:[%s5104_s15 + $0x88] sm:$0xff] }
  0x2b   : > { %4305 = vmatpush.xpose.msk.msra.mxu1 %vm702_vm0, %v417_v18  ;;  %v425_v55 = vld [vmem:[%s5104_s15 + $0x118] sm:$0xff]  ;;  %v424_v61 = vld [vmem:[%s5104_s15 + $0x110] sm:$0xff]  ;;  %v423_v1 = vld [vmem:[%s5104_s15 + $0x108] sm:$0xff] }
  0x2c   : > { %4329 = vmatpush.xpose.msk.msra.mxu2 %vm702_vm0, %v433_v19  ;;  %v441_v56 = vld [vmem:[%s5104_s15 + $0x198] sm:$0xff]  ;;  %v440_v62 = vld [vmem:[%s5104_s15 + $0x190] sm:$0xff]  ;;  %v439_v2 = vld [vmem:[%s5104_s15 + $0x188] sm:$0xff] }
  0x2d   : > { %4353 = vmatpush.xpose.msk.msra.mxu3 %vm702_vm0, %v449_v20  ;;  %v655_v3 = vld [vmem:[%s7255_s2 + $0x8] sm:$0xff]  ;;  %v390_v4 = vld [vmem:[%s5104_s15] sm:$0xff]  ;;  %v469_v8 = vld [vmem:[%s5104_s15 + $0x278] sm:$0xff] }
  0x2e   : > { %4282 = vmatpush.xpose.msk.msra.mxu0 %vm702_vm0, %v400_v21  ;;  %v406_v5 = vld [vmem:[%s5104_s15 + $0x80] sm:$0xff]  ;;  %669 = vperm.xlu0 %4817, %v655_v3   ;;  %v485_v9 = vld [vmem:[%s5104_s15 + $0x2f8] sm:$0xff]  ;;  %v468_v13 = vld [vmem:[%s5104_s15 + $0x270] sm:$0xff] }
  0x2f   : > { %4306 = vmatpush.xpose.msk.msra.mxu1 %vm702_vm0, %v416_v22  ;;  %v422_v6 = vld [vmem:[%s5104_s15 + $0x100] sm:$0xff]  ;;  %v501_v11 = vld [vmem:[%s5104_s15 + $0x378] sm:$0xff]  ;;  %v484_v14 = vld [vmem:[%s5104_s15 + $0x2f0] sm:$0xff] }
  0x30   : > { %4330 = vmatpush.xpose.msk.msra.mxu2 %vm702_vm0, %v432_v23  ;;  %v438_v7 = vld [vmem:[%s5104_s15 + $0x180] sm:$0xff]  ;;  %v517_v12 = vld [vmem:[%s5104_s15 + $0x3f8] sm:$0xff]  ;;  %v500_v15 = vld [vmem:[%s5104_s15 + $0x370] sm:$0xff] }
  0x31   : > { %4354 = vmatpush.xpose.msk.msra.mxu3 %vm702_vm0, %v448_v24  ;;  %v5255_v10 = vld [vmem:[%s7254_s1] sm:$0xff]  ;;  %v516_v16 = vld [vmem:[%s5104_s15 + $0x3f0] sm:$0xff]  ;;  %v467_v17 = vld [vmem:[%s5104_s15 + $0x268] sm:$0xff] }
  0x32   : > { %4283 = vmatpush.xpose.msk.msra.mxu0 %vm702_vm0, %v399_v25  ;;  %v483_v18 = vld [vmem:[%s5104_s15 + $0x2e8] sm:$0xff]  ;;  %v466_v22 = vld [vmem:[%s5104_s15 + $0x260] sm:$0xff]  ;;  %v477_v47 = vld [vmem:[%s5104_s15 + $0x2b8] sm:$0xff] }
  0x33   : > { %4307 = vmatpush.xpose.msk.msra.mxu1 %vm702_vm0, %v415_v26  ;;  %v5284_v19 = vld [vmem:[%s7254_s1 + $0x8] sm:$0xff]  ;;  %v482_v23 = vld [vmem:[%s5104_s15 + $0x2e0] sm:$0xff]  ;;  %v465_v26 = vld [vmem:[%s5104_s15 + $0x258] sm:$0xff] }
  0x34   : > { %4331 = vmatpush.xpose.msk.msra.mxu2 %vm702_vm0, %v431_v27  ;;  %v499_v20 = vld [vmem:[%s5104_s15 + $0x368] sm:$0xff]  ;;  %v498_v24 = vld [vmem:[%s5104_s15 + $0x360] sm:$0xff]  ;;  %v481_v27 = vld [vmem:[%s5104_s15 + $0x2d8] sm:$0xff] }
  0x35   : > { %4355 = vmatpush.xpose.msk.msra.mxu3 %vm702_vm0, %v447_v28  ;;  %v515_v21 = vld [vmem:[%s5104_s15 + $0x3e8] sm:$0xff]  ;;  %v514_v25 = vld [vmem:[%s5104_s15 + $0x3e0] sm:$0xff]  ;;  %v5313_v28 = vld [vmem:[%s7254_s1 + $0x10] sm:$0xff] }
  0x36   : > { %4284 = vmatpush.xpose.msk.msra.mxu0 %vm702_vm0, %v398_v29  ;;  %v497_v29 = vld [vmem:[%s5104_s15 + $0x358] sm:$0xff]  ;;  %v479_v37 = vld [vmem:[%s5104_s15 + $0x2c8] sm:$0xff]  ;;  %v5377_v48 = vld [vmem:[%s7254_s1 + $0x20] sm:$0xff] }
  0x37   : > { %4308 = vmatpush.xpose.msk.msra.mxu1 %vm702_vm0, %v414_v30  ;;  %v513_v30 = vld [vmem:[%s5104_s15 + $0x3d8] sm:$0xff]  ;;  %v5406_v57 = vld [vmem:[%s7254_s1 + $0x28] sm:$0xff] }
  0x38   : > { %4332 = vmatpush.xpose.msk.msra.mxu2 %vm702_vm0, %v430_v31  ;;  %v464_v31 = vld [vmem:[%s5104_s15 + $0x250] sm:$0xff]  ;;  %v491_v58 = vld [vmem:[%s5104_s15 + $0x328] sm:$0xff]  ;;  %v489_v3 = vld [vmem:[%s5104_s15 + $0x318] sm:$0xff] }
  0x39   : > { %4356 = vmatpush.xpose.msk.msra.mxu3 %vm702_vm0, %v446_v32  ;;  %v480_v32 = vld [vmem:[%s5104_s15 + $0x2d0] sm:$0xff] }
  0x3a   : > { %4285 = vmatpush.xpose.msk.msra.mxu0 %vm702_vm0, %v397_v33  ;;  %v657_v33 = vld [vmem:[%s7255_s2 + $0x18] sm:$0xff] }
  0x3b   : > { %4309 = vmatpush.xpose.msk.msra.mxu1 %vm702_vm0, %v413_v34  ;;  %v496_v34 = vld [vmem:[%s5104_s15 + $0x350] sm:$0xff]  ;;  %679 = vperm.xlu2 %4819, %v657_v33   ;;  %v530_v33 = vld [vmem:[%s5104_s15 + $0x460] sm:$0xff] }
  0x3c   : > { %4333 = vmatpush.xpose.msk.msra.mxu2 %vm702_vm0, %v429_v35  ;;  %v512_v35 = vld [vmem:[%s5104_s15 + $0x3d0] sm:$0xff] }
  0x3d   : > { %4357 = vmatpush.xpose.msk.msra.mxu3 %vm702_vm0, %v445_v36  ;;  %v463_v36 = vld [vmem:[%s5104_s15 + $0x248] sm:$0xff] }
  0x3e   : > { %4286 = vmatpush.xpose.msk.msra.mxu0 %vm702_vm0, %v396_v39  ;;  %v495_v39 = vld [vmem:[%s5104_s15 + $0x348] sm:$0xff] }
  0x3f   : > { %4310 = vmatpush.xpose.msk.msra.mxu1 %vm702_vm0, %v412_v40  ;;  %v511_v40 = vld [vmem:[%s5104_s15 + $0x3c8] sm:$0xff] }
  0x40   : > { %4334 = vmatpush.xpose.msk.msra.mxu2 %vm702_vm0, %v428_v41  ;;  %v462_v41 = vld [vmem:[%s5104_s15 + $0x240] sm:$0xff] }
  0x41   : > { %4358 = vmatpush.xpose.msk.msra.mxu3 %vm702_vm0, %v444_v42  ;;  %v478_v42 = vld [vmem:[%s5104_s15 + $0x2c0] sm:$0xff] }
  0x42   : > { %4287 = vmatpush.xpose.msk.msra.mxu0 %vm702_vm0, %v395_v43  ;;  %v656_v43 = vld [vmem:[%s7255_s2 + $0x10] sm:$0xff] }
  0x43   : > { %4311 = vmatpush.xpose.msk.msra.mxu1 %vm702_vm0, %v411_v44  ;;  %v494_v44 = vld [vmem:[%s5104_s15 + $0x340] sm:$0xff]  ;;  %674 = vperm.xlu2 %4819, %v656_v43   ;;  %v544_v43 = vld [vmem:[%s5104_s15 + $0x4d0] sm:$0xff] }
  0x44   : > { %4335 = vmatpush.xpose.msk.msra.mxu2 %vm702_vm0, %v427_v45  ;;  %v510_v45 = vld [vmem:[%s5104_s15 + $0x3c0] sm:$0xff] }
  0x45   : > { %4359 = vmatpush.xpose.msk.msra.mxu3 %vm702_vm0, %v443_v46  ;;  %v461_v46 = vld [vmem:[%s5104_s15 + $0x238] sm:$0xff] }
  0x46   : > { %4288 = vmatpush.xpose.msk.msra.mxu0 %vm702_vm0, %v394_v49  ;;  %v493_v49 = vld [vmem:[%s5104_s15 + $0x338] sm:$0xff] }
  0x47   : > { %4312 = vmatpush.xpose.msk.msra.mxu1 %vm702_vm0, %v410_v50  ;;  %v509_v50 = vld [vmem:[%s5104_s15 + $0x3b8] sm:$0xff] }
  0x48   : > { %4336 = vmatpush.xpose.msk.msra.mxu2 %vm702_vm0, %v426_v51  ;;  %v460_v51 = vld [vmem:[%s5104_s15 + $0x230] sm:$0xff] }
  0x49   : > { %4360 = vmatpush.xpose.msk.msra.mxu3 %vm702_vm0, %v442_v52  ;;  %v476_v52 = vld [vmem:[%s5104_s15 + $0x2b0] sm:$0xff] }
  0x4a   : > { %4289 = vmatpush.xpose.msk.msra.mxu0 %vm702_vm0, %v393_v53  ;;  %v492_v53 = vld [vmem:[%s5104_s15 + $0x330] sm:$0xff] }
  0x4b   : > { %4313 = vmatpush.xpose.msk.msra.mxu1 %vm702_vm0, %v409_v54  ;;  %v508_v54 = vld [vmem:[%s5104_s15 + $0x3b0] sm:$0xff] }
  0x4c   : > { %4337 = vmatpush.xpose.msk.msra.mxu2 %vm702_vm0, %v425_v55  ;;  %v459_v55 = vld [vmem:[%s5104_s15 + $0x228] sm:$0xff] }
  0x4d   : > { %4361 = vmatpush.xpose.msk.msra.mxu3 %vm702_vm0, %v441_v56  ;;  %v475_v56 = vld [vmem:[%s5104_s15 + $0x2a8] sm:$0xff] }
  0x4e   : > { %4290 = vmatpush.xpose.msk.msra.mxu0 %vm702_vm0, %v392_v59  ;;  %v507_v59 = vld [vmem:[%s5104_s15 + $0x3a8] sm:$0xff] }
  0x4f   : > { %4314 = vmatpush.xpose.msk.msra.mxu1 %vm702_vm0, %v408_v60  ;;  %v458_v60 = vld [vmem:[%s5104_s15 + $0x220] sm:$0xff] }
  0x50   : > { %4338 = vmatpush.xpose.msk.msra.mxu2 %vm702_vm0, %v424_v61  ;;  %v474_v61 = vld [vmem:[%s5104_s15 + $0x2a0] sm:$0xff] }
  0x51   : > { %4362 = vmatpush.xpose.msk.msra.mxu3 %vm702_vm0, %v440_v62  ;;  %v490_v62 = vld [vmem:[%s5104_s15 + $0x320] sm:$0xff] }
  0x52   : > { %4291 = vmatpush.xpose.msk.msra.mxu0 %vm702_vm0, %v391_v63  ;;  %v506_v63 = vld [vmem:[%s5104_s15 + $0x3a0] sm:$0xff] }
  0x53   : > { %4315 = vmatpush.xpose.msk.msra.mxu1 %vm702_vm0, %v407_v0  ;;  %v457_v0 = vld [vmem:[%s5104_s15 + $0x218] sm:$0xff] }
  0x54   : > { %4339 = vmatpush.xpose.msk.msra.mxu2 %vm702_vm0, %v423_v1  ;;  %v473_v1 = vld [vmem:[%s5104_s15 + $0x298] sm:$0xff] }
  0x55   : > { %4363 = vmatpush.xpose.msk.msra.mxu3 %vm702_vm0, %v439_v2  ;;  %v5435_v2 = vld [vmem:[%s7254_s1 + $0x30] sm:$0xff] }
  0x56   : > { %4292 = vmatpush.xpose.msk.msra.mxu0 %vm702_vm0, %v390_v4  ;;  %v505_v4 = vld [vmem:[%s5104_s15 + $0x398] sm:$0xff] }
  0x57   : > { %4316 = vmatpush.xpose.msk.msra.mxu1 %vm702_vm0, %v406_v5  ;;  %v456_v5 = vld [vmem:[%s5104_s15 + $0x210] sm:$0xff] }
  0x58   : > { %4340 = vmatpush.xpose.msk.msra.mxu2 %vm702_vm0, %v422_v6  ;;  %v472_v6 = vld [vmem:[%s5104_s15 + $0x290] sm:$0xff] }
  0x59   : > { %4364 = vmatpush.xpose.msk.msra.mxu3 %vm702_vm0, %v438_v7  ;;  %4293 = vmatmul.msk.f32.vlgmr.msra.gmra.mxu0 %vm702_vm0, %v5255_v10  ;;  %v488_v7 = vld [vmem:[%s5104_s15 + $0x310] sm:$0xff] }
  0x5a   : > { %4373 = vmatpush.xpose.msk.msrb.mxu0 %vm702_vm0, %v469_v8  ;;  %4317 = vmatmul.msk.f32.vlgmr.msra.gmra.mxu1 %vm702_vm0, %v5255_v10  ;;  %v504_v8 = vld [vmem:[%s5104_s15 + $0x390] sm:$0xff] }
  0x5b   : > { %4397 = vmatpush.xpose.msk.msrb.mxu1 %vm702_vm0, %v485_v9  ;;  %4341 = vmatmul.msk.f32.vlgmr.msra.gmra.mxu2 %vm702_vm0, %v5255_v10  ;;  %v455_v9 = vld [vmem:[%s5104_s15 + $0x208] sm:$0xff] }
  0x5c   : > { %4365 = vmatmul.msk.f32.vlgmr.msra.gmra.mxu3 %vm702_vm0, %v5255_v10  ;;  %4421 = vmatpush.xpose.msk.msrb.mxu2 %vm702_vm0, %v501_v11  ;;  %v471_v11 = vld [vmem:[%s5104_s15 + $0x288] sm:$0xff] }
  0x5d   : > { %4445 = vmatpush.xpose.msk.msrb.mxu3 %vm702_vm0, %v517_v12  ;;  %v5464_v12 = vld [vmem:[%s7254_s1 + $0x38] sm:$0xff] }
  0x5e   : > { %4374 = vmatpush.xpose.msk.msrb.mxu0 %vm702_vm0, %v468_v13  ;;  %v487_v13 = vld [vmem:[%s5104_s15 + $0x308] sm:$0xff] }
  0x5f   : > { %4398 = vmatpush.xpose.msk.msrb.mxu1 %vm702_vm0, %v484_v14  ;;  %v503_v14 = vld [vmem:[%s5104_s15 + $0x388] sm:$0xff] }
  0x60   : > { %4422 = vmatpush.xpose.msk.msrb.mxu2 %vm702_vm0, %v500_v15  ;;  %v454_v15 = vld [vmem:[%s5104_s15 + $0x200] sm:$0xff] }
  0x61   : > { %4446 = vmatpush.xpose.msk.msrb.mxu3 %vm702_vm0, %v516_v16  ;;  %4294 = vmatmul.msk.f32.gmra.mxu0 %vm702_vm0, %v5284_v19  ;;  %v470_v16 = vld [vmem:[%s5104_s15 + $0x280] sm:$0xff] }
  0x62   : > { %4375 = vmatpush.xpose.msk.msrb.mxu0 %vm702_vm0, %v467_v17  ;;  %4318 = vmatmul.msk.f32.gmra.mxu1 %vm702_vm0, %v5284_v19  ;;  %v533_v17 = vld [vmem:[%s5104_s15 + $0x478] sm:$0xff] }
  0x63   : > { %4399 = vmatpush.xpose.msk.msrb.mxu1 %vm702_vm0, %v483_v18  ;;  %4342 = vmatmul.msk.f32.gmra.mxu2 %vm702_vm0, %v5284_v19  ;;  %v549_v18 = vld [vmem:[%s5104_s15 + $0x4f8] sm:$0xff] }
  0x64   : > { %4366 = vmatmul.msk.f32.gmra.mxu3 %vm702_vm0, %v5284_v19  ;;  %4423 = vmatpush.xpose.msk.msrb.mxu2 %vm702_vm0, %v499_v20  ;;  %v486_v20 = vld [vmem:[%s5104_s15 + $0x300] sm:$0xff] }
  0x65   : > { %4447 = vmatpush.xpose.msk.msrb.mxu3 %vm702_vm0, %v515_v21  ;;  %v502_v21 = vld [vmem:[%s5104_s15 + $0x380] sm:$0xff] }
  0x66   : > { %4376 = vmatpush.xpose.msk.msrb.mxu0 %vm702_vm0, %v466_v22  ;;  %v565_v22 = vld [vmem:[%s5104_s15 + $0x578] sm:$0xff] }
  0x67   : > { %4400 = vmatpush.xpose.msk.msrb.mxu1 %vm702_vm0, %v482_v23  ;;  %v581_v23 = vld [vmem:[%s5104_s15 + $0x5f8] sm:$0xff] }
  0x68   : > { %4424 = vmatpush.xpose.msk.msrb.mxu2 %vm702_vm0, %v498_v24  ;;  %v532_v24 = vld [vmem:[%s5104_s15 + $0x470] sm:$0xff] }
  0x69   : > { %4448 = vmatpush.xpose.msk.msrb.mxu3 %vm702_vm0, %v514_v25  ;;  %4295 = vmatmul.msk.f32.gmra.mxu0 %vm702_vm0, %v5313_v28  ;;  %v548_v25 = vld [vmem:[%s5104_s15 + $0x4f0] sm:$0xff] }
  0x6a   : > { %4377 = vmatpush.xpose.msk.msrb.mxu0 %vm702_vm0, %v465_v26  ;;  %4319 = vmatmul.msk.f32.gmra.mxu1 %vm702_vm0, %v5313_v28  ;;  %v564_v26 = vld [vmem:[%s5104_s15 + $0x570] sm:$0xff] }
  0x6b   : > { %4401 = vmatpush.xpose.msk.msrb.mxu1 %vm702_vm0, %v481_v27  ;;  %4343 = vmatmul.msk.f32.gmra.mxu2 %vm702_vm0, %v5313_v28  ;;  %v580_v27 = vld [vmem:[%s5104_s15 + $0x5f0] sm:$0xff] }
  0x6c   : > { %4367 = vmatmul.msk.f32.gmra.mxu3 %vm702_vm0, %v5313_v28  ;;  %4425 = vmatpush.xpose.msk.msrb.mxu2 %vm702_vm0, %v497_v29  ;;  %v531_v29 = vld [vmem:[%s5104_s15 + $0x468] sm:$0xff] }
  0x6d   : > { %4449 = vmatpush.xpose.msk.msrb.mxu3 %vm702_vm0, %v513_v30  ;;  %v547_v30 = vld [vmem:[%s5104_s15 + $0x4e8] sm:$0xff] }
  0x6e   : > { %4378 = vmatpush.xpose.msk.msrb.mxu0 %vm702_vm0, %v464_v31  ;;  %v563_v31 = vld [vmem:[%s5104_s15 + $0x568] sm:$0xff] }
  0x6f   : > { %4402 = vmatpush.xpose.msk.msrb.mxu1 %vm702_vm0, %v480_v32  ;;  %v579_v32 = vld [vmem:[%s5104_s15 + $0x5e8] sm:$0xff] }
  0x70   : > { %4426 = vmatpush.xpose.msk.msrb.mxu2 %vm702_vm0, %v496_v34  ;;  %v546_v34 = vld [vmem:[%s5104_s15 + $0x4e0] sm:$0xff] }
  0x71   : > { %4450 = vmatpush.xpose.msk.msrb.mxu3 %vm702_vm0, %v512_v35  ;;  %4296 = vmatmul.msk.f32.gmra.mxu0 %vm702_vm0, %v5345_v38  ;;  %v562_v35 = vld [vmem:[%s5104_s15 + $0x560] sm:$0xff] }
  0x72   : > { %4379 = vmatpush.xpose.msk.msrb.mxu0 %vm702_vm0, %v463_v36  ;;  %4320 = vmatmul.msk.f32.gmra.mxu1 %vm702_vm0, %v5345_v38  ;;  %v578_v36 = vld [vmem:[%s5104_s15 + $0x5e0] sm:$0xff] }
  0x73   : > { %4403 = vmatpush.xpose.msk.msrb.mxu1 %vm702_vm0, %v479_v37  ;;  %4344 = vmatmul.msk.f32.gmra.mxu2 %vm702_vm0, %v5345_v38  ;;  %v529_v37 = vld [vmem:[%s5104_s15 + $0x458] sm:$0xff] }
  0x74   : > { %4368 = vmatmul.msk.f32.gmra.mxu3 %vm702_vm0, %v5345_v38  ;;  %4427 = vmatpush.xpose.msk.msrb.mxu2 %vm702_vm0, %v495_v39  ;;  %v545_v39 = vld [vmem:[%s5104_s15 + $0x4d8] sm:$0xff] }
  0x75   : > { %4451 = vmatpush.xpose.msk.msrb.mxu3 %vm702_vm0, %v511_v40  ;;  %v561_v40 = vld [vmem:[%s5104_s15 + $0x558] sm:$0xff] }
  0x76   : > { %4380 = vmatpush.xpose.msk.msrb.mxu0 %vm702_vm0, %v462_v41  ;;  %v577_v41 = vld [vmem:[%s5104_s15 + $0x5d8] sm:$0xff] }
  0x77   : > { %4404 = vmatpush.xpose.msk.msrb.mxu1 %vm702_vm0, %v478_v42  ;;  %v528_v42 = vld [vmem:[%s5104_s15 + $0x450] sm:$0xff] }
  0x78   : > { %4428 = vmatpush.xpose.msk.msrb.mxu2 %vm702_vm0, %v494_v44  ;;  %v560_v44 = vld [vmem:[%s5104_s15 + $0x550] sm:$0xff] }
  0x79   : > { %4452 = vmatpush.xpose.msk.msrb.mxu3 %vm702_vm0, %v510_v45  ;;  %4297 = vmatmul.msk.f32.gmra.mxu0 %vm702_vm0, %v5377_v48  ;;  %v576_v45 = vld [vmem:[%s5104_s15 + $0x5d0] sm:$0xff] }
  0x7a   : > { %4381 = vmatpush.xpose.msk.msrb.mxu0 %vm702_vm0, %v461_v46  ;;  %4321 = vmatmul.msk.f32.gmra.mxu1 %vm702_vm0, %v5377_v48  ;;  %v527_v46 = vld [vmem:[%s5104_s15 + $0x448] sm:$0xff] }
  0x7b   : > { %4405 = vmatpush.xpose.msk.msrb.mxu1 %vm702_vm0, %v477_v47  ;;  %4345 = vmatmul.msk.f32.gmra.mxu2 %vm702_vm0, %v5377_v48  ;;  %v543_v47 = vld [vmem:[%s5104_s15 + $0x4c8] sm:$0xff] }
  0x7c   : > { %4369 = vmatmul.msk.f32.gmra.mxu3 %vm702_vm0, %v5377_v48  ;;  %4429 = vmatpush.xpose.msk.msrb.mxu2 %vm702_vm0, %v493_v49  ;;  %v559_v49 = vld [vmem:[%s5104_s15 + $0x548] sm:$0xff] }
  0x7d   : > { %4453 = vmatpush.xpose.msk.msrb.mxu3 %vm702_vm0, %v509_v50  ;;  %v575_v50 = vld [vmem:[%s5104_s15 + $0x5c8] sm:$0xff] }
  0x7e   : > { %4382 = vmatpush.xpose.msk.msrb.mxu0 %vm702_vm0, %v460_v51  ;;  %v526_v51 = vld [vmem:[%s5104_s15 + $0x440] sm:$0xff] }
  0x7f   : > { %4406 = vmatpush.xpose.msk.msrb.mxu1 %vm702_vm0, %v476_v52  ;;  %v542_v52 = vld [vmem:[%s5104_s15 + $0x4c0] sm:$0xff] }
  0x80   : > { %4430 = vmatpush.xpose.msk.msrb.mxu2 %vm702_vm0, %v492_v53  ;;  %v558_v53 = vld [vmem:[%s5104_s15 + $0x540] sm:$0xff] }
  0x81   : > { %4454 = vmatpush.xpose.msk.msrb.mxu3 %vm702_vm0, %v508_v54  ;;  %4298 = vmatmul.msk.f32.gmra.mxu0 %vm702_vm0, %v5406_v57  ;;  %v574_v54 = vld [vmem:[%s5104_s15 + $0x5c0] sm:$0xff] }
  0x82   : > { %4383 = vmatpush.xpose.msk.msrb.mxu0 %vm702_vm0, %v459_v55  ;;  %4322 = vmatmul.msk.f32.gmra.mxu1 %vm702_vm0, %v5406_v57  ;;  %v2285_v55 = vld [vmem:[%s7257_s4 + $0x10] sm:$0xff] }
  0x83   : > { %4407 = vmatpush.xpose.msk.msrb.mxu1 %vm702_vm0, %v475_v56  ;;  %4346 = vmatmul.msk.f32.gmra.mxu2 %vm702_vm0, %v5406_v57  ;;  %v525_v56 = vld [vmem:[%s5104_s15 + $0x438] sm:$0xff] }
  0x84   : > { %4370 = vmatmul.msk.f32.gmra.mxu3 %vm702_vm0, %v5406_v57  ;;  %4431 = vmatpush.xpose.msk.msrb.mxu2 %vm702_vm0, %v491_v58  ;;  %v541_v58 = vld [vmem:[%s5104_s15 + $0x4b8] sm:$0xff] }
  0x85   : > { %4455 = vmatpush.xpose.msk.msrb.mxu3 %vm702_vm0, %v507_v59  ;;  %v557_v59 = vld [vmem:[%s5104_s15 + $0x538] sm:$0xff]  ;;  %2299 = vperm.xlu0 %4817, %v2285_v55   ;;  %v610_v55 = vld [vmem:[%s5104_s15 + $0x6e0] sm:$0xff] }
  0x86   : > { %4384 = vmatpush.xpose.msk.msrb.mxu0 %vm702_vm0, %v458_v60  ;;  %v573_v60 = vld [vmem:[%s5104_s15 + $0x5b8] sm:$0xff] }
  0x87   : > { %4408 = vmatpush.xpose.msk.msrb.mxu1 %vm702_vm0, %v474_v61  ;;  %v524_v61 = vld [vmem:[%s5104_s15 + $0x430] sm:$0xff] }
  0x88   : > { %4432 = vmatpush.xpose.msk.msrb.mxu2 %vm702_vm0, %v490_v62  ;;  %v540_v62 = vld [vmem:[%s5104_s15 + $0x4b0] sm:$0xff] }
  0x89   : > { %4456 = vmatpush.xpose.msk.msrb.mxu3 %vm702_vm0, %v506_v63  ;;  %4299 = vmatmul.msk.f32.gmra.mxu0 %vm702_vm0, %v5435_v2  ;;  %v556_v63 = vld [vmem:[%s5104_s15 + $0x530] sm:$0xff] }
  0x8a   : > { %4385 = vmatpush.xpose.msk.msrb.mxu0 %vm702_vm0, %v457_v0  ;;  %4323 = vmatmul.msk.f32.gmra.mxu1 %vm702_vm0, %v5435_v2  ;;  %v572_v0 = vld [vmem:[%s5104_s15 + $0x5b0] sm:$0xff] }
  0x8b   : > { %4409 = vmatpush.xpose.msk.msrb.mxu1 %vm702_vm0, %v473_v1  ;;  %4347 = vmatmul.msk.f32.gmra.mxu2 %vm702_vm0, %v5435_v2  ;;  %v2851_v1 = vld [vmem:[%s7259_s6 + $0x8] sm:$0xff] }
  0x8c   : > { %4371 = vmatmul.msk.f32.gmra.mxu3 %vm702_vm0, %v5435_v2  ;;  %4433 = vmatpush.xpose.msk.msrb.mxu2 %vm702_vm0, %v489_v3  ;;  %v523_v3 = vld [vmem:[%s5104_s15 + $0x428] sm:$0xff] }
  0x8d   : > { %4457 = vmatpush.xpose.msk.msrb.mxu3 %vm702_vm0, %v505_v4  ;;  %v539_v4 = vld [vmem:[%s5104_s15 + $0x4a8] sm:$0xff]  ;;  %2859 = vperm.xlu0 %4817, %v2851_v1  }
  0x8e   : > { %4386 = vmatpush.xpose.msk.msrb.mxu0 %vm702_vm0, %v456_v5  ;;  %v555_v5 = vld [vmem:[%s5104_s15 + $0x528] sm:$0xff] }
  0x8f   : > { %4410 = vmatpush.xpose.msk.msrb.mxu1 %vm702_vm0, %v472_v6  ;;  %v571_v6 = vld [vmem:[%s5104_s15 + $0x5a8] sm:$0xff] }
  0x90   : > { %4434 = vmatpush.xpose.msk.msrb.mxu2 %vm702_vm0, %v488_v7  ;;  %v522_v7 = vld [vmem:[%s5104_s15 + $0x420] sm:$0xff] }
  0x91   : > { %4458 = vmatpush.xpose.msk.msrb.mxu3 %vm702_vm0, %v504_v8  ;;  %4300 = vmatmul.msk.f32.gmra.mxu0 %vm702_vm0, %v5464_v12  ;;  %v538_v8 = vld [vmem:[%s5104_s15 + $0x4a0] sm:$0xff] }
  0x92   : > { %4387 = vmatpush.xpose.msk.msrb.mxu0 %vm702_vm0, %v455_v9  ;;  %4324 = vmatmul.msk.f32.gmra.mxu1 %vm702_vm0, %v5464_v12  ;;  %v554_v9 = vld [vmem:[%s5104_s15 + $0x520] sm:$0xff] }
  0x93   : > { %4411 = vmatpush.xpose.msk.msrb.mxu1 %vm702_vm0, %v471_v11  ;;  %4348 = vmatmul.msk.f32.gmra.mxu2 %vm702_vm0, %v5464_v12  ;;  %v570_v11 = vld [vmem:[%s5104_s15 + $0x5a0] sm:$0xff] }
  0x94   : > { %4372 = vmatmul.msk.f32.gmra.mxu3 %vm702_vm0, %v5464_v12  ;;  %4435 = vmatpush.xpose.msk.msrb.mxu2 %vm702_vm0, %v487_v13  ;;  %v3615_v13 = vld [vmem:[%s7262_s9] sm:$0xff] }
  0x95   : > { %4459 = vmatpush.xpose.msk.msrb.mxu3 %vm702_vm0, %v503_v14  ;;  %v2284_v14 = vld [vmem:[%s7257_s4 + $0x8] sm:$0xff]  ;;  %3618 = vperm.xlu0 %4817, %v3615_v13  }
  0x96   : > { %4388 = vmatpush.xpose.msk.msrb.mxu0 %vm702_vm0, %v454_v15  ;;  %v521_v15 = vld [vmem:[%s5104_s15 + $0x418] sm:$0xff]  ;;  %2294 = vperm.xlu1 %4818, %v2284_v14   ;;  %v623_v13 = vld [vmem:[%s5104_s15 + $0x748] sm:$0xff] }
  0x97   : > { %4412 = vmatpush.xpose.msk.msrb.mxu1 %vm702_vm0, %v470_v16  ;;  %v537_v16 = vld [vmem:[%s5104_s15 + $0x498] sm:$0xff]  ;;  %v639_v14 = vld [vmem:[%s5104_s15 + $0x7c8] sm:$0xff] }
  0x98   : > { %4436 = vmatpush.xpose.msk.msrb.mxu2 %vm702_vm0, %v486_v20  ;;  %v520_v20 = vld [vmem:[%s5104_s15 + $0x410] sm:$0xff] }
  0x99   : > { %4460 = vmatpush.xpose.msk.msrb.mxu3 %vm702_vm0, %v502_v21  ;;  %4389 = vmatmul.msk.f32.vlgmr.msrb.gmra.mxu0 %vm702_vm0, %v5255_v10  ;;  %v536_v21 = vld [vmem:[%s5104_s15 + $0x490] sm:$0xff] }
  0x9a   : > { %4469 = vmatpush.xpose.msk.msra.mxu0 %vm702_vm0, %v533_v17  ;;  %4413 = vmatmul.msk.f32.vlgmr.msrb.gmra.mxu1 %vm702_vm0, %v5255_v10  ;;  %v553_v17 = vld [vmem:[%s5104_s15 + $0x518] sm:$0xff] }
  0x9b   : > { %4493 = vmatpush.xpose.msk.msra.mxu1 %vm702_vm0, %v549_v18  ;;  %4437 = vmatmul.msk.f32.vlgmr.msrb.gmra.mxu2 %vm702_vm0, %v5255_v10  ;;  %v569_v18 = vld [vmem:[%s5104_s15 + $0x598] sm:$0xff] }
  0x9c   : > { %4517 = vmatpush.xpose.msk.msra.mxu2 %vm702_vm0, %v565_v22  ;;  %4461 = vmatmul.msk.f32.vlgmr.msrb.gmra.mxu3 %vm702_vm0, %v5255_v10  ;;  %v552_v22 = vld [vmem:[%s5104_s15 + $0x510] sm:$0xff] }
  0x9d   : > { %4541 = vmatpush.xpose.msk.msra.mxu3 %vm702_vm0, %v581_v23  ;;  %v568_v23 = vld [vmem:[%s5104_s15 + $0x590] sm:$0xff] }
  0x9e   : > { %4470 = vmatpush.xpose.msk.msra.mxu0 %vm702_vm0, %v532_v24  ;;  %v2850_v24 = vld [vmem:[%s7259_s6] sm:$0xff] }
  0x9f   : > { %4494 = vmatpush.xpose.msk.msra.mxu1 %vm702_vm0, %v548_v25  ;;  %v519_v25 = vld [vmem:[%s5104_s15 + $0x408] sm:$0xff]  ;;  %2854 = vperm.xlu1 %4818, %v2850_v24   ;;  %v605_v24 = vld [vmem:[%s5104_s15 + $0x6b8] sm:$0xff] }
  0xa0   : > { %4518 = vmatpush.xpose.msk.msra.mxu2 %vm702_vm0, %v564_v26  ;;  %v535_v26 = vld [vmem:[%s5104_s15 + $0x488] sm:$0xff] }
  0xa1   : > { %4542 = vmatpush.xpose.msk.msra.mxu3 %vm702_vm0, %v580_v27  ;;  %4390 = vmatmul.msk.f32.gmra.mxu0 %vm702_vm0, %v5284_v19  ;;  %v551_v27 = vld [vmem:[%s5104_s15 + $0x508] sm:$0xff] }
  0xa2   : > { %4471 = vmatpush.xpose.msk.msra.mxu0 %vm702_vm0, %v531_v29  ;;  %4414 = vmatmul.msk.f32.gmra.mxu1 %vm702_vm0, %v5284_v19  ;;  %v567_v29 = vld [vmem:[%s5104_s15 + $0x588] sm:$0xff] }
  0xa3   : > { %4495 = vmatpush.xpose.msk.msra.mxu1 %vm702_vm0, %v547_v30  ;;  %4438 = vmatmul.msk.f32.gmra.mxu2 %vm702_vm0, %v5284_v19  ;;  %v518_v30 = vld [vmem:[%s5104_s15 + $0x400] sm:$0xff] }
  0xa4   : > { %4519 = vmatpush.xpose.msk.msra.mxu2 %vm702_vm0, %v563_v31  ;;  %4462 = vmatmul.msk.f32.gmra.mxu3 %vm702_vm0, %v5284_v19  ;;  %v534_v31 = vld [vmem:[%s5104_s15 + $0x480] sm:$0xff] }
  0xa5   : > { %4543 = vmatpush.xpose.msk.msra.mxu3 %vm702_vm0, %v579_v32  ;;  %v550_v32 = vld [vmem:[%s5104_s15 + $0x500] sm:$0xff] }
  0xa6   : > { %4472 = vmatpush.xpose.msk.msra.mxu0 %vm702_vm0, %v530_v33  ;;  %v566_v33 = vld [vmem:[%s5104_s15 + $0x580] sm:$0xff] }
  0xa7   : > { %4496 = vmatpush.xpose.msk.msra.mxu1 %vm702_vm0, %v546_v34  ;;  %v597_v34 = vld [vmem:[%s5104_s15 + $0x678] sm:$0xff] }
  0xa8   : > { %4520 = vmatpush.xpose.msk.msra.mxu2 %vm702_vm0, %v562_v35  ;;  %v613_v35 = vld [vmem:[%s5104_s15 + $0x6f8] sm:$0xff] }
  0xa9   : > { %4544 = vmatpush.xpose.msk.msra.mxu3 %vm702_vm0, %v578_v36  ;;  %4391 = vmatmul.msk.f32.gmra.mxu0 %vm702_vm0, %v5313_v28  ;;  %v629_v36 = vld [vmem:[%s5104_s15 + $0x778] sm:$0xff] }
  0xaa   : > { %4473 = vmatpush.xpose.msk.msra.mxu0 %vm702_vm0, %v529_v37  ;;  %4415 = vmatmul.msk.f32.gmra.mxu1 %vm702_vm0, %v5313_v28  ;;  %v645_v37 = vld [vmem:[%s5104_s15 + $0x7f8] sm:$0xff] }
  0xab   : > { %4497 = vmatpush.xpose.msk.msra.mxu1 %vm702_vm0, %v545_v39  ;;  %4439 = vmatmul.msk.f32.gmra.mxu2 %vm702_vm0, %v5313_v28  ;;  %v3733_v39 = vld [vmem:[#allocation2] sm:$0x1] }
  0xac   : > { %4521 = vmatpush.xpose.msk.msra.mxu2 %vm702_vm0, %v561_v40  ;;  %4463 = vmatmul.msk.f32.gmra.mxu3 %vm702_vm0, %v5313_v28 }
  0xad   : > { %4545 = vmatpush.xpose.msk.msra.mxu3 %vm702_vm0, %v577_v41  ;;  %3736 = vperm.xlu1 %4818, %v3733_v39  }
  0xae   : > { %4474 = vmatpush.xpose.msk.msra.mxu0 %vm702_vm0, %v528_v42  ;;  %v596_v42 = vld [vmem:[%s5104_s15 + $0x670] sm:$0xff] }
  0xaf   : > { %4498 = vmatpush.xpose.msk.msra.mxu1 %vm702_vm0, %v544_v43  ;;  %v612_v43 = vld [vmem:[%s5104_s15 + $0x6f0] sm:$0xff] }
  0xb0   : > { %4522 = vmatpush.xpose.msk.msra.mxu2 %vm702_vm0, %v560_v44  ;;  %v628_v44 = vld [vmem:[%s5104_s15 + $0x770] sm:$0xff] }
  0xb1   : > { %4546 = vmatpush.xpose.msk.msra.mxu3 %vm702_vm0, %v576_v45  ;;  %4392 = vmatmul.msk.f32.gmra.mxu0 %vm702_vm0, %v5345_v38  ;;  %v644_v45 = vld [vmem:[%s5104_s15 + $0x7f0] sm:$0xff] }
  0xb2   : > { %4475 = vmatpush.xpose.msk.msra.mxu0 %vm702_vm0, %v527_v46  ;;  %4416 = vmatmul.msk.f32.gmra.mxu1 %vm702_vm0, %v5345_v38  ;;  %v595_v46 = vld [vmem:[%s5104_s15 + $0x668] sm:$0xff] }
  0xb3   : > { %4499 = vmatpush.xpose.msk.msra.mxu1 %vm702_vm0, %v543_v47  ;;  %4440 = vmatmul.msk.f32.gmra.mxu2 %vm702_vm0, %v5345_v38  ;;  %v611_v47 = vld [vmem:[%s5104_s15 + $0x6e8] sm:$0xff] }
  0xb4   : > { %4523 = vmatpush.xpose.msk.msra.mxu2 %vm702_vm0, %v559_v49  ;;  %4464 = vmatmul.msk.f32.gmra.mxu3 %vm702_vm0, %v5345_v38 }
  0xb5   : > { %4547 = vmatpush.xpose.msk.msra.mxu3 %vm702_vm0, %v575_v50 }
  0xb6   : > { %4476 = vmatpush.xpose.msk.msra.mxu0 %vm702_vm0, %v526_v51  ;;  %v627_v51 = vld [vmem:[%s5104_s15 + $0x768] sm:$0xff] }
  0xb7   : > { %4500 = vmatpush.xpose.msk.msra.mxu1 %vm702_vm0, %v542_v52  ;;  %v643_v52 = vld [vmem:[%s5104_s15 + $0x7e8] sm:$0xff] }
  0xb8   : > { %4524 = vmatpush.xpose.msk.msra.mxu2 %vm702_vm0, %v558_v53 }
  0xb9   : > { %4548 = vmatpush.xpose.msk.msra.mxu3 %vm702_vm0, %v574_v54  ;;  %4393 = vmatmul.msk.f32.gmra.mxu0 %vm702_vm0, %v5377_v48  ;;  %v594_v54 = vld [vmem:[%s5104_s15 + $0x660] sm:$0xff] }
  0xba   : > { %4477 = vmatpush.xpose.msk.msra.mxu0 %vm702_vm0, %v525_v56  ;;  %4417 = vmatmul.msk.f32.gmra.mxu1 %vm702_vm0, %v5377_v48  ;;  %v626_v56 = vld [vmem:[%s5104_s15 + $0x760] sm:$0xff] }
  0xbb   : > { %4501 = vmatpush.xpose.msk.msra.mxu1 %vm702_vm0, %v541_v58  ;;  %4441 = vmatmul.msk.f32.gmra.mxu2 %vm702_vm0, %v5377_v48  ;;  %v642_v58 = vld [vmem:[%s5104_s15 + $0x7e0] sm:$0xff] }
  0xbc   : > { %4525 = vmatpush.xpose.msk.msra.mxu2 %vm702_vm0, %v557_v59  ;;  %4465 = vmatmul.msk.f32.gmra.mxu3 %vm702_vm0, %v5377_v48  ;;  %v593_v59 = vld [vmem:[%s5104_s15 + $0x658] sm:$0xff] }
  0xbd   : > { %4549 = vmatpush.xpose.msk.msra.mxu3 %vm702_vm0, %v573_v60  ;;  %v609_v60 = vld [vmem:[%s5104_s15 + $0x6d8] sm:$0xff] }
  0xbe   : > { %4478 = vmatpush.xpose.msk.msra.mxu0 %vm702_vm0, %v524_v61 }
  0xbf   : > { %4502 = vmatpush.xpose.msk.msra.mxu1 %vm702_vm0, %v540_v62 }
  0xc0   : > { %4526 = vmatpush.xpose.msk.msra.mxu2 %vm702_vm0, %v556_v63  ;;  %v625_v63 = vld [vmem:[%s5104_s15 + $0x758] sm:$0xff] }
  0xc1   : > { %4550 = vmatpush.xpose.msk.msra.mxu3 %vm702_vm0, %v572_v0  ;;  %4394 = vmatmul.msk.f32.gmra.mxu0 %vm702_vm0, %v5406_v57  ;;  %v641_v0 = vld [vmem:[%s5104_s15 + $0x7d8] sm:$0xff] }
  0xc2   : > { %4479 = vmatpush.xpose.msk.msra.mxu0 %vm702_vm0, %v523_v3  ;;  %4418 = vmatmul.msk.f32.gmra.mxu1 %vm702_vm0, %v5406_v57  ;;  %v592_v3 = vld [vmem:[%s5104_s15 + $0x650] sm:$0xff] }
  0xc3   : > { %4503 = vmatpush.xpose.msk.msra.mxu1 %vm702_vm0, %v539_v4  ;;  %4442 = vmatmul.msk.f32.gmra.mxu2 %vm702_vm0, %v5406_v57  ;;  %v608_v4 = vld [vmem:[%s5104_s15 + $0x6d0] sm:$0xff] }
  0xc4   : > { %4527 = vmatpush.xpose.msk.msra.mxu2 %vm702_vm0, %v555_v5  ;;  %4466 = vmatmul.msk.f32.gmra.mxu3 %vm702_vm0, %v5406_v57  ;;  %v624_v5 = vld [vmem:[%s5104_s15 + $0x750] sm:$0xff] }
  0xc5   : > { %4551 = vmatpush.xpose.msk.msra.mxu3 %vm702_vm0, %v571_v6  ;;  %v640_v6 = vld [vmem:[%s5104_s15 + $0x7d0] sm:$0xff] }
  0xc6   : > { %4480 = vmatpush.xpose.msk.msra.mxu0 %vm702_vm0, %v522_v7  ;;  %v2286_v7 = vld [vmem:[%s7257_s4 + $0x18] sm:$0xff] }
  0xc7   : > { %4504 = vmatpush.xpose.msk.msra.mxu1 %vm702_vm0, %v538_v8  ;;  %v591_v8 = vld [vmem:[%s5104_s15 + $0x648] sm:$0xff]  ;;  %2304 = vperm.xlu2 %4819, %v2286_v7   ;;  %v632_v7 = vld [vmem:[%s5104_s15 + $0x790] sm:$0xff] }
  0xc8   : > { %4528 = vmatpush.xpose.msk.msra.mxu2 %vm702_vm0, %v554_v9  ;;  %v607_v9 = vld [vmem:[%s5104_s15 + $0x6c8] sm:$0xff] }
  0xc9   : > { %4552 = vmatpush.xpose.msk.msra.mxu3 %vm702_vm0, %v570_v11  ;;  %4395 = vmatmul.msk.f32.gmra.mxu0 %vm702_vm0, %v5435_v2 }
  0xca   : > { %4481 = vmatpush.xpose.msk.msra.mxu0 %vm702_vm0, %v521_v15  ;;  %4419 = vmatmul.msk.f32.gmra.mxu1 %vm702_vm0, %v5435_v2 }
  0xcb   : > { %4505 = vmatpush.xpose.msk.msra.mxu1 %vm702_vm0, %v537_v16  ;;  %4443 = vmatmul.msk.f32.gmra.mxu2 %vm702_vm0, %v5435_v2 }
  0xcc   : > { %4529 = vmatpush.xpose.msk.msra.mxu2 %vm702_vm0, %v553_v17  ;;  %4467 = vmatmul.msk.f32.gmra.mxu3 %vm702_vm0, %v5435_v2  ;;  %v590_v17 = vld [vmem:[%s5104_s15 + $0x640] sm:$0xff] }
  0xcd   : > { %4553 = vmatpush.xpose.msk.msra.mxu3 %vm702_vm0, %v569_v18  ;;  %v606_v18 = vld [vmem:[%s5104_s15 + $0x6c0] sm:$0xff] }
  0xce   : > { %4482 = vmatpush.xpose.msk.msra.mxu0 %vm702_vm0, %v520_v20  ;;  %v622_v20 = vld [vmem:[%s5104_s15 + $0x740] sm:$0xff] }
  0xcf   : > { %4506 = vmatpush.xpose.msk.msra.mxu1 %vm702_vm0, %v536_v21  ;;  %v638_v21 = vld [vmem:[%s5104_s15 + $0x7c0] sm:$0xff] }
  0xd0   : > { %4530 = vmatpush.xpose.msk.msra.mxu2 %vm702_vm0, %v552_v22  ;;  %v2283_v22 = vld [vmem:[%s7257_s4] sm:$0xff] }
  0xd1   : > { %4554 = vmatpush.xpose.msk.msra.mxu3 %vm702_vm0, %v568_v23  ;;  %4396 = vmatmul.msk.f32.gmra.mxu0 %vm702_vm0, %v5464_v12  ;;  %v589_v23 = vld [vmem:[%s5104_s15 + $0x638] sm:$0xff] }
  0xd2   : > { %4483 = vmatpush.xpose.msk.msra.mxu0 %vm702_vm0, %v519_v25  ;;  %4420 = vmatmul.msk.f32.gmra.mxu1 %vm702_vm0, %v5464_v12 }
  0xd3   : > { %4507 = vmatpush.xpose.msk.msra.mxu1 %vm702_vm0, %v535_v26  ;;  %4444 = vmatmul.msk.f32.gmra.mxu2 %vm702_vm0, %v5464_v12  ;;  %v621_v26 = vld [vmem:[%s5104_s15 + $0x738] sm:$0xff] }
  0xd4   : > { %4531 = vmatpush.xpose.msk.msra.mxu2 %vm702_vm0, %v551_v27  ;;  %4468 = vmatmul.msk.f32.gmra.mxu3 %vm702_vm0, %v5464_v12  ;;  %v637_v27 = vld [vmem:[%s5104_s15 + $0x7b8] sm:$0xff] }
  0xd5   : > { %4555 = vmatpush.xpose.msk.msra.mxu3 %vm702_vm0, %v567_v29  ;;  %2289 = vperm.xlu2 %4819, %v2283_v22  }
  0xd6   : > { %4484 = vmatpush.xpose.msk.msra.mxu0 %vm702_vm0, %v518_v30  ;;  %v5703_v40 = vpop.f32.mrf.mxu0 }
  0xd7   : > { %4508 = vmatpush.xpose.msk.msra.mxu1 %vm702_vm0, %v534_v31  ;;  %v5705_v41 = vpop.f32.mrf.mxu1  ;;  %v588_v31 = vld [vmem:[%s5104_s15 + $0x630] sm:$0xff] }
  0xd8   : > { %4532 = vmatpush.xpose.msk.msra.mxu2 %vm702_vm0, %v550_v32  ;;  %v604_v32 = vld [vmem:[%s5104_s15 + $0x6b0] sm:$0xff] }
  0xd9   : > { %4556 = vmatpush.xpose.msk.msra.mxu3 %vm702_vm0, %v566_v33  ;;  %4485 = vmatmul.msk.f32.vlgmr.msra.gmra.mxu0 %vm702_vm0, %v5255_v10  ;;  %v620_v33 = vld [vmem:[%s5104_s15 + $0x730] sm:$0xff] }
  0xda   : > { %4565 = vmatpush.xpose.msk.msrb.mxu0 %vm702_vm0, %v597_v34  ;;  %4509 = vmatmul.msk.f32.vlgmr.msra.gmra.mxu1 %vm702_vm0, %v5255_v10  ;;  %v636_v34 = vld [vmem:[%s5104_s15 + $0x7b0] sm:$0xff] }
  0xdb   : > { %4589 = vmatpush.xpose.msk.msrb.mxu1 %vm702_vm0, %v613_v35  ;;  %4533 = vmatmul.msk.f32.vlgmr.msra.gmra.mxu2 %vm702_vm0, %v5255_v10  ;;  %v587_v35 = vld [vmem:[%s5104_s15 + $0x628] sm:$0xff] }
  0xdc   : > { %4613 = vmatpush.xpose.msk.msrb.mxu2 %vm702_vm0, %v629_v36  ;;  %4557 = vmatmul.msk.f32.vlgmr.msra.gmra.mxu3 %vm702_vm0, %v5255_v10  ;;  %v603_v36 = vld [vmem:[%s5104_s15 + $0x6a8] sm:$0xff] }
  0xdd   : > { %4637 = vmatpush.xpose.msk.msrb.mxu3 %vm702_vm0, %v645_v37  ;;  %v3269_v37 = vld [vmem:[%s7261_s8] sm:$0xff] }
  0xde   : > { %4566 = vmatpush.xpose.msk.msrb.mxu0 %vm702_vm0, %v596_v42  ;;  %v5727_v49 = vpop.f32.mrf.mxu2  ;;  %v5733_v10 = vpop.f32.mrf.mxu0  ;;  %v619_v42 = vld [vmem:[%s5104_s15 + $0x728] sm:$0xff]  ;;  %3272 = vperm.xlu2 %4819, %v3269_v37  }
  0xdf   : > { %4590 = vmatpush.xpose.msk.msrb.mxu1 %vm702_vm0, %v612_v43  ;;  %v5729_v50 = vpop.f32.mrf.mxu3  ;;  %v5735_v53 = vpop.f32.mrf.mxu1  ;;  %v635_v43 = vld [vmem:[%s5104_s15 + $0x7a8] sm:$0xff] }
  0xe0   : > { %4614 = vmatpush.xpose.msk.msrb.mxu2 %vm702_vm0, %v628_v44 }
  0xe1   : > { %4638 = vmatpush.xpose.msk.msrb.mxu3 %vm702_vm0, %v644_v45  ;;  %4486 = vmatmul.msk.f32.gmra.mxu0 %vm702_vm0, %v5284_v19 }
  0xe2   : > { %4567 = vmatpush.xpose.msk.msrb.mxu0 %vm702_vm0, %v595_v46  ;;  %4510 = vmatmul.msk.f32.gmra.mxu1 %vm702_vm0, %v5284_v19  ;;  %v586_v46 = vld [vmem:[%s5104_s15 + $0x620] sm:$0xff] }
  0xe3   : > { %4591 = vmatpush.xpose.msk.msrb.mxu1 %vm702_vm0, %v611_v47  ;;  %4534 = vmatmul.msk.f32.gmra.mxu2 %vm702_vm0, %v5284_v19  ;;  %v602_v47 = vld [vmem:[%s5104_s15 + $0x6a0] sm:$0xff] }
  0xe4   : > { %4615 = vmatpush.xpose.msk.msrb.mxu2 %vm702_vm0, %v627_v51  ;;  %4558 = vmatmul.msk.f32.gmra.mxu3 %vm702_vm0, %v5284_v19  ;;  %v618_v51 = vld [vmem:[%s5104_s15 + $0x720] sm:$0xff] }
  0xe5   : > { %4639 = vmatpush.xpose.msk.msrb.mxu3 %vm702_vm0, %v643_v52  ;;  %v634_v52 = vld [vmem:[%s5104_s15 + $0x7a0] sm:$0xff] }
  0xe6   : > { %4568 = vmatpush.xpose.msk.msrb.mxu0 %vm702_vm0, %v594_v54  ;;  %v5759_v61 = vpop.f32.mrf.mxu2  ;;  %v5765_v19 = vpop.f32.mrf.mxu0 }
  0xe7   : > { %4592 = vmatpush.xpose.msk.msrb.mxu1 %vm702_vm0, %v610_v55  ;;  %v5761_v62 = vpop.f32.mrf.mxu3  ;;  %v5767_v1 = vpop.f32.mrf.mxu1  ;;  %v585_v55 = vld [vmem:[%s5104_s15 + $0x618] sm:$0xff] }
  0xe8   : > { %4616 = vmatpush.xpose.msk.msrb.mxu2 %vm702_vm0, %v626_v56  ;;  %v5882_v54 = vpop.permute.xlu0 %699  ;;  %v601_v56 = vld [vmem:[%s5104_s15 + $0x698] sm:$0xff] }
  0xe9   : > { %4640 = vmatpush.xpose.msk.msrb.mxu3 %vm702_vm0, %v642_v58  ;;  %4487 = vmatmul.msk.f32.gmra.mxu0 %vm702_vm0, %v5313_v28 }
  0xea   : > { %4569 = vmatpush.xpose.msk.msrb.mxu0 %vm702_vm0, %v593_v59  ;;  %4511 = vmatmul.msk.f32.gmra.mxu1 %vm702_vm0, %v5313_v28 }
  0xeb   : > { %4593 = vmatpush.xpose.msk.msrb.mxu1 %vm702_vm0, %v609_v60  ;;  %4535 = vmatmul.msk.f32.gmra.mxu2 %vm702_vm0, %v5313_v28  ;;  %v617_v60 = vld [vmem:[%s5104_s15 + $0x718] sm:$0xff] }
  0xec   : > { %4617 = vmatpush.xpose.msk.msrb.mxu2 %vm702_vm0, %v625_v63  ;;  %4559 = vmatmul.msk.f32.gmra.mxu3 %vm702_vm0, %v5313_v28 }
  0xed   : > { %4641 = vmatpush.xpose.msk.msrb.mxu3 %vm702_vm0, %v641_v0 }
  0xee   : > { %4570 = vmatpush.xpose.msk.msrb.mxu0 %vm702_vm0, %v592_v3  ;;  %v5794_v11 = vpop.f32.mrf.mxu2  ;;  %v5800_v15 = vpop.f32.mrf.mxu0 }
  0xef   : > { %4594 = vmatpush.xpose.msk.msrb.mxu1 %vm702_vm0, %v608_v4  ;;  %v5796_v28 = vpop.f32.mrf.mxu3  ;;  %v5802_v16 = vpop.f32.mrf.mxu1  ;;  %v584_v4 = vld [vmem:[%s5104_s15 + $0x610] sm:$0xff] }
  0xf0   : > { %4618 = vmatpush.xpose.msk.msrb.mxu2 %vm702_vm0, %v624_v5  ;;  %v5902_v3 = vpop.permute.xlu1 %689  ;;  %v600_v5 = vld [vmem:[%s5104_s15 + $0x690] sm:$0xff] }
  0xf1   : > { %4642 = vmatpush.xpose.msk.msrb.mxu3 %vm702_vm0, %v640_v6  ;;  %4488 = vmatmul.msk.f32.gmra.mxu0 %vm702_vm0, %v5345_v38  ;;  %v616_v6 = vld [vmem:[%s5104_s15 + $0x710] sm:$0xff] }
  0xf2   : > { %4571 = vmatpush.xpose.msk.msrb.mxu0 %vm702_vm0, %v591_v8  ;;  %4512 = vmatmul.msk.f32.gmra.mxu1 %vm702_vm0, %v5345_v38  ;;  %v5920_v8 = vpop.permute.xlu0 %694 }
  0xf3   : > { %4595 = vmatpush.xpose.msk.msrb.mxu1 %vm702_vm0, %v607_v9  ;;  %4536 = vmatmul.msk.f32.gmra.mxu2 %vm702_vm0, %v5345_v38  ;;  %v5922_v9 = vpop.permute.xlu2 %679 }
  0xf4   : > { %4619 = vmatpush.xpose.msk.msrb.mxu2 %vm702_vm0, %v623_v13  ;;  %4560 = vmatmul.msk.f32.gmra.mxu3 %vm702_vm0, %v5345_v38  ;;  %v583_v13 = vld [vmem:[%s5104_s15 + $0x608] sm:$0xff] }
  0xf5   : > { %4643 = vmatpush.xpose.msk.msrb.mxu3 %vm702_vm0, %v639_v14  ;;  %v599_v14 = vld [vmem:[%s5104_s15 + $0x688] sm:$0xff] }
  0xf6   : > { %4572 = vmatpush.xpose.msk.msrb.mxu0 %vm702_vm0, %v590_v17  ;;  %v5829_v25 = vpop.f32.mrf.mxu2  ;;  %v5835_v29 = vpop.f32.mrf.mxu0 }
  0xf7   : > { %4596 = vmatpush.xpose.msk.msrb.mxu1 %vm702_vm0, %v606_v18  ;;  %v5831_v38 = vpop.f32.mrf.mxu3  ;;  %v5837_v30 = vpop.f32.mrf.mxu1 }
  0xf8   : > { %4620 = vmatpush.xpose.msk.msrb.mxu2 %vm702_vm0, %v622_v20  ;;  %v615_v20 = vld [vmem:[%s5104_s15 + $0x708] sm:$0xff]  ;;  %v5946_v37 = vpop.permute.xlu1 %684 }
  0xf9   : > { %4644 = vmatpush.xpose.msk.msrb.mxu3 %vm702_vm0, %v638_v21  ;;  %4489 = vmatmul.msk.f32.gmra.mxu0 %vm702_vm0, %v5377_v48 }
  0xfa   : > { %4573 = vmatpush.xpose.msk.msrb.mxu0 %vm702_vm0, %v589_v23  ;;  %4513 = vmatmul.msk.f32.gmra.mxu1 %vm702_vm0, %v5377_v48 }
  0xfb   : > { %4597 = vmatpush.xpose.msk.msrb.mxu1 %vm702_vm0, %v605_v24  ;;  %4537 = vmatmul.msk.f32.gmra.mxu2 %vm702_vm0, %v5377_v48 }
  0xfc   : > { %4621 = vmatpush.xpose.msk.msrb.mxu2 %vm702_vm0, %v621_v26  ;;  %4561 = vmatmul.msk.f32.gmra.mxu3 %vm702_vm0, %v5377_v48 }
  0xfd   : > { %4645 = vmatpush.xpose.msk.msrb.mxu3 %vm702_vm0, %v637_v27 }
  0xfe   : > { %4574 = vmatpush.xpose.msk.msrb.mxu0 %vm702_vm0, %v588_v31  ;;  %v5864_v39 = vpop.f32.mrf.mxu2  ;;  %v1527_v44 = vpop.f32.mrf.mxu0 }
  0xff   : > { %4598 = vmatpush.xpose.msk.msrb.mxu1 %vm702_vm0, %v604_v32  ;;  %v5866_v48 = vpop.f32.mrf.mxu3  ;;  %v1568_v45 = vpop.f32.mrf.mxu1  ;;  %v1528_v31 = vadd.f32 %v1527_v44, %v5902_v3  ;;  %v614_v44 = vld [vmem:[%s5104_s15 + $0x700] sm:$0xff] }
 0x100   : > { %4622 = vmatpush.xpose.msk.msrb.mxu2 %vm702_vm0, %v620_v33  ;;  %v1569_v32 = vadd.f32 %v1568_v45, %v5902_v3  ;;  %v582_v33 = vld [vmem:[%s5104_s15 + $0x600] sm:$0xff] }
 0x101   : > { %4646 = vmatpush.xpose.msk.msrb.mxu3 %vm702_vm0, %v636_v34  ;;  %4490 = vmatmul.msk.f32.gmra.mxu0 %vm702_vm0, %v5406_v57  ;;  %v598_v34 = vld [vmem:[%s5104_s15 + $0x680] sm:$0xff] }
 0x102   : > { %4575 = vmatpush.xpose.msk.msrb.mxu0 %vm702_vm0, %v587_v35  ;;  %4514 = vmatmul.msk.f32.gmra.mxu1 %vm702_vm0, %v5406_v57  ;;  %v630_v45 = vld [vmem:[%s5104_s15 + $0x780] sm:$0xff] }
 0x103   : > { %4599 = vmatpush.xpose.msk.msrb.mxu1 %vm702_vm0, %v603_v36  ;;  %4538 = vmatmul.msk.f32.gmra.mxu2 %vm702_vm0, %v5406_v57 }
 0x104   : > { %4623 = vmatpush.xpose.msk.msrb.mxu2 %vm702_vm0, %v619_v42  ;;  %4562 = vmatmul.msk.f32.gmra.mxu3 %vm702_vm0, %v5406_v57  ;;  %v633_v57 = vld [vmem:[%s5104_s15 + $0x798] sm:$0xff] }
 0x105   : > { %4647 = vmatpush.xpose.msk.msrb.mxu3 %vm702_vm0, %v635_v43 }
 0x106   : > { %4576 = vmatpush.xpose.msk.msrb.mxu0 %vm702_vm0, %v586_v46  ;;  %v5894_v58 = vpop.f32.mrf.mxu2  ;;  %v1530_v63 = vpop.f32.mrf.mxu0  ;;  %v2231_v46 = vmax.f32 %v1528_v31, 0.0 }
 0x107   : > { %4600 = vmatpush.xpose.msk.msrb.mxu1 %vm702_vm0, %v602_v47  ;;  %v5896_v59 = vpop.f32.mrf.mxu3  ;;  %v1571_v0 = vpop.f32.mrf.mxu1  ;;  %v1531_v21 = vadd.f32 %v1530_v63, %v5920_v8  ;;  %v2232_v47 = vmax.f32 %v1569_v32, 0.0 }
 0x108   : > { %4624 = vmatpush.xpose.msk.msrb.mxu2 %vm702_vm0, %v618_v51  ;;  %v1572_v22 = vadd.f32 %v1571_v0, %v5920_v8  ;;  %v1525_v51 = vadd.f32 %v5835_v29, %v5946_v37  ;;  %v1522_v29 = vadd.f32 %v5800_v15, %v5922_v9  ;;  %v5972_v0 = vpop.permute.xlu2 %674 }
 0x109   : > { %4648 = vmatpush.xpose.msk.msrb.mxu3 %vm702_vm0, %v634_v52  ;;  %4491 = vmatmul.msk.f32.gmra.mxu0 %vm702_vm0, %v5435_v2  ;;  %v2247_v42 = vmax.f32 %v1531_v21, 0.0  ;;  %v1566_v52 = vadd.f32 %v5837_v30, %v5946_v37  ;;  %v1563_v30 = vadd.f32 %v5802_v16, %v5922_v9  ;;  %v1519_v15 = vadd.f32 %v5765_v19, %v5972_v0 }
 0x10a   : > { %4577 = vmatpush.xpose.msk.msrb.mxu0 %vm702_vm0, %v585_v55  ;;  %4515 = vmatmul.msk.f32.gmra.mxu1 %vm702_vm0, %v5435_v2  ;;  %v2248_v43 = vmax.f32 %v1572_v22, 0.0  ;;  %v1560_v16 = vadd.f32 %v5767_v1, %v5972_v0  ;;  %v2199_v21 = vmax.f32 %v1522_v29, 0.0 }
 0x10b   : > { %4601 = vmatpush.xpose.msk.msrb.mxu1 %vm702_vm0, %v601_v56  ;;  %4539 = vmatmul.msk.f32.gmra.mxu2 %vm702_vm0, %v5435_v2  ;;  %v2200_v22 = vmax.f32 %v1563_v30, 0.0  ;;  %v2183_v31 = vmax.f32 %v1519_v15, 0.0  ;;  %v4919_v15 = vld [vmem:[%s7254_s1 + $0x18] sm:$0xff] }
 0x10c   : > { %4625 = vmatpush.xpose.msk.msrb.mxu2 %vm702_vm0, %v617_v60  ;;  %4563 = vmatmul.msk.f32.gmra.mxu3 %vm702_vm0, %v5435_v2  ;;  %v631_v2 = vld [vmem:[%s5104_s15 + $0x788] sm:$0xff]  ;;  %s4774_s15 = sshll.u32 %s5073_s10, 4  ;;  %s4208_s10 = sshll.u32 %s6988_s12, 4  ;;  %s4209_s10 = int_to_ptr.vmem [resolvable:$true] %s4208_s10 }
 0x10d   : > { %4649 = vmatpush.xpose.msk.msrb.mxu3 %vm702_vm0, %v633_v57  ;;  %s4206_s16 = scalar_lea.hbm %s7264_s11, %s4774_s15 }
 0x10e   : > { %4578 = vmatpush.xpose.msk.msrb.mxu0 %vm702_vm0, %v584_v4  ;;  %v1612_v17 = vpop.f32.mrf.mxu2  ;;  %v1533_v23 = vpop.f32.mrf.mxu0  ;;  %s4210_s17 = sshll.u32 %s4206_s16, 4  ;;  %s4211_s17 = int_to_ptr.hbm [resolvable:$true] %s4210_s17 }
 0x10f   : > { %4602 = vmatpush.xpose.msk.msrb.mxu1 %vm702_vm0, %v600_v5  ;;  %v1653_v18 = vpop.f32.mrf.mxu3  ;;  %v1574_v24 = vpop.f32.mrf.mxu1  ;;  %v1534_v26 = vadd.f32 %v1533_v23, %v5882_v54  ;;  %v1613_v4 = vadd.f32 %v1612_v17, %v5920_v8  ;;  %s4938_s23 = sshra.s32 %s4211_s17, 4  ;;  %s4939_s23 = int_to_ptr.hbm [resolvable:$true] %s4938_s23 }
 0x110   : > { %4626 = vmatpush.xpose.msk.msrb.mxu2 %vm702_vm0, %v616_v6  ;;  %v1575_v27 = vadd.f32 %v1574_v24, %v5882_v54  ;;  %v1654_v5 = vadd.f32 %v1653_v18, %v5920_v8  ;;  %v5985_v17 = vpop.permute.xlu0 %669  ;;  %v1610_v18 = vadd.f32 %v5894_v58, %v5902_v3  ;;  %v5997_v23 = vpop.permute.xlu1 %664  ;;  %v1607_v58 = vadd.f32 %v5864_v39, %v5946_v37  ;;  %s4940_s25 = scalar_lea.hbm %s4939_s23, 16  ;;  %p4945_p0 = scmp.lt.s32.totalorder %s4939_s23, %s7264_s11 }
 0x111   : > { %4650 = vmatpush.xpose.msk.msrb.mxu3 %vm702_vm0, %v632_v7  ;;  %v2263_v35 = vmax.f32 %v1534_v26, 0.0  ;;  %4492 = vmatmul.msk.f32.gmra.mxu0 %vm702_vm0, %v5464_v12  ;;  %v1516_v19 = vadd.f32 %v5733_v10, %v5985_v17  ;;  %v1557_v1 = vadd.f32 %v5735_v53, %v5985_v17  ;;  %v2249_v24 = vmax.f32 %v1613_v4, 0.0  ;;  %p4941_p11 = scmp.ne.s32.totalorder %s4939_s23, %s4940_s25  ;;  %p4946_p1 = scmp.lt.s32.totalorder %s4944_s13, %s4940_s25 }
 0x112   : > { %4579 = vmatpush.xpose.msk.msrb.mxu0 %vm702_vm0, %v583_v13  ;;  %v2264_v36 = vmax.f32 %v1575_v27, 0.0  ;;  %4516 = vmatmul.msk.f32.gmra.mxu1 %vm702_vm0, %v5464_v12  ;;  %v2215_v13 = vmax.f32 %v1525_v51, 0.0  ;;  %v2250_v26 = vmax.f32 %v1654_v5, 0.0  ;;  %v2184_v53 = vmax.f32 %v1560_v16, 0.0 }
 0x113   : > { %4603 = vmatpush.xpose.msk.msrb.mxu1 %vm702_vm0, %v599_v14  ;;  %4540 = vmatmul.msk.f32.gmra.mxu2 %vm702_vm0, %v5464_v12  ;;  %v2216_v14 = vmax.f32 %v1566_v52, 0.0  ;;  %v2233_v32 = vmax.f32 %v1610_v18, 0.0  ;;  %v1598_v51 = vadd.f32 %v5759_v61, %v5985_v17  ;;  %v1636_v61 = vadd.f32 %v5729_v50, %v5997_v23  ;;  %p4942_p12 = pnand %p4941_p11, %p5090_p5  ;;  %p4947_p2 = por %p4946_p1, %p4945_p0 }
 0x114   : > { %4627 = vmatpush.xpose.msk.msrb.mxu2 %vm702_vm0, %v615_v20  ;;  %4564 = vmatmul.msk.f32.gmra.mxu3 %vm702_vm0, %v5464_v12  ;;  %v4916_v20 = vld [vmem:[%s7254_s1] sm:$0xff] }
 0x115   : > { %4651 = vmatpush.xpose.msk.msrb.mxu3 %vm702_vm0, %v631_v2  ;;  %v1651_v2 = vadd.f32 %v5896_v59, %v5902_v3  ;;  %v1648_v59 = vadd.f32 %v5866_v48, %v5946_v37  ;;  %v2167_v48 = vmax.f32 %v1516_v19, 0.0  ;;  %v2169_v4 = vmax.f32 %v1598_v51, 0.0  ;;  %p4943_p13 = pneg %p4942_p12 }
 0x116   : > { %4580 = vmatpush.xpose.msk.msrb.mxu0 %vm702_vm0, %v582_v33  ;;  %v1615_v55 = vpop.f32.mrf.mxu2  ;;  %v5964_v57 = vpop.f32.mrf.mxu0 }
 0x117   : > { %4604 = vmatpush.xpose.msk.msrb.mxu1 %vm702_vm0, %v598_v34  ;;  %v1656_v56 = vpop.f32.mrf.mxu3  ;;  %v1616_v12 = vadd.f32 %v1615_v55, %v5882_v54  ;;  %v5966_v63 = vpop.f32.mrf.mxu1  ;;  %v2234_v33 = vmax.f32 %v1651_v2, 0.0  ;;  %p4948_p3 = pnand %p4947_p2, %p4943_p13 }
 0x118   : > { %4628 = vmatpush.xpose.msk.msrb.mxu2 %vm702_vm0, %v614_v44  ;;  %v1657_v60 = vadd.f32 %v1656_v56, %v5882_v54  ;;  %v1645_v44 = vadd.f32 %v5831_v38, %v5922_v9 }
 0x119   : > { %4652 = vmatpush.xpose.msk.msrb.mxu3 %vm702_vm0, %v630_v45  ;;  %v2265_v6 = vmax.f32 %v1616_v12, 0.0  ;;  %4581 = vmatmul.msk.f32.vlgmr.msrb.gmra.mxu0 %vm702_vm0, %v4916_v20  ;;  %v2217_v45 = vmax.f32 %v1607_v58, 0.0  ;;  %v1595_v12 = vadd.f32 %v5727_v49, %v5997_v23  ;;  %v4918_v49 = vld [vmem:[%s7254_s1 + $0x10] sm:$0xff] }
 0x11a   : > { %2328 = vmatpush.msra.mxu0 %v2263_v35  ;;  %v2266_v7 = vmax.f32 %v1657_v60, 0.0  ;;  %4605 = vmatmul.msk.f32.vlgmr.msrb.gmra.mxu1 %vm702_vm0, %v4916_v20  ;;  %v2168_v35 = vmax.f32 %v1557_v1, 0.0 }
 0x11b   : > { %2357 = vmatpush.msra.mxu1 %v2264_v36  ;;  %4629 = vmatmul.msk.f32.vlgmr.msrb.gmra.mxu2 %vm702_vm0, %v4916_v20  ;;  %v1513_v36 = vadd.f32 %v5703_v40, %v5997_v23  ;;  %v1642_v40 = vadd.f32 %v5796_v28, %v5972_v0  ;;  %v2202_v28 = vmax.f32 %v1645_v44, 0.0 }
 0x11c   : > { %2329 = vmatpush.msra.mxu0 %v2247_v42  ;;  %4653 = vmatmul.msk.f32.vlgmr.msrb.gmra.mxu3 %vm702_vm0, %v4916_v20  ;;  %v1554_v42 = vadd.f32 %v5705_v41, %v5997_v23  ;;  %v4917_v41 = vld [vmem:[%s7254_s1 + $0x8] sm:$0xff] }
 0x11d   : > { %2358 = vmatpush.msra.mxu1 %v2248_v43  ;;  %2386 = vmatpush.msra.mxu2 %v2265_v6  ;;  %v1604_v43 = vadd.f32 %v5829_v25, %v5922_v9  ;;  %v2151_v25 = vmax.f32 %v1513_v36, 0.0  ;;  %v2153_v6 = vmax.f32 %v1595_v12, 0.0 }
 0x11e   : > { %2330 = vmatpush.msra.mxu0 %v2231_v46  ;;  %2415 = vmatpush.msra.mxu3 %v2266_v7  ;;  %v6003_v27 = vpop.f32.mrf.mxu2  ;;  %v6007_v39 = vpop.f32.mrf.mxu0  ;;  %v2218_v46 = vmax.f32 %v1648_v59, 0.0  ;;  %v2152_v38 = vmax.f32 %v1554_v42, 0.0  ;;  %v2154_v7 = vmax.f32 %v1636_v61, 0.0 }
 0x11f   : > { %2359 = vmatpush.msra.mxu1 %v2232_v47  ;;  %v6005_v10 = vpop.f32.mrf.mxu3  ;;  %2387 = vmatpush.msra.mxu2 %v2249_v24  ;;  %v6009_v34 = vpop.f32.mrf.mxu1  ;;  %v1601_v47 = vadd.f32 %v5794_v11, %v5972_v0  ;;  %v1639_v11 = vadd.f32 %v5761_v62, %v5985_v17  ;;  %v2201_v52 = vmax.f32 %v1604_v43, 0.0  ;;  %v2186_v62 = vmax.f32 %v1642_v40, 0.0  ;;  %v4921_v24 = vld [vmem:[%s7254_s1 + $0x28] sm:$0xff] }
 0x120   : > { %2331 = vmatpush.msra.mxu0 %v2215_v13  ;;  %2416 = vmatpush.msra.mxu3 %v2250_v26 }
 0x121   : > { %2360 = vmatpush.msra.mxu1 %v2216_v14  ;;  %2388 = vmatpush.msra.mxu2 %v2233_v32  ;;  %v2185_v60 = vmax.f32 %v1601_v47, 0.0  ;;  %v2170_v5 = vmax.f32 %v1639_v11, 0.0 }
 0x122   : > { %2332 = vmatpush.msra.mxu0 %v2199_v21  ;;  %2417 = vmatpush.msra.mxu3 %v2234_v33  ;;  %v4922_v33 = vld [vmem:[%s7254_s1 + $0x30] sm:$0xff] }
 0x123   : > { %2361 = vmatpush.msra.mxu1 %v2200_v22  ;;  %2389 = vmatpush.msra.mxu2 %v2217_v45  ;;  %v4920_v22 = vld [vmem:[%s7254_s1 + $0x20] sm:$0xff] }
 0x124   : > { %2333 = vmatpush.msra.mxu0 %v2183_v31  ;;  %2418 = vmatpush.msra.mxu3 %v2218_v46 }
 0x125   : > { %2362 = vmatpush.msra.mxu1 %v2184_v53  ;;  %4582 = vmatmul.msk.f32.gmra.mxu0 %vm702_vm0, %v4917_v41 }
 0x126   : > { %2334 = vmatpush.msra.mxu0 %v2167_v48  ;;  %4606 = vmatmul.msk.f32.gmra.mxu1 %vm702_vm0, %v4917_v41  ;;  %v6034_v55 = vpop.f32.mrf.mxu2  ;;  %v6042_v29 = vpop.f32.mrf.mxu0 }
 0x127   : > { %2363 = vmatpush.msra.mxu1 %v2168_v35  ;;  %4630 = vmatmul.msk.f32.gmra.mxu2 %vm702_vm0, %v4917_v41  ;;  %v6036_v56 = vpop.f32.mrf.mxu3  ;;  %v6044_v30 = vpop.f32.mrf.mxu1 }
 0x128   : > { %4654 = vmatmul.msk.f32.gmra.mxu3 %vm702_vm0, %v4917_v41  ;;  %2335 = vmatpush.msra.mxu0 %v2151_v25 }
 0x129   : > { %2364 = vmatpush.msra.mxu1 %v2152_v38  ;;  %2390 = vmatpush.msra.mxu2 %v2201_v52  ;;  %v4923_v52 = vld [vmem:[%s7254_s1 + $0x38] sm:$0xff] }
 0x12a   : > { %2419 = vmatpush.msra.mxu3 %v2202_v28 }
 0x12b   : > { %2391 = vmatpush.msra.mxu2 %v2185_v60 }
 0x12c   : > { %2420 = vmatpush.msra.mxu3 %v2186_v62 }
 0x12d   : > { %2392 = vmatpush.msra.mxu2 %v2169_v4  ;;  %4583 = vmatmul.msk.f32.gmra.mxu0 %vm702_vm0, %v4918_v49 }
 0x12e   : > { %2421 = vmatpush.msra.mxu3 %v2170_v5  ;;  %4607 = vmatmul.msk.f32.gmra.mxu1 %vm702_vm0, %v4918_v49  ;;  %v6053_v50 = vpop.f32.mrf.mxu2  ;;  %v6057_v14 = vpop.f32.mrf.mxu0 }
 0x12f   : > { %2393 = vmatpush.msra.mxu2 %v2153_v6  ;;  %v6055_v13 = vpop.f32.mrf.mxu3  ;;  %v6059_v20 = vpop.f32.mrf.mxu1 }
 0x130   : > { %2422 = vmatpush.msra.mxu3 %v2154_v7  ;;  %4631 = vmatmul.msk.f32.gmra.mxu2 %vm702_vm0, %v4918_v49 }
 0x131   : > { %4655 = vmatmul.msk.f32.gmra.mxu3 %vm702_vm0, %v4918_v49  ;;  %v1686_v49 = vadd.f32 %v6057_v14, %v5922_v9  ;;  %v1683_v14 = vadd.f32 %v6042_v29, %v5972_v0  ;;  %v1721_v29 = vadd.f32 %v6009_v34, %v5985_v17 }
 0x135   : > { %4584 = vmatmul.msk.f32.gmra.mxu0 %vm702_vm0, %v4919_v15 }
 0x136   : > { %4608 = vmatmul.msk.f32.gmra.mxu1 %vm702_vm0, %v4919_v15  ;;  %v6068_v16 = vpop.f32.mrf.mxu2  ;;  %v1688_v2 = vpop.f32.mrf.mxu0 }
 0x137   : > { %v6070_v18 = vpop.f32.mrf.mxu3  ;;  %v1729_v21 = vpop.f32.mrf.mxu1  ;;  %v1689_v11 = vadd.f32 %v1688_v2, %v5946_v37 }
 0x138   : > { %4632 = vmatmul.msk.f32.gmra.mxu2 %vm702_vm0, %v4919_v15  ;;  %v1730_v28 = vadd.f32 %v1729_v21, %v5946_v37 }
 0x139   : > { %4656 = vmatmul.msk.f32.gmra.mxu3 %vm702_vm0, %v4919_v15  ;;  %v1727_v15 = vadd.f32 %v6059_v20, %v5922_v9  ;;  %v2219_v2 = vmax.f32 %v1689_v11, 0.0  ;;  %v1724_v20 = vadd.f32 %v6044_v30, %v5972_v0 }
 0x13a   : > { %v2220_v21 = vmax.f32 %v1730_v28, 0.0 }
 0x13b   : > { %v2204_v30 = vmax.f32 %v1727_v15, 0.0 }
 0x13d   : > { %4585 = vmatmul.msk.f32.gmra.mxu0 %vm702_vm0, %v4920_v22 }
 0x13e   : > { %4609 = vmatmul.msk.f32.gmra.mxu1 %vm702_vm0, %v4920_v22  ;;  %v6079_v19 = vpop.f32.mrf.mxu2  ;;  %v1691_v58 = vpop.f32.mrf.mxu0 }
 0x13f   : > { %v6081_v1 = vpop.f32.mrf.mxu3  ;;  %v1732_v59 = vpop.f32.mrf.mxu1  ;;  %v1692_v47 = vadd.f32 %v1691_v58, %v5902_v3 }
 0x140   : > { %4633 = vmatmul.msk.f32.gmra.mxu2 %vm702_vm0, %v4920_v22  ;;  %v1733_v40 = vadd.f32 %v1732_v59, %v5902_v3  ;;  %v6125_v59 = vld [vmem:[%s7256_s3] sm:$0xff] }
 0x141   : > { %4657 = vmatmul.msk.f32.gmra.mxu3 %vm702_vm0, %v4920_v22  ;;  %v2235_v12 = vmax.f32 %v1692_v47, 0.0  ;;  %v1677_v47 = vadd.f32 %v5964_v57, %v5997_v23  ;;  %v6170_v57 = vld [vmem:[%s7256_s3 + $0x8] sm:$0xff] }
 0x142   : > { %v2236_v61 = vmax.f32 %v1733_v40, 0.0  ;;  %v1718_v40 = vadd.f32 %v5966_v63, %v5997_v23  ;;  %v1765_v63 = vadd.f32 %v6053_v50, %v5972_v0 }
 0x144   : > { %v2156_v28 = vmax.f32 %v1718_v40, 0.0 }
 0x145   : > { %4586 = vmatmul.msk.f32.gmra.mxu0 %vm702_vm0, %v4921_v24 }
 0x146   : > { %4610 = vmatmul.msk.f32.gmra.mxu1 %vm702_vm0, %v4921_v24  ;;  %v1773_v26 = vpop.f32.mrf.mxu2  ;;  %v1694_v53 = vpop.f32.mrf.mxu0 }
 0x147   : > { %v1814_v31 = vpop.f32.mrf.mxu3  ;;  %v1735_v32 = vpop.f32.mrf.mxu1  ;;  %v1695_v36 = vadd.f32 %v1694_v53, %v5920_v8 }
 0x148   : > { %4634 = vmatmul.msk.f32.gmra.mxu2 %vm702_vm0, %v4921_v24  ;;  %v1736_v42 = vadd.f32 %v1735_v32, %v5920_v8  ;;  %v1774_v32 = vadd.f32 %v1773_v26, %v5902_v3  ;;  %v1771_v26 = vadd.f32 %v6079_v19, %v5946_v37 }
 0x149   : > { %4658 = vmatmul.msk.f32.gmra.mxu3 %vm702_vm0, %v4921_v24  ;;  %v2251_v38 = vmax.f32 %v1695_v36, 0.0 }
 0x14a   : > { %v2252_v51 = vmax.f32 %v1736_v42, 0.0  ;;  %v2221_v11 = vmax.f32 %v1771_v26, 0.0 }
 0x14d   : > { %4587 = vmatmul.msk.f32.gmra.mxu0 %vm702_vm0, %v4922_v33 }
 0x14e   : > { %4611 = vmatmul.msk.f32.gmra.mxu1 %vm702_vm0, %v4922_v33  ;;  %v1776_v48 = vpop.f32.mrf.mxu2  ;;  %v1697_v43 = vpop.f32.mrf.mxu0 }
 0x14f   : > { %v1817_v35 = vpop.f32.mrf.mxu3  ;;  %v1738_v44 = vpop.f32.mrf.mxu1  ;;  %v1698_v45 = vadd.f32 %v1697_v43, %v5882_v54  ;;  %v1777_v24 = vadd.f32 %v1776_v48, %v5920_v8  ;;  %v1680_v48 = vadd.f32 %v6007_v39, %v5985_v17  ;;  %v2187_v43 = vmax.f32 %v1683_v14, 0.0 }
 0x150   : > { %4635 = vmatmul.msk.f32.gmra.mxu2 %vm702_vm0, %v4922_v33  ;;  %v1739_v46 = vadd.f32 %v1738_v44, %v5882_v54  ;;  %v1818_v53 = vadd.f32 %v1817_v35, %v5920_v8  ;;  %v2203_v35 = vmax.f32 %v1686_v49, 0.0  ;;  %v2188_v44 = vmax.f32 %v1724_v20, 0.0  ;;  %v6220_v20 = vld [vmem:[%s7256_s3 + $0x18] sm:$0xff] }
 0x151   : > { %4659 = vmatmul.msk.f32.gmra.mxu3 %vm702_vm0, %v4922_v33  ;;  %v2267_v41 = vmax.f32 %v1698_v45, 0.0  ;;  %v1815_v33 = vadd.f32 %v1814_v31, %v5902_v3  ;;  %v1812_v31 = vadd.f32 %v6081_v1, %v5946_v37  ;;  %v2253_v36 = vmax.f32 %v1777_v24, 0.0 }
 0x152   : > { %v2268_v25 = vmax.f32 %v1739_v46, 0.0  ;;  %v2254_v42 = vmax.f32 %v1818_v53, 0.0  ;;  %v2237_v1 = vmax.f32 %v1774_v32, 0.0  ;;  %v2189_v49 = vmax.f32 %v1765_v63, 0.0 }
 0x153   : > { %2444 = vmatpush.msrb.mxu0 %v2267_v41  ;;  %v2238_v46 = vmax.f32 %v1815_v33, 0.0  ;;  %v2171_v41 = vmax.f32 %v1680_v48, 0.0 }
 0x154   : > { %2473 = vmatpush.msrb.mxu1 %v2268_v25  ;;  %v2172_v25 = vmax.f32 %v1721_v29, 0.0 }
 0x155   : > { %4588 = vmatmul.msk.f32.gmra.mxu0 %vm702_vm0, %v4923_v52 }
 0x156   : > { %4612 = vmatmul.msk.f32.gmra.mxu1 %vm702_vm0, %v4923_v52  ;;  %v1779_v60 = vpop.f32.mrf.mxu2  ;;  %2445 = vmatpush.msrb.mxu0 %v2251_v38  ;;  %v6114_v6 = vpop.f32.mrf.mxu0  ;;  %v1768_v38 = vadd.f32 %v6068_v16, %v5922_v9  ;;  %v1806_v16 = vadd.f32 %v6055_v13, %v5972_v0 }
 0x157   : > { %v1820_v62 = vpop.f32.mrf.mxu3  ;;  %v1780_v4 = vadd.f32 %v1779_v60, %v5882_v54  ;;  %2474 = vmatpush.msrb.mxu1 %v2252_v51  ;;  %v6116_v7 = vpop.f32.mrf.mxu1  ;;  %v1809_v51 = vadd.f32 %v6070_v18, %v5922_v9  ;;  %v2155_v18 = vmax.f32 %v1677_v47, 0.0 }
 0x158   : > { %4636 = vmatmul.msk.f32.gmra.mxu2 %vm702_vm0, %v4923_v52  ;;  %v1821_v5 = vadd.f32 %v1820_v62, %v5882_v54  ;;  %2446 = vmatpush.msrb.mxu0 %v2235_v12  ;;  %v1762_v12 = vadd.f32 %v6034_v55, %v5985_v17  ;;  %v2205_v50 = vmax.f32 %v1768_v38, 0.0  ;;  %v2190_v15 = vmax.f32 %v1806_v16, 0.0 }
 0x159   : > { %4660 = vmatmul.msk.f32.gmra.mxu3 %vm702_vm0, %v4923_v52  ;;  %v2269_v22 = vmax.f32 %v1780_v4, 0.0  ;;  %2475 = vmatpush.msrb.mxu1 %v2236_v61  ;;  %v2222_v52 = vmax.f32 %v1812_v31, 0.0  ;;  %v1803_v61 = vadd.f32 %v6036_v56, %v5985_v17  ;;  %v2206_v60 = vmax.f32 %v1809_v51, 0.0 }
 0x15a   : > { %v2270_v58 = vmax.f32 %v1821_v5, 0.0  ;;  %2447 = vmatpush.msrb.mxu0 %v2219_v2  ;;  %v1759_v56 = vadd.f32 %v6003_v27, %v5997_v23  ;;  %v1800_v5 = vadd.f32 %v6005_v10, %v5997_v23  ;;  %v2173_v2 = vmax.f32 %v1762_v12, 0.0 }
 0x15b   : > { %2476 = vmatpush.msrb.mxu1 %v2220_v21  ;;  %2502 = vmatpush.msrb.mxu2 %v2269_v22  ;;  %v2174_v21 = vmax.f32 %v1803_v61, 0.0  ;;  %v6203_v22 = vld [vmem:[%s7256_s3 + $0x10] sm:$0xff] }
 0x15c   : > { %2531 = vmatpush.msrb.mxu3 %v2270_v58  ;;  %2448 = vmatpush.msrb.mxu0 %v2203_v35  ;;  %v2157_v58 = vmax.f32 %v1759_v56, 0.0  ;;  %v2158_v24 = vmax.f32 %v1800_v5, 0.0 }
 0x15d   : > { %4661 = vmatmul.msk.f32.vlgmr.msra.gmra.mxu0 %vm2307_vm1, %v6125_v59  ;;  %2477 = vmatpush.msrb.mxu1 %v2204_v30 }
 0x15e   : > { %4665 = vmatmul.msk.f32.vlgmr.msra.gmra.mxu1 %vm2307_vm1, %v6125_v59  ;;  %v6151_v39 = vpop.f32.mrf.mxu2  ;;  %v6155_v19 = vpop.f32.mrf.mxu0  ;;  %2503 = vmatpush.msrb.mxu2 %v2253_v36 }
 0x15f   : > { %v6153_v34 = vpop.f32.mrf.mxu3  ;;  %v6157_v45 = vpop.f32.mrf.mxu1  ;;  %2532 = vmatpush.msrb.mxu3 %v2254_v42  ;;  %2449 = vmatpush.msrb.mxu0 %v2187_v43 }
 0x160   : > { %4669 = vmatmul.msk.f32.vlgmr.msra.gmra.mxu2 %vm2307_vm1, %v6125_v59  ;;  %2478 = vmatpush.msrb.mxu1 %v2188_v44 }
 0x161   : > { %4673 = vmatmul.msk.f32.vlgmr.msra.gmra.mxu3 %vm2307_vm1, %v6125_v59  ;;  %2504 = vmatpush.msrb.mxu2 %v2237_v1 }
 0x162   : > { %2533 = vmatpush.msrb.mxu3 %v2238_v46  ;;  %2450 = vmatpush.msrb.mxu0 %v2171_v41 }
 0x163   : > { %2479 = vmatpush.msrb.mxu1 %v2172_v25  ;;  %2505 = vmatpush.msrb.mxu2 %v2221_v11 }
 0x164   : > { %2534 = vmatpush.msrb.mxu3 %v2222_v52  ;;  %2451 = vmatpush.msrb.mxu0 %v2155_v18 }
 0x165   : > { %4662 = vmatmul.msk.f32.gmra.mxu0 %vm2307_vm1, %v6170_v57  ;;  %2480 = vmatpush.msrb.mxu1 %v2156_v28 }
 0x166   : > { %4666 = vmatmul.msk.f32.gmra.mxu1 %vm2307_vm1, %v6170_v57  ;;  %v6188_v13 = vpop.f32.mrf.mxu2  ;;  %v6192_v4 = vpop.f32.mrf.mxu0  ;;  %2506 = vmatpush.msrb.mxu2 %v2205_v50 }
 0x167   : > { %v6190_v62 = vpop.f32.mrf.mxu3  ;;  %v6194_v55 = vpop.f32.mrf.mxu1  ;;  %2535 = vmatpush.msrb.mxu3 %v2206_v60 }
 0x168   : > { %4670 = vmatmul.msk.f32.gmra.mxu2 %vm2307_vm1, %v6170_v57 }
 0x169   : > { %4674 = vmatmul.msk.f32.gmra.mxu3 %vm2307_vm1, %v6170_v57  ;;  %2507 = vmatpush.msrb.mxu2 %v2189_v49 }
 0x16a   : > { %2536 = vmatpush.msrb.mxu3 %v2190_v15 }
 0x16b   : > { %2508 = vmatpush.msrb.mxu2 %v2173_v2 }
 0x16c   : > { %2537 = vmatpush.msrb.mxu3 %v2174_v21 }
 0x16d   : > { %4663 = vmatmul.msk.f32.gmra.mxu0 %vm2307_vm1, %v6203_v22  ;;  %2509 = vmatpush.msrb.mxu2 %v2157_v58 }
 0x16e   : > { %4667 = vmatmul.msk.f32.gmra.mxu1 %vm2307_vm1, %v6203_v22  ;;  %2538 = vmatpush.msrb.mxu3 %v2158_v24  ;;  %v6209_v27 = vpop.f32.mrf.mxu2  ;;  %v1849_v53 = vpop.f32.mrf.mxu0 }
 0x16f   : > { %v6211_v10 = vpop.f32.mrf.mxu3  ;;  %v1890_v14 = vpop.f32.mrf.mxu1  ;;  %v1850_v50 = vadd.f32 %v1849_v53, %v5922_v9 }
 0x170   : > { %4671 = vmatmul.msk.f32.gmra.mxu2 %vm2307_vm1, %v6203_v22  ;;  %v1891_v60 = vadd.f32 %v1890_v14, %v5922_v9 }
 0x171   : > { %4675 = vmatmul.msk.f32.gmra.mxu3 %vm2307_vm1, %v6203_v22 }
 0x175   : > { %4664 = vmatmul.msk.f32.gmra.mxu0 %vm2307_vm1, %v6220_v20 }
 0x176   : > { %4668 = vmatmul.msk.f32.gmra.mxu1 %vm2307_vm1, %v6220_v20  ;;  %v6226_v32 = vpop.f32.mrf.mxu2  ;;  %v1852_v48 = vpop.f32.mrf.mxu0 }
 0x177   : > { %v6228_v33 = vpop.f32.mrf.mxu3  ;;  %v1893_v29 = vpop.f32.mrf.mxu1  ;;  %v1853_v18 = vadd.f32 %v1852_v48, %v5946_v37  ;;  %v1847_v48 = vadd.f32 %v6192_v4, %v5972_v0  ;;  %v2207_v4 = vmax.f32 %v1850_v50, 0.0  ;;  %v1926_v50 = vadd.f32 %v6188_v13, %v5985_v17 }
 0x178   : > { %4672 = vmatmul.msk.f32.gmra.mxu2 %vm2307_vm1, %v6220_v20  ;;  %v1894_v28 = vadd.f32 %v1893_v29, %v5946_v37  ;;  %v1888_v29 = vadd.f32 %v6194_v55, %v5972_v0 }
 0x179   : > { %4676 = vmatmul.msk.f32.gmra.mxu3 %vm2307_vm1, %v6220_v20 }
 0x17d   : > { %4677 = vmatmul.msk.f32.vlgmr.msrb.gmra.mxu0 %vm2307_vm1, %v6125_v59 }
 0x17e   : > { %4681 = vmatmul.msk.f32.vlgmr.msrb.gmra.mxu1 %vm2307_vm1, %v6125_v59  ;;  %v6238_v35 = vpop.f32.mrf.mxu2  ;;  %v1855_v26 = vpop.f32.mrf.mxu0 }
 0x17f   : > { %v6240_v30 = vpop.f32.mrf.mxu3  ;;  %v1896_v31 = vpop.f32.mrf.mxu1  ;;  %v1856_v11 = vadd.f32 %v1855_v26, %v5902_v3  ;;  %v2223_v26 = vmax.f32 %v1853_v18, 0.0  ;;  %v1935_v55 = vadd.f32 %v6238_v35, %v5946_v37  ;;  %v1932_v35 = vadd.f32 %v6226_v32, %v5922_v9 }
 0x180   : > { %4685 = vmatmul.msk.f32.vlgmr.msrb.gmra.mxu2 %vm2307_vm1, %v6125_v59  ;;  %v1897_v52 = vadd.f32 %v1896_v31, %v5902_v3  ;;  %v2224_v31 = vmax.f32 %v1894_v28, 0.0  ;;  %v1970_v32 = vadd.f32 %v6211_v10, %v5972_v0  ;;  %v1923_v10 = vadd.f32 %v6151_v39, %v5997_v23 }
 0x181   : > { %4689 = vmatmul.msk.f32.vlgmr.msrb.gmra.mxu3 %vm2307_vm1, %v6125_v59  ;;  %v2239_v56 = vmax.f32 %v1856_v11, 0.0  ;;  %v2225_v28 = vmax.f32 %v1935_v55, 0.0 }
 0x182   : > { %v2240_v5 = vmax.f32 %v1897_v52, 0.0 }
 0x185   : > { %4678 = vmatmul.msk.f32.gmra.mxu0 %vm2307_vm1, %v6170_v57 }
 0x186   : > { %4682 = vmatmul.msk.f32.gmra.mxu1 %vm2307_vm1, %v6170_v57  ;;  %v1937_v36 = vpop.f32.mrf.mxu2  ;;  %v1858_v43 = vpop.f32.mrf.mxu0 }
 0x187   : > { %v1978_v42 = vpop.f32.mrf.mxu3  ;;  %v1899_v44 = vpop.f32.mrf.mxu1  ;;  %v1859_v41 = vadd.f32 %v1858_v43, %v5920_v8  ;;  %v1938_v43 = vadd.f32 %v1937_v36, %v5902_v3  ;;  %v1976_v36 = vadd.f32 %v6240_v30, %v5946_v37  ;;  %v1973_v30 = vadd.f32 %v6228_v33, %v5922_v9 }
 0x188   : > { %4686 = vmatmul.msk.f32.gmra.mxu2 %vm2307_vm1, %v6170_v57  ;;  %v1900_v25 = vadd.f32 %v1899_v44, %v5920_v8  ;;  %v1979_v44 = vadd.f32 %v1978_v42, %v5902_v3 }
 0x189   : > { %4690 = vmatmul.msk.f32.gmra.mxu3 %vm2307_vm1, %v6170_v57  ;;  %v2255_v12 = vmax.f32 %v1859_v41, 0.0  ;;  %v2208_v41 = vmax.f32 %v1891_v60, 0.0  ;;  %v2241_v11 = vmax.f32 %v1938_v43, 0.0  ;;  %v2226_v33 = vmax.f32 %v1976_v36, 0.0 }
 0x18a   : > { %v2256_v61 = vmax.f32 %v1900_v25, 0.0  ;;  %v2242_v52 = vmax.f32 %v1979_v44, 0.0  ;;  %v1967_v60 = vadd.f32 %v6190_v62, %v5985_v17  ;;  %v2177_v62 = vmax.f32 %v1926_v50, 0.0 }
 0x18d   : > { %4679 = vmatmul.msk.f32.gmra.mxu0 %vm2307_vm1, %v6203_v22 }
 0x18e   : > { %4683 = vmatmul.msk.f32.gmra.mxu1 %vm2307_vm1, %v6203_v22  ;;  %v1940_v1 = vpop.f32.mrf.mxu2  ;;  %v1861_v47 = vpop.f32.mrf.mxu0 }
 0x18f   : > { %v1981_v46 = vpop.f32.mrf.mxu3  ;;  %v1902_v40 = vpop.f32.mrf.mxu1  ;;  %v1862_v38 = vadd.f32 %v1861_v47, %v5882_v54  ;;  %v1941_v49 = vadd.f32 %v1940_v1, %v5920_v8  ;;  %v1844_v47 = vadd.f32 %v6155_v19, %v5985_v17  ;;  %v1841_v19 = vadd.f32 %v6114_v6, %v5997_v23 }
 0x190   : > { %4687 = vmatmul.msk.f32.gmra.mxu2 %vm2307_vm1, %v6203_v22  ;;  %v1903_v51 = vadd.f32 %v1902_v40, %v5882_v54  ;;  %v1982_v21 = vadd.f32 %v1981_v46, %v5920_v8  ;;  %v1885_v40 = vadd.f32 %v6157_v45, %v5985_v17  ;;  %v1882_v45 = vadd.f32 %v6116_v7, %v5997_v23 }
 0x191   : > { %4691 = vmatmul.msk.f32.gmra.mxu3 %vm2307_vm1, %v6203_v22  ;;  %v2271_v63 = vmax.f32 %v1862_v38, 0.0  ;;  %v2257_v25 = vmax.f32 %v1941_v49, 0.0  ;;  %v2191_v38 = vmax.f32 %v1847_v48, 0.0  ;;  %v1929_v7 = vadd.f32 %v6209_v27, %v5972_v0 }
 0x192   : > { %v2272_v16 = vmax.f32 %v1903_v51, 0.0  ;;  %v2258_v42 = vmax.f32 %v1982_v21, 0.0  ;;  %v2192_v51 = vmax.f32 %v1888_v29, 0.0  ;;  %v2178_v21 = vmax.f32 %v1967_v60, 0.0 }
 0x193   : > { %2560 = vmatpush.msra.mxu0 %v2271_v63  ;;  %v2175_v63 = vmax.f32 %v1844_v47, 0.0  ;;  %v2193_v13 = vmax.f32 %v1929_v7, 0.0 }
 0x194   : > { %2589 = vmatpush.msra.mxu1 %v2272_v16  ;;  %v2176_v16 = vmax.f32 %v1885_v40, 0.0 }
 0x195   : > { %4680 = vmatmul.msk.f32.gmra.mxu0 %vm2307_vm1, %v6220_v20 }
 0x196   : > { %4684 = vmatmul.msk.f32.gmra.mxu1 %vm2307_vm1, %v6220_v20  ;;  %v1943_v15 = vpop.f32.mrf.mxu2  ;;  %2561 = vmatpush.msra.mxu0 %v2255_v12  ;;  %v6284_v53 = vpop.f32.mrf.mxu0  ;;  %v2159_v12 = vmax.f32 %v1841_v19, 0.0 }
 0x197   : > { %v1984_v2 = vpop.f32.mrf.mxu3  ;;  %2590 = vmatpush.msra.mxu1 %v2256_v61  ;;  %v1944_v58 = vadd.f32 %v1943_v15, %v5882_v54  ;;  %v6286_v14 = vpop.f32.mrf.mxu1  ;;  %v2160_v61 = vmax.f32 %v1882_v45, 0.0  ;;  %v1964_v15 = vadd.f32 %v6153_v34, %v5997_v23 }
 0x198   : > { %4688 = vmatmul.msk.f32.gmra.mxu2 %vm2307_vm1, %v6220_v20  ;;  %v1985_v24 = vadd.f32 %v1984_v2, %v5882_v54  ;;  %2562 = vmatpush.msra.mxu0 %v2239_v56  ;;  %v2209_v56 = vmax.f32 %v1932_v35, 0.0  ;;  %v2194_v2 = vmax.f32 %v1970_v32, 0.0 }
 0x199   : > { %4692 = vmatmul.msk.f32.gmra.mxu3 %vm2307_vm1, %v6220_v20  ;;  %2591 = vmatpush.msra.mxu1 %v2240_v5  ;;  %v2273_v1 = vmax.f32 %v1944_v58, 0.0  ;;  %v2210_v5 = vmax.f32 %v1973_v30, 0.0  ;;  %v2161_v58 = vmax.f32 %v1923_v10, 0.0 }
 0x19a   : > { %v2274_v46 = vmax.f32 %v1985_v24, 0.0  ;;  %2563 = vmatpush.msra.mxu0 %v2223_v26  ;;  %v2162_v24 = vmax.f32 %v1964_v15, 0.0 }
 0x19b   : > { %2592 = vmatpush.msra.mxu1 %v2224_v31  ;;  %2618 = vmatpush.msra.mxu2 %v2273_v1 }
 0x19c   : > { %2647 = vmatpush.msra.mxu3 %v2274_v46  ;;  %2564 = vmatpush.msra.mxu0 %v2207_v4 }
 0x19d   : > { %2593 = vmatpush.msra.mxu1 %v2208_v41  ;;  %2619 = vmatpush.msra.mxu2 %v2257_v25 }
 0x19e   : > { %2648 = vmatpush.msra.mxu3 %v2258_v42  ;;  %v6310_v6 = vpop.f32.mrf.mxu2  ;;  %2565 = vmatpush.msra.mxu0 %v2191_v38 }
 0x19f   : > { %v6312_v18 = vpop.f32.mrf.mxu3  ;;  %2594 = vmatpush.msra.mxu1 %v2192_v51  ;;  %2620 = vmatpush.msra.mxu2 %v2241_v11 }
 0x1a0   : > { %2649 = vmatpush.msra.mxu3 %v2242_v52  ;;  %2566 = vmatpush.msra.mxu0 %v2175_v63 }
 0x1a1   : > { %2595 = vmatpush.msra.mxu1 %v2176_v16  ;;  %2621 = vmatpush.msra.mxu2 %v2225_v28 }
 0x1a2   : > { %v6322_v27 = vpop.f32.mrf.mxu0  ;;  %2650 = vmatpush.msra.mxu3 %v2226_v33  ;;  %2567 = vmatpush.msra.mxu0 %v2159_v12 }
 0x1a3   : > { %v6324_v49 = vpop.f32.mrf.mxu1  ;;  %2596 = vmatpush.msra.mxu1 %v2160_v61  ;;  %2622 = vmatpush.msra.mxu2 %v2209_v56 }
 0x1a4   : > { %2651 = vmatpush.msra.mxu3 %v2210_v5  ;;  %4693 = vmatmul.msk.f32.vlgmr.msra.gmra.mxu0 %vm2307_vm1, %v6125_v59 }
 0x1a5   : > { %4697 = vmatmul.msk.f32.vlgmr.msra.gmra.mxu1 %vm2307_vm1, %v6125_v59  ;;  %2623 = vmatpush.msra.mxu2 %v2193_v13 }
 0x1a6   : > { %2652 = vmatpush.msra.mxu3 %v2194_v2 }
 0x1a7   : > { %2624 = vmatpush.msra.mxu2 %v2177_v62 }
 0x1a8   : > { %2653 = vmatpush.msra.mxu3 %v2178_v21 }
 0x1a9   : > { %2625 = vmatpush.msra.mxu2 %v2161_v58 }
 0x1aa   : > { %v6334_v39 = vpop.f32.mrf.mxu2  ;;  %v6338_v48 = vpop.f32.mrf.mxu0  ;;  %2654 = vmatpush.msra.mxu3 %v2162_v24  ;;  %4701 = vmatmul.msk.f32.vlgmr.msra.gmra.mxu2 %vm2307_vm1, %v6125_v59 }
 0x1ab   : > { %v6336_v34 = vpop.f32.mrf.mxu3  ;;  %v6340_v29 = vpop.f32.mrf.mxu1  ;;  %4705 = vmatmul.msk.f32.vlgmr.msra.gmra.mxu3 %vm2307_vm1, %v6125_v59 }
 0x1ac   : > { %4694 = vmatmul.msk.f32.gmra.mxu0 %vm2307_vm1, %v6170_v57 }
 0x1ad   : > { %4698 = vmatmul.msk.f32.gmra.mxu1 %vm2307_vm1, %v6170_v57 }
 0x1b2   : > { %v2013_v43 = vpop.f32.mrf.mxu0  ;;  %4702 = vmatmul.msk.f32.gmra.mxu2 %vm2307_vm1, %v6170_v57 }
 0x1b3   : > { %v6350_v26 = vpop.f32.mrf.mxu2  ;;  %v2054_v44 = vpop.f32.mrf.mxu1  ;;  %4706 = vmatmul.msk.f32.gmra.mxu3 %vm2307_vm1, %v6170_v57  ;;  %v2014_v56 = vadd.f32 %v2013_v43, %v5922_v9  ;;  %v2011_v43 = vadd.f32 %v6338_v48, %v5972_v0 }
 0x1b4   : > { %v6352_v31 = vpop.f32.mrf.mxu3  ;;  %4695 = vmatmul.msk.f32.gmra.mxu0 %vm2307_vm1, %v6203_v22  ;;  %v2055_v5 = vadd.f32 %v2054_v44, %v5922_v9  ;;  %v2052_v44 = vadd.f32 %v6340_v29, %v5972_v0 }
 0x1b5   : > { %4699 = vmatmul.msk.f32.gmra.mxu1 %vm2307_vm1, %v6203_v22  ;;  %v2211_v48 = vmax.f32 %v2014_v56, 0.0 }
 0x1ba   : > { %v2016_v47 = vpop.f32.mrf.mxu0  ;;  %4703 = vmatmul.msk.f32.gmra.mxu2 %vm2307_vm1, %v6203_v22 }
 0x1bb   : > { %v6362_v1 = vpop.f32.mrf.mxu2  ;;  %v2057_v40 = vpop.f32.mrf.mxu1  ;;  %4707 = vmatmul.msk.f32.gmra.mxu3 %vm2307_vm1, %v6203_v22  ;;  %v2017_v12 = vadd.f32 %v2016_v47, %v5946_v37 }
 0x1bc   : > { %v6364_v46 = vpop.f32.mrf.mxu3  ;;  %4696 = vmatmul.msk.f32.gmra.mxu0 %vm2307_vm1, %v6220_v20  ;;  %v2058_v61 = vadd.f32 %v2057_v40, %v5946_v37 }
 0x1bd   : > { %4700 = vmatmul.msk.f32.gmra.mxu1 %vm2307_vm1, %v6220_v20 }
 0x1c2   : > { %v2019_v55 = vpop.f32.mrf.mxu0  ;;  %4704 = vmatmul.msk.f32.gmra.mxu2 %vm2307_vm1, %v6220_v20 }
 0x1c3   : > { %v2098_v4 = vpop.f32.mrf.mxu2  ;;  %v2060_v36 = vpop.f32.mrf.mxu1  ;;  %4708 = vmatmul.msk.f32.gmra.mxu3 %vm2307_vm1, %v6220_v20  ;;  %v2020_v7 = vadd.f32 %v2019_v55, %v5902_v3  ;;  %v2227_v55 = vmax.f32 %v2017_v12, 0.0 }
 0x1c4   : > { %v2139_v41 = vpop.f32.mrf.mxu3  ;;  %v2061_v32 = vadd.f32 %v2060_v36, %v5902_v3  ;;  %v2228_v36 = vmax.f32 %v2058_v61, 0.0  ;;  %v2099_v29 = vadd.f32 %v2098_v4, %v5946_v37  ;;  %v2090_v61 = vadd.f32 %v6334_v39, %v5985_v17 }
 0x1c5   : > { %v2243_v10 = vmax.f32 %v2020_v7, 0.0 }
 0x1c6   : > { %v2244_v15 = vmax.f32 %v2061_v32, 0.0  ;;  %v2229_v32 = vmax.f32 %v2099_v29, 0.0 }
 0x1ca   : > { %v2022_v19 = vpop.f32.mrf.mxu0 }
 0x1cb   : > { %v2101_v25 = vpop.f32.mrf.mxu2  ;;  %v2063_v45 = vpop.f32.mrf.mxu1  ;;  %v2023_v11 = vadd.f32 %v2022_v19, %v5920_v8 }
 0x1cc   : > { %v2142_v42 = vpop.f32.mrf.mxu3  ;;  %v2064_v52 = vadd.f32 %v2063_v45, %v5920_v8 }
 0x1cd   : > { %v2259_v50 = vmax.f32 %v2023_v11, 0.0  ;;  %v2143_v19 = vadd.f32 %v2142_v42, %v5902_v3  ;;  %v2195_v42 = vmax.f32 %v2011_v43, 0.0 }
 0x1ce   : > { %v2260_v60 = vmax.f32 %v2064_v52, 0.0  ;;  %v2096_v52 = vadd.f32 %v6362_v1, %v5922_v9  ;;  %v2134_v1 = vadd.f32 %v6352_v31, %v5972_v0  ;;  %v2128_v31 = vadd.f32 %v6312_v18, %v5997_v23 }
 0x1d2   : > { %v2025_v35 = vpop.f32.mrf.mxu0 }
 0x1d3   : > { %v2104_v38 = vpop.f32.mrf.mxu2  ;;  %v2066_v30 = vpop.f32.mrf.mxu1  ;;  %v2026_v63 = vadd.f32 %v2025_v35, %v5882_v54  ;;  %v2212_v35 = vmax.f32 %v2055_v5, 0.0  ;;  %v2198_v5 = vmax.f32 %v2134_v1, 0.0 }
 0x1d4   : > { %v2145_v51 = vpop.f32.mrf.mxu3  ;;  %v2067_v16 = vadd.f32 %v2066_v30, %v5882_v54  ;;  %v2105_v62 = vadd.f32 %v2104_v38, %v5920_v8  ;;  %v2008_v38 = vadd.f32 %v6322_v27, %v5985_v17  ;;  %v2140_v30 = vadd.f32 %v2139_v41, %v5946_v37 }
 0x1d5   : > { %v2275_v28 = vmax.f32 %v2026_v63, 0.0  ;;  %v2146_v21 = vadd.f32 %v2145_v51, %v5920_v8  ;;  %v2102_v8 = vadd.f32 %v2101_v25, %v5902_v3  ;;  %v2049_v51 = vadd.f32 %v6324_v49, %v5985_v17 }
 0x1d6   : > { %v2276_v33 = vmax.f32 %v2067_v16, 0.0  ;;  %v2261_v11 = vmax.f32 %v2105_v62, 0.0  ;;  %v2005_v3 = vadd.f32 %v6284_v53, %v5997_v23  ;;  %v2046_v27 = vadd.f32 %v6286_v14, %v5997_v23 }
 0x1d7   : > { %2676 = vmatpush.msrb.mxu0 %v2275_v28  ;;  %v2262_v25 = vmax.f32 %v2146_v21, 0.0  ;;  %v2196_v49 = vmax.f32 %v2052_v44, 0.0  ;;  %v2137_v37 = vadd.f32 %v6364_v46, %v5922_v9  ;;  %v2245_v4 = vmax.f32 %v2102_v8, 0.0 }
 0x1d8   : > { %2705 = vmatpush.msrb.mxu1 %v2276_v33  ;;  %v2246_v41 = vmax.f32 %v2143_v19, 0.0  ;;  %v2179_v63 = vmax.f32 %v2008_v38, 0.0  ;;  %v2180_v16 = vmax.f32 %v2049_v51, 0.0  ;;  %v2093_v14 = vadd.f32 %v6350_v26, %v5972_v0 }
 0x1d9   : > { %2677 = vmatpush.msrb.mxu0 %v2259_v50  ;;  %v2230_v9 = vmax.f32 %v2140_v30, 0.0  ;;  %v2163_v33 = vmax.f32 %v2005_v3, 0.0  ;;  %v2164_v12 = vmax.f32 %v2046_v27, 0.0  ;;  %v2131_v50 = vadd.f32 %v6336_v34, %v5985_v17 }
 0x1da   : > { %2706 = vmatpush.msrb.mxu1 %v2260_v60  ;;  %v6392_v47 = vpop.f32.mrf.mxu0  ;;  %v2213_v26 = vmax.f32 %v2096_v52, 0.0  ;;  %v2214_v60 = vmax.f32 %v2137_v37, 0.0  ;;  %v2087_v0 = vadd.f32 %v6310_v6, %v5997_v23  ;;  %v2197_v56 = vmax.f32 %v2093_v14, 0.0 }
 0x1db   : > { %v2107_v13 = vpop.f32.mrf.mxu2  ;;  %v6394_v40 = vpop.f32.mrf.mxu1  ;;  %2678 = vmatpush.msrb.mxu0 %v2243_v10  ;;  %v2181_v17 = vmax.f32 %v2090_v61, 0.0  ;;  %v2182_v39 = vmax.f32 %v2131_v50, 0.0  ;;  %v6499_v50 = vld [vmem:[%s7258_s5] sm:$0xff] }
 0x1dc   : > { %v2148_v2 = vpop.f32.mrf.mxu3  ;;  %v2108_v58 = vadd.f32 %v2107_v13, %v5882_v54  ;;  %2707 = vmatpush.msrb.mxu1 %v2244_v15  ;;  %v2165_v6 = vmax.f32 %v2087_v0, 0.0  ;;  %v2166_v15 = vmax.f32 %v2128_v31, 0.0  ;;  %v6436_v13 = vpop.permute.xlu2 %2304 }
 0x1dd   : > { %v2149_v24 = vadd.f32 %v2148_v2, %v5882_v54  ;;  %2679 = vmatpush.msrb.mxu0 %v2227_v55  ;;  %v6446_v2 = vpop.permute.xlu0 %2299 }
 0x1de   : > { %v2277_v45 = vmax.f32 %v2108_v58, 0.0  ;;  %2708 = vmatpush.msrb.mxu1 %v2228_v36  ;;  %v6452_v36 = vpop.permute.xlu1 %2294 }
 0x1df   : > { %v2278_v54 = vmax.f32 %v2149_v24, 0.0  ;;  %2680 = vmatpush.msrb.mxu0 %v2211_v48 }
 0x1e0   : > { %2734 = vmatpush.msrb.mxu2 %v2277_v45  ;;  %2709 = vmatpush.msrb.mxu1 %v2212_v35 }
 0x1e1   : > { %2763 = vmatpush.msrb.mxu3 %v2278_v54  ;;  %2681 = vmatpush.msrb.mxu0 %v2195_v42 }
 0x1e2   : > { %2735 = vmatpush.msrb.mxu2 %v2261_v11  ;;  %2710 = vmatpush.msrb.mxu1 %v2196_v49  ;;  %v2340_v46 = vpop.f32.mrf.mxu0 }
 0x1e3   : > { %2764 = vmatpush.msrb.mxu3 %v2262_v25  ;;  %v6416_v53 = vpop.f32.mrf.mxu2  ;;  %v2369_v28 = vpop.f32.mrf.mxu1  ;;  %2682 = vmatpush.msrb.mxu0 %v2179_v63  ;;  %v2341_v8 = vadd.f32 %v2340_v46, %v6452_v36 }
 0x1e4   : > { %v6418_v7 = vpop.f32.mrf.mxu3  ;;  %2736 = vmatpush.msrb.mxu2 %v2245_v4  ;;  %2711 = vmatpush.msrb.mxu1 %v2180_v16  ;;  %v2370_v19 = vadd.f32 %v2369_v28, %v6452_v36  ;;  %v6460_v38 = vpop.permute.xlu2 %2289 }
 0x1e5   : > { %2765 = vmatpush.msrb.mxu3 %v2246_v41  ;;  %2683 = vmatpush.msrb.mxu0 %v2163_v33  ;;  %v2338_v51 = vadd.f32 %v6392_v47, %v6460_v38  ;;  %v2800_v29 = vmax.f32 %v2341_v8, 0.0  ;;  %v2396_v14 = vadd.f32 %v6416_v53, %v6460_v38  ;;  %v2425_v1 = vadd.f32 %v6418_v7, %v6460_v38 }
 0x1e6   : > { %2737 = vmatpush.msrb.mxu2 %v2229_v32  ;;  %2712 = vmatpush.msrb.mxu1 %v2164_v12  ;;  %v2801_v30 = vmax.f32 %v2370_v19, 0.0 }
 0x1e7   : > { %2766 = vmatpush.msrb.mxu3 %v2230_v9  ;;  %4709 = vmatmul.msk.f32.vlgmr.msrb.gmra.mxu0 %vm2307_vm1, %v6125_v59  ;;  %v2784_v52 = vmax.f32 %v2338_v51, 0.0  ;;  %v2786_v33 = vmax.f32 %v2396_v14, 0.0  ;;  %v2787_v7 = vmax.f32 %v2425_v1, 0.0 }
 0x1e8   : > { %2738 = vmatpush.msrb.mxu2 %v2213_v26  ;;  %4713 = vmatmul.msk.f32.vlgmr.msrb.gmra.mxu1 %vm2307_vm1, %v6125_v59 }
 0x1e9   : > { %2767 = vmatpush.msrb.mxu3 %v2214_v60 }
 0x1ea   : > { %2739 = vmatpush.msrb.mxu2 %v2197_v56  ;;  %v2343_v23 = vpop.f32.mrf.mxu0  ;;  %v6512_v56 = vld [vmem:[%s7258_s5 + $0x8] sm:$0xff] }
 0x1eb   : > { %2768 = vmatpush.msrb.mxu3 %v2198_v5  ;;  %v2398_v34 = vpop.f32.mrf.mxu2  ;;  %v2372_v18 = vpop.f32.mrf.mxu1  ;;  %v2344_v43 = vadd.f32 %v2343_v23, %v6446_v2 }
 0x1ec   : > { %v2427_v10 = vpop.f32.mrf.mxu3  ;;  %2740 = vmatpush.msrb.mxu2 %v2181_v17  ;;  %v2373_v44 = vadd.f32 %v2372_v18, %v6446_v2  ;;  %v2399_v4 = vadd.f32 %v2398_v34, %v6452_v36 }
 0x1ed   : > { %2769 = vmatpush.msrb.mxu3 %v2182_v39  ;;  %v2816_v48 = vmax.f32 %v2344_v43, 0.0  ;;  %v2428_v41 = vadd.f32 %v2427_v10, %v6452_v36 }
 0x1ee   : > { %2741 = vmatpush.msrb.mxu2 %v2165_v6  ;;  %v2817_v35 = vmax.f32 %v2373_v44, 0.0  ;;  %v2802_v46 = vmax.f32 %v2399_v4, 0.0 }
 0x1ef   : > { %2770 = vmatpush.msrb.mxu3 %v2166_v15  ;;  %4717 = vmatmul.msk.f32.vlgmr.msrb.gmra.mxu2 %vm2307_vm1, %v6125_v59 }
 0x1f0   : > { %4721 = vmatmul.msk.f32.vlgmr.msrb.gmra.mxu3 %vm2307_vm1, %v6125_v59  ;;  %4710 = vmatmul.msk.f32.gmra.mxu0 %vm2307_vm1, %v6170_v57 }
 0x1f1   : > { %4714 = vmatmul.msk.f32.gmra.mxu1 %vm2307_vm1, %v6170_v57 }
 0x1f2   : > { %v2346_v58 = vpop.f32.mrf.mxu0 }
 0x1f3   : > { %v2401_v62 = vpop.f32.mrf.mxu2  ;;  %v2375_v24 = vpop.f32.mrf.mxu1  ;;  %v2347_v55 = vadd.f32 %v2346_v58, %v6436_v13 }
 0x1f4   : > { %v2430_v21 = vpop.f32.mrf.mxu3  ;;  %v2376_v59 = vadd.f32 %v2375_v24, %v6436_v13  ;;  %v2402_v3 = vadd.f32 %v2401_v62, %v6446_v2 }
 0x1f5   : > { %v2832_v45 = vmax.f32 %v2347_v55, 0.0  ;;  %v2431_v27 = vadd.f32 %v2430_v21, %v6446_v2 }
 0x1f6   : > { %v2833_v54 = vmax.f32 %v2376_v59, 0.0  ;;  %v2818_v32 = vmax.f32 %v2402_v3, 0.0 }
 0x1f7   : > { %4718 = vmatmul.msk.f32.gmra.mxu2 %vm2307_vm1, %v6170_v57  ;;  %2880 = vmatpush.msra.mxu0 %v2832_v45  ;;  %v2819_v9 = vmax.f32 %v2431_v27, 0.0 }
 0x1f8   : > { %4722 = vmatmul.msk.f32.gmra.mxu3 %vm2307_vm1, %v6170_v57  ;;  %4711 = vmatmul.msk.f32.gmra.mxu0 %vm2307_vm1, %v6203_v22  ;;  %v2367_v57 = vadd.f32 %v6394_v40, %v6460_v38 }
 0x1f9   : > { %4715 = vmatmul.msk.f32.gmra.mxu1 %vm2307_vm1, %v6203_v22  ;;  %2881 = vmatpush.msra.mxu0 %v2816_v48 }
 0x1fa   : > { %2903 = vmatpush.msra.mxu1 %v2833_v54  ;;  %v6474_v49 = vpop.f32.mrf.mxu0  ;;  %v2785_v37 = vmax.f32 %v2367_v57, 0.0 }
 0x1fb   : > { %v2404_v11 = vpop.f32.mrf.mxu2  ;;  %v6476_v40 = vpop.f32.mrf.mxu1  ;;  %2882 = vmatpush.msra.mxu0 %v2800_v29  ;;  %v2454_v58 = vadd.f32 %v6474_v49, %v6460_v38 }
 0x1fc   : > { %v2433_v25 = vpop.f32.mrf.mxu3  ;;  %2904 = vmatpush.msra.mxu1 %v2817_v35  ;;  %v2405_v42 = vadd.f32 %v2404_v11, %v6436_v13  ;;  %v2483_v24 = vadd.f32 %v6476_v40, %v6460_v38 }
 0x1fd   : > { %v2434_v47 = vadd.f32 %v2433_v25, %v6436_v13  ;;  %2883 = vmatpush.msra.mxu0 %v2784_v52  ;;  %v2788_v48 = vmax.f32 %v2454_v58, 0.0 }
 0x1fe   : > { %2905 = vmatpush.msra.mxu1 %v2801_v30  ;;  %v2834_v63 = vmax.f32 %v2405_v42, 0.0  ;;  %v2789_v35 = vmax.f32 %v2483_v24, 0.0 }
 0x1ff   : > { %v2835_v16 = vmax.f32 %v2434_v47, 0.0  ;;  %4719 = vmatmul.msk.f32.gmra.mxu2 %vm2307_vm1, %v6203_v22 }
 0x200   : > { %4723 = vmatmul.msk.f32.gmra.mxu3 %vm2307_vm1, %v6203_v22  ;;  %2906 = vmatpush.msra.mxu1 %v2785_v37  ;;  %v2803_v22 = vmax.f32 %v2428_v41, 0.0 }
 0x201   : > { %2926 = vmatpush.msra.mxu2 %v2834_v63  ;;  %2949 = vmatpush.msra.mxu3 %v2835_v16 }
 0x202   : > { %4712 = vmatmul.msk.f32.gmra.mxu0 %vm2307_vm1, %v6220_v20  ;;  %4716 = vmatmul.msk.f32.gmra.mxu1 %vm2307_vm1, %v6220_v20  ;;  %v2456_v12 = vpop.f32.mrf.mxu0 }
 0x203   : > { %2927 = vmatpush.msra.mxu2 %v2818_v32  ;;  %2950 = vmatpush.msra.mxu3 %v2819_v9  ;;  %v6492_v28 = vpop.f32.mrf.mxu2  ;;  %v2485_v61 = vpop.f32.mrf.mxu1  ;;  %v2457_v23 = vadd.f32 %v2456_v12, %v6452_v36 }
 0x204   : > { %v6494_v53 = vpop.f32.mrf.mxu3  ;;  %v2486_v18 = vadd.f32 %v2485_v61, %v6452_v36  ;;  %v2512_v3 = vadd.f32 %v6492_v28, %v6460_v38 }
 0x205   : > { %2928 = vmatpush.msra.mxu2 %v2802_v46  ;;  %2951 = vmatpush.msra.mxu3 %v2803_v22  ;;  %v2804_v55 = vmax.f32 %v2457_v23, 0.0  ;;  %v2541_v27 = vadd.f32 %v6494_v53, %v6460_v38 }
 0x206   : > { %v2805_v59 = vmax.f32 %v2486_v18, 0.0  ;;  %v2790_v4 = vmax.f32 %v2512_v3, 0.0 }
 0x207   : > { %2929 = vmatpush.msra.mxu2 %v2786_v33  ;;  %2952 = vmatpush.msra.mxu3 %v2787_v7  ;;  %v2791_v41 = vmax.f32 %v2541_v27, 0.0 }
 0x208   : > { %4720 = vmatmul.msk.f32.gmra.mxu2 %vm2307_vm1, %v6220_v20  ;;  %4724 = vmatmul.msk.f32.gmra.mxu3 %vm2307_vm1, %v6220_v20 }
 0x20a   : > { %4725 = vmatmul.msk.f32.vlgmr.msra.gmra.mxu0 %vm702_vm0, %v6499_v50  ;;  %4727 = vmatmul.msk.f32.vlgmr.msra.gmra.mxu1 %vm702_vm0, %v6499_v50  ;;  %v2459_v0 = vpop.f32.mrf.mxu0 }
 0x20b   : > { %v2514_v26 = vpop.f32.mrf.mxu2  ;;  %v2488_v31 = vpop.f32.mrf.mxu1  ;;  %v2460_v34 = vadd.f32 %v2459_v0, %v6446_v2 }
 0x20c   : > { %v2543_v60 = vpop.f32.mrf.mxu3  ;;  %v2489_v10 = vadd.f32 %v2488_v31, %v6446_v2  ;;  %v2515_v29 = vadd.f32 %v2514_v26, %v6452_v36 }
 0x20d   : > { %v2820_v43 = vmax.f32 %v2460_v34, 0.0  ;;  %v2544_v30 = vadd.f32 %v2543_v60, %v6452_v36 }
 0x20e   : > { %v2821_v44 = vmax.f32 %v2489_v10, 0.0  ;;  %v2806_v49 = vmax.f32 %v2515_v29, 0.0 }
 0x20f   : > { %v2807_v40 = vmax.f32 %v2544_v30, 0.0 }
 0x210   : > { %4729 = vmatmul.msk.f32.vlgmr.msra.gmra.mxu2 %vm702_vm0, %v6499_v50  ;;  %4731 = vmatmul.msk.f32.vlgmr.msra.gmra.mxu3 %vm702_vm0, %v6499_v50 }
 0x212   : > { %4726 = vmatmul.msk.f32.gmra.mxu0 %vm702_vm0, %v6512_v56  ;;  %4728 = vmatmul.msk.f32.gmra.mxu1 %vm702_vm0, %v6512_v56  ;;  %v2462_v17 = vpop.f32.mrf.mxu0 }
 0x213   : > { %v2517_v20 = vpop.f32.mrf.mxu2  ;;  %v2491_v39 = vpop.f32.mrf.mxu1  ;;  %v2463_v6 = vadd.f32 %v2462_v17, %v6436_v13 }
 0x214   : > { %v2546_v5 = vpop.f32.mrf.mxu3  ;;  %v2492_v15 = vadd.f32 %v2491_v39, %v6436_v13  ;;  %v2518_v45 = vadd.f32 %v2517_v20, %v6446_v2 }
 0x215   : > { %v2836_v62 = vmax.f32 %v2463_v6, 0.0  ;;  %v2547_v54 = vadd.f32 %v2546_v5, %v6446_v2 }
 0x216   : > { %v2837_v21 = vmax.f32 %v2492_v15, 0.0  ;;  %v2822_v42 = vmax.f32 %v2518_v45, 0.0 }
 0x217   : > { %2972 = vmatpush.msrb.mxu0 %v2836_v62  ;;  %v2823_v47 = vmax.f32 %v2547_v54, 0.0 }
 0x218   : > { %4730 = vmatmul.msk.f32.gmra.mxu2 %vm702_vm0, %v6512_v56  ;;  %4732 = vmatmul.msk.f32.gmra.mxu3 %vm702_vm0, %v6512_v56 }
 0x219   : > { %2995 = vmatpush.msrb.mxu1 %v2837_v21  ;;  %2973 = vmatpush.msrb.mxu0 %v2820_v43 }
 0x21b   : > { %v2520_v8 = vpop.f32.mrf.mxu2  ;;  %2996 = vmatpush.msrb.mxu1 %v2821_v44  ;;  %2974 = vmatpush.msrb.mxu0 %v2804_v55 }
 0x21c   : > { %v2549_v19 = vpop.f32.mrf.mxu3  ;;  %v2521_v51 = vadd.f32 %v2520_v8, %v6436_v13 }
 0x21d   : > { %v2550_v57 = vadd.f32 %v2549_v19, %v6436_v13  ;;  %2997 = vmatpush.msrb.mxu1 %v2805_v59  ;;  %2975 = vmatpush.msrb.mxu0 %v2788_v48 }
 0x21e   : > { %v2838_v11 = vmax.f32 %v2521_v51, 0.0  ;;  %4733 = vmatmul.msk.f32.vlgmr.msrb.gmra.mxu0 %vm702_vm0, %v6499_v50 }
 0x21f   : > { %v2839_v25 = vmax.f32 %v2550_v57, 0.0  ;;  %2998 = vmatpush.msrb.mxu1 %v2789_v35 }
 0x220   : > { %3018 = vmatpush.msrb.mxu2 %v2838_v11  ;;  %4735 = vmatmul.msk.f32.vlgmr.msrb.gmra.mxu1 %vm702_vm0, %v6499_v50 }
 0x221   : > { %3041 = vmatpush.msrb.mxu3 %v2839_v25  ;;  %v2569_v52 = vpop.f32.mrf.mxu0 }
 0x222   : > { %3019 = vmatpush.msrb.mxu2 %v2822_v42  ;;  %v2598_v37 = vpop.f32.mrf.mxu1  ;;  %v2570_v17 = vadd.f32 %v2569_v52, %v6460_v38 }
 0x223   : > { %3042 = vmatpush.msrb.mxu3 %v2823_v47  ;;  %v2599_v39 = vadd.f32 %v2598_v37, %v6460_v38 }
 0x224   : > { %3020 = vmatpush.msrb.mxu2 %v2806_v49  ;;  %v2792_v23 = vmax.f32 %v2570_v17, 0.0 }
 0x225   : > { %3043 = vmatpush.msrb.mxu3 %v2807_v40  ;;  %v2793_v18 = vmax.f32 %v2599_v39, 0.0 }
 0x226   : > { %3021 = vmatpush.msrb.mxu2 %v2790_v4  ;;  %4734 = vmatmul.msk.f32.gmra.mxu0 %vm702_vm0, %v6512_v56 }
 0x227   : > { %3044 = vmatpush.msrb.mxu3 %v2791_v41  ;;  %4737 = vmatmul.msk.f32.vlgmr.msrb.gmra.mxu2 %vm702_vm0, %v6499_v50 }
 0x228   : > { %4739 = vmatmul.msk.f32.vlgmr.msrb.gmra.mxu3 %vm702_vm0, %v6499_v50  ;;  %4736 = vmatmul.msk.f32.gmra.mxu1 %vm702_vm0, %v6512_v56 }
 0x229   : > { %v2572_v63 = vpop.f32.mrf.mxu0 }
 0x22a   : > { %v2601_v16 = vpop.f32.mrf.mxu1  ;;  %v2573_v26 = vadd.f32 %v2572_v63, %v6452_v36 }
 0x22b   : > { %v2602_v60 = vadd.f32 %v2601_v16, %v6452_v36 }
 0x22c   : > { %v2808_v6 = vmax.f32 %v2573_v26, 0.0 }
 0x22d   : > { %v2627_v14 = vpop.f32.mrf.mxu2  ;;  %v2809_v15 = vmax.f32 %v2602_v60, 0.0 }
 0x22e   : > { %v2656_v1 = vpop.f32.mrf.mxu3  ;;  %v2628_v45 = vadd.f32 %v2627_v14, %v6460_v38 }
 0x22f   : > { %4738 = vmatmul.msk.f32.gmra.mxu2 %vm702_vm0, %v6512_v56  ;;  %v2657_v54 = vadd.f32 %v2656_v1, %v6460_v38 }
 0x230   : > { %4740 = vmatmul.msk.f32.gmra.mxu3 %vm702_vm0, %v6512_v56  ;;  %v2794_v29 = vmax.f32 %v2628_v45, 0.0 }
 0x231   : > { %v2575_v32 = vpop.f32.mrf.mxu0  ;;  %v2795_v30 = vmax.f32 %v2657_v54, 0.0 }
 0x232   : > { %v2604_v9 = vpop.f32.mrf.mxu1  ;;  %v2576_v33 = vadd.f32 %v2575_v32, %v6446_v2 }
 0x233   : > { %v2605_v7 = vadd.f32 %v2604_v9, %v6446_v2 }
 0x234   : > { %v2824_v34 = vmax.f32 %v2576_v33, 0.0 }
 0x235   : > { %v2630_v46 = vpop.f32.mrf.mxu2  ;;  %v2825_v10 = vmax.f32 %v2605_v7, 0.0 }
 0x236   : > { %v2659_v22 = vpop.f32.mrf.mxu3  ;;  %v2631_v55 = vadd.f32 %v2630_v46, %v6452_v36 }
 0x237   : > { %v2660_v59 = vadd.f32 %v2659_v22, %v6452_v36 }
 0x238   : > { %v2810_v48 = vmax.f32 %v2631_v55, 0.0 }
 0x239   : > { %v2578_v28 = vpop.f32.mrf.mxu0  ;;  %v2811_v35 = vmax.f32 %v2660_v59, 0.0  ;;  %v6616_v59 = vpop.permute.xlu1 %2854 }
 0x23a   : > { %v2607_v53 = vpop.f32.mrf.mxu1  ;;  %v2579_v12 = vadd.f32 %v2578_v28, %v6436_v13 }
 0x23b   : > { %v2608_v61 = vadd.f32 %v2607_v53, %v6436_v13 }
 0x23c   : > { %v2840_v0 = vmax.f32 %v2579_v12, 0.0 }
 0x23d   : > { %v2841_v31 = vmax.f32 %v2608_v61, 0.0  ;;  %v2633_v20 = vpop.f32.mrf.mxu2 }
 0x23e   : > { %v2662_v5 = vpop.f32.mrf.mxu3  ;;  %3064 = vmatpush.msra.mxu0 %v2840_v0  ;;  %v2634_v58 = vadd.f32 %v2633_v20, %v6446_v2 }
 0x23f   : > { %3087 = vmatpush.msra.mxu1 %v2841_v31  ;;  %v2663_v24 = vadd.f32 %v2662_v5, %v6446_v2 }
 0x240   : > { %3065 = vmatpush.msra.mxu0 %v2824_v34  ;;  %v2826_v51 = vmax.f32 %v2634_v58, 0.0 }
 0x241   : > { %3088 = vmatpush.msra.mxu1 %v2825_v10  ;;  %v2827_v57 = vmax.f32 %v2663_v24, 0.0 }
 0x242   : > { %3066 = vmatpush.msra.mxu0 %v2808_v6 }
 0x243   : > { %3089 = vmatpush.msra.mxu1 %v2809_v15 }
 0x244   : > { %3067 = vmatpush.msra.mxu0 %v2792_v23  ;;  %v6610_v23 = vpop.permute.xlu0 %2859 }
 0x245   : > { %3090 = vmatpush.msra.mxu1 %v2793_v18  ;;  %v2636_v62 = vpop.f32.mrf.mxu2  ;;  %4741 = vmatmul.msk.f32.vlgmr.msra.gmra.mxu0 %vm702_vm0, %v6499_v50 }
 0x246   : > { %v2665_v21 = vpop.f32.mrf.mxu3  ;;  %4743 = vmatmul.msk.f32.vlgmr.msra.gmra.mxu1 %vm702_vm0, %v6499_v50  ;;  %v2637_v43 = vadd.f32 %v2636_v62, %v6436_v13 }
 0x247   : > { %v2666_v44 = vadd.f32 %v2665_v21, %v6436_v13 }
 0x248   : > { %v2842_v8 = vmax.f32 %v2637_v43, 0.0 }
 0x249   : > { %v2843_v19 = vmax.f32 %v2666_v44, 0.0 }
 0x24a   : > { %3110 = vmatpush.msra.mxu2 %v2842_v8 }
 0x24b   : > { %3133 = vmatpush.msra.mxu3 %v2843_v19 }
 0x24c   : > { %3111 = vmatpush.msra.mxu2 %v2826_v51 }
 0x24d   : > { %3134 = vmatpush.msra.mxu3 %v2827_v57  ;;  %4742 = vmatmul.msk.f32.gmra.mxu0 %vm702_vm0, %v6512_v56 }
 0x24e   : > { %4744 = vmatmul.msk.f32.gmra.mxu1 %vm702_vm0, %v6512_v56  ;;  %3112 = vmatpush.msra.mxu2 %v2810_v48 }
 0x24f   : > { %3135 = vmatpush.msra.mxu3 %v2811_v35 }
 0x250   : > { %3113 = vmatpush.msra.mxu2 %v2794_v29 }
 0x251   : > { %3136 = vmatpush.msra.mxu3 %v2795_v30  ;;  %4745 = vmatmul.msk.f32.vlgmr.msra.gmra.mxu2 %vm702_vm0, %v6499_v50 }
 0x252   : > { %4747 = vmatmul.msk.f32.vlgmr.msra.gmra.mxu3 %vm702_vm0, %v6499_v50 }
 0x259   : > { %4746 = vmatmul.msk.f32.gmra.mxu2 %vm702_vm0, %v6512_v56 }
 0x25a   : > { %4748 = vmatmul.msk.f32.gmra.mxu3 %vm702_vm0, %v6512_v56 }
 0x264   : > { %v2685_v11 = vpop.f32.mrf.mxu0 }
 0x265   : > { %v2714_v25 = vpop.f32.mrf.mxu1  ;;  %v2686_v33 = vadd.f32 %v2685_v11, %v6460_v38 }
 0x266   : > { %v2715_v7 = vadd.f32 %v2714_v25, %v6460_v38 }
 0x267   : > { %v2796_v20 = vmax.f32 %v2686_v33, 0.0 }
 0x268   : > { %v2797_v5 = vmax.f32 %v2715_v7, 0.0 }
 0x26d   : > { %v2688_v3 = vpop.f32.mrf.mxu0 }
 0x26e   : > { %v2717_v27 = vpop.f32.mrf.mxu1  ;;  %v2689_v32 = vadd.f32 %v2688_v3, %v6452_v36  ;;  %v6633_v3 = vld [vmem:[%s7260_s7] sm:$0xff] }
 0x26f   : > { %v2718_v9 = vadd.f32 %v2717_v27, %v6452_v36 }
 0x270   : > { %v2812_v26 = vmax.f32 %v2689_v32, 0.0 }
 0x271   : > { %v2813_v60 = vmax.f32 %v2718_v9, 0.0 }
 0x272   : > { %v2743_v42 = vpop.f32.mrf.mxu2 }
 0x273   : > { %v2772_v47 = vpop.f32.mrf.mxu3  ;;  %v2744_v24 = vadd.f32 %v2743_v42, %v6460_v38 }
 0x274   : > { %v2773_v43 = vadd.f32 %v2772_v47, %v6460_v38 }
 0x275   : > { %v2691_v49 = vpop.f32.mrf.mxu0  ;;  %v2798_v29 = vmax.f32 %v2744_v24, 0.0 }
 0x276   : > { %v2720_v40 = vpop.f32.mrf.mxu1  ;;  %v2692_v63 = vadd.f32 %v2691_v49, %v6446_v2  ;;  %v2799_v30 = vmax.f32 %v2773_v43, 0.0 }
 0x277   : > { %v2721_v16 = vadd.f32 %v2720_v40, %v6446_v2 }
 0x278   : > { %v2828_v12 = vmax.f32 %v2692_v63, 0.0 }
 0x279   : > { %v2829_v61 = vmax.f32 %v2721_v16, 0.0 }
 0x27a   : > { %v2746_v52 = vpop.f32.mrf.mxu2 }
 0x27b   : > { %v2775_v37 = vpop.f32.mrf.mxu3  ;;  %v2747_v18 = vadd.f32 %v2746_v52, %v6452_v36 }
 0x27c   : > { %v2776_v62 = vadd.f32 %v2775_v37, %v6452_v36 }
 0x27d   : > { %v2814_v54 = vmax.f32 %v2747_v18, 0.0 }
 0x27e   : > { %v2815_v51 = vmax.f32 %v2776_v62, 0.0 }
 0x27f   : > { %v2694_v4 = vpop.f32.mrf.mxu0  ;;  %v2723_v41 = vpop.f32.mrf.mxu1 }
 0x280   : > { %v2695_v14 = vadd.f32 %v2694_v4, %v6436_v13  ;;  %v2724_v1 = vadd.f32 %v2723_v41, %v6436_v13 }
 0x282   : > { %v2844_v46 = vmax.f32 %v2695_v14, 0.0  ;;  %v2845_v22 = vmax.f32 %v2724_v1, 0.0  ;;  %v2749_v28 = vpop.f32.mrf.mxu2 }
 0x283   : > { %v2778_v53 = vpop.f32.mrf.mxu3  ;;  %v2750_v34 = vadd.f32 %v2749_v28, %v6446_v2 }
 0x284   : > { %3156 = vmatpush.msrb.mxu0 %v2844_v46  ;;  %3179 = vmatpush.msrb.mxu1 %v2845_v22  ;;  %v2779_v10 = vadd.f32 %v2778_v53, %v6446_v2 }
 0x285   : > { %v2830_v2 = vmax.f32 %v2750_v34, 0.0 }
 0x286   : > { %3157 = vmatpush.msrb.mxu0 %v2828_v12  ;;  %3180 = vmatpush.msrb.mxu1 %v2829_v61  ;;  %v2831_v8 = vmax.f32 %v2779_v10, 0.0 }
 0x287   : > { %v2885_v0 = vpop.f32.mrf.mxu0  ;;  %v2908_v31 = vpop.f32.mrf.mxu1 }
 0x288   : > { %3158 = vmatpush.msrb.mxu0 %v2812_v26  ;;  %3181 = vmatpush.msrb.mxu1 %v2813_v60  ;;  %v2886_v36 = vadd.f32 %v2885_v0, %v6616_v59  ;;  %v2909_v45 = vadd.f32 %v2908_v31, %v6616_v59 }
 0x28a   : > { %3159 = vmatpush.msrb.mxu0 %v2796_v20  ;;  %3182 = vmatpush.msrb.mxu1 %v2797_v5  ;;  %v3236_v11 = vmax.f32 %v2886_v36, 0.0  ;;  %v3237_v25 = vmax.f32 %v2909_v45, 0.0 }
 0x28b   : > { %v2752_v17 = vpop.f32.mrf.mxu2  ;;  %v2781_v39 = vpop.f32.mrf.mxu3  ;;  %4749 = vmatmul.msk.f32.vlgmr.msrb.gmra.mxu0 %vm702_vm0, %v6499_v50  ;;  %4751 = vmatmul.msk.f32.vlgmr.msrb.gmra.mxu1 %vm702_vm0, %v6499_v50 }
 0x28c   : > { %v2753_v6 = vadd.f32 %v2752_v17, %v6436_v13  ;;  %v2782_v15 = vadd.f32 %v2781_v39, %v6436_v13 }
 0x28e   : > { %v2846_v21 = vmax.f32 %v2753_v6, 0.0  ;;  %v2847_v58 = vmax.f32 %v2782_v15, 0.0 }
 0x28f   : > { %v2888_v44 = vpop.f32.mrf.mxu0  ;;  %v2911_v55 = vpop.f32.mrf.mxu1 }
 0x290   : > { %v2889_v13 = vadd.f32 %v2888_v44, %v6610_v23  ;;  %v2912_v19 = vadd.f32 %v2911_v55, %v6610_v23  ;;  %3202 = vmatpush.msrb.mxu2 %v2846_v21  ;;  %3225 = vmatpush.msrb.mxu3 %v2847_v58 }
 0x292   : > { %v3252_v57 = vmax.f32 %v2889_v13, 0.0  ;;  %v3253_v38 = vmax.f32 %v2912_v19, 0.0  ;;  %3203 = vmatpush.msrb.mxu2 %v2830_v2  ;;  %3226 = vmatpush.msrb.mxu3 %v2831_v8 }
 0x293   : > { %v2931_v48 = vpop.f32.mrf.mxu2  ;;  %v2954_v35 = vpop.f32.mrf.mxu3  ;;  %4750 = vmatmul.msk.f32.gmra.mxu0 %vm702_vm0, %v6512_v56  ;;  %4752 = vmatmul.msk.f32.gmra.mxu1 %vm702_vm0, %v6512_v56 }
 0x294   : > { %3204 = vmatpush.msrb.mxu2 %v2814_v54  ;;  %3227 = vmatpush.msrb.mxu3 %v2815_v51  ;;  %v2955_v40 = vadd.f32 %v2954_v35, %v6616_v59 }
 0x295   : > { %3293 = vmatpush.msra.mxu0 %v3252_v57  ;;  %3313 = vmatpush.msra.mxu1 %v3253_v38 }
 0x296   : > { %3205 = vmatpush.msrb.mxu2 %v2798_v29  ;;  %3228 = vmatpush.msrb.mxu3 %v2799_v30  ;;  %v3239_v16 = vmax.f32 %v2955_v40, 0.0 }
 0x297   : > { %3294 = vmatpush.msra.mxu0 %v3236_v11  ;;  %3314 = vmatpush.msra.mxu1 %v3237_v25 }
 0x298   : > { %4753 = vmatmul.msk.f32.vlgmr.msrb.gmra.mxu2 %vm702_vm0, %v6499_v50  ;;  %4755 = vmatmul.msk.f32.vlgmr.msrb.gmra.mxu3 %vm702_vm0, %v6499_v50  ;;  %v2932_v50 = vadd.f32 %v2931_v48, %v6616_v59 }
 0x29a   : > { %v3238_v63 = vmax.f32 %v2932_v50, 0.0 }
 0x29b   : > { %v2934_v27 = vpop.f32.mrf.mxu2  ;;  %v2957_v42 = vpop.f32.mrf.mxu3  ;;  %4757 = vmatmul.msk.f32.vlgmr.msra.gmra.mxu0 %vm3275_vm2, %v6633_v3  ;;  %4758 = vmatmul.msk.f32.vlgmr.msra.gmra.mxu1 %vm3275_vm2, %v6633_v3 }
 0x29c   : > { %v2935_v47 = vadd.f32 %v2934_v27, %v6610_v23  ;;  %v2958_v49 = vadd.f32 %v2957_v42, %v6610_v23  ;;  %v2977_v4 = vpop.f32.mrf.mxu0 }
 0x29d   : > { %v3000_v41 = vpop.f32.mrf.mxu1  ;;  %v2978_v14 = vadd.f32 %v2977_v4, %v6616_v59 }
 0x29e   : > { %v3254_v52 = vmax.f32 %v2935_v47, 0.0  ;;  %v3255_v37 = vmax.f32 %v2958_v49, 0.0  ;;  %v3001_v9 = vadd.f32 %v3000_v41, %v6616_v59  ;;  %v6687_v41 = vpop.permute.xlu2 %3272 }
 0x29f   : > { %v3240_v7 = vmax.f32 %v2978_v14, 0.0 }
 0x2a0   : > { %4754 = vmatmul.msk.f32.gmra.mxu2 %vm702_vm0, %v6512_v56  ;;  %4756 = vmatmul.msk.f32.gmra.mxu3 %vm702_vm0, %v6512_v56  ;;  %v3241_v12 = vmax.f32 %v3001_v9, 0.0 }
 0x2a1   : > { %3333 = vmatpush.msra.mxu2 %v3254_v52  ;;  %3353 = vmatpush.msra.mxu3 %v3255_v37 }
 0x2a3   : > { %3334 = vmatpush.msra.mxu2 %v3238_v63  ;;  %3354 = vmatpush.msra.mxu3 %v3239_v16 }
 0x2a4   : > { %v2980_v1 = vpop.f32.mrf.mxu0 }
 0x2a5   : > { %v3003_v32 = vpop.f32.mrf.mxu1  ;;  %v2981_v46 = vadd.f32 %v2980_v1, %v6610_v23 }
 0x2a6   : > { %v3004_v22 = vadd.f32 %v3003_v32, %v6610_v23 }
 0x2a7   : > { %v3256_v56 = vmax.f32 %v2981_v46, 0.0 }
 0x2a8   : > { %4759 = vmatmul.msk.f32.vlgmr.msra.gmra.mxu2 %vm3275_vm2, %v6633_v3  ;;  %4760 = vmatmul.msk.f32.vlgmr.msra.gmra.mxu3 %vm3275_vm2, %v6633_v3  ;;  %v3257_v28 = vmax.f32 %v3004_v22, 0.0 }
 0x2a9   : > { %3373 = vmatpush.msrb.mxu0 %v3256_v56  ;;  %v6695_v56 = vpop.permute.xlu0 %3618 }
 0x2aa   : > { %v3023_v53 = vpop.f32.mrf.mxu2  ;;  %3393 = vmatpush.msrb.mxu1 %v3257_v28 }
 0x2ab   : > { %v3046_v33 = vpop.f32.mrf.mxu3  ;;  %3374 = vmatpush.msrb.mxu0 %v3240_v7  ;;  %v3024_v60 = vadd.f32 %v3023_v53, %v6616_v59 }
 0x2ac   : > { %3394 = vmatpush.msrb.mxu1 %v3241_v12  ;;  %4761 = vmatmul.msk.f32.vlgmr.msrb.gmra.mxu0 %vm3275_vm2, %v6633_v3  ;;  %v3047_v0 = vadd.f32 %v3046_v33, %v6616_v59 }
 0x2ad   : > { %4762 = vmatmul.msk.f32.vlgmr.msrb.gmra.mxu1 %vm3275_vm2, %v6633_v3  ;;  %v3242_v39 = vmax.f32 %v3024_v60, 0.0 }
 0x2ae   : > { %v3243_v34 = vmax.f32 %v3047_v0, 0.0 }
 0x2b2   : > { %v3026_v61 = vpop.f32.mrf.mxu2 }
 0x2b3   : > { %v3049_v26 = vpop.f32.mrf.mxu3  ;;  %v3027_v31 = vadd.f32 %v3026_v61, %v6610_v23 }
 0x2b4   : > { %v3050_v20 = vadd.f32 %v3049_v26, %v6610_v23 }
 0x2b5   : > { %v3258_v5 = vmax.f32 %v3027_v31, 0.0 }
 0x2b6   : > { %v3259_v17 = vmax.f32 %v3050_v20, 0.0 }
 0x2b7   : > { %3413 = vmatpush.msrb.mxu2 %v3258_v5 }
 0x2b8   : > { %3433 = vmatpush.msrb.mxu3 %v3259_v17 }
 0x2b9   : > { %3414 = vmatpush.msrb.mxu2 %v3242_v39 }
 0x2ba   : > { %3434 = vmatpush.msrb.mxu3 %v3243_v34  ;;  %4763 = vmatmul.msk.f32.vlgmr.msrb.gmra.mxu2 %vm3275_vm2, %v6633_v3 }
 0x2bb   : > { %4764 = vmatmul.msk.f32.vlgmr.msrb.gmra.mxu3 %vm3275_vm2, %v6633_v3 }
 0x2c2   : > { %v3069_v10 = vpop.f32.mrf.mxu0 }
 0x2c3   : > { %v3092_v6 = vpop.f32.mrf.mxu1  ;;  %v3070_v62 = vadd.f32 %v3069_v10, %v6616_v59 }
 0x2c4   : > { %v3093_v21 = vadd.f32 %v3092_v6, %v6616_v59 }
 0x2c5   : > { %v3244_v55 = vmax.f32 %v3070_v62, 0.0  ;;  %v3737_v62 = vpop.permute.xlu1 %3736 }
 0x2c6   : > { %v3245_v2 = vmax.f32 %v3093_v21, 0.0 }
 0x2ca   : > { %v3072_v15 = vpop.f32.mrf.mxu0 }
 0x2cb   : > { %v3095_v18 = vpop.f32.mrf.mxu1  ;;  %v3073_v58 = vadd.f32 %v3072_v15, %v6610_v23 }
 0x2cc   : > { %v3096_v24 = vadd.f32 %v3095_v18, %v6610_v23 }
 0x2cd   : > { %v3260_v43 = vmax.f32 %v3073_v58, 0.0 }
 0x2ce   : > { %v3261_v44 = vmax.f32 %v3096_v24, 0.0 }
 0x2cf   : > { %3453 = vmatpush.msra.mxu0 %v3260_v43 }
 0x2d0   : > { %3473 = vmatpush.msra.mxu1 %v3261_v44  ;;  %v6703_v44 = vperm.slane %v3737_v62, 0 }
 0x2d1   : > { %3454 = vmatpush.msra.mxu0 %v3244_v55 }
 0x2d2   : > { %3474 = vmatpush.msra.mxu1 %v3245_v2  ;;  %4765 = vmatmul.msk.f32.vlgmr.msra.gmra.mxu0 %vm3275_vm2, %v6633_v3 }
 0x2d3   : > { %4766 = vmatmul.msk.f32.vlgmr.msra.gmra.mxu1 %vm3275_vm2, %v6633_v3 }
 0x2d4   : > { %v3115_v8 = vpop.f32.mrf.mxu2 }
 0x2d5   : > { %v3138_v13 = vpop.f32.mrf.mxu3  ;;  %v3116_v45 = vadd.f32 %v3115_v8, %v6616_v59 }
 0x2d6   : > { %v3139_v54 = vadd.f32 %v3138_v13, %v6616_v59 }
 0x2d7   : > { %v3246_v35 = vmax.f32 %v3116_v45, 0.0 }
 0x2d8   : > { %v3247_v29 = vmax.f32 %v3139_v54, 0.0 }
 0x2dc   : > { %v3118_v19 = vpop.f32.mrf.mxu2 }
 0x2dd   : > { %v3141_v36 = vpop.f32.mrf.mxu3  ;;  %v3119_v51 = vadd.f32 %v3118_v19, %v6610_v23 }
 0x2de   : > { %v3142_v57 = vadd.f32 %v3141_v36, %v6610_v23 }
 0x2df   : > { %v3262_v38 = vmax.f32 %v3119_v51, 0.0 }
 0x2e0   : > { %v3263_v48 = vmax.f32 %v3142_v57, 0.0 }
 0x2e1   : > { %3493 = vmatpush.msra.mxu2 %v3262_v38 }
 0x2e2   : > { %3513 = vmatpush.msra.mxu3 %v3263_v48 }
 0x2e3   : > { %3494 = vmatpush.msra.mxu2 %v3246_v35 }
 0x2e4   : > { %3514 = vmatpush.msra.mxu3 %v3247_v29  ;;  %4767 = vmatmul.msk.f32.vlgmr.msra.gmra.mxu2 %vm3275_vm2, %v6633_v3 }
 0x2e5   : > { %4768 = vmatmul.msk.f32.vlgmr.msra.gmra.mxu3 %vm3275_vm2, %v6633_v3 }
 0x308   : > { %v3161_v30 = vpop.f32.mrf.mxu0  ;;  %v3184_v11 = vpop.f32.mrf.mxu1 }
 0x309   : > { %v3162_v42 = vadd.f32 %v3161_v30, %v6616_v59  ;;  %v3185_v47 = vadd.f32 %v3184_v11, %v6616_v59 }
 0x30b   : > { %v3248_v37 = vmax.f32 %v3162_v42, 0.0  ;;  %v3249_v4 = vmax.f32 %v3185_v47, 0.0 }
 0x310   : > { %v3164_v25 = vpop.f32.mrf.mxu0  ;;  %v3187_v27 = vpop.f32.mrf.mxu1 }
 0x311   : > { %v3165_v49 = vadd.f32 %v3164_v25, %v6610_v23  ;;  %v3188_v50 = vadd.f32 %v3187_v27, %v6610_v23 }
 0x313   : > { %v3264_v40 = vmax.f32 %v3165_v49, 0.0  ;;  %v3265_v52 = vmax.f32 %v3188_v50, 0.0 }
 0x315   : > { %3533 = vmatpush.msrb.mxu0 %v3264_v40  ;;  %3553 = vmatpush.msrb.mxu1 %v3265_v52 }
 0x317   : > { %3534 = vmatpush.msrb.mxu0 %v3248_v37  ;;  %3554 = vmatpush.msrb.mxu1 %v3249_v4 }
 0x318   : > { %v3296_v63 = vpop.f32.mrf.mxu0  ;;  %v3316_v16 = vpop.f32.mrf.mxu1  ;;  %4769 = vmatmul.msk.f32.vlgmr.msrb.gmra.mxu0 %vm3275_vm2, %v6633_v3  ;;  %4770 = vmatmul.msk.f32.vlgmr.msrb.gmra.mxu1 %vm3275_vm2, %v6633_v3 }
 0x319   : > { %v3297_v14 = vadd.f32 %v3296_v63, %v6687_v41  ;;  %v3317_v1 = vadd.f32 %v3316_v16, %v6687_v41 }
 0x31b   : > { %v3599_v32 = vmax.f32 %v3297_v14, 0.0  ;;  %v3600_v9 = vmax.f32 %v3317_v1, 0.0  ;;  %v3207_v46 = vpop.f32.mrf.mxu2  ;;  %v3230_v22 = vpop.f32.mrf.mxu3 }
 0x31c   : > { %v3208_v20 = vadd.f32 %v3207_v46, %v6616_v59  ;;  %v3231_v5 = vadd.f32 %v3230_v22, %v6616_v59 }
 0x31d   : > { %v3621_v28 = vmul.f32 %v6695_v56, %v3599_v32  ;;  %v3622_v53 = vmul.f32 %v6695_v56, %v3600_v9 }
 0x31e   : > { %v3250_v21 = vmax.f32 %v3208_v20, 0.0  ;;  %v3251_v58 = vmax.f32 %v3231_v5, 0.0 }
 0x31f   : > { %v3637_v33 = vrot.slane %v3621_v28, 4  ;;  %v3643_v7 = vrot.slane %v3622_v53, 4 }
 0x321   : > { %v3638_v12 = vadd.f32 %v3637_v33, %v3621_v28  ;;  %v3644_v61 = vadd.f32 %v3643_v7, %v3622_v53 }
 0x323   : > { %v3639_v26 = vrot.slane %v3638_v12, 2  ;;  %v3645_v60 = vrot.slane %v3644_v61, 2  ;;  %v3210_v0 = vpop.f32.mrf.mxu2  ;;  %v3233_v31 = vpop.f32.mrf.mxu3 }
 0x324   : > { %v3211_v17 = vadd.f32 %v3210_v0, %v6610_v23  ;;  %v3234_v39 = vadd.f32 %v3233_v31, %v6610_v23 }
 0x325   : > { %v3640_v34 = vadd.f32 %v3639_v26, %v3638_v12  ;;  %v3646_v10 = vadd.f32 %v3645_v60, %v3644_v61 }
 0x326   : > { %v3266_v6 = vmax.f32 %v3211_v17, 0.0  ;;  %v3267_v15 = vmax.f32 %v3234_v39, 0.0 }
 0x327   : > { %v3647_v18 = vrot.slane %v3646_v10, 1  ;;  %v3641_v24 = vrot.slane %v3640_v34, 1 }
 0x328   : > { %3573 = vmatpush.msrb.mxu2 %v3266_v6  ;;  %3593 = vmatpush.msrb.mxu3 %v3267_v15 }
 0x329   : > { %v3648_v43 = vadd.f32 %v3647_v18, %v3646_v10  ;;  %v3376_v8 = vpop.f32.mrf.mxu0  ;;  %v3642_v19 = vadd.f32 %v3641_v24, %v3640_v34 }
 0x32a   : > { %3574 = vmatpush.msrb.mxu2 %v3250_v21  ;;  %3594 = vmatpush.msrb.mxu3 %v3251_v58  ;;  %v3396_v13 = vpop.f32.mrf.mxu1  ;;  %v3377_v51 = vadd.f32 %v3376_v8, %v6687_v41 }
 0x32b   : > { %v3336_v59 = vpop.f32.mrf.mxu2  ;;  %v3356_v55 = vpop.f32.mrf.mxu3  ;;  %4771 = vmatmul.msk.f32.vlgmr.msrb.gmra.mxu2 %vm3275_vm2, %v6633_v3  ;;  %4772 = vmatmul.msk.f32.vlgmr.msrb.gmra.mxu3 %vm3275_vm2, %v6633_v3  ;;  %v6712_v36 = vadd.f32 %v6703_v44, %v3648_v43  ;;  %v3397_v57 = vadd.f32 %v3396_v13, %v6687_v41  ;;  %v6719_v29 = vadd.f32 %v6703_v44, %v3642_v19 }
 0x32c   : > { %v3337_v23 = vadd.f32 %v3336_v59, %v6687_v41  ;;  %v3357_v2 = vadd.f32 %v3356_v55, %v6687_v41  ;;  %v3603_v48 = vmax.f32 %v3377_v51, 0.0 }
 0x32d   : > { %v3604_v35 = vmax.f32 %v3397_v57, 0.0  ;;  %v3757_v30 = vand.u32 2147483647, %v6712_v36  ;;  %v3756_v37 = vand.u32 2147483647, %v6719_v29  ;;  %vm3821_vm10 = vcmp.ge.f32.partialorder %v6712_v36, 0.0 }
 0x32e   : > { %v3601_v45 = vmax.f32 %v3337_v23, 0.0  ;;  %v3602_v54 = vmax.f32 %v3357_v2, 0.0  ;;  %v3625_v27 = vmul.f32 %v6695_v56, %v3603_v48 }
 0x32f   : > { %v3626_v42 = vmul.f32 %v6695_v56, %v3604_v35  ;;  %v3773_v40 = vsub.f32 0.0, %v3757_v30  ;;  %v3772_v28 = vsub.f32 0.0, %v3756_v37 }
 0x330   : > { %v3623_v38 = vmul.f32 %v6695_v56, %v3601_v45  ;;  %v3624_v3 = vmul.f32 %v6695_v56, %v3602_v54  ;;  %v3661_v50 = vrot.slane %v3625_v27, 4 }
 0x331   : > { %v3667_v52 = vrot.slane %v3626_v42, 4  ;;  %v3790_v46 = vmul.f32 1.442695, %v3773_v40  ;;  %v3788_v61 = vmul.f32 1.442695, %v3772_v28 }
 0x332   : > { %v3649_v11 = vrot.slane %v3623_v38, 4  ;;  %v3655_v25 = vrot.slane %v3624_v3, 4  ;;  %v3662_v16 = vadd.f32 %v3661_v50, %v3625_v27 }
 0x333   : > { %v3668_v14 = vadd.f32 %v3667_v52, %v3626_v42  ;;  %4820 = vpow2.f32 %v3790_v46 }
 0x334   : > { %v3650_v47 = vadd.f32 %v3649_v11, %v3623_v38  ;;  %v3656_v49 = vadd.f32 %v3655_v25, %v3624_v3  ;;  %v3663_v9 = vrot.slane %v3662_v16, 2  ;;  %4822 = vpow2.f32 %v3788_v61 }
 0x335   : > { %v3669_v22 = vrot.slane %v3668_v14, 2 }
 0x336   : > { %v3651_v4 = vrot.slane %v3650_v47, 2  ;;  %v3657_v63 = vrot.slane %v3656_v49, 2  ;;  %v3664_v7 = vadd.f32 %v3663_v9, %v3662_v16 }
 0x337   : > { %v3670_v12 = vadd.f32 %v3669_v22, %v3668_v14 }
 0x338   : > { %v3652_v1 = vadd.f32 %v3651_v4, %v3650_v47  ;;  %v3658_v32 = vadd.f32 %v3657_v63, %v3656_v49  ;;  %v3665_v0 = vrot.slane %v3664_v7, 1 }
 0x339   : > { %v3671_v31 = vrot.slane %v3670_v12, 1  ;;  %v6733_v18 = vpop.eup %4820 }
 0x33a   : > { %v3653_v53 = vrot.slane %v3652_v1, 1  ;;  %v3659_v33 = vrot.slane %v3658_v32, 1  ;;  %v3666_v39 = vadd.f32 %v3665_v0, %v3664_v7  ;;  %v6746_v2 = vadd.f32 1.0, %v6733_v18  ;;  %v6748_v13 = vpop.eup %4822 }
 0x33b   : > { %v3672_v34 = vadd.f32 %v3671_v31, %v3670_v12  ;;  %v6753_v3 = vadd.f32 1.0, %v6748_v13 }
 0x33c   : > { %v3654_v26 = vadd.f32 %v3653_v53, %v3652_v1  ;;  %v3660_v60 = vadd.f32 %v3659_v33, %v3658_v32  ;;  %v6736_v62 = vadd.f32 %v6703_v44, %v3666_v39  ;;  %4824 = vrcp.f32 %v6746_v2 }
 0x33d   : > { %v3416_v17 = vpop.f32.mrf.mxu2  ;;  %v6739_v21 = vadd.f32 %v6703_v44, %v3672_v34  ;;  %vm3872_vm4 = vweird.f32 %v6746_v2  ;;  %vm3857_vm8 = vweird.f32 %v6753_v3 }
 0x33e   : > { %v6726_v20 = vadd.f32 %v6703_v44, %v3654_v26  ;;  %v6729_v5 = vadd.f32 %v6703_v44, %v3660_v60  ;;  %v3436_v10 = vpop.f32.mrf.mxu3  ;;  %v3417_v58 = vadd.f32 %v3416_v17, %v6687_v41  ;;  %v3760_v55 = vand.u32 2147483647, %v6736_v62 }
 0x33f   : > { %v3437_v43 = vadd.f32 %v3436_v10, %v6687_v41  ;;  %v3761_v23 = vand.u32 2147483647, %v6739_v21 }
 0x340   : > { %v3758_v6 = vand.u32 2147483647, %v6726_v20  ;;  %v3759_v15 = vand.u32 2147483647, %v6729_v5  ;;  %v3605_v8 = vmax.f32 %v3417_v58, 0.0  ;;  %v3776_v45 = vsub.f32 0.0, %v3760_v55 }
 0x341   : > { %v3606_v54 = vmax.f32 %v3437_v43, 0.0  ;;  %v3777_v57 = vsub.f32 0.0, %v3761_v23 }
 0x342   : > { %v3774_v24 = vsub.f32 0.0, %v3758_v6  ;;  %v3775_v59 = vsub.f32 0.0, %v3759_v15  ;;  %v3627_v38 = vmul.f32 %v6695_v56, %v3605_v8  ;;  %v3796_v35 = vmul.f32 1.442695, %v3776_v45  ;;  %v4825_v42 = vpop.eup %4824 }
 0x343   : > { %v3628_v48 = vmul.f32 %v6695_v56, %v3606_v54  ;;  %v3798_v11 = vmul.f32 1.442695, %v3777_v57  ;;  %v3868_v40 = vmul.f32 %v4825_v42, %v6746_v2  ;;  %vm3873_vm3 = vweird.f32 %v4825_v42 }
 0x344   : > { %v3792_v19 = vmul.f32 1.442695, %v3774_v24  ;;  %v3794_v51 = vmul.f32 1.442695, %v3775_v59  ;;  %v3673_v30 = vrot.slane %v3627_v38, 4  ;;  %v3878_v6 = vand.u32 2147483648, %v6746_v2  ;;  %vm6801_vm5 = vmor %vm3872_vm4, %vm3873_vm3 }
 0x345   : > { %v3679_v27 = vrot.slane %v3628_v48, 4  ;;  %v3869_v32 = vsub.f32 1.0, %v3868_v40  ;;  %v3876_v24 = vand.u32 2147483647, %v6746_v2  ;;  %v3861_v54 = vand.u32 2147483647, %v6753_v3 }
 0x346   : > { %4826 = vpow2.f32 %v3792_v19  ;;  %v3674_v25 = vadd.f32 %v3673_v30, %v3627_v38 }
 0x347   : > { %4828 = vpow2.f32 %v3794_v51  ;;  %v3680_v52 = vadd.f32 %v3679_v27, %v3628_v48  ;;  %v3870_v12 = vmul.f32 %v4825_v42, %v3869_v32  ;;  %v3879_v51 = vor.u32 1.1754944e-38, %v3878_v6 }
 0x348   : > { %4830 = vrcp.f32 %v6753_v3  ;;  %v3675_v47 = vrot.slane %v3674_v25, 2  ;;  %v3863_v48 = vand.u32 2147483648, %v6753_v3  ;;  %vm3877_vm7 = vcmp.eq.f32.partialorder %v3876_v24, 8.507059e+37 }
 0x349   : > { %4832 = vpow2.f32 %v3796_v35  ;;  %v3681_v46 = vrot.slane %v3680_v52, 2  ;;  %v3871_v39 = vadd.f32 %v4825_v42, %v3870_v12  ;;  %vm3862_vm11 = vcmp.eq.f32.partialorder %v3861_v54, 8.507059e+37 }
 0x34a   : > { %4834 = vpow2.f32 %v3798_v11  ;;  %v3676_v37 = vadd.f32 %v3675_v47, %v3674_v25 }
 0x34b   : > { %v3682_v33 = vadd.f32 %v3681_v46, %v3680_v52  ;;  %v3875_v19 = vsel %vm6801_vm5, %v4825_v42, %v3871_v39 }
 0x34c   : > { %v6757_v49 = vpop.eup %4826  ;;  %v3677_v9 = vrot.slane %v3676_v37, 1  ;;  %v3880_v35 = vsel %vm3877_vm7, %v3879_v51, %v3875_v19 }
 0x34d   : > { %v6759_v50 = vpop.eup %4828  ;;  %v6765_v63 = vadd.f32 1.0, %v6757_v49  ;;  %v3683_v26 = vrot.slane %v3682_v33, 1 }
 0x34e   : > { %v6762_v4 = vpop.eup %4830  ;;  %v6770_v14 = vadd.f32 1.0, %v6759_v50  ;;  %v3678_v53 = vadd.f32 %v3677_v9, %v3676_v37  ;;  %v3864_v37 = vor.u32 1.1754944e-38, %v3863_v48 }
 0x34f   : > { %v6767_v16 = vpop.eup %4832  ;;  %v3853_v22 = vmul.f32 %v6762_v4, %v6753_v3  ;;  %4836 = vrcp.f32 %v6765_v63  ;;  %v3684_v31 = vadd.f32 %v3683_v26, %v3682_v33  ;;  %vm3858_vm6 = vweird.f32 %v6762_v4 }
 0x350   : > { %v6772_v1 = vpop.eup %4834  ;;  %v6778_v28 = vadd.f32 1.0, %v6767_v16  ;;  %4838 = vrcp.f32 %v6770_v14  ;;  %v6785_v61 = vadd.f32 %v6703_v44, %v3678_v53  ;;  %vm6825_vm9 = vmor %vm3857_vm8, %vm3858_vm6  ;;  %v4093_v3 = vmul.f32 %v6733_v18, %v3880_v35  ;;  %v3476_v53 = vpop.f32.mrf.mxu1 }
 0x351   : > { %v6782_v7 = vadd.f32 1.0, %v6772_v1  ;;  %v3854_v60 = vsub.f32 1.0, %v3853_v22  ;;  %v6796_v15 = vadd.f32 %v6703_v44, %v3684_v31  ;;  %v3891_v9 = vand.u32 2147483647, %v6765_v63 }
 0x352   : > { %4840 = vrcp.f32 %v6778_v28  ;;  %v3762_v0 = vand.u32 2147483647, %v6785_v61  ;;  %v3893_v33 = vand.u32 2147483648, %v6765_v63  ;;  %v3908_v18 = vand.u32 2147483648, %v6770_v14 }
 0x353   : > { %4842 = vrcp.f32 %v6782_v7  ;;  %v3855_v58 = vmul.f32 %v6762_v4, %v3854_v60  ;;  %v3763_v23 = vand.u32 2147483647, %v6796_v15  ;;  %v3906_v60 = vand.u32 2147483647, %v6770_v14 }
 0x354   : > { %v3778_v34 = vsub.f32 0.0, %v3762_v0  ;;  %v6850_v0 = vsel %vm3821_vm10, %v3880_v35, %v4093_v3  ;;  %vm3887_vm12 = vweird.f32 %v6765_v63  ;;  %vm3902_vm13 = vweird.f32 %v6770_v14 }
 0x355   : > { %v6790_v17 = vpop.eup %4836  ;;  %v3779_v57 = vsub.f32 0.0, %v3763_v23  ;;  %v3856_v38 = vadd.f32 %v6762_v4, %v3855_v58  ;;  %v3477_v31 = vadd.f32 %v3476_v53, %v6687_v41  ;;  %vm6857_vm15 = vcmp.eq.f32.partialorder %v3891_v9, 8.507059e+37 }
 0x356   : > { %v6792_v10 = vpop.eup %4838  ;;  %v3800_v43 = vmul.f32 1.442695, %v3778_v34  ;;  %v3883_v55 = vmul.f32 %v6790_v17, %v6765_v63  ;;  %vm3888_vm14 = vweird.f32 %v6790_v17  ;;  %v3894_v58 = vor.u32 1.1754944e-38, %v3893_v33 }
 0x357   : > { %v3898_v45 = vmul.f32 %v6792_v10, %v6770_v14  ;;  %v3802_v42 = vmul.f32 1.442695, %v3779_v57  ;;  %v3860_v52 = vsel %vm6825_vm9, %v6762_v4, %v3856_v38  ;;  %vm3903_vm0 = vweird.f32 %v6792_v10  ;;  %vm6875_vm3 = vmor %vm3887_vm12, %vm3888_vm14 }
 0x358   : > { %v6808_v8 = vpop.eup %4840  ;;  %4844 = vpow2.f32 %v3800_v43  ;;  %v3884_v30 = vsub.f32 1.0, %v3883_v55  ;;  %v6843_v4 = vsel %vm3862_vm11, %v3864_v37, %v3860_v52  ;;  %vm6865_vm1 = vcmp.eq.f32.partialorder %v3906_v60, 8.507059e+37  ;;  %vm6889_vm5 = vmor %vm3902_vm13, %vm3903_vm0 }
 0x359   : > { %v6814_v2 = vpop.eup %4842  ;;  %v3913_v11 = vmul.f32 %v6808_v8, %v6778_v28  ;;  %v3899_v25 = vsub.f32 1.0, %v3898_v45  ;;  %4846 = vpow2.f32 %v3802_v42  ;;  %v3909_v59 = vor.u32 1.1754944e-38, %v3908_v18 }
 0x35a   : > { %v3928_v27 = vmul.f32 %v6814_v2, %v6782_v7  ;;  %v3885_v32 = vmul.f32 %v6790_v17, %v3884_v30  ;;  %vm3917_vm2 = vweird.f32 %v6778_v28  ;;  %v3921_v55 = vand.u32 2147483647, %v6778_v28 }
 0x35b   : > { %v3914_v46 = vsub.f32 1.0, %v3913_v11  ;;  %v3900_v12 = vmul.f32 %v6792_v10, %v3899_v25  ;;  %v3923_v45 = vand.u32 2147483648, %v6778_v28  ;;  %vm3932_vm4 = vweird.f32 %v6782_v7  ;;  %v3456_v11 = vpop.f32.mrf.mxu0 }
 0x35c   : > { %v3929_v26 = vsub.f32 1.0, %v3928_v27  ;;  %v3886_v39 = vadd.f32 %v6790_v17, %v3885_v32  ;;  %v3936_v54 = vand.u32 2147483647, %v6782_v7  ;;  %v3608_v51 = vmax.f32 %v3477_v31, 0.0 }
 0x35d   : > { %v3915_v6 = vmul.f32 %v6808_v8, %v3914_v46  ;;  %v3901_v36 = vadd.f32 %v6792_v10, %v3900_v12  ;;  %vm3918_vm6 = vweird.f32 %v6808_v8  ;;  %vm3933_vm7 = vweird.f32 %v6814_v2 }
 0x35e   : > { %v6830_v40 = vpop.eup %4844  ;;  %v3930_v24 = vmul.f32 %v6814_v2, %v3929_v26  ;;  %v3890_v48 = vsel %vm6875_vm3, %v6790_v17, %v3886_v39  ;;  %vm3822_vm8 = vcmp.ge.f32.partialorder %v6726_v20, 0.0  ;;  %vm6905_vm9 = vcmp.eq.f32.partialorder %v3921_v55, 8.507059e+37  ;;  %vm6917_vm11 = vmor %vm3917_vm2, %vm3918_vm6 }
 0x35f   : > { %v6839_v22 = vadd.f32 1.0, %v6830_v40  ;;  %v6871_v23 = vpop.eup %4846  ;;  %v3916_v35 = vadd.f32 %v6808_v8, %v3915_v6  ;;  %v3905_v17 = vsel %vm6889_vm5, %v6792_v10, %v3901_v36  ;;  %v3938_v42 = vand.u32 2147483648, %v6782_v7  ;;  %vm6931_vm12 = vmor %vm3932_vm4, %vm3933_vm7 }
 0x360   : > { %v6896_v30 = vadd.f32 1.0, %v6871_v23  ;;  %v3931_v25 = vadd.f32 %v6814_v2, %v3930_v24  ;;  %v3895_v10 = vsel %vm6857_vm15, %v3894_v58, %v3890_v48  ;;  %vm3823_vm10 = vcmp.ge.f32.partialorder %v6729_v5, 0.0 }
 0x361   : > { %4848 = vrcp.f32 %v6839_v22  ;;  %v3924_v37 = vor.u32 1.1754944e-38, %v3923_v45  ;;  %v3457_v32 = vadd.f32 %v3456_v11, %v6687_v41  ;;  %v3910_v9 = vsel %vm6865_vm1, %v3909_v59, %v3905_v17 }
 0x362   : > { %4850 = vrcp.f32 %v6896_v30  ;;  %v3920_v46 = vsel %vm6917_vm11, %v6808_v8, %v3916_v35  ;;  %v3953_v53 = vand.u32 2147483648, %v6839_v22  ;;  %v3630_v33 = vmul.f32 %v6695_v56, %v3608_v51 }
 0x363   : > { %vm3824_vm13 = vcmp.ge.f32.partialorder %v6736_v62, 0.0  ;;  %v3935_v26 = vsel %vm6931_vm12, %v6814_v2, %v3931_v25  ;;  %v3951_v60 = vand.u32 2147483647, %v6839_v22  ;;  %v4094_v7 = vmul.f32 %v6757_v49, %v3895_v10 }
 0x364   : > { %vm3937_vm15 = vcmp.eq.f32.partialorder %v3936_v54, 8.507059e+37  ;;  %v3939_v18 = vor.u32 1.1754944e-38, %v3938_v42  ;;  %v3925_v39 = vsel %vm6905_vm9, %v3924_v37, %v3920_v46  ;;  %vm3825_vm0 = vcmp.ge.f32.partialorder %v6739_v21, 0.0 }
 0x365   : > { %vm3947_vm1 = vweird.f32 %v6839_v22  ;;  %v4095_v58 = vmul.f32 %v6759_v50, %v3910_v9  ;;  %v3954_v24 = vor.u32 1.1754944e-38, %v3953_v53  ;;  %v3607_v49 = vmax.f32 %v3457_v32, 0.0 }
 0x366   : > { %v3940_v36 = vsel %vm3937_vm15, %v3939_v18, %v3935_v26  ;;  %vm3952_vm3 = vcmp.eq.f32.partialorder %v3951_v60, 8.507059e+37  ;;  %v3691_v55 = vrot.slane %v3630_v33, 4  ;;  %4852 = vpow2.f32 %v6850_v0 }
 0x367   : > { %v3496_v57 = vpop.f32.mrf.mxu2  ;;  %v4849_v38 = vpop.eup %4848  ;;  %v4096_v19 = vmul.f32 %v6767_v16, %v3925_v39  ;;  %v4110_v54 = vsel %vm3822_vm8, %v3895_v10, %v4094_v7  ;;  %v4097_v48 = vmul.f32 %v6772_v1, %v3940_v36  ;;  %v3968_v63 = vand.u32 2147483648, %v6896_v30 }
 0x368   : > { %v3943_v14 = vmul.f32 %v4849_v38, %v6839_v22  ;;  %v3497_v47 = vadd.f32 %v3496_v57, %v6687_v41  ;;  %v3516_v12 = vpop.f32.mrf.mxu3  ;;  %vm3948_vm14 = vweird.f32 %v4849_v38  ;;  %v4851_v2 = vpop.eup %4850  ;;  %v3629_v0 = vmul.f32 %v6695_v56, %v3607_v49 }
 0x369   : > { %v3517_v6 = vadd.f32 %v3516_v12, %v6687_v41  ;;  %vm3949_vm2 = vmor %vm3947_vm1, %vm3948_vm14  ;;  %v3958_v59 = vmul.f32 %v4851_v2, %v6896_v30  ;;  %vm3963_vm4 = vweird.f32 %v4851_v2  ;;  %v3966_v35 = vand.u32 2147483647, %v6896_v30 }
 0x36a   : > { %v3944_v3 = vsub.f32 1.0, %v3943_v14  ;;  %v3609_v31 = vmax.f32 %v3497_v47, 0.0  ;;  %v3692_v11 = vadd.f32 %v3691_v55, %v3630_v33  ;;  %4854 = vpow2.f32 %v4110_v54 }
 0x36b   : > { %v3959_v51 = vsub.f32 1.0, %v3958_v59  ;;  %v3610_v57 = vmax.f32 %v3517_v6, 0.0  ;;  %v4112_v20 = vsel %vm3824_vm13, %v3925_v39, %v4096_v19  ;;  %vm3826_vm5 = vcmp.ge.f32.partialorder %v6785_v61, 0.0 }
 0x36c   : > { %v3945_v8 = vmul.f32 %v4849_v38, %v3944_v3  ;;  %v3631_v22 = vmul.f32 %v6695_v56, %v3609_v31  ;;  %vm3962_vm6 = vweird.f32 %v6896_v30  ;;  %v4853_v25 = vpop.eup %4852  ;;  %v4113_v14 = vsel %vm3825_vm0, %v3940_v36, %v4097_v48 }
 0x36d   : > { %v3960_v16 = vmul.f32 %v4851_v2, %v3959_v51  ;;  %v3632_v1 = vmul.f32 %v6695_v56, %v3610_v57  ;;  %vm3964_vm7 = vmor %vm3962_vm6, %vm3963_vm4  ;;  %v3969_v27 = vor.u32 1.1754944e-38, %v3968_v63  ;;  %v3685_v42 = vrot.slane %v3629_v0, 4 }
 0x36e   : > { %v3946_v34 = vadd.f32 %v4849_v38, %v3945_v8  ;;  %vm3967_vm8 = vcmp.eq.f32.partialorder %v3966_v35, 8.507059e+37  ;;  %v3693_v47 = vrot.slane %v3692_v11, 2  ;;  %v4092_v61 = vmul.f32 %v6748_v13, %v6843_v4 }
 0x36f   : > { %v3961_v17 = vadd.f32 %v4851_v2, %v3960_v16  ;;  %v3703_v37 = vrot.slane %v3632_v1, 4  ;;  %vm3827_vm9 = vcmp.ge.f32.partialorder %v6796_v15, 0.0  ;;  %v3686_v32 = vadd.f32 %v3685_v42, %v3629_v0 }
 0x370   : > { %v3950_v43 = vsel %vm3949_vm2, %v4849_v38, %v3946_v34  ;;  %v4111_v38 = vsel %vm3823_vm10, %v3910_v9, %v4095_v58  ;;  %v4855_v3 = vpop.eup %4854  ;;  %vm3820_vm10 = vcmp.ge.f32.partialorder %v6719_v29, 0.0  ;;  %v3694_v9 = vadd.f32 %v3693_v47, %v3692_v11 }
 0x371   : > { %v3955_v45 = vsel %vm3952_vm3, %v3954_v24, %v3950_v43  ;;  %4856 = vpow2.f32 %v4111_v38  ;;  %v3965_v62 = vsel %vm3964_vm7, %v4851_v2, %v3961_v17  ;;  %v4108_v28 = vsel %vm3820_vm10, %v6843_v4, %v4092_v61 }
 0x372   : > { %v4098_v50 = vmul.f32 %v6830_v40, %v3955_v45  ;;  %v3697_v40 = vrot.slane %v3631_v22, 4  ;;  %4858 = vpow2.f32 %v4112_v20  ;;  %v3970_v10 = vsel %vm3967_vm8, %v3969_v27, %v3965_v62 }
 0x373   : > { %v4099_v52 = vmul.f32 %v6871_v23, %v3970_v10  ;;  %v3704_v33 = vadd.f32 %v3703_v37, %v3632_v1  ;;  %v3687_v23 = vrot.slane %v3686_v32, 2  ;;  %v3695_v8 = vrot.slane %v3694_v9, 1 }
 0x374   : > { %v4114_v5 = vsel %vm3826_vm5, %v3955_v45, %v4098_v50  ;;  %v3698_v30 = vadd.f32 %v3697_v40, %v3631_v22  ;;  %v4157_v29 = vrot.slane %v4855_v3, 6  ;;  %vm4170_vm11 = vcmask 1040384  }
 0x375   : > { %4860 = vpow2.f32 %v4114_v5  ;;  %v4115_v21 = vsel %vm3827_vm9, %v3970_v10, %v4099_v52  ;;  %v3705_v7 = vrot.slane %v3704_v33, 2  ;;  %vm4172_vm12 = vcmask 1042434  }
 0x376   : > { %4862 = vpow2.f32 %v4113_v14  ;;  %v3699_v13 = vrot.slane %v3698_v30, 2  ;;  %v4156_v4 = vrot.slane %v4853_v25, 7  ;;  %vm4178_vm13 = vcmask 1046534  }
 0x377   : > { %v4857_v46 = vpop.eup %4856  ;;  %4864 = vpow2.f32 %v4115_v21  ;;  %v3688_v6 = vadd.f32 %v3687_v23, %v3686_v32  ;;  %v3696_v2 = vadd.f32 %v3695_v8, %v3694_v9  ;;  %vm4176_vm14 = vcmask 1044484  }
 0x378   : > { %v4859_v53 = vpop.eup %4858  ;;  %4866 = vpow2.f32 %v4108_v28  ;;  %v3700_v15 = vadd.f32 %v3699_v13, %v3698_v30  ;;  %v4158_v60 = vrot.slane %v4857_v46, 5  ;;  %vm4174_vm15 = vcmask 1041408  }
 0x379   : > { %v4159_v39 = vrot.slane %v4859_v53, 4  ;;  %vm4180_vm0 = vcmask 1045508   ;;  %v3706_v43 = vadd.f32 %v3705_v7, %v3704_v33  ;;  %vm4182_vm1 = vcmask 1043456  }
 0x37a   : > { %v3701_v36 = vrot.slane %v3700_v15, 1  ;;  %v4173_v24 = vsel %vm4172_vm12, %v4157_v29, %v4158_v60  ;;  %v3689_v45 = vrot.slane %v3688_v6, 1  ;;  %v6983_v22 = vadd.f32 %v6703_v44, %v3696_v2 }
 0x37b   : > { %v4861_v12 = vpop.eup %4860  ;;  %v3707_v38 = vrot.slane %v3706_v43, 1 }
 0x37c   : > { %v4863_v26 = vpop.eup %4862  ;;  %v4161_v18 = vrot.slane %v4861_v12, 2  ;;  %v3702_v51 = vadd.f32 %v3701_v36, %v3700_v15  ;;  %v3690_v35 = vadd.f32 %v3689_v45, %v3688_v6  ;;  %v3765_v11 = vand.u32 2147483647, %v6983_v22 }
 0x37d   : > { %v4865_v31 = vpop.eup %4864  ;;  %v4160_v34 = vrot.slane %v4863_v26, 3  ;;  %v3708_v17 = vadd.f32 %v3707_v38, %v3706_v43 }
 0x37e   : > { %v4162_v58 = vrot.slane %v4865_v31, 1  ;;  %v4867_v49 = vpop.eup %4866  ;;  %v6995_v20 = vadd.f32 %v6703_v44, %v3702_v51  ;;  %v6999_v25 = vadd.f32 %v6703_v44, %v3690_v35  ;;  %v3781_v14 = vsub.f32 0.0, %v3765_v11 }
 0x37f   : > { %v4171_v55 = vsel %vm4170_vm11, %v4867_v49, %v4156_v4  ;;  %v4177_v19 = vsel %vm4176_vm14, %v4159_v39, %v4160_v34  ;;  %v7004_v47 = vadd.f32 %v6703_v44, %v3708_v17 }
 0x380   : > { %v4179_v59 = vsel %vm4178_vm13, %v4161_v18, %v4162_v58  ;;  %v4175_v54 = vsel %vm4174_vm15, %v4171_v55, %v4173_v24  ;;  %v3766_v42 = vand.u32 2147483647, %v6995_v20  ;;  %v3764_v30 = vand.u32 2147483647, %v6999_v25 }
 0x381   : > { %v4181_v50 = vsel %vm4180_vm0, %v4177_v19, %v4179_v59  ;;  %v3806_v52 = vmul.f32 1.442695, %v3781_v14  ;;  %v3767_v32 = vand.u32 2147483647, %v7004_v47 }
 0x382   : > { %v4183_v57 = vsel %vm4182_vm1, %v4175_v54, %v4181_v50  ;;  %v3782_v3 = vsub.f32 0.0, %v3766_v42  ;;  %v3780_v28 = vsub.f32 0.0, %v3764_v30 }
 0x383   : > { %4193 = vst [vmem:[%s6988_s12] sm:$0xff] %v4183_v57  ;;  %4868 = vpow2.f32 %v3806_v52  ;;  %v3783_v12 = vsub.f32 0.0, %v3767_v32 }
 0x384   : > { %v3808_v53 = vmul.f32 1.442695, %v3782_v3  ;;  %v3804_v8 = vmul.f32 1.442695, %v3780_v28 }
 0x385   : > { %v3810_v7 = vmul.f32 1.442695, %v3783_v12 }
 0x386   : > { %4870 = vpow2.f32 %v3808_v53 }
 0x387   : > { %4872 = vpow2.f32 %v3804_v8 }
 0x388   : > { %4874 = vpow2.f32 %v3810_v7 }
 0x389   : > { %v7011_v60 = vpop.eup %4868 }
 0x38a   : > { %v7019_v39 = vadd.f32 1.0, %v7011_v60 }
 0x38c   : > { %v7021_v2 = vpop.eup %4870  ;;  %4876 = vrcp.f32 %v7019_v39  ;;  %vm3992_vm3 = vweird.f32 %v7019_v39 }
 0x38d   : > { %v7026_v55 = vpop.eup %4872  ;;  %v7029_v19 = vadd.f32 1.0, %v7021_v2 }
 0x38e   : > { %v7031_v50 = vpop.eup %4874  ;;  %v7036_v38 = vadd.f32 1.0, %v7026_v55 }
 0x38f   : > { %vm4007_vm8 = vweird.f32 %v7029_v19 }
 0x390   : > { %vm3977_vm9 = vweird.f32 %v7036_v38 }
 0x395   : > { %v3536_v48 = vpop.f32.mrf.mxu0  ;;  %v3556_v63 = vpop.f32.mrf.mxu1 }
 0x396   : > { %v3537_v0 = vadd.f32 %v3536_v48, %v6687_v41  ;;  %v3557_v16 = vadd.f32 %v3556_v63, %v6687_v41  ;;  %v7039_v63 = vpop.eup %4876 }
 0x397   : > { %vm3993_vm2 = vweird.f32 %v7039_v63 }
 0x398   : > { %v3611_v40 = vmax.f32 %v3537_v0, 0.0  ;;  %v3612_v5 = vmax.f32 %v3557_v16, 0.0  ;;  %v7042_v0 = vadd.f32 1.0, %v7031_v50  ;;  %vm7095_vm4 = vmor %vm3992_vm3, %vm3993_vm2 }
 0x39a   : > { %v3633_v1 = vmul.f32 %v6695_v56, %v3611_v40  ;;  %v3634_v27 = vmul.f32 %v6695_v56, %v3612_v5 }
 0x39c   : > { %v3709_v62 = vrot.slane %v3633_v1, 4  ;;  %v3715_v61 = vrot.slane %v3634_v27, 4 }
 0x39e   : > { %v3710_v10 = vadd.f32 %v3709_v62, %v3633_v1  ;;  %v3716_v37 = vadd.f32 %v3715_v61, %v3634_v27 }
 0x3a0   : > { %v3711_v21 = vrot.slane %v3710_v10, 2  ;;  %v3717_v9 = vrot.slane %v3716_v37, 2 }
 0x3a2   : > { %v3712_v46 = vadd.f32 %v3711_v21, %v3710_v10  ;;  %v3718_v13 = vadd.f32 %v3717_v9, %v3716_v37 }
 0x3a4   : > { %v3713_v33 = vrot.slane %v3712_v46, 1  ;;  %v3719_v26 = vrot.slane %v3718_v13, 1 }
 0x3a6   : > { %v3714_v23 = vadd.f32 %v3713_v33, %v3712_v46  ;;  %v3720_v15 = vadd.f32 %v3719_v26, %v3718_v13 }
 0x3a8   : > { %v7009_v29 = vadd.f32 %v6703_v44, %v3714_v23  ;;  %v7014_v18 = vadd.f32 %v6703_v44, %v3720_v15 }
 0x3aa   : > { %v3768_v31 = vand.u32 2147483647, %v7009_v29  ;;  %v3769_v4 = vand.u32 2147483647, %v7014_v18 }
 0x3ac   : > { %v3784_v34 = vsub.f32 0.0, %v3768_v31  ;;  %v3785_v6 = vsub.f32 0.0, %v3769_v4 }
 0x3ae   : > { %v3812_v58 = vmul.f32 1.442695, %v3784_v34  ;;  %v3576_v36 = vpop.f32.mrf.mxu2  ;;  %v3596_v24 = vpop.f32.mrf.mxu3  ;;  %v3814_v49 = vmul.f32 1.442695, %v3785_v6 }
 0x3af   : > { %v3577_v43 = vadd.f32 %v3576_v36, %v6687_v41  ;;  %v3597_v59 = vadd.f32 %v3596_v24, %v6687_v41 }
 0x3b0   : > { %4878 = vpow2.f32 %v3812_v58  ;;  %v3998_v58 = vand.u32 2147483648, %v7019_v39 }
 0x3b1   : > { %v3613_v45 = vmax.f32 %v3577_v43, 0.0  ;;  %v3614_v54 = vmax.f32 %v3597_v59, 0.0  ;;  %4880 = vpow2.f32 %v3814_v49  ;;  %v3996_v43 = vand.u32 2147483647, %v7019_v39 }
 0x3b2   : > { %4882 = vrcp.f32 %v7029_v19 }
 0x3b3   : > { %v3635_v51 = vmul.f32 %v6695_v56, %v3613_v45  ;;  %v3636_v57 = vmul.f32 %v6695_v56, %v3614_v54  ;;  %4884 = vrcp.f32 %v7036_v38  ;;  %v3988_v56 = vmul.f32 %v7039_v63, %v7019_v39 }
 0x3b4   : > { %4886 = vrcp.f32 %v7042_v0  ;;  %vm3997_vm7 = vcmp.eq.f32.partialorder %v3996_v43, 8.507059e+37 }
 0x3b5   : > { %v3721_v41 = vrot.slane %v3635_v51, 4  ;;  %v3727_v48 = vrot.slane %v3636_v57, 4  ;;  %v3989_v10 = vsub.f32 1.0, %v3988_v56 }
 0x3b6   : > { %v7044_v16 = vpop.eup %4878 }
 0x3b7   : > { %v3722_v35 = vadd.f32 %v3721_v41, %v3635_v51  ;;  %v3728_v11 = vadd.f32 %v3727_v48, %v3636_v57  ;;  %v7046_v40 = vpop.eup %4880  ;;  %v7053_v5 = vadd.f32 1.0, %v7044_v16  ;;  %v3990_v46 = vmul.f32 %v7039_v63, %v3989_v10 }
 0x3b8   : > { %v7055_v17 = vpop.eup %4882  ;;  %v7058_v1 = vadd.f32 1.0, %v7046_v40  ;;  %v3999_v48 = vor.u32 1.1754944e-38, %v3998_v58 }
 0x3b9   : > { %v3723_v14 = vrot.slane %v3722_v35, 2  ;;  %v3729_v27 = vrot.slane %v3728_v11, 2  ;;  %v7060_v61 = vpop.eup %4884  ;;  %v4003_v30 = vmul.f32 %v7055_v17, %v7029_v19  ;;  %4888 = vrcp.f32 %v7053_v5 }
 0x3ba   : > { %4890 = vrcp.f32 %v7058_v1  ;;  %v7066_v3 = vpop.eup %4886  ;;  %v3973_v21 = vmul.f32 %v7060_v61, %v7036_v38  ;;  %v3991_v7 = vadd.f32 %v7039_v63, %v3990_v46  ;;  %vm3978_vm5 = vweird.f32 %v7060_v61 }
 0x3bb   : > { %v3724_v42 = vadd.f32 %v3723_v14, %v3722_v35  ;;  %v3730_v62 = vadd.f32 %v3729_v27, %v3728_v11  ;;  %v4004_v28 = vsub.f32 1.0, %v4003_v30  ;;  %v4018_v13 = vmul.f32 %v7066_v3, %v7042_v0  ;;  %vm7127_vm3 = vmor %vm3977_vm9, %vm3978_vm5 }
 0x3bc   : > { %v3974_v23 = vsub.f32 1.0, %v3973_v21  ;;  %v3995_v54 = vsel %vm7095_vm4, %v7039_v63, %v3991_v7  ;;  %vm4008_vm6 = vweird.f32 %v7055_v17  ;;  %v4013_v35 = vand.u32 2147483648, %v7029_v19 }
 0x3bd   : > { %v3725_v52 = vrot.slane %v3724_v42, 1  ;;  %v3731_v37 = vrot.slane %v3730_v62, 1  ;;  %v4005_v31 = vmul.f32 %v7055_v17, %v4004_v28  ;;  %v4019_v4 = vsub.f32 1.0, %v4018_v13  ;;  %vm7114_vm10 = vmor %vm4007_vm8, %vm4008_vm6 }
 0x3be   : > { %v3975_v24 = vmul.f32 %v7060_v61, %v3974_v23  ;;  %v4011_v63 = vand.u32 2147483647, %v7029_v19  ;;  %v4000_v56 = vsel %vm3997_vm7, %v3999_v48, %v3995_v54  ;;  %v4028_v27 = vand.u32 2147483648, %v7042_v0 }
 0x3bf   : > { %v3726_v32 = vadd.f32 %v3725_v52, %v3724_v42  ;;  %v3732_v9 = vadd.f32 %v3731_v37, %v3730_v62  ;;  %v7079_v12 = vpop.eup %4888  ;;  %v4006_v51 = vadd.f32 %v7055_v17, %v4005_v31  ;;  %v4020_v57 = vmul.f32 %v7066_v3, %v4019_v4 }
 0x3c0   : > { %v7081_v26 = vpop.eup %4890  ;;  %v3976_v11 = vadd.f32 %v7060_v61, %v3975_v24  ;;  %vm4023_vm2 = vweird.f32 %v7066_v3  ;;  %v3981_v30 = vand.u32 2147483647, %v7036_v38  ;;  %v3983_v52 = vand.u32 2147483648, %v7036_v38 }
 0x3c1   : > { %v7074_v53 = vadd.f32 %v6703_v44, %v3726_v32  ;;  %v7077_v33 = vadd.f32 %v6703_v44, %v3732_v9  ;;  %v4033_v44 = vmul.f32 %v7079_v12, %v7053_v5  ;;  %v4048_v36 = vmul.f32 %v7081_v26, %v7058_v1 }
 0x3c2   : > { %v4010_v42 = vsel %vm7114_vm10, %v7055_v17, %v4006_v51  ;;  %v4021_v62 = vadd.f32 %v7066_v3, %v4020_v57  ;;  %v4014_v37 = vor.u32 1.1754944e-38, %v4013_v35  ;;  %v3980_v32 = vsel %vm7127_vm3, %v7060_v61, %v3976_v11 }
 0x3c3   : > { %v3770_v8 = vand.u32 2147483647, %v7074_v53  ;;  %v3771_v15 = vand.u32 2147483647, %v7077_v33  ;;  %v4034_v41 = vsub.f32 1.0, %v4033_v44  ;;  %v4049_v39 = vsub.f32 1.0, %v4048_v36 }
 0x3c4   : > { %vm4012_vm4 = vcmp.eq.f32.partialorder %v4011_v63, 8.507059e+37  ;;  %vm4022_vm6 = vweird.f32 %v7042_v0  ;;  %v4026_v9 = vand.u32 2147483647, %v7042_v0  ;;  %v4101_v28 = vmul.f32 %v7011_v60, %v4000_v56 }
 0x3c5   : > { %v3786_v34 = vsub.f32 0.0, %v3770_v8  ;;  %v3787_v6 = vsub.f32 0.0, %v3771_v15  ;;  %v4035_v19 = vmul.f32 %v7079_v12, %v4034_v41  ;;  %v4050_v21 = vmul.f32 %v7081_v26, %v4049_v39  ;;  %vm7146_vm5 = vmor %vm4022_vm6, %vm4023_vm2 }
 0x3c6   : > { %v4015_v13 = vsel %vm4012_vm4, %v4014_v37, %v4010_v42  ;;  %v4029_v23 = vor.u32 1.1754944e-38, %v4028_v27  ;;  %v4025_v61 = vsel %vm7146_vm5, %v7066_v3, %v4021_v62  ;;  %vm4038_vm7 = vweird.f32 %v7079_v12 }
 0x3c7   : > { %v3816_v59 = vmul.f32 1.442695, %v3786_v34  ;;  %v3818_v45 = vmul.f32 1.442695, %v3787_v6  ;;  %v4036_v0 = vadd.f32 %v7079_v12, %v4035_v19  ;;  %v4043_v15 = vand.u32 2147483648, %v7053_v5 }
 0x3c8   : > { %v4051_v7 = vadd.f32 %v7081_v26, %v4050_v21  ;;  %vm4053_vm8 = vweird.f32 %v7081_v26  ;;  %vm4037_vm9 = vweird.f32 %v7053_v5  ;;  %v4041_v31 = vand.u32 2147483647, %v7053_v5 }
 0x3c9   : > { %4892 = vpow2.f32 %v3816_v59  ;;  %v4058_v3 = vand.u32 2147483648, %v7058_v1  ;;  %v4102_v4 = vmul.f32 %v7021_v2, %v4015_v13  ;;  %vm4027_vm10 = vcmp.eq.f32.partialorder %v4026_v9, 8.507059e+37  ;;  %vm7170_vm2 = vmor %vm4037_vm9, %vm4038_vm7 }
 0x3ca   : > { %4894 = vpow2.f32 %v3818_v45  ;;  %vm4052_vm3 = vweird.f32 %v7058_v1  ;;  %v4056_v34 = vand.u32 2147483647, %v7058_v1  ;;  %v3984_v6 = vor.u32 1.1754944e-38, %v3983_v52 }
 0x3cb   : > { %vm3829_vm4 = vcmp.ge.f32.partialorder %v6983_v22, 0.0  ;;  %v4030_v58 = vsel %vm4027_vm10, %v4029_v23, %v4025_v61  ;;  %v4040_v5 = vsel %vm7170_vm2, %v7079_v12, %v4036_v0  ;;  %vm7182_vm6 = vmor %vm4052_vm3, %vm4053_vm8  ;;  %vm3982_vm5 = vcmp.eq.f32.partialorder %v3981_v30, 8.507059e+37 }
 0x3cc   : > { %vm3830_vm7 = vcmp.ge.f32.partialorder %v6995_v20, 0.0  ;;  %v4044_v36 = vor.u32 1.1754944e-38, %v4043_v15  ;;  %v4055_v1 = vsel %vm7182_vm6, %v7081_v26, %v4051_v7  ;;  %v3985_v22 = vsel %vm3982_vm5, %v3984_v6, %v3980_v32 }
 0x3cd   : > { %v4117_v24 = vsel %vm3829_vm4, %v4000_v56, %v4101_v28  ;;  %vm4042_vm9 = vcmp.eq.f32.partialorder %v4041_v31, 8.507059e+37  ;;  %v4059_v49 = vor.u32 1.1754944e-38, %v4058_v3  ;;  %v4118_v12 = vsel %vm3830_vm7, %v4015_v13, %v4102_v4 }
 0x3ce   : > { %v4103_v59 = vmul.f32 %v7031_v50, %v4030_v58  ;;  %v4045_v45 = vsel %vm4042_vm9, %v4044_v36, %v4040_v5  ;;  %vm4057_vm8 = vcmp.eq.f32.partialorder %v4056_v34, 8.507059e+37  ;;  %vm3831_vm10 = vcmp.ge.f32.partialorder %v7004_v47, 0.0 }
 0x3cf   : > { %v7134_v17 = vpop.eup %4892  ;;  %v4060_v51 = vsel %vm4057_vm8, %v4059_v49, %v4055_v1  ;;  %v4100_v26 = vmul.f32 %v7026_v55, %v3985_v22  ;;  %v4104_v41 = vmul.f32 %v7044_v16, %v4045_v45  ;;  %vm3832_vm3 = vcmp.ge.f32.partialorder %v7009_v29, 0.0 }
 0x3d0   : > { %v7141_v46 = vpop.eup %4894  ;;  %v7151_v8 = vadd.f32 1.0, %v7134_v17  ;;  %v4119_v35 = vsel %vm3831_vm10, %v4030_v58, %v4103_v59  ;;  %v4105_v50 = vmul.f32 %v7046_v40, %v4060_v51  ;;  %vm3833_vm6 = vcmp.ge.f32.partialorder %v7014_v18, 0.0 }
 0x3d1   : > { %v7159_v60 = vadd.f32 1.0, %v7141_v46  ;;  %v4120_v16 = vsel %vm3832_vm3, %v4045_v45, %v4104_v41 }
 0x3d2   : > { %4896 = vrcp.f32 %v7151_v8  ;;  %v4073_v39 = vand.u32 2147483648, %v7151_v8  ;;  %v4071_v56 = vand.u32 2147483647, %v7151_v8  ;;  %vm4067_vm5 = vweird.f32 %v7151_v8 }
 0x3d3   : > { %4898 = vrcp.f32 %v7159_v60  ;;  %v4088_v47 = vand.u32 2147483648, %v7159_v60  ;;  %v4086_v55 = vand.u32 2147483647, %v7159_v60  ;;  %v4121_v42 = vsel %vm3833_vm6, %v4060_v51, %v4105_v50 }
 0x3d4   : > { %4900 = vpow2.f32 %v4117_v24  ;;  %v4074_v62 = vor.u32 1.1754944e-38, %v4073_v39  ;;  %vm4082_vm9 = vweird.f32 %v7159_v60  ;;  %vm4072_vm8 = vcmp.eq.f32.partialorder %v4071_v56, 8.507059e+37 }
 0x3d5   : > { %4902 = vpow2.f32 %v4118_v12  ;;  %v4089_v30 = vor.u32 1.1754944e-38, %v4088_v47  ;;  %vm4087_vm3 = vcmp.eq.f32.partialorder %v4086_v55, 8.507059e+37  ;;  %vm3828_vm6 = vcmp.ge.f32.partialorder %v6999_v25, 0.0 }
 0x3d6   : > { %4904 = vpow2.f32 %v4119_v35  ;;  %v4116_v28 = vsel %vm3828_vm6, %v3985_v22, %v4100_v26 }
 0x3d7   : > { %4906 = vpow2.f32 %v4120_v16 }
 0x3d8   : > { %v4897_v43 = vpop.eup %4896  ;;  %4908 = vpow2.f32 %v4121_v42 }
 0x3d9   : > { %v4899_v54 = vpop.eup %4898  ;;  %v4063_v57 = vmul.f32 %v4897_v43, %v7151_v8  ;;  %vm4068_vm2 = vweird.f32 %v4897_v43 }
 0x3da   : > { %v4078_v20 = vmul.f32 %v4899_v54, %v7159_v60  ;;  %vm4083_vm4 = vweird.f32 %v4899_v54  ;;  %v4901_v40 = vpop.eup %4900  ;;  %vm4069_vm7 = vmor %vm4067_vm5, %vm4068_vm2  ;;  %vm3834_vm2 = vcmp.ge.f32.partialorder %v7074_v53, 0.0  ;;  %vm3835_vm5 = vcmp.ge.f32.partialorder %v7077_v33, 0.0 }
 0x3db   : > { %v4064_v48 = vsub.f32 1.0, %v4063_v57  ;;  %v4903_v10 = vpop.eup %4902  ;;  %vm4084_vm10 = vmor %vm4082_vm9, %vm4083_vm4  ;;  %v4163_v53 = vrot.slane %v4901_v40, 7 }
 0x3dc   : > { %v4079_v11 = vsub.f32 1.0, %v4078_v20  ;;  %v4905_v38 = vpop.eup %4904 }
 0x3dd   : > { %v4065_v63 = vmul.f32 %v4897_v43, %v4064_v48  ;;  %v4907_v23 = vpop.eup %4906  ;;  %v4165_v61 = vrot.slane %v4905_v38, 5 }
 0x3de   : > { %v4080_v14 = vmul.f32 %v4899_v54, %v4079_v11  ;;  %v4909_v8 = vpop.eup %4908 }
 0x3df   : > { %v4066_v27 = vadd.f32 %v4897_v43, %v4065_v63  ;;  %v4167_v33 = vrot.slane %v4909_v8, 3 }
 0x3e0   : > { %v4081_v19 = vadd.f32 %v4899_v54, %v4080_v14 }
 0x3e1   : > { %v4070_v29 = vsel %vm4069_vm7, %v4897_v43, %v4066_v27 }
 0x3e2   : > { %v4075_v52 = vsel %vm4072_vm8, %v4074_v62, %v4070_v29  ;;  %v4085_v18 = vsel %vm4084_vm10, %v4899_v54, %v4081_v19 }
 0x3e3   : > { %v4106_v37 = vmul.f32 %v7134_v17, %v4075_v52  ;;  %v4090_v21 = vsel %vm4087_vm3, %v4089_v30, %v4085_v18  ;;  %v4164_v17 = vrot.slane %v4903_v10, 6 }
 0x3e4   : > { %v4107_v32 = vmul.f32 %v7141_v46, %v4090_v21  ;;  %v4166_v46 = vrot.slane %v4907_v23, 4 }
 0x3e5   : > { %v4122_v9 = vsel %vm3834_vm2, %v4075_v52, %v4106_v37  ;;  %v4185_v7 = vsel %vm4172_vm12, %v4164_v17, %v4165_v61 }
 0x3e6   : > { %4910 = vpow2.f32 %v4122_v9  ;;  %v4123_v13 = vsel %vm3835_vm5, %v4090_v21, %v4107_v32  ;;  %v4187_v4 = vsel %vm4176_vm14, %v4166_v46, %v4167_v33 }
 0x3e7   : > { %4912 = vpow2.f32 %v4123_v13 }
 0x3e8   : > { %4914 = vpow2.f32 %v4116_v28 }
 0x3ec   : > { %v4911_v25 = vpop.eup %4910 }
 0x3ed   : > { %v4913_v0 = vpop.eup %4912  ;;  %v4168_v60 = vrot.slane %v4911_v25, 2 }
 0x3ee   : > { %v4169_v15 = vrot.slane %v4913_v0, 1  ;;  %v4915_v31 = vpop.eup %4914 }
 0x3ef   : > { %v4184_v3 = vsel %vm4170_vm11, %v4915_v31, %v4163_v53 }
 0x3f0   : > { %v4188_v44 = vsel %vm4178_vm13, %v4168_v60, %v4169_v15  ;;  %v4186_v34 = vsel %vm4174_vm15, %v4184_v3, %v4185_v7 }
 0x3f1   : > { %v4189_v6 = vsel %vm4180_vm0, %v4187_v4, %v4188_v44 }
 0x3f2   : > { %v4190_v58 = vsel %vm4182_vm1, %v4186_v34, %v4189_v6 }
 0x3f3   : > { %4194 = vst [vmem:[%s6988_s12 + $0x8] sm:$0xff] %v4190_v58 }
 0x3f4   : > { %4951 = shalt.err (!%p4948_p3)
}
 0x3f5   : > { %4777 = dma.vmem_to_hbm [thread:$0]  (%p5090_p5), %s4209_s10, 256, %s4211_s17, %s4196_s18  }
 0x3f6 PF: > { %p4783_p4 = scmp.ge.s32.totalorder %s4986_s22, 2  ;;  %s4222_s26 = sand.u32 1, %s4974_s19  }
 0x3f7   : > { %s4223_s12 = scalar_lea.sflag [#allocation4], %s4222_s26 }
 0x3f8   : > { %p4780_p7 = pnand %p4783_p4, %p5094_p6 }
 0x3fa   : > { %p4781_p8 = pneg %p4780_p7 }
 0x3fc   : > { %4969 = dma.done.wait (%p4781_p8), %s4223_s12, 256  }
 0x3fd   : > { %4971 = vsyncadd (%p4781_p8), %s4223_s12, 4294967040  ;;  %p23_p9 = scmp.ge.s32.totalorder %s5077_s24, 4   ;;  %s7297_s19 = smov %s4978_s20 }
 0x3fe   : > { %s7298_s20 = smov %s4982_s21  ;;  %s7299_s21 = smov %s5088_s27 }
 0x3ff   : > { %s7300_s22 = smov %s5077_s24  ;;  %25 = sbr.rel (!%p23_p9) target bundleno = 6 (0x6), region = 99 }
 0x404   :  { %4229 = vsyncpa [#allocation4], 1 }
 0x405   :  { %4231 = vsyncpa [#allocation4 + $0x1], 1 }

</bundles_post_ra>
